<compile_context>
chip_gen: v7x
topology: tpu7x:2x2x1
jax: 0.10.0
libtpu: 0.0.40
codegen_flags: <defaults>
</compile_context>

<pallas_src>
import math

import jax
import jax.numpy as jnp
from jax.experimental import pallas as pl
from jax.experimental.pallas import tpu as pltpu


# ----------------------------------------------------------------------------
# Helpers
# ----------------------------------------------------------------------------
def _round_up(x, m):
    return ((x + m - 1) // m) * m


def _pick_tile(mp8, cap=512, min_steps=2):
    """Largest multiple-of-8 divisor of mp8 that is <= cap; prefer a tile that
    yields >= min_steps grid steps (keeps both v7x TensorCores busy via the
    'parallel' row axis) whenever mp8 is large enough to split."""
    d = mp8 // 8
    cands = [8 * f for f in range(1, d + 1) if d % f == 0 and 8 * f <= cap]
    multi = [t for t in cands if mp8 // t >= min_steps]
    return max(multi) if multi else max(cands)


_VMEM_LIMIT = 32 * 1024 * 1024  # safe on v7x (64 MiB physical) and v5e/v6e (128 MiB)


# ----------------------------------------------------------------------------
# Pallas kernel: fused NiN block  relu(relu(relu(x@W0+b0)@W1+b1)@W2+b2)
# ----------------------------------------------------------------------------
def _nin_block_kernel(x_ref, w0_ref, b0_ref, w1_ref, b1_ref, w2_ref, b2_ref,
                      o_ref):
    # bf16 operands into the MXU, f32 accumulation, bias+ReLU in f32.
    h = jnp.dot(x_ref[...], w0_ref[...], preferred_element_type=jnp.float32)
    h = jnp.maximum(h + b0_ref[...], 0.0)
    h = jnp.dot(h.astype(jnp.bfloat16), w1_ref[...],
                preferred_element_type=jnp.float32)
    h = jnp.maximum(h + b1_ref[...], 0.0)
    h = jnp.dot(h.astype(jnp.bfloat16), w2_ref[...],
                preferred_element_type=jnp.float32)
    o_ref[...] = jnp.maximum(h + b2_ref[...], 0.0).astype(o_ref.dtype)


# ----------------------------------------------------------------------------
# Wrappers
# ----------------------------------------------------------------------------
def nin_block_apply(x_nhwc, blk):
    """One NiN block (conv k/stride/pad + ReLU, two 1x1 conv + ReLU), fused.

    Input/output channel dims are carried 128-padded (zeros in the padding);
    the packed weights have matching zero rows/cols so results are exact.
    """
    N = x_nhwc.shape[0]
    kH = kW = blk["k"]
    stride, pad = blk["stride"], blk["pad"]
    Kp, Cp = blk["Kp"], blk["Cp"]

    x_nhwc = x_nhwc.astype(jnp.bfloat16)
    if pad > 0:
        x_nhwc = jnp.pad(x_nhwc, ((0, 0), (pad, pad), (pad, pad), (0, 0)))
    Hp, Wp = x_nhwc.shape[1], x_nhwc.shape[2]
    OH = (Hp - kH) // stride + 1
    OW = (Wp - kW) // stride + 1
    M = N * OH * OW
    Cin = x_nhwc.shape[3]

    # TODO(synk): im2col still duplicates activations kH*kW-fold in HBM for the
    # leading k>1 conv; folding the tap loop into a K grid axis (f32 accumulator,
    # per-tap shifted-window index maps) would remove it once batch/M grows, but
    # strided shifted windows aren't expressible with blocked index_maps here.
    if kH == 1 and kW == 1 and stride == 1:
        patches = x_nhwc.reshape(M, Cin)
    else:
        cols = []
        for i in range(kH):
            for j in range(kW):
                cols.append(x_nhwc[:, i:i + stride * (OH - 1) + 1:stride,
                                   j:j + stride * (OW - 1) + 1:stride, :])
        # flatten order (kh, kw, cin) — matches the packed-weight layout
        patches = jnp.stack(cols, axis=3).reshape(M, kH * kW * Cin)

    if Kp != patches.shape[1]:  # only block 0 (K=121 -> 128)
        patches = jnp.pad(patches, ((0, 0), (0, Kp - patches.shape[1])))

    Mp8 = _round_up(M, 8)
    tm = _pick_tile(Mp8)

    out = pl.pallas_call(
        _nin_block_kernel,
        out_shape=jax.ShapeDtypeStruct((M, Cp), jnp.bfloat16),
        grid_spec=pltpu.PrefetchScalarGridSpec(
            num_scalar_prefetch=0,
            grid=(pl.cdiv(M, tm),),   # tail tile handled by Pallas OOB masking
            in_specs=[
                pl.BlockSpec((tm, Kp), lambda i: (i, 0)),
                pl.BlockSpec((Kp, Cp), lambda i: (0, 0)),
                pl.BlockSpec((1, Cp), lambda i: (0, 0)),
                pl.BlockSpec((Cp, Cp), lambda i: (0, 0)),
                pl.BlockSpec((1, Cp), lambda i: (0, 0)),
                pl.BlockSpec((Cp, Cp), lambda i: (0, 0)),
                pl.BlockSpec((1, Cp), lambda i: (0, 0)),
            ],
            out_specs=pl.BlockSpec((tm, Cp), lambda i: (i, 0)),
        ),
        compiler_params=pltpu.CompilerParams(
            dimension_semantics=("parallel",),
            vmem_limit_bytes=_VMEM_LIMIT),
    )(patches, blk["w0"], blk["b0"], blk["w1"], blk["b1"], blk["w2"], blk["b2"])

    return out.reshape(N, OH, OW, Cp)


def maxpool2d_nhwc(x, k=3, s=2):
    """MaxPool2d(k, stride=s) as an XLA-fused jnp.maximum tree over the k*k
    strided windows: one pass over the activation, no HBM duplication, no
    extra kernel launch. Channel dim stays 128-padded (padding is zeros, and
    max over zeros is zero)."""
    N, H, W, C = x.shape
    OH = (H - k) // s + 1
    OW = (W - k) // s + 1
    out = None
    for i in range(k):
        for j in range(k):
            win = x[:, i:i + s * (OH - 1) + 1:s, j:j + s * (OW - 1) + 1:s, :]
            out = win if out is None else jnp.maximum(out, win)
    return out


def global_avgpool_flatten_nhwc(x):
    """AdaptiveAvgPool2d((1,1)) + Flatten: (N,H,W,C) -> (N,C)."""
    N, H, W, C = x.shape
    if H * W == 1:
        # Already 1x1 spatial (the case for this NiN): pooling is a reshape.
        return x.reshape(N, C)
    return jnp.mean(x.astype(jnp.float32), axis=(1, 2))  # generic fallback


# ----------------------------------------------------------------------------
# NiN model: deterministic init (pre-packed bf16, MXU/lane-aligned) + forward
# ----------------------------------------------------------------------------
def _init_conv(key, cout, cin, k):
    kw_key, kb_key = jax.random.split(key)
    bound = 1.0 / math.sqrt(cin * k * k)
    w = jax.random.uniform(kw_key, (cout, cin, k, k), jnp.float32, -bound, bound)
    b = jax.random.uniform(kb_key, (cout,), jnp.float32, -bound, bound)
    return w, b


def _pack_conv(w, b, cin_pad, Kp, Cp):
    """PyTorch (Cout,Cin,kH,kW) -> bf16 (Kp,Cp) matmul weight whose rows follow
    the (kh, kw, cin_pad) im2col flatten order (zero rows for padded input
    channels / padded K), plus f32 (1,Cp) bias (zero for padded outputs)."""
    cout, cin, kh, kw = w.shape
    wfull = jnp.zeros((kh, kw, cin_pad, cout), jnp.float32)
    wfull = wfull.at[:, :, :cin, :].set(jnp.transpose(w, (2, 3, 1, 0)))
    wmat = wfull.reshape(kh * kw * cin_pad, cout)
    wp = jnp.zeros((Kp, Cp), jnp.float32).at[:wmat.shape[0], :cout].set(wmat)
    bp = jnp.zeros((1, Cp), jnp.float32).at[0, :cout].set(b)
    return wp.astype(jnp.bfloat16), bp


def init_nin_params(key):
    # (cin, cout, k, stride, pad) for each nin_block's leading conv (PyTorch spec)
    specs = [(1, 96, 11, 4, 0),
             (96, 256, 5, 1, 2),
             (256, 384, 3, 1, 1),
             (384, 10, 3, 1, 1)]
    params = []
    cin_pad = 1  # real channel count of the network input (not padded)
    for cin, cout, k, s, p in specs:
        key, k0, k1, k2 = jax.random.split(key, 4)
        Cp = _round_up(cout, 128)        # lane-dense output channels (carried)
        K = k * k * cin_pad              # contraction over carried channels
        Kp = _round_up(K, 128)           # lane-aligned contraction
        w0, b0 = _init_conv(k0, cout, cin, k)
        w1, b1 = _init_conv(k1, cout, cout, 1)
        w2, b2 = _init_conv(k2, cout, cout, 1)
        w0p, b0p = _pack_conv(w0, b0, cin_pad, Kp, Cp)
        w1p, b1p = _pack_conv(w1, b1, Cp, Cp, Cp)
        w2p, b2p = _pack_conv(w2, b2, Cp, Cp, Cp)
        params.append(dict(w0=w0p, b0=b0p, w1=w1p, b1=b1p, w2=w2p, b2=b2p,
                           k=k, stride=s, pad=p, cin=cin, cout=cout,
                           K=K, Kp=Kp, Cp=Cp))
        cin_pad = Cp  # next block consumes the Cp-padded channels
    return params


def nin_forward(x_nchw, params):
    x = jnp.transpose(x_nchw, (0, 2, 3, 1))        # NCHW -> NHWC
    x = nin_block_apply(x, params[0])
    x = maxpool2d_nhwc(x, 3, 2)
    x = nin_block_apply(x, params[1])
    x = maxpool2d_nhwc(x, 3, 2)
    x = nin_block_apply(x, params[2])
    x = maxpool2d_nhwc(x, 3, 2)
    # nn.Dropout(0.5): identity under eval-mode semantics.
    x = nin_block_apply(x, params[3])
    x = global_avgpool_flatten_nhwc(x)              # (N, Cp_last)
    # Strip the carried channel padding only once, at the very end.
    return x[:, :params[3]["cout"]].astype(jnp.float32)   # (N, 10)


if __name__ == "__main__":
    key = jax.random.PRNGKey(0)
    pkey, xkey = jax.random.split(key)
    params = init_nin_params(pkey)

    # NCHW input, 1 channel; 79x79 is the smallest-ish spatial size that
    # survives the 11x11/s4 conv and three 3x2 max-pools down to 1x1.
    x = jax.random.normal(xkey, (2, 1, 79, 79), jnp.float32)

    # Params are closed over (metadata stays Python-level; packed weights become
    # jit constants) so the whole forward compiles into one XLA program.
    fwd = jax.jit(lambda xin: nin_forward(xin, params))
    out = jax.block_until_ready(fwd(x))
    assert out.shape == (2, 10) and out.dtype == jnp.float32
    print("KERNEL_OK")
</pallas_src>

<mosaic_0001>
module attributes {stable_mosaic.version = 11 : i64} {
  func.func @_nin_block_kernel(%arg0: i32, %arg1: memref<216x128xbf16, #tpu.memory_space<vmem>>, %arg2: memref<128x128xbf16, #tpu.memory_space<vmem>>, %arg3: memref<1x128xf32, #tpu.memory_space<vmem>>, %arg4: memref<128x128xbf16, #tpu.memory_space<vmem>>, %arg5: memref<1x128xf32, #tpu.memory_space<vmem>>, %arg6: memref<128x128xbf16, #tpu.memory_space<vmem>>, %arg7: memref<1x128xf32, #tpu.memory_space<vmem>>, %arg8: memref<216x128xbf16, #tpu.memory_space<vmem>>) attributes {dimension_semantics = [#tpu.dimension_semantics<parallel>], iteration_bounds = array<i64: 3>, scalar_prefetch = 0 : i64, scratch_operands = 0 : i64, tpu.core_type = #tpu.core_type<tc>, window_params = [{transform_indices = @transform_0, window_bounds = array<i64: 216, 128>}, {pipeline_mode = #tpu.pipeline_mode<synchronous>, transform_indices = @transform_1, window_bounds = array<i64: 128, 128>}, {pipeline_mode = #tpu.pipeline_mode<synchronous>, transform_indices = @transform_2, window_bounds = array<i64: 1, 128>}, {pipeline_mode = #tpu.pipeline_mode<synchronous>, transform_indices = @transform_3, window_bounds = array<i64: 128, 128>}, {pipeline_mode = #tpu.pipeline_mode<synchronous>, transform_indices = @transform_4, window_bounds = array<i64: 1, 128>}, {pipeline_mode = #tpu.pipeline_mode<synchronous>, transform_indices = @transform_5, window_bounds = array<i64: 128, 128>}, {pipeline_mode = #tpu.pipeline_mode<synchronous>, transform_indices = @transform_6, window_bounds = array<i64: 1, 128>}, {transform_indices = @transform_7, window_bounds = array<i64: 216, 128>}]} {
    %c0 = arith.constant 0 : index
    %c0_0 = arith.constant 0 : index
    %0 = vector.load %arg1[%c0, %c0_0] : memref<216x128xbf16, #tpu.memory_space<vmem>>, vector<216x128xbf16>
    %c0_1 = arith.constant 0 : index
    %c0_2 = arith.constant 0 : index
    %1 = vector.load %arg2[%c0_1, %c0_2] : memref<128x128xbf16, #tpu.memory_space<vmem>>, vector<128x128xbf16>
    %cst = arith.constant dense<0.000000e+00> : vector<216x128xf32>
    %2 = tpu.matmul %0, %1, %cst {dimension_numbers = #tpu.dot_dimension_numbers<[1], [0], [0], [1], [0, 0, 1, 1], [], []>} : vector<216x128xbf16>, vector<128x128xbf16>, vector<216x128xf32> -> vector<216x128xf32>
    %c0_3 = arith.constant 0 : index
    %c0_4 = arith.constant 0 : index
    %3 = vector.load %arg3[%c0_3, %c0_4] : memref<1x128xf32, #tpu.memory_space<vmem>>, vector<1x128xf32>
    %4 = vector.broadcast %3 : vector<1x128xf32> to vector<216x128xf32>
    %5 = arith.addf %2, %4 : vector<216x128xf32>
    %cst_5 = arith.constant 0.000000e+00 : f32
    %6 = vector.broadcast %cst_5 : f32 to vector<216x128xf32>
    %7 = arith.maximumf %5, %6 : vector<216x128xf32>
    %8 = arith.truncf %7 : vector<216x128xf32> to vector<216x128xbf16>
    %c0_6 = arith.constant 0 : index
    %c0_7 = arith.constant 0 : index
    %9 = vector.load %arg4[%c0_6, %c0_7] : memref<128x128xbf16, #tpu.memory_space<vmem>>, vector<128x128xbf16>
    %cst_8 = arith.constant dense<0.000000e+00> : vector<216x128xf32>
    %10 = tpu.matmul %8, %9, %cst_8 {dimension_numbers = #tpu.dot_dimension_numbers<[1], [0], [0], [1], [0, 0, 1, 1], [], []>} : vector<216x128xbf16>, vector<128x128xbf16>, vector<216x128xf32> -> vector<216x128xf32>
    %c0_9 = arith.constant 0 : index
    %c0_10 = arith.constant 0 : index
    %11 = vector.load %arg5[%c0_9, %c0_10] : memref<1x128xf32, #tpu.memory_space<vmem>>, vector<1x128xf32>
    %12 = vector.broadcast %11 : vector<1x128xf32> to vector<216x128xf32>
    %13 = arith.addf %10, %12 : vector<216x128xf32>
    %cst_11 = arith.constant 0.000000e+00 : f32
    %14 = vector.broadcast %cst_11 : f32 to vector<216x128xf32>
    %15 = arith.maximumf %13, %14 : vector<216x128xf32>
    %16 = arith.truncf %15 : vector<216x128xf32> to vector<216x128xbf16>
    %c0_12 = arith.constant 0 : index
    %c0_13 = arith.constant 0 : index
    %17 = vector.load %arg6[%c0_12, %c0_13] : memref<128x128xbf16, #tpu.memory_space<vmem>>, vector<128x128xbf16>
    %cst_14 = arith.constant dense<0.000000e+00> : vector<216x128xf32>
    %18 = tpu.matmul %16, %17, %cst_14 {dimension_numbers = #tpu.dot_dimension_numbers<[1], [0], [0], [1], [0, 0, 1, 1], [], []>} : vector<216x128xbf16>, vector<128x128xbf16>, vector<216x128xf32> -> vector<216x128xf32>
    %c0_15 = arith.constant 0 : index
    %c0_16 = arith.constant 0 : index
    %19 = vector.load %arg7[%c0_15, %c0_16] : memref<1x128xf32, #tpu.memory_space<vmem>>, vector<1x128xf32>
    %20 = vector.broadcast %19 : vector<1x128xf32> to vector<216x128xf32>
    %21 = arith.addf %18, %20 : vector<216x128xf32>
    %cst_17 = arith.constant 0.000000e+00 : f32
    %22 = vector.broadcast %cst_17 : f32 to vector<216x128xf32>
    %23 = arith.maximumf %21, %22 : vector<216x128xf32>
    %24 = arith.truncf %23 : vector<216x128xf32> to vector<216x128xbf16>
    %c0_18 = arith.constant 0 : index
    %c0_19 = arith.constant 0 : index
    %25 = vector.load %arg8[%c0_18, %c0_19] : memref<216x128xbf16, #tpu.memory_space<vmem>>, vector<216x128xbf16>
    tpu.vector_store %arg8[%c0_18, %c0_19], %24 {strides = array<i32>} : memref<216x128xbf16, #tpu.memory_space<vmem>>, vector<216x128xbf16>,
    return
  }
  func.func @transform_0(%arg0: i32) -> (i32, i32) {
    %c0_i32 = arith.constant 0 : i32
    %c0_i32_0 = arith.constant 0 : i32
    return %arg0, %c0_i32 : i32, i32
  }
  func.func @transform_1(%arg0: i32) -> (i32, i32) {
    %c0_i32 = arith.constant 0 : i32
    %c0_i32_0 = arith.constant 0 : i32
    %c0_i32_1 = arith.constant 0 : i32
    return %c0_i32, %c0_i32_0 : i32, i32
  }
  func.func @transform_2(%arg0: i32) -> (i32, i32) {
    %c0_i32 = arith.constant 0 : i32
    %c0_i32_0 = arith.constant 0 : i32
    %c0_i32_1 = arith.constant 0 : i32
    return %c0_i32, %c0_i32_0 : i32, i32
  }
  func.func @transform_3(%arg0: i32) -> (i32, i32) {
    %c0_i32 = arith.constant 0 : i32
    %c0_i32_0 = arith.constant 0 : i32
    %c0_i32_1 = arith.constant 0 : i32
    return %c0_i32, %c0_i32_0 : i32, i32
  }
  func.func @transform_4(%arg0: i32) -> (i32, i32) {
    %c0_i32 = arith.constant 0 : i32
    %c0_i32_0 = arith.constant 0 : i32
    %c0_i32_1 = arith.constant 0 : i32
    return %c0_i32, %c0_i32_0 : i32, i32
  }
  func.func @transform_5(%arg0: i32) -> (i32, i32) {
    %c0_i32 = arith.constant 0 : i32
    %c0_i32_0 = arith.constant 0 : i32
    %c0_i32_1 = arith.constant 0 : i32
    return %c0_i32, %c0_i32_0 : i32, i32
  }
  func.func @transform_6(%arg0: i32) -> (i32, i32) {
    %c0_i32 = arith.constant 0 : i32
    %c0_i32_0 = arith.constant 0 : i32
    %c0_i32_1 = arith.constant 0 : i32
    return %c0_i32, %c0_i32_0 : i32, i32
  }
  func.func @transform_7(%arg0: i32) -> (i32, i32) {
    %c0_i32 = arith.constant 0 : i32
    %c0_i32_0 = arith.constant 0 : i32
    return %arg0, %c0_i32 : i32, i32
  }
}

module attributes {stable_mosaic.version = 11 : i64} {
  func.func @_nin_block_kernel(%arg0: i32, %arg1: memref<64x3200xbf16, #tpu.memory_space<vmem>>, %arg2: memref<3200x256xbf16, #tpu.memory_space<vmem>>, %arg3: memref<1x256xf32, #tpu.memory_space<vmem>>, %arg4: memref<256x256xbf16, #tpu.memory_space<vmem>>, %arg5: memref<1x256xf32, #tpu.memory_space<vmem>>, %arg6: memref<256x256xbf16, #tpu.memory_space<vmem>>, %arg7: memref<1x256xf32, #tpu.memory_space<vmem>>, %arg8: memref<64x256xbf16, #tpu.memory_space<vmem>>) attributes {dimension_semantics = [#tpu.dimension_semantics<parallel>], iteration_bounds = array<i64: 2>, scalar_prefetch = 0 : i64, scratch_operands = 0 : i64, tpu.core_type = #tpu.core_type<tc>, window_params = [{transform_indices = @transform_0, window_bounds = array<i64: 64, 3200>}, {pipeline_mode = #tpu.pipeline_mode<synchronous>, transform_indices = @transform_1, window_bounds = array<i64: 3200, 256>}, {pipeline_mode = #tpu.pipeline_mode<synchronous>, transform_indices = @transform_2, window_bounds = array<i64: 1, 256>}, {pipeline_mode = #tpu.pipeline_mode<synchronous>, transform_indices = @transform_3, window_bounds = array<i64: 256, 256>}, {pipeline_mode = #tpu.pipeline_mode<synchronous>, transform_indices = @transform_4, window_bounds = array<i64: 1, 256>}, {pipeline_mode = #tpu.pipeline_mode<synchronous>, transform_indices = @transform_5, window_bounds = array<i64: 256, 256>}, {pipeline_mode = #tpu.pipeline_mode<synchronous>, transform_indices = @transform_6, window_bounds = array<i64: 1, 256>}, {transform_indices = @transform_7, window_bounds = array<i64: 64, 256>}]} {
    %c0 = arith.constant 0 : index
    %c0_0 = arith.constant 0 : index
    %0 = vector.load %arg1[%c0, %c0_0] : memref<64x3200xbf16, #tpu.memory_space<vmem>>, vector<64x3200xbf16>
    %c0_1 = arith.constant 0 : index
    %c0_2 = arith.constant 0 : index
    %1 = vector.load %arg2[%c0_1, %c0_2] : memref<3200x256xbf16, #tpu.memory_space<vmem>>, vector<3200x256xbf16>
    %cst = arith.constant dense<0.000000e+00> : vector<64x256xf32>
    %2 = tpu.matmul %0, %1, %cst {dimension_numbers = #tpu.dot_dimension_numbers<[1], [0], [0], [1], [0, 0, 1, 1], [], []>} : vector<64x3200xbf16>, vector<3200x256xbf16>, vector<64x256xf32> -> vector<64x256xf32>
    %c0_3 = arith.constant 0 : index
    %c0_4 = arith.constant 0 : index
    %3 = vector.load %arg3[%c0_3, %c0_4] : memref<1x256xf32, #tpu.memory_space<vmem>>, vector<1x256xf32>
    %4 = vector.broadcast %3 : vector<1x256xf32> to vector<64x256xf32>
    %5 = arith.addf %2, %4 : vector<64x256xf32>
    %cst_5 = arith.constant 0.000000e+00 : f32
    %6 = vector.broadcast %cst_5 : f32 to vector<64x256xf32>
    %7 = arith.maximumf %5, %6 : vector<64x256xf32>
    %8 = arith.truncf %7 : vector<64x256xf32> to vector<64x256xbf16>
    %c0_6 = arith.constant 0 : index
    %c0_7 = arith.constant 0 : index
    %9 = vector.load %arg4[%c0_6, %c0_7] : memref<256x256xbf16, #tpu.memory_space<vmem>>, vector<256x256xbf16>
    %cst_8 = arith.constant dense<0.000000e+00> : vector<64x256xf32>
    %10 = tpu.matmul %8, %9, %cst_8 {dimension_numbers = #tpu.dot_dimension_numbers<[1], [0], [0], [1], [0, 0, 1, 1], [], []>} : vector<64x256xbf16>, vector<256x256xbf16>, vector<64x256xf32> -> vector<64x256xf32>
    %c0_9 = arith.constant 0 : index
    %c0_10 = arith.constant 0 : index
    %11 = vector.load %arg5[%c0_9, %c0_10] : memref<1x256xf32, #tpu.memory_space<vmem>>, vector<1x256xf32>
    %12 = vector.broadcast %11 : vector<1x256xf32> to vector<64x256xf32>
    %13 = arith.addf %10, %12 : vector<64x256xf32>
    %cst_11 = arith.constant 0.000000e+00 : f32
    %14 = vector.broadcast %cst_11 : f32 to vector<64x256xf32>
    %15 = arith.maximumf %13, %14 : vector<64x256xf32>
    %16 = arith.truncf %15 : vector<64x256xf32> to vector<64x256xbf16>
    %c0_12 = arith.constant 0 : index
    %c0_13 = arith.constant 0 : index
    %17 = vector.load %arg6[%c0_12, %c0_13] : memref<256x256xbf16, #tpu.memory_space<vmem>>, vector<256x256xbf16>
    %cst_14 = arith.constant dense<0.000000e+00> : vector<64x256xf32>
    %18 = tpu.matmul %16, %17, %cst_14 {dimension_numbers = #tpu.dot_dimension_numbers<[1], [0], [0], [1], [0, 0, 1, 1], [], []>} : vector<64x256xbf16>, vector<256x256xbf16>, vector<64x256xf32> -> vector<64x256xf32>
    %c0_15 = arith.constant 0 : index
    %c0_16 = arith.constant 0 : index
    %19 = vector.load %arg7[%c0_15, %c0_16] : memref<1x256xf32, #tpu.memory_space<vmem>>, vector<1x256xf32>
    %20 = vector.broadcast %19 : vector<1x256xf32> to vector<64x256xf32>
    %21 = arith.addf %18, %20 : vector<64x256xf32>
    %cst_17 = arith.constant 0.000000e+00 : f32
    %22 = vector.broadcast %cst_17 : f32 to vector<64x256xf32>
    %23 = arith.maximumf %21, %22 : vector<64x256xf32>
    %24 = arith.truncf %23 : vector<64x256xf32> to vector<64x256xbf16>
    %c0_18 = arith.constant 0 : index
    %c0_19 = arith.constant 0 : index
    %25 = vector.load %arg8[%c0_18, %c0_19] : memref<64x256xbf16, #tpu.memory_space<vmem>>, vector<64x256xbf16>
    tpu.vector_store %arg8[%c0_18, %c0_19], %24 {strides = array<i32>} : memref<64x256xbf16, #tpu.memory_space<vmem>>, vector<64x256xbf16>,
    return
  }
  func.func @transform_0(%arg0: i32) -> (i32, i32) {
    %c0_i32 = arith.constant 0 : i32
    %c0_i32_0 = arith.constant 0 : i32
    return %arg0, %c0_i32 : i32, i32
  }
  func.func @transform_1(%arg0: i32) -> (i32, i32) {
    %c0_i32 = arith.constant 0 : i32
    %c0_i32_0 = arith.constant 0 : i32
    %c0_i32_1 = arith.constant 0 : i32
    return %c0_i32, %c0_i32_0 : i32, i32
  }
  func.func @transform_2(%arg0: i32) -> (i32, i32) {
    %c0_i32 = arith.constant 0 : i32
    %c0_i32_0 = arith.constant 0 : i32
    %c0_i32_1 = arith.constant 0 : i32
    return %c0_i32, %c0_i32_0 : i32, i32
  }
  func.func @transform_3(%arg0: i32) -> (i32, i32) {
    %c0_i32 = arith.constant 0 : i32
    %c0_i32_0 = arith.constant 0 : i32
    %c0_i32_1 = arith.constant 0 : i32
    return %c0_i32, %c0_i32_0 : i32, i32
  }
  func.func @transform_4(%arg0: i32) -> (i32, i32) {
    %c0_i32 = arith.constant 0 : i32
    %c0_i32_0 = arith.constant 0 : i32
    %c0_i32_1 = arith.constant 0 : i32
    return %c0_i32, %c0_i32_0 : i32, i32
  }
  func.func @transform_5(%arg0: i32) -> (i32, i32) {
    %c0_i32 = arith.constant 0 : i32
    %c0_i32_0 = arith.constant 0 : i32
    %c0_i32_1 = arith.constant 0 : i32
    return %c0_i32, %c0_i32_0 : i32, i32
  }
  func.func @transform_6(%arg0: i32) -> (i32, i32) {
    %c0_i32 = arith.constant 0 : i32
    %c0_i32_0 = arith.constant 0 : i32
    %c0_i32_1 = arith.constant 0 : i32
    return %c0_i32, %c0_i32_0 : i32, i32
  }
  func.func @transform_7(%arg0: i32) -> (i32, i32) {
    %c0_i32 = arith.constant 0 : i32
    %c0_i32_0 = arith.constant 0 : i32
    return %arg0, %c0_i32 : i32, i32
  }
}

module attributes {stable_mosaic.version = 11 : i64} {
  func.func @_nin_block_kernel(%arg0: i32, %arg1: memref<8x2304xbf16, #tpu.memory_space<vmem>>, %arg2: memref<2304x384xbf16, #tpu.memory_space<vmem>>, %arg3: memref<1x384xf32, #tpu.memory_space<vmem>>, %arg4: memref<384x384xbf16, #tpu.memory_space<vmem>>, %arg5: memref<1x384xf32, #tpu.memory_space<vmem>>, %arg6: memref<384x384xbf16, #tpu.memory_space<vmem>>, %arg7: memref<1x384xf32, #tpu.memory_space<vmem>>, %arg8: memref<8x384xbf16, #tpu.memory_space<vmem>>) attributes {dimension_semantics = [#tpu.dimension_semantics<parallel>], iteration_bounds = array<i64: 3>, scalar_prefetch = 0 : i64, scratch_operands = 0 : i64, tpu.core_type = #tpu.core_type<tc>, window_params = [{transform_indices = @transform_0, window_bounds = array<i64: 8, 2304>}, {pipeline_mode = #tpu.pipeline_mode<synchronous>, transform_indices = @transform_1, window_bounds = array<i64: 2304, 384>}, {pipeline_mode = #tpu.pipeline_mode<synchronous>, transform_indices = @transform_2, window_bounds = array<i64: 1, 384>}, {pipeline_mode = #tpu.pipeline_mode<synchronous>, transform_indices = @transform_3, window_bounds = array<i64: 384, 384>}, {pipeline_mode = #tpu.pipeline_mode<synchronous>, transform_indices = @transform_4, window_bounds = array<i64: 1, 384>}, {pipeline_mode = #tpu.pipeline_mode<synchronous>, transform_indices = @transform_5, window_bounds = array<i64: 384, 384>}, {pipeline_mode = #tpu.pipeline_mode<synchronous>, transform_indices = @transform_6, window_bounds = array<i64: 1, 384>}, {transform_indices = @transform_7, window_bounds = array<i64: 8, 384>}]} {
    %c0 = arith.constant 0 : index
    %c0_0 = arith.constant 0 : index
    %0 = vector.load %arg1[%c0, %c0_0] : memref<8x2304xbf16, #tpu.memory_space<vmem>>, vector<8x2304xbf16>
    %c0_1 = arith.constant 0 : index
    %c0_2 = arith.constant 0 : index
    %1 = vector.load %arg2[%c0_1, %c0_2] : memref<2304x384xbf16, #tpu.memory_space<vmem>>, vector<2304x384xbf16>
    %cst = arith.constant dense<0.000000e+00> : vector<8x384xf32>
    %2 = tpu.matmul %0, %1, %cst {dimension_numbers = #tpu.dot_dimension_numbers<[1], [0], [0], [1], [0, 0, 1, 1], [], []>} : vector<8x2304xbf16>, vector<2304x384xbf16>, vector<8x384xf32> -> vector<8x384xf32>
    %c0_3 = arith.constant 0 : index
    %c0_4 = arith.constant 0 : index
    %3 = vector.load %arg3[%c0_3, %c0_4] : memref<1x384xf32, #tpu.memory_space<vmem>>, vector<1x384xf32>
    %4 = vector.broadcast %3 : vector<1x384xf32> to vector<8x384xf32>
    %5 = arith.addf %2, %4 : vector<8x384xf32>
    %cst_5 = arith.constant 0.000000e+00 : f32
    %6 = vector.broadcast %cst_5 : f32 to vector<8x384xf32>
    %7 = arith.maximumf %5, %6 : vector<8x384xf32>
    %8 = arith.truncf %7 : vector<8x384xf32> to vector<8x384xbf16>
    %c0_6 = arith.constant 0 : index
    %c0_7 = arith.constant 0 : index
    %9 = vector.load %arg4[%c0_6, %c0_7] : memref<384x384xbf16, #tpu.memory_space<vmem>>, vector<384x384xbf16>
    %cst_8 = arith.constant dense<0.000000e+00> : vector<8x384xf32>
    %10 = tpu.matmul %8, %9, %cst_8 {dimension_numbers = #tpu.dot_dimension_numbers<[1], [0], [0], [1], [0, 0, 1, 1], [], []>} : vector<8x384xbf16>, vector<384x384xbf16>, vector<8x384xf32> -> vector<8x384xf32>
    %c0_9 = arith.constant 0 : index
    %c0_10 = arith.constant 0 : index
    %11 = vector.load %arg5[%c0_9, %c0_10] : memref<1x384xf32, #tpu.memory_space<vmem>>, vector<1x384xf32>
    %12 = vector.broadcast %11 : vector<1x384xf32> to vector<8x384xf32>
    %13 = arith.addf %10, %12 : vector<8x384xf32>
    %cst_11 = arith.constant 0.000000e+00 : f32
    %14 = vector.broadcast %cst_11 : f32 to vector<8x384xf32>
    %15 = arith.maximumf %13, %14 : vector<8x384xf32>
    %16 = arith.truncf %15 : vector<8x384xf32> to vector<8x384xbf16>
    %c0_12 = arith.constant 0 : index
    %c0_13 = arith.constant 0 : index
    %17 = vector.load %arg6[%c0_12, %c0_13] : memref<384x384xbf16, #tpu.memory_space<vmem>>, vector<384x384xbf16>
    %cst_14 = arith.constant dense<0.000000e+00> : vector<8x384xf32>
    %18 = tpu.matmul %16, %17, %cst_14 {dimension_numbers = #tpu.dot_dimension_numbers<[1], [0], [0], [1], [0, 0, 1, 1], [], []>} : vector<8x384xbf16>, vector<384x384xbf16>, vector<8x384xf32> -> vector<8x384xf32>
    %c0_15 = arith.constant 0 : index
    %c0_16 = arith.constant 0 : index
    %19 = vector.load %arg7[%c0_15, %c0_16] : memref<1x384xf32, #tpu.memory_space<vmem>>, vector<1x384xf32>
    %20 = vector.broadcast %19 : vector<1x384xf32> to vector<8x384xf32>
    %21 = arith.addf %18, %20 : vector<8x384xf32>
    %cst_17 = arith.constant 0.000000e+00 : f32
    %22 = vector.broadcast %cst_17 : f32 to vector<8x384xf32>
    %23 = arith.maximumf %21, %22 : vector<8x384xf32>
    %24 = arith.truncf %23 : vector<8x384xf32> to vector<8x384xbf16>
    %c0_18 = arith.constant 0 : index
    %c0_19 = arith.constant 0 : index
    %25 = vector.load %arg8[%c0_18, %c0_19] : memref<8x384xbf16, #tpu.memory_space<vmem>>, vector<8x384xbf16>
    tpu.vector_store %arg8[%c0_18, %c0_19], %24 {strides = array<i32>} : memref<8x384xbf16, #tpu.memory_space<vmem>>, vector<8x384xbf16>,
    return
  }
  func.func @transform_0(%arg0: i32) -> (i32, i32) {
    %c0_i32 = arith.constant 0 : i32
    %c0_i32_0 = arith.constant 0 : i32
    return %arg0, %c0_i32 : i32, i32
  }
  func.func @transform_1(%arg0: i32) -> (i32, i32) {
    %c0_i32 = arith.constant 0 : i32
    %c0_i32_0 = arith.constant 0 : i32
    %c0_i32_1 = arith.constant 0 : i32
    return %c0_i32, %c0_i32_0 : i32, i32
  }
  func.func @transform_2(%arg0: i32) -> (i32, i32) {
    %c0_i32 = arith.constant 0 : i32
    %c0_i32_0 = arith.constant 0 : i32
    %c0_i32_1 = arith.constant 0 : i32
    return %c0_i32, %c0_i32_0 : i32, i32
  }
  func.func @transform_3(%arg0: i32) -> (i32, i32) {
    %c0_i32 = arith.constant 0 : i32
    %c0_i32_0 = arith.constant 0 : i32
    %c0_i32_1 = arith.constant 0 : i32
    return %c0_i32, %c0_i32_0 : i32, i32
  }
  func.func @transform_4(%arg0: i32) -> (i32, i32) {
    %c0_i32 = arith.constant 0 : i32
    %c0_i32_0 = arith.constant 0 : i32
    %c0_i32_1 = arith.constant 0 : i32
    return %c0_i32, %c0_i32_0 : i32, i32
  }
  func.func @transform_5(%arg0: i32) -> (i32, i32) {
    %c0_i32 = arith.constant 0 : i32
    %c0_i32_0 = arith.constant 0 : i32
    %c0_i32_1 = arith.constant 0 : i32
    return %c0_i32, %c0_i32_0 : i32, i32
  }
  func.func @transform_6(%arg0: i32) -> (i32, i32) {
    %c0_i32 = arith.constant 0 : i32
    %c0_i32_0 = arith.constant 0 : i32
    %c0_i32_1 = arith.constant 0 : i32
    return %c0_i32, %c0_i32_0 : i32, i32
  }
  func.func @transform_7(%arg0: i32) -> (i32, i32) {
    %c0_i32 = arith.constant 0 : i32
    %c0_i32_0 = arith.constant 0 : i32
    return %arg0, %c0_i32 : i32, i32
  }
}

module attributes {stable_mosaic.version = 11 : i64} {
  func.func @_nin_block_kernel(%arg0: i32, %arg1: memref<8x3456xbf16, #tpu.memory_space<vmem>>, %arg2: memref<3456x128xbf16, #tpu.memory_space<vmem>>, %arg3: memref<1x128xf32, #tpu.memory_space<vmem>>, %arg4: memref<128x128xbf16, #tpu.memory_space<vmem>>, %arg5: memref<1x128xf32, #tpu.memory_space<vmem>>, %arg6: memref<128x128xbf16, #tpu.memory_space<vmem>>, %arg7: memref<1x128xf32, #tpu.memory_space<vmem>>, %arg8: memref<8x128xbf16, #tpu.memory_space<vmem>>) attributes {dimension_semantics = [#tpu.dimension_semantics<parallel>], iteration_bounds = array<i64: 1>, scalar_prefetch = 0 : i64, scratch_operands = 0 : i64, tpu.core_type = #tpu.core_type<tc>, window_params = [{transform_indices = @transform_0, window_bounds = array<i64: 8, 3456>}, {pipeline_mode = #tpu.pipeline_mode<synchronous>, transform_indices = @transform_1, window_bounds = array<i64: 3456, 128>}, {pipeline_mode = #tpu.pipeline_mode<synchronous>, transform_indices = @transform_2, window_bounds = array<i64: 1, 128>}, {pipeline_mode = #tpu.pipeline_mode<synchronous>, transform_indices = @transform_3, window_bounds = array<i64: 128, 128>}, {pipeline_mode = #tpu.pipeline_mode<synchronous>, transform_indices = @transform_4, window_bounds = array<i64: 1, 128>}, {pipeline_mode = #tpu.pipeline_mode<synchronous>, transform_indices = @transform_5, window_bounds = array<i64: 128, 128>}, {pipeline_mode = #tpu.pipeline_mode<synchronous>, transform_indices = @transform_6, window_bounds = array<i64: 1, 128>}, {transform_indices = @transform_7, window_bounds = array<i64: 8, 128>}]} {
    %c0 = arith.constant 0 : index
    %c0_0 = arith.constant 0 : index
    %0 = vector.load %arg1[%c0, %c0_0] : memref<8x3456xbf16, #tpu.memory_space<vmem>>, vector<8x3456xbf16>
    %c0_1 = arith.constant 0 : index
    %c0_2 = arith.constant 0 : index
    %1 = vector.load %arg2[%c0_1, %c0_2] : memref<3456x128xbf16, #tpu.memory_space<vmem>>, vector<3456x128xbf16>
    %cst = arith.constant dense<0.000000e+00> : vector<8x128xf32>
    %2 = tpu.matmul %0, %1, %cst {dimension_numbers = #tpu.dot_dimension_numbers<[1], [0], [0], [1], [0, 0, 1, 1], [], []>} : vector<8x3456xbf16>, vector<3456x128xbf16>, vector<8x128xf32> -> vector<8x128xf32>
    %c0_3 = arith.constant 0 : index
    %c0_4 = arith.constant 0 : index
    %3 = vector.load %arg3[%c0_3, %c0_4] : memref<1x128xf32, #tpu.memory_space<vmem>>, vector<1x128xf32>
    %4 = vector.broadcast %3 : vector<1x128xf32> to vector<8x128xf32>
    %5 = arith.addf %2, %4 : vector<8x128xf32>
    %cst_5 = arith.constant 0.000000e+00 : f32
    %6 = vector.broadcast %cst_5 : f32 to vector<8x128xf32>
    %7 = arith.maximumf %5, %6 : vector<8x128xf32>
    %8 = arith.truncf %7 : vector<8x128xf32> to vector<8x128xbf16>
    %c0_6 = arith.constant 0 : index
    %c0_7 = arith.constant 0 : index
    %9 = vector.load %arg4[%c0_6, %c0_7] : memref<128x128xbf16, #tpu.memory_space<vmem>>, vector<128x128xbf16>
    %cst_8 = arith.constant dense<0.000000e+00> : vector<8x128xf32>
    %10 = tpu.matmul %8, %9, %cst_8 {dimension_numbers = #tpu.dot_dimension_numbers<[1], [0], [0], [1], [0, 0, 1, 1], [], []>} : vector<8x128xbf16>, vector<128x128xbf16>, vector<8x128xf32> -> vector<8x128xf32>
    %c0_9 = arith.constant 0 : index
    %c0_10 = arith.constant 0 : index
    %11 = vector.load %arg5[%c0_9, %c0_10] : memref<1x128xf32, #tpu.memory_space<vmem>>, vector<1x128xf32>
    %12 = vector.broadcast %11 : vector<1x128xf32> to vector<8x128xf32>
    %13 = arith.addf %10, %12 : vector<8x128xf32>
    %cst_11 = arith.constant 0.000000e+00 : f32
    %14 = vector.broadcast %cst_11 : f32 to vector<8x128xf32>
    %15 = arith.maximumf %13, %14 : vector<8x128xf32>
    %16 = arith.truncf %15 : vector<8x128xf32> to vector<8x128xbf16>
    %c0_12 = arith.constant 0 : index
    %c0_13 = arith.constant 0 : index
    %17 = vector.load %arg6[%c0_12, %c0_13] : memref<128x128xbf16, #tpu.memory_space<vmem>>, vector<128x128xbf16>
    %cst_14 = arith.constant dense<0.000000e+00> : vector<8x128xf32>
    %18 = tpu.matmul %16, %17, %cst_14 {dimension_numbers = #tpu.dot_dimension_numbers<[1], [0], [0], [1], [0, 0, 1, 1], [], []>} : vector<8x128xbf16>, vector<128x128xbf16>, vector<8x128xf32> -> vector<8x128xf32>
    %c0_15 = arith.constant 0 : index
    %c0_16 = arith.constant 0 : index
    %19 = vector.load %arg7[%c0_15, %c0_16] : memref<1x128xf32, #tpu.memory_space<vmem>>, vector<1x128xf32>
    %20 = vector.broadcast %19 : vector<1x128xf32> to vector<8x128xf32>
    %21 = arith.addf %18, %20 : vector<8x128xf32>
    %cst_17 = arith.constant 0.000000e+00 : f32
    %22 = vector.broadcast %cst_17 : f32 to vector<8x128xf32>
    %23 = arith.maximumf %21, %22 : vector<8x128xf32>
    %24 = arith.truncf %23 : vector<8x128xf32> to vector<8x128xbf16>
    %c0_18 = arith.constant 0 : index
    %c0_19 = arith.constant 0 : index
    %25 = vector.load %arg8[%c0_18, %c0_19] : memref<8x128xbf16, #tpu.memory_space<vmem>>, vector<8x128xbf16>
    tpu.vector_store %arg8[%c0_18, %c0_19], %24 {strides = array<i32>} : memref<8x128xbf16, #tpu.memory_space<vmem>>, vector<8x128xbf16>,
    return
  }
  func.func @transform_0(%arg0: i32) -> (i32, i32) {
    %c0_i32 = arith.constant 0 : i32
    %c0_i32_0 = arith.constant 0 : i32
    return %arg0, %c0_i32 : i32, i32
  }
  func.func @transform_1(%arg0: i32) -> (i32, i32) {
    %c0_i32 = arith.constant 0 : i32
    %c0_i32_0 = arith.constant 0 : i32
    %c0_i32_1 = arith.constant 0 : i32
    return %c0_i32, %c0_i32_0 : i32, i32
  }
  func.func @transform_2(%arg0: i32) -> (i32, i32) {
    %c0_i32 = arith.constant 0 : i32
    %c0_i32_0 = arith.constant 0 : i32
    %c0_i32_1 = arith.constant 0 : i32
    return %c0_i32, %c0_i32_0 : i32, i32
  }
  func.func @transform_3(%arg0: i32) -> (i32, i32) {
    %c0_i32 = arith.constant 0 : i32
    %c0_i32_0 = arith.constant 0 : i32
    %c0_i32_1 = arith.constant 0 : i32
    return %c0_i32, %c0_i32_0 : i32, i32
  }
  func.func @transform_4(%arg0: i32) -> (i32, i32) {
    %c0_i32 = arith.constant 0 : i32
    %c0_i32_0 = arith.constant 0 : i32
    %c0_i32_1 = arith.constant 0 : i32
    return %c0_i32, %c0_i32_0 : i32, i32
  }
  func.func @transform_5(%arg0: i32) -> (i32, i32) {
    %c0_i32 = arith.constant 0 : i32
    %c0_i32_0 = arith.constant 0 : i32
    %c0_i32_1 = arith.constant 0 : i32
    return %c0_i32, %c0_i32_0 : i32, i32
  }
  func.func @transform_6(%arg0: i32) -> (i32, i32) {
    %c0_i32 = arith.constant 0 : i32
    %c0_i32_0 = arith.constant 0 : i32
    %c0_i32_1 = arith.constant 0 : i32
    return %c0_i32, %c0_i32_0 : i32, i32
  }
  func.func @transform_7(%arg0: i32) -> (i32, i32) {
    %c0_i32 = arith.constant 0 : i32
    %c0_i32_0 = arith.constant 0 : i32
    return %arg0, %c0_i32 : i32, i32
  }
}

</mosaic_0001>

<bundles_post_ra>
// kernel: _lambda_.4
= control target key start
LH: loop header
LB: loop body
LE: loop exit
PB: predicated region body
PF: predicated region fallthrough
CT: control target
= control target key end

     0   :  { %s1827_s24 = smov 0   ;;  %s2057_s0 = inlined_call_operand.vmem [shape: bf16[648,128], index: 0, kind: input, shape index: {}]   ;;  %s2058_s1 = inlined_call_operand.vmem [shape: bf16[128,128], index: 1, kind: input, shape index: {}]   ;;  %s2059_s2 = inlined_call_operand.vmem [shape: f32[1,128], index: 2, kind: input, shape index: {}]   ;;  %s2060_s3 = inlined_call_operand.vmem [shape: bf16[128,128], index: 3, kind: input, shape index: {}]   ;;  %s2061_s4 = inlined_call_operand.vmem [shape: f32[1,128], index: 4, kind: input, shape index: {}]   ;;  %s2062_s5 = inlined_call_operand.vmem [shape: bf16[128,128], index: 5, kind: input, shape index: {}]   ;;  %s2063_s6 = inlined_call_operand.vmem [shape: f32[1,128], index: 6, kind: input, shape index: {}]   ;;  %s2064_s7 = inlined_call_operand.vmem [shape: bf16[648,128], index: 7, kind: output, shape index: {}]  }
   0x1 LB: > { %s1338_s25 = sadd.s32 4294967295, %s1785_s24   ;;  %p1342_p0 = scmp.ge.s32.totalorder %s1785_s24, 1  ;;  %s1785_s24 = sphi %s1827_s24, %s17_s24  }
   0x2   : > { %p238_p1 = scmp.lt.s32.totalorder %s1785_s24, 4 }
   0x4   : > { %p239_p2 = pnand %p1342_p0, %p238_p1 }
   0x5   : > { %v1741_v0 = vld [vmem:[%s2058_s1] sm:$0xff] (!%p239_p2)   ;;  %s270_s28 = smul.u32 (!%p239_p2), 27, %s1338_s25  ;;  %v1742_v1 = vld [vmem:[%s2058_s1 + $0x8] sm:$0xff] (!%p239_p2)   ;;  %v1743_v2 = vld [vmem:[%s2058_s1 + $0x10] sm:$0xff] (!%p239_p2)  }
   0x6   : > { %242 = sbr.rel (%p239_p2) target bundleno = 752 (0x2f0), region = 48  ;;  %1585 = vmatprep.subr.bf16.mxu0 (!%p239_p2), %v1741_v0  ;;  %1717 = vmatprep.subr.bf16.mxu1 (!%p239_p2), %v1741_v0  ;;  %v1744_v3 = vld [vmem:[%s2058_s1 + $0x18] sm:$0xff] (!%p239_p2)   ;;  %v1745_v5 = vld [vmem:[%s2058_s1 + $0x20] sm:$0xff] (!%p239_p2)   ;;  %v1746_v6 = vld [vmem:[%s2058_s1 + $0x28] sm:$0xff] (!%p239_p2)  }
   0x7   : > { %p271_p3 = scmp.lt.s32.totalorder (!%p239_p2), %s270_s28, 80  ;;  %1586 = vmatpush3.bf16.msra.mxu0 (!%p239_p2), %v1741_v0  ;;  %1725 = vmatpush3.bf16.msra.mxu1 (!%p239_p2), %v1741_v0  ;;  %v1747_v8 = vld [vmem:[%s2058_s1 + $0x30] sm:$0xff] (!%p239_p2)   ;;  %v1748_v9 = vld [vmem:[%s2058_s1 + $0x38] sm:$0xff] (!%p239_p2)   ;;  %v1763_v10 = vld [vmem:[%s2060_s3] sm:$0xff] (!%p239_p2)  }
   0x8   : > { %1587 = vmatprep.subr.bf16.mxu0 (!%p239_p2), %v1742_v1  ;;  %1718 = vmatprep.subr.bf16.mxu1 (!%p239_p2), %v1742_v1  ;;  %v1764_v15 = vld [vmem:[%s2060_s3 + $0x8] sm:$0xff] (!%p239_p2)   ;;  %v1765_v16 = vld [vmem:[%s2060_s3 + $0x10] sm:$0xff] (!%p239_p2)   ;;  %v1766_v21 = vld [vmem:[%s2060_s3 + $0x18] sm:$0xff] (!%p239_p2)  }
   0x9   : > { %v1767_v22 = vld [vmem:[%s2060_s3 + $0x20] sm:$0xff] (!%p239_p2)   ;;  %v1768_v26 = vld [vmem:[%s2060_s3 + $0x28] sm:$0xff] (!%p239_p2)   ;;  %v1769_v28 = vld [vmem:[%s2060_s3 + $0x30] sm:$0xff] (!%p239_p2)  }
   0xa   : > { %v1770_v29 = vld [vmem:[%s2060_s3 + $0x38] sm:$0xff] (!%p239_p2)   ;;  %v1771_v30 = vld [vmem:[%s2062_s5] sm:$0xff] (!%p239_p2)   ;;  %v1772_v31 = vld [vmem:[%s2062_s5 + $0x8] sm:$0xff] (!%p239_p2)  }
   0xb   : > { %1588 = vmatpush3.bf16.msra.mxu0 (!%p239_p2), %v1742_v1  ;;  %1726 = vmatpush3.bf16.msra.mxu1 (!%p239_p2), %v1742_v1  ;;  %v1773_v32 = vld [vmem:[%s2062_s5 + $0x10] sm:$0xff] (!%p239_p2)   ;;  %v1774_v33 = vld [vmem:[%s2062_s5 + $0x18] sm:$0xff] (!%p239_p2)   ;;  %v1775_v34 = vld [vmem:[%s2062_s5 + $0x20] sm:$0xff] (!%p239_p2)  }
   0xc   : > { %1589 = vmatprep.subr.bf16.mxu0 (!%p239_p2), %v1743_v2  ;;  %1719 = vmatprep.subr.bf16.mxu1 (!%p239_p2), %v1743_v2  ;;  %v1776_v35 = vld [vmem:[%s2062_s5 + $0x28] sm:$0xff] (!%p239_p2)   ;;  %v1928_v36 = vld [vmem:[%s2059_s2] ss:$0 sm:$0xff] (!%p239_p2) }
   0xd   : > { %s2066_s28 = smov (!%p271_p3, %s270_s28), 80 }
   0xe   : > { %s1343_s10 = sshll.u32 %s2066_s28, 2 }
   0xf   : > { %s1855_s15 = scalar_lea.vmem %s2057_s0, %s1343_s10  ;;  %1590 = vmatpush3.bf16.msra.mxu0 %v1743_v2  ;;  %1727 = vmatpush3.bf16.msra.mxu1 %v1743_v2  ;;  %s2015_s25 = scalar_lea.vmem %s2064_s7, %s1343_s10 }
  0x10   : > { %v1749_v4 = vld [vmem:[%s1855_s15] sm:$0xff]   ;;  %1591 = vmatprep.subr.bf16.mxu0 %v1744_v3  ;;  %1720 = vmatprep.subr.bf16.mxu1 %v1744_v3  ;;  %v1750_v11 = vld [vmem:[%s1855_s15 + $0x8] sm:$0xff]   ;;  %v1751_v13 = vld [vmem:[%s1855_s15 + $0x10] sm:$0xff]  }
  0x11   : > { %1601 = vmatprep.mubr.bf16.mxu0 %v1749_v4  ;;  %v1757_v7 = vld [vmem:[%s1855_s15 + $0x40] sm:$0xff]   ;;  %v1758_v12 = vld [vmem:[%s1855_s15 + $0x48] sm:$0xff]   ;;  %v1759_v14 = vld [vmem:[%s1855_s15 + $0x50] sm:$0xff]  }
  0x12   : > { %1617 = vmatprep.mubr.bf16.mxu1 %v1757_v7  ;;  %v1752_v17 = vld [vmem:[%s1855_s15 + $0x18] sm:$0xff]   ;;  %v1753_v19 = vld [vmem:[%s1855_s15 + $0x20] sm:$0xff]   ;;  %v1754_v23 = vld [vmem:[%s1855_s15 + $0x28] sm:$0xff]  }
  0x13   : > { %1592 = vmatpush3.bf16.msra.mxu0 %v1744_v3  ;;  %1728 = vmatpush3.bf16.msra.mxu1 %v1744_v3  ;;  %v1760_v18 = vld [vmem:[%s1855_s15 + $0x58] sm:$0xff]   ;;  %v1761_v20 = vld [vmem:[%s1855_s15 + $0x60] sm:$0xff]   ;;  %v1762_v24 = vld [vmem:[%s1855_s15 + $0x68] ss:$0 sps:$4 sm:$0xff]  }
  0x14   : > { %1593 = vmatprep.subr.bf16.mxu0 %v1745_v5  ;;  %1721 = vmatprep.subr.bf16.mxu1 %v1745_v5  ;;  %v1755_v25 = vld [vmem:[%s1855_s15 + $0x30] sm:$0xff]   ;;  %v1756_v27 = vld [vmem:[%s1855_s15 + $0x38] sm:$0xff]  }
  0x17   : > { %1594 = vmatpush3.bf16.msra.mxu0 %v1745_v5  ;;  %1729 = vmatpush3.bf16.msra.mxu1 %v1745_v5 }
  0x18   : > { %1595 = vmatprep.subr.bf16.mxu0 %v1746_v6  ;;  %1722 = vmatprep.subr.bf16.mxu1 %v1746_v6 }
  0x1b   : > { %1596 = vmatpush3.bf16.msra.mxu0 %v1746_v6  ;;  %1730 = vmatpush3.bf16.msra.mxu1 %v1746_v6 }
  0x1c   : > { %1597 = vmatprep.subr.bf16.mxu0 %v1747_v8  ;;  %1723 = vmatprep.subr.bf16.mxu1 %v1747_v8 }
  0x1f   : > { %1598 = vmatpush3.bf16.msra.mxu0 %v1747_v8  ;;  %1731 = vmatpush3.bf16.msra.mxu1 %v1747_v8 }
  0x20   : > { %1599 = vmatprep.subr.bf16.mxu0 %v1748_v9  ;;  %1724 = vmatprep.subr.bf16.mxu1 %v1748_v9 }
  0x23   : > { %1600 = vmatpush3.bf16.msra.mxu0 %v1748_v9  ;;  %1732 = vmatpush3.bf16.msra.mxu1 %v1748_v9 }
  0x24   : > { %1629 = vmatprep.subr.bf16.mxu1 %v1763_v10  ;;  %1673 = vmatprep.subr.bf16.mxu0 %v1771_v30 }
  0x26   : > { %1602 = vmatmul.mubr.bf16.vlgmr.msra.gmra.mrb[0].mxu0 %v1750_v11  ;;  %1618 = vmatmul.mubr.bf16.vlgmr.msra.gmra.mrb[0].mxu1 %v1758_v12 }
  0x27   : > { %1605 = vmatprep.mubr.bf16.mxu0 %v1751_v13  ;;  %1621 = vmatprep.mubr.bf16.mxu1 %v1759_v14 }
  0x28   : > { %1630 = vmatpush3.bf16.msra.mxu1 %v1763_v10  ;;  %1674 = vmatpush3.bf16.msra.mxu0 %v1771_v30 }
  0x29   : > { %1631 = vmatprep.subr.bf16.mxu1 %v1764_v15  ;;  %1675 = vmatprep.subr.bf16.mxu0 %v1772_v31 }
  0x2c   : > { %1632 = vmatpush3.bf16.msra.mxu1 %v1764_v15  ;;  %1676 = vmatpush3.bf16.msra.mxu0 %v1772_v31 }
  0x2d   : > { %1633 = vmatprep.subr.bf16.mxu1 %v1765_v16  ;;  %1677 = vmatprep.subr.bf16.mxu0 %v1773_v32 }
  0x2e   : > { %1606 = vmatmul.mubr.bf16.gmra.mrb[4].mxu0 %v1752_v17  ;;  %1622 = vmatmul.mubr.bf16.gmra.mrb[4].mxu1 %v1760_v18 }
  0x2f   : > { %1609 = vmatprep.mubr.bf16.mxu0 %v1753_v19  ;;  %1625 = vmatprep.mubr.bf16.mxu1 %v1761_v20 }
  0x30   : > { %1634 = vmatpush3.bf16.msra.mxu1 %v1765_v16  ;;  %1678 = vmatpush3.bf16.msra.mxu0 %v1773_v32 }
  0x31   : > { %1635 = vmatprep.subr.bf16.mxu1 %v1766_v21  ;;  %1679 = vmatprep.subr.bf16.mxu0 %v1774_v33 }
  0x34   : > { %1636 = vmatpush3.bf16.msra.mxu1 %v1766_v21  ;;  %1680 = vmatpush3.bf16.msra.mxu0 %v1774_v33 }
  0x35   : > { %1637 = vmatprep.subr.bf16.mxu1 %v1767_v22  ;;  %1681 = vmatprep.subr.bf16.mxu0 %v1775_v34 }
  0x36   : > { %1610 = vmatmul.mubr.bf16.gmra.mrb[8].mxu0 %v1754_v23  ;;  %1626 = vmatmul.mubr.bf16.gmra.mrb[8].mxu1 %v1762_v24 }
  0x37   : > { %1613 = vmatprep.mubr.bf16.mxu0 %v1755_v25 }
  0x38   : > { %1638 = vmatpush3.bf16.msra.mxu1 %v1767_v22  ;;  %1682 = vmatpush3.bf16.msra.mxu0 %v1775_v34 }
  0x39   : > { %1639 = vmatprep.subr.bf16.mxu1 %v1768_v26  ;;  %1683 = vmatprep.subr.bf16.mxu0 %v1776_v35 }
  0x3c   : > { %1640 = vmatpush3.bf16.msra.mxu1 %v1768_v26  ;;  %1684 = vmatpush3.bf16.msra.mxu0 %v1776_v35 }
  0x3d   : > { %1641 = vmatprep.subr.bf16.mxu1 %v1769_v28 }
  0x3e   : > { %1614 = vmatmul.mubr.bf16.gmra.mrb[12].mxu0 %v1756_v27 }
  0x40   : > { %1642 = vmatpush3.bf16.msra.mxu1 %v1769_v28 }
  0x41   : > { %1643 = vmatprep.subr.bf16.mxu1 %v1770_v29 }
  0x44   : > { %1644 = vmatpush3.bf16.msra.mxu1 %v1770_v29 }
  0xf9   : > { %v1603_v37 = vpop.f32.mrb[0].mxu0  ;;  %v1619_v38 = vpop.f32.mrb[0].mxu1 }
  0xfa   : > { %v506_v39 = vadd.f32 %v1603_v37, %v1928_v36  ;;  %v497_v40 = vpop.f32.mrb[1].mxu0  ;;  %v570_v41 = vadd.f32 %v1619_v38, %v1928_v36  ;;  %v561_v42 = vpop.f32.mrb[1].mxu1 }
  0xfb   : > { %v498_v43 = vadd.f32 %v1928_v36, %v497_v40  ;;  %v1604_v44 = vpop.f32.mrb[2].mxu0  ;;  %v562_v45 = vadd.f32 %v1928_v36, %v561_v42  ;;  %v1620_v46 = vpop.f32.mrb[2].mxu1 }
  0xfc   : > { %v509_v47 = vadd.f32 %v1604_v44, %v1928_v36  ;;  %v500_v48 = vpop.f32.mrb[3].mxu0  ;;  %v625_v49 = vmax.f32 %v570_v41, 0.0  ;;  %v573_v50 = vadd.f32 %v1620_v46, %v1928_v36  ;;  %v564_v51 = vpop.f32.mrb[3].mxu1  ;;  %v609_v55 = vmax.f32 %v506_v39, 0.0 }
  0xfd   : > { %v501_v52 = vadd.f32 %v1928_v36, %v500_v48  ;;  %v623_v53 = vmax.f32 %v562_v45, 0.0  ;;  %v565_v54 = vadd.f32 %v1928_v36, %v564_v51  ;;  %v607_v58 = vmax.f32 %v498_v43, 0.0 }
  0xfe   : > { %v610_v56 = vmax.f32 %v509_v47, 0.0  ;;  %v626_v57 = vmax.f32 %v573_v50, 0.0 }
  0xff   : > { %v608_v59 = vmax.f32 %v501_v52, 0.0  ;;  %v624_v60 = vmax.f32 %v565_v54, 0.0 }
 0x100   : > { %v635_v61 = vpack.c.bf16 %v610_v56, %v609_v55  ;;  %v1938_v62 = vpack.c.bf16 %v626_v57, %v625_v49 }
 0x101   : > { %v634_v63 = vpack.c.bf16 %v608_v59, %v607_v58  ;;  %v1607_v0 = vpop.f32.mrb[4].mxu0  ;;  %v1940_v1 = vpack.c.bf16 %v624_v60, %v623_v53  ;;  %v1623_v2 = vpop.f32.mrb[4].mxu1 }
 0x102   : > { %v522_v3 = vadd.f32 %v1607_v0, %v1928_v36  ;;  %v513_v4 = vpop.f32.mrb[5].mxu0  ;;  %v586_v5 = vadd.f32 %v1623_v2, %v1928_v36  ;;  %v577_v6 = vpop.f32.mrb[5].mxu1 }
 0x103   : > { %v514_v7 = vadd.f32 %v1928_v36, %v513_v4  ;;  %v1608_v8 = vpop.f32.mrb[6].mxu0  ;;  %1645 = vmatprep.mubr.bf16.mxu1 %v634_v63  ;;  %v578_v9 = vadd.f32 %v1928_v36, %v577_v6  ;;  %v1624_v10 = vpop.f32.mrb[6].mxu1 }
 0x104   : > { %v525_v11 = vadd.f32 %v1608_v8, %v1928_v36  ;;  %v516_v12 = vpop.f32.mrb[7].mxu0  ;;  %1646 = vmatmul.mubr.bf16.vlgmr.msra.gmra.mrb[12].mxu1 %v635_v61  ;;  %v629_v13 = vmax.f32 %v586_v5, 0.0  ;;  %v589_v14 = vadd.f32 %v1624_v10, %v1928_v36  ;;  %v580_v15 = vpop.f32.mrb[7].mxu1  ;;  %v613_v19 = vmax.f32 %v522_v3, 0.0  ;;  %v1777_v8 = vld [vmem:[%s2062_s5 + $0x30] sm:$0xff]  }
 0x105   : > { %v517_v16 = vadd.f32 %v1928_v36, %v516_v12  ;;  %v627_v17 = vmax.f32 %v578_v9, 0.0  ;;  %v581_v18 = vadd.f32 %v1928_v36, %v580_v15  ;;  %v611_v22 = vmax.f32 %v514_v7, 0.0  ;;  %1685 = vmatprep.subr.bf16.mxu0 %v1777_v8 }
 0x106   : > { %v614_v20 = vmax.f32 %v525_v11, 0.0  ;;  %v630_v21 = vmax.f32 %v589_v14, 0.0  ;;  %1686 = vmatpush3.bf16.msra.mxu0 %v1777_v8 }
 0x107   : > { %v612_v23 = vmax.f32 %v517_v16, 0.0  ;;  %v628_v24 = vmax.f32 %v581_v18, 0.0 }
 0x108   : > { %v637_v25 = vpack.c.bf16 %v614_v20, %v613_v19  ;;  %v645_v26 = vpack.c.bf16 %v630_v21, %v629_v13 }
 0x109   : > { %v636_v27 = vpack.c.bf16 %v612_v23, %v611_v22  ;;  %v1611_v28 = vpop.f32.mrb[8].mxu0  ;;  %v644_v29 = vpack.c.bf16 %v628_v24, %v627_v17  ;;  %v1627_v30 = vpop.f32.mrb[8].mxu1 }
 0x10a   : > { %v538_v31 = vadd.f32 %v1611_v28, %v1928_v36  ;;  %v529_v32 = vpop.f32.mrb[9].mxu0  ;;  %v593_v33 = vpop.f32.mrb[9].mxu1  ;;  %v602_v5 = vadd.f32 %v1627_v30, %v1928_v36 }
 0x10b   : > { %v530_v34 = vadd.f32 %v1928_v36, %v529_v32  ;;  %v1612_v35 = vpop.f32.mrb[10].mxu0  ;;  %1649 = vmatprep.mubr.bf16.mxu1 %v636_v27  ;;  %v594_v37 = vadd.f32 %v1928_v36, %v593_v33  ;;  %v1628_v38 = vpop.f32.mrb[10].mxu1 }
 0x10c   : > { %v541_v39 = vadd.f32 %v1612_v35, %v1928_v36  ;;  %v532_v40 = vpop.f32.mrb[11].mxu0  ;;  %1650 = vmatmul.mubr.bf16.gmra.mrb[16].mxu1 %v637_v25  ;;  %v596_v41 = vpop.f32.mrb[11].mxu1  ;;  %v617_v45 = vmax.f32 %v538_v31, 0.0  ;;  %v633_v6 = vmax.f32 %v602_v5, 0.0 }
 0x10d   : > { %v533_v42 = vadd.f32 %v1928_v36, %v532_v40  ;;  %v631_v43 = vmax.f32 %v594_v37, 0.0  ;;  %v597_v44 = vadd.f32 %v1928_v36, %v596_v41  ;;  %v615_v47 = vmax.f32 %v530_v34, 0.0 }
 0x10e   : > { %v618_v46 = vmax.f32 %v541_v39, 0.0  ;;  %v647_v7 = vpack.c.bf16 %v633_v6, %v633_v6 }
 0x10f   : > { %v616_v48 = vmax.f32 %v533_v42, 0.0  ;;  %v632_v49 = vmax.f32 %v597_v44, 0.0 }
 0x110   : > { %v639_v50 = vpack.c.bf16 %v618_v46, %v617_v45 }
 0x111   : > { %v638_v51 = vpack.c.bf16 %v616_v48, %v615_v47  ;;  %v1615_v52 = vpop.f32.mrb[12].mxu0  ;;  %v646_v53 = vpack.c.bf16 %v632_v49, %v631_v43 }
 0x112   : > { %v554_v54 = vadd.f32 %v1615_v52, %v1928_v36  ;;  %v545_v55 = vpop.f32.mrb[13].mxu0 }
 0x113   : > { %v546_v56 = vadd.f32 %v1928_v36, %v545_v55  ;;  %v1616_v57 = vpop.f32.mrb[14].mxu0  ;;  %1653 = vmatprep.mubr.bf16.mxu1 %v638_v51 }
 0x114   : > { %v557_v58 = vadd.f32 %v1616_v57, %v1928_v36  ;;  %v548_v59 = vpop.f32.mrb[15].mxu0  ;;  %1654 = vmatmul.mubr.bf16.gmra.mrb[20].mxu1 %v639_v50  ;;  %v621_v61 = vmax.f32 %v554_v54, 0.0 }
 0x115   : > { %v549_v60 = vadd.f32 %v1928_v36, %v548_v59  ;;  %v619_v0 = vmax.f32 %v546_v56, 0.0  ;;  %v1972_v36 = vld [vmem:[%s2061_s4] ss:$0 sm:$0xff] }
 0x116   : > { %v622_v63 = vmax.f32 %v557_v58, 0.0 }
 0x117   : > { %v620_v2 = vmax.f32 %v549_v60, 0.0 }
 0x118   : > { %v641_v3 = vpack.c.bf16 %v622_v63, %v621_v61 }
 0x119   : > { %v640_v4 = vpack.c.bf16 %v620_v2, %v619_v0 }
 0x11b   : > { %1657 = vmatprep.mubr.bf16.mxu1 %v640_v4 }
 0x11c   : > { %1658 = vmatmul.mubr.bf16.gmra.mrb[24].mxu1 %v641_v3 }
 0x11d   : > { %1661 = vmatprep.mubr.bf16.mxu1 %v1940_v1  ;;  %v1778_v1 = vld [vmem:[%s2062_s5 + $0x38] sm:$0xff]  }
 0x11e   : > { %1687 = vmatprep.subr.bf16.mxu0 %v1778_v1 }
 0x11f   : > { %1688 = vmatpush3.bf16.msra.mxu0 %v1778_v1 }
 0x124   : > { %1662 = vmatmul.mubr.bf16.gmra.mrb[28].mxu1 %v1938_v62 }
 0x125   : > { %1665 = vmatprep.mubr.bf16.mxu1 %v644_v29 }
 0x12c   : > { %1666 = vmatmul.mubr.bf16.gmra.mrb[32].mxu1 %v645_v26 }
 0x12d   : > { %1669 = vmatprep.mubr.bf16.mxu1 %v646_v53 }
 0x134   : > { %1670 = vmatmul.mubr.bf16.gmra.mrb[36].mxu1 %v647_v7 }
 0x1d7   : > { %v1647_v62 = vpop.f32.mrb[12].mxu1 }
 0x1d8   : > { %v762_v9 = vadd.f32 %v1647_v62, %v1972_v36  ;;  %v753_v10 = vpop.f32.mrb[13].mxu1 }
 0x1d9   : > { %v754_v11 = vadd.f32 %v1972_v36, %v753_v10  ;;  %v1648_v12 = vpop.f32.mrb[14].mxu1 }
 0x1da   : > { %v765_v13 = vadd.f32 %v1648_v12, %v1972_v36  ;;  %v756_v14 = vpop.f32.mrb[15].mxu1  ;;  %v865_v16 = vmax.f32 %v762_v9, 0.0 }
 0x1db   : > { %v757_v15 = vadd.f32 %v1972_v36, %v756_v14  ;;  %v863_v18 = vmax.f32 %v754_v11, 0.0 }
 0x1dc   : > { %v866_v17 = vmax.f32 %v765_v13, 0.0 }
 0x1dd   : > { %v864_v19 = vmax.f32 %v757_v15, 0.0 }
 0x1de   : > { %v891_v20 = vpack.c.bf16 %v866_v17, %v865_v16 }
 0x1df   : > { %v890_v21 = vpack.c.bf16 %v864_v19, %v863_v18  ;;  %v1651_v22 = vpop.f32.mrb[16].mxu1 }
 0x1e0   : > { %v778_v23 = vadd.f32 %v1651_v22, %v1972_v36  ;;  %v769_v24 = vpop.f32.mrb[17].mxu1 }
 0x1e1   : > { %v770_v25 = vadd.f32 %v1972_v36, %v769_v24  ;;  %v1652_v26 = vpop.f32.mrb[18].mxu1  ;;  %1689 = vmatprep.mubr.bf16.mxu0 %v890_v21 }
 0x1e2   : > { %v781_v27 = vadd.f32 %v1652_v26, %v1972_v36  ;;  %v772_v28 = vpop.f32.mrb[19].mxu1  ;;  %1690 = vmatmul.mubr.bf16.vlgmr.msra.gmra.mrb[16].mxu0 %v891_v20  ;;  %v869_v30 = vmax.f32 %v778_v23, 0.0 }
 0x1e3   : > { %v773_v29 = vadd.f32 %v1972_v36, %v772_v28  ;;  %v867_v32 = vmax.f32 %v770_v25, 0.0 }
 0x1e4   : > { %v870_v31 = vmax.f32 %v781_v27, 0.0 }
 0x1e5   : > { %v868_v33 = vmax.f32 %v773_v29, 0.0 }
 0x1e6   : > { %v893_v34 = vpack.c.bf16 %v870_v31, %v869_v30 }
 0x1e7   : > { %v892_v35 = vpack.c.bf16 %v868_v33, %v867_v32  ;;  %v1655_v37 = vpop.f32.mrb[20].mxu1 }
 0x1e8   : > { %v794_v38 = vadd.f32 %v1655_v37, %v1972_v36  ;;  %v785_v39 = vpop.f32.mrb[21].mxu1 }
 0x1e9   : > { %v786_v40 = vadd.f32 %v1972_v36, %v785_v39  ;;  %v1656_v41 = vpop.f32.mrb[22].mxu1  ;;  %1693 = vmatprep.mubr.bf16.mxu0 %v892_v35 }
 0x1ea   : > { %v797_v42 = vadd.f32 %v1656_v41, %v1972_v36  ;;  %v788_v43 = vpop.f32.mrb[23].mxu1  ;;  %1694 = vmatmul.mubr.bf16.gmra.mrb[20].mxu0 %v893_v34  ;;  %v873_v45 = vmax.f32 %v794_v38, 0.0 }
 0x1eb   : > { %v789_v44 = vadd.f32 %v1972_v36, %v788_v43  ;;  %v871_v47 = vmax.f32 %v786_v40, 0.0 }
 0x1ec   : > { %v874_v46 = vmax.f32 %v797_v42, 0.0  ;;  %v2004_v42 = vld [vmem:[%s2063_s6] ss:$0 sm:$0xff] }
 0x1ed   : > { %v872_v48 = vmax.f32 %v789_v44, 0.0 }
 0x1ee   : > { %v895_v49 = vpack.c.bf16 %v874_v46, %v873_v45 }
 0x1ef   : > { %v894_v50 = vpack.c.bf16 %v872_v48, %v871_v47  ;;  %v1659_v51 = vpop.f32.mrb[24].mxu1 }
 0x1f0   : > { %v810_v52 = vadd.f32 %v1659_v51, %v1972_v36  ;;  %v801_v53 = vpop.f32.mrb[25].mxu1 }
 0x1f1   : > { %v802_v54 = vadd.f32 %v1972_v36, %v801_v53  ;;  %v1660_v55 = vpop.f32.mrb[26].mxu1  ;;  %1697 = vmatprep.mubr.bf16.mxu0 %v894_v50 }
 0x1f2   : > { %v813_v56 = vadd.f32 %v1660_v55, %v1972_v36  ;;  %v804_v57 = vpop.f32.mrb[27].mxu1  ;;  %1698 = vmatmul.mubr.bf16.gmra.mrb[24].mxu0 %v895_v49  ;;  %v877_v59 = vmax.f32 %v810_v52, 0.0 }
 0x1f3   : > { %v805_v58 = vadd.f32 %v1972_v36, %v804_v57  ;;  %v875_v61 = vmax.f32 %v802_v54, 0.0 }
 0x1f4   : > { %v878_v60 = vmax.f32 %v813_v56, 0.0 }
 0x1f5   : > { %v876_v63 = vmax.f32 %v805_v58, 0.0 }
 0x1f6   : > { %v897_v0 = vpack.c.bf16 %v878_v60, %v877_v59 }
 0x1f7   : > { %v896_v2 = vpack.c.bf16 %v876_v63, %v875_v61  ;;  %v1663_v3 = vpop.f32.mrb[28].mxu1 }
 0x1f8   : > { %v826_v4 = vadd.f32 %v1663_v3, %v1972_v36  ;;  %v817_v5 = vpop.f32.mrb[29].mxu1 }
 0x1f9   : > { %v818_v6 = vadd.f32 %v1972_v36, %v817_v5  ;;  %v1664_v7 = vpop.f32.mrb[30].mxu1  ;;  %1701 = vmatprep.mubr.bf16.mxu0 %v896_v2 }
 0x1fa   : > { %v829_v8 = vadd.f32 %v1664_v7, %v1972_v36  ;;  %v820_v1 = vpop.f32.mrb[31].mxu1  ;;  %1702 = vmatmul.mubr.bf16.gmra.mrb[28].mxu0 %v897_v0  ;;  %v881_v9 = vmax.f32 %v826_v4, 0.0 }
 0x1fb   : > { %v821_v62 = vadd.f32 %v1972_v36, %v820_v1  ;;  %v879_v11 = vmax.f32 %v818_v6, 0.0 }
 0x1fc   : > { %v882_v10 = vmax.f32 %v829_v8, 0.0 }
 0x1fd   : > { %v880_v12 = vmax.f32 %v821_v62, 0.0 }
 0x1fe   : > { %v899_v13 = vpack.c.bf16 %v882_v10, %v881_v9 }
 0x1ff   : > { %v898_v14 = vpack.c.bf16 %v880_v12, %v879_v11  ;;  %v1667_v15 = vpop.f32.mrb[32].mxu1 }
 0x200   : > { %v842_v16 = vadd.f32 %v1667_v15, %v1972_v36  ;;  %v833_v17 = vpop.f32.mrb[33].mxu1 }
 0x201   : > { %v834_v18 = vadd.f32 %v1972_v36, %v833_v17  ;;  %v1668_v19 = vpop.f32.mrb[34].mxu1  ;;  %1705 = vmatprep.mubr.bf16.mxu0 %v898_v14 }
 0x202   : > { %v845_v20 = vadd.f32 %v1668_v19, %v1972_v36  ;;  %v836_v21 = vpop.f32.mrb[35].mxu1  ;;  %1706 = vmatmul.mubr.bf16.gmra.mrb[32].mxu0 %v899_v13  ;;  %v885_v23 = vmax.f32 %v842_v16, 0.0 }
 0x203   : > { %v837_v22 = vadd.f32 %v1972_v36, %v836_v21  ;;  %v883_v25 = vmax.f32 %v834_v18, 0.0 }
 0x204   : > { %v886_v24 = vmax.f32 %v845_v20, 0.0 }
 0x205   : > { %v884_v26 = vmax.f32 %v837_v22, 0.0 }
 0x206   : > { %v901_v27 = vpack.c.bf16 %v886_v24, %v885_v23 }
 0x207   : > { %v900_v28 = vpack.c.bf16 %v884_v26, %v883_v25  ;;  %v1671_v29 = vpop.f32.mrb[36].mxu1 }
 0x208   : > { %v858_v30 = vadd.f32 %v1671_v29, %v1972_v36  ;;  %v849_v31 = vpop.f32.mrb[37].mxu1 }
 0x209   : > { %v850_v32 = vadd.f32 %v1972_v36, %v849_v31  ;;  %v1672_v33 = vpop.f32.mrb[38].mxu1  ;;  %1709 = vmatprep.mubr.bf16.mxu0 %v900_v28 }
 0x20a   : > { %v852_v34 = vpop.f32.mrb[39].mxu1  ;;  %1710 = vmatmul.mubr.bf16.gmra.mrb[36].mxu0 %v901_v27  ;;  %v889_v37 = vmax.f32 %v858_v30, 0.0 }
 0x20b   : > { %v853_v35 = vadd.f32 %v1972_v36, %v852_v34  ;;  %v887_v38 = vmax.f32 %v850_v32, 0.0 }
 0x20c   : > { %v903_v41 = vpack.c.bf16 %v889_v37, %v889_v37 }
 0x20d   : > { %v888_v39 = vmax.f32 %v853_v35, 0.0 }
 0x20f   : > { %v902_v40 = vpack.c.bf16 %v888_v39, %v887_v38 }
 0x211   : > { %1713 = vmatprep.mubr.bf16.mxu0 %v902_v40 }
 0x212   : > { %1714 = vmatmul.mubr.bf16.gmra.mrb[40].mxu0 %v903_v41 }
 0x2b5   : > { %v1691_v43 = vpop.f32.mrb[16].mxu0 }
 0x2b6   : > { %v1018_v44 = vadd.f32 %v1691_v43, %v2004_v42  ;;  %v1009_v45 = vpop.f32.mrb[17].mxu0 }
 0x2b7   : > { %v1010_v46 = vadd.f32 %v2004_v42, %v1009_v45  ;;  %v1692_v36 = vpop.f32.mrb[18].mxu0 }
 0x2b8   : > { %v1021_v47 = vadd.f32 %v1692_v36, %v2004_v42  ;;  %v1012_v48 = vpop.f32.mrb[19].mxu0  ;;  %v1121_v50 = vmax.f32 %v1018_v44, 0.0 }
 0x2b9   : > { %v1013_v49 = vadd.f32 %v2004_v42, %v1012_v48  ;;  %v1119_v52 = vmax.f32 %v1010_v46, 0.0 }
 0x2ba   : > { %v1122_v51 = vmax.f32 %v1021_v47, 0.0 }
 0x2bb   : > { %v1120_v53 = vmax.f32 %v1013_v49, 0.0 }
 0x2bc   : > { %v1450_v54 = vpack.c.bf16 %v1122_v51, %v1121_v50 }
 0x2bd   : > { %v1445_v55 = vpack.c.bf16 %v1120_v53, %v1119_v52  ;;  %v1695_v56 = vpop.f32.mrb[20].mxu0 }
 0x2be   : > { %1507 = vst [vmem:[%s2015_s25 + $0x8] sm:$0xff] %v1450_v54   ;;  %v1034_v57 = vadd.f32 %v1695_v56, %v2004_v42  ;;  %v1025_v58 = vpop.f32.mrb[21].mxu0 }
 0x2bf   : > { %1446 = vst [vmem:[%s2015_s25] sm:$0xff] %v1445_v55   ;;  %v1026_v59 = vadd.f32 %v2004_v42, %v1025_v58  ;;  %v1696_v60 = vpop.f32.mrb[22].mxu0 }
 0x2c0   : > { %v1037_v61 = vadd.f32 %v1696_v60, %v2004_v42  ;;  %v1028_v63 = vpop.f32.mrb[23].mxu0  ;;  %v1125_v2 = vmax.f32 %v1034_v57, 0.0 }
 0x2c1   : > { %v1029_v0 = vadd.f32 %v2004_v42, %v1028_v63  ;;  %v1123_v4 = vmax.f32 %v1026_v59, 0.0 }
 0x2c2   : > { %v1126_v3 = vmax.f32 %v1037_v61, 0.0 }
 0x2c3   : > { %v1124_v5 = vmax.f32 %v1029_v0, 0.0 }
 0x2c4   : > { %v1460_v6 = vpack.c.bf16 %v1126_v3, %v1125_v2 }
 0x2c5   : > { %v1455_v7 = vpack.c.bf16 %v1124_v5, %v1123_v4  ;;  %v1699_v8 = vpop.f32.mrb[24].mxu0 }
 0x2c6   : > { %1509 = vst [vmem:[%s2015_s25 + $0x18] sm:$0xff] %v1460_v6   ;;  %v1050_v1 = vadd.f32 %v1699_v8, %v2004_v42  ;;  %v1041_v62 = vpop.f32.mrb[25].mxu0 }
 0x2c7   : > { %1508 = vst [vmem:[%s2015_s25 + $0x10] sm:$0xff] %v1455_v7   ;;  %v1042_v9 = vadd.f32 %v2004_v42, %v1041_v62  ;;  %v1700_v10 = vpop.f32.mrb[26].mxu0 }
 0x2c8   : > { %v1053_v11 = vadd.f32 %v1700_v10, %v2004_v42  ;;  %v1044_v12 = vpop.f32.mrb[27].mxu0  ;;  %v1129_v14 = vmax.f32 %v1050_v1, 0.0 }
 0x2c9   : > { %v1045_v13 = vadd.f32 %v2004_v42, %v1044_v12  ;;  %v1127_v16 = vmax.f32 %v1042_v9, 0.0 }
 0x2ca   : > { %v1130_v15 = vmax.f32 %v1053_v11, 0.0 }
 0x2cb   : > { %v1128_v17 = vmax.f32 %v1045_v13, 0.0 }
 0x2cc   : > { %v1470_v18 = vpack.c.bf16 %v1130_v15, %v1129_v14 }
 0x2cd   : > { %v1465_v19 = vpack.c.bf16 %v1128_v17, %v1127_v16  ;;  %v1703_v20 = vpop.f32.mrb[28].mxu0 }
 0x2ce   : > { %1511 = vst [vmem:[%s2015_s25 + $0x28] sm:$0xff] %v1470_v18   ;;  %v1066_v21 = vadd.f32 %v1703_v20, %v2004_v42  ;;  %v1057_v22 = vpop.f32.mrb[29].mxu0 }
 0x2cf   : > { %1510 = vst [vmem:[%s2015_s25 + $0x20] sm:$0xff] %v1465_v19   ;;  %v1058_v23 = vadd.f32 %v2004_v42, %v1057_v22  ;;  %v1704_v24 = vpop.f32.mrb[30].mxu0 }
 0x2d0   : > { %v1069_v25 = vadd.f32 %v1704_v24, %v2004_v42  ;;  %v1060_v26 = vpop.f32.mrb[31].mxu0  ;;  %v1133_v28 = vmax.f32 %v1066_v21, 0.0 }
 0x2d1   : > { %v1061_v27 = vadd.f32 %v2004_v42, %v1060_v26  ;;  %v1131_v30 = vmax.f32 %v1058_v23, 0.0 }
 0x2d2   : > { %v1134_v29 = vmax.f32 %v1069_v25, 0.0 }
 0x2d3   : > { %v1132_v31 = vmax.f32 %v1061_v27, 0.0 }
 0x2d4   : > { %v1480_v32 = vpack.c.bf16 %v1134_v29, %v1133_v28 }
 0x2d5   : > { %v1475_v33 = vpack.c.bf16 %v1132_v31, %v1131_v30  ;;  %v1707_v34 = vpop.f32.mrb[32].mxu0 }
 0x2d6   : > { %1513 = vst [vmem:[%s2015_s25 + $0x38] sm:$0xff] %v1480_v32   ;;  %v1082_v35 = vadd.f32 %v1707_v34, %v2004_v42  ;;  %v1073_v37 = vpop.f32.mrb[33].mxu0 }
 0x2d7   : > { %1512 = vst [vmem:[%s2015_s25 + $0x30] sm:$0xff] %v1475_v33   ;;  %v1074_v38 = vadd.f32 %v2004_v42, %v1073_v37  ;;  %v1708_v39 = vpop.f32.mrb[34].mxu0 }
 0x2d8   : > { %v1085_v40 = vadd.f32 %v1708_v39, %v2004_v42  ;;  %v1076_v41 = vpop.f32.mrb[35].mxu0  ;;  %v1137_v44 = vmax.f32 %v1082_v35, 0.0 }
 0x2d9   : > { %v1077_v43 = vadd.f32 %v2004_v42, %v1076_v41  ;;  %v1135_v46 = vmax.f32 %v1074_v38, 0.0 }
 0x2da   : > { %v1138_v45 = vmax.f32 %v1085_v40, 0.0 }
 0x2db   : > { %v1136_v36 = vmax.f32 %v1077_v43, 0.0 }
 0x2dc   : > { %v1490_v47 = vpack.c.bf16 %v1138_v45, %v1137_v44 }
 0x2dd   : > { %v1485_v48 = vpack.c.bf16 %v1136_v36, %v1135_v46  ;;  %v1711_v49 = vpop.f32.mrb[36].mxu0 }
 0x2de   : > { %1515 = vst [vmem:[%s2015_s25 + $0x48] sm:$0xff] %v1490_v47   ;;  %v1098_v50 = vadd.f32 %v1711_v49, %v2004_v42  ;;  %v1089_v51 = vpop.f32.mrb[37].mxu0 }
 0x2df   : > { %1514 = vst [vmem:[%s2015_s25 + $0x40] sm:$0xff] %v1485_v48   ;;  %v1090_v52 = vadd.f32 %v2004_v42, %v1089_v51  ;;  %v1712_v53 = vpop.f32.mrb[38].mxu0 }
 0x2e0   : > { %v1101_v54 = vadd.f32 %v1712_v53, %v2004_v42  ;;  %v1092_v55 = vpop.f32.mrb[39].mxu0  ;;  %v1141_v57 = vmax.f32 %v1098_v50, 0.0 }
 0x2e1   : > { %v1093_v56 = vadd.f32 %v2004_v42, %v1092_v55  ;;  %v1139_v59 = vmax.f32 %v1090_v52, 0.0 }
 0x2e2   : > { %v1142_v58 = vmax.f32 %v1101_v54, 0.0 }
 0x2e3   : > { %v1140_v60 = vmax.f32 %v1093_v56, 0.0 }
 0x2e4   : > { %v1500_v61 = vpack.c.bf16 %v1142_v58, %v1141_v57 }
 0x2e5   : > { %v1495_v63 = vpack.c.bf16 %v1140_v60, %v1139_v59  ;;  %v1715_v0 = vpop.f32.mrb[40].mxu0 }
 0x2e6   : > { %1517 = vst [vmem:[%s2015_s25 + $0x58] sm:$0xff] %v1500_v61   ;;  %v1114_v2 = vadd.f32 %v1715_v0, %v2004_v42  ;;  %v1105_v3 = vpop.f32.mrb[41].mxu0 }
 0x2e7   : > { %1516 = vst [vmem:[%s2015_s25 + $0x50] sm:$0xff] %v1495_v63   ;;  %v1106_v4 = vadd.f32 %v2004_v42, %v1105_v3  ;;  %v1716_v5 = vpop.f32.mrb[42].mxu0 }
 0x2e8   : > { %v1145_v6 = vmax.f32 %v1114_v2, 0.0  ;;  %v1108_v7 = vpop.f32.mrb[43].mxu0 }
 0x2e9   : > { %v1109_v8 = vadd.f32 %v2004_v42, %v1108_v7  ;;  %v1143_v62 = vmax.f32 %v1106_v4, 0.0 }
 0x2ea   : > { %v1441_v1 = vpack.c.bf16 %v1145_v6, %v1145_v6 }
 0x2eb   : > { %v1144_v9 = vmax.f32 %v1109_v8, 0.0 }
 0x2ec   : > { %1281 = vst [vmem:[%s2015_s25 + $0x68] sm:$0xf] %v1441_v1 }
 0x2ed   : > { %v1505_v10 = vpack.c.bf16 %v1144_v9, %v1143_v62 }
 0x2ef   : > { %1518 = vst [vmem:[%s2015_s25 + $0x60] sm:$0xff] %v1505_v10  }
 0x2f0 PF: > { %s17_s24 = sadd.s32 1, %s1785_s24  }
 0x2f1   : > { %p14_p4 = scmp.ge.s32.totalorder %s17_s24, 5  }
 0x2f3   :  { %16 = sbr.rel (!%p14_p4) target bundleno = 1 (0x1), region = 78 }

// kernel: _lambda_.5
= control target key start
LH: loop header
LB: loop body
LE: loop exit
PB: predicated region body
PF: predicated region fallthrough
CT: control target
= control target key end

     0   :  { %s6693_s24 = smov 0   ;;  %s8283_s0 = inlined_call_operand.vmem [shape: bf16[128,3200], index: 0, kind: input, shape index: {}]   ;;  %s8284_s1 = inlined_call_operand.vmem [shape: bf16[3200,256], index: 1, kind: input, shape index: {}]   ;;  %s8285_s2 = inlined_call_operand.vmem [shape: f32[1,256], index: 2, kind: input, shape index: {}]   ;;  %s8286_s3 = inlined_call_operand.vmem [shape: bf16[256,256], index: 3, kind: input, shape index: {}]   ;;  %s8287_s4 = inlined_call_operand.vmem [shape: f32[1,256], index: 4, kind: input, shape index: {}]   ;;  %s8288_s5 = inlined_call_operand.vmem [shape: bf16[256,256], index: 5, kind: input, shape index: {}]   ;;  %s8289_s6 = inlined_call_operand.vmem [shape: f32[1,256], index: 6, kind: input, shape index: {}]   ;;  %s8290_s7 = inlined_call_operand.vmem [shape: bf16[128,256], index: 7, kind: output, shape index: {}]  }
   0x1 LB: > { %s4989_s25 = sadd.s32 4294967295, %s6650_s24   ;;  %p4993_p0 = scmp.ge.s32.totalorder %s6650_s24, 1  ;;  %s6650_s24 = sphi %s6693_s24, %s17_s24  }
   0x2   : > { %p239_p1 = scmp.lt.s32.totalorder %s6650_s24, 3 }
   0x4   : > { %p240_p2 = pnand %p4993_p0, %p239_p1 }
   0x5   : > { %v5800_v0 = vld [vmem:[%s8284_s1 + $0x4] ss:$8 sps:$4 sm:$0xff] (!%p240_p2)   ;;  %v5804_v2 = vld [vmem:[%s8284_s1] ss:$8 sps:$4 sm:$0xff] (!%p240_p2)   ;;  %v5806_v4 = vld [vmem:[%s8284_s1 + $0x14] ss:$8 sps:$4 sm:$0xff] (!%p240_p2)  }
   0x6   : > { %243 = sbr.rel (%p240_p2) target bundleno = 1177 (0x499), region = 48  ;;  %v5802_v1 = vld [vmem:[%s8284_s1 + $0x504] ss:$8 sps:$4 sm:$0xff] (!%p240_p2)   ;;  %3308 = vmatprep.subr.bf16.mxu1 (!%p240_p2), %v5800_v0  ;;  %v5805_v3 = vld [vmem:[%s8284_s1 + $0x500] ss:$8 sps:$4 sm:$0xff] (!%p240_p2)   ;;  %s4994_s21 = sshll.u32 (!%p240_p2), %s4989_s25, 3 }
   0x7   : > { %3673 = vmatprep.subr.bf16.mxu0 (!%p240_p2), %v5802_v1  ;;  %3309 = vmatpush1.bf16.msra.mxu1 (!%p240_p2), %v5804_v2  ;;  %v5808_v5 = vld [vmem:[%s8284_s1 + $0x514] ss:$8 sps:$4 sm:$0xff] (!%p240_p2)   ;;  %v5810_v6 = vld [vmem:[%s8284_s1 + $0x10] ss:$8 sps:$4 sm:$0xff] (!%p240_p2)   ;;  %v5812_v8 = vld [vmem:[%s8284_s1 + $0x24] ss:$8 sps:$4 sm:$0xff] (!%p240_p2)  }
   0x8   : > { %3674 = vmatpush1.bf16.msra.mxu0 (!%p240_p2), %v5805_v3  ;;  %3310 = vmatprep.subr.bf16.mxu1 (!%p240_p2), %v5806_v4  ;;  %v5811_v7 = vld [vmem:[%s8284_s1 + $0x510] ss:$8 sps:$4 sm:$0xff] (!%p240_p2)   ;;  %v5814_v9 = vld [vmem:[%s8284_s1 + $0x524] ss:$8 sps:$4 sm:$0xff] (!%p240_p2)   ;;  %v5816_v10 = vld [vmem:[%s8284_s1 + $0x20] ss:$8 sps:$4 sm:$0xff] (!%p240_p2)  }
   0x9   : > { %3675 = vmatprep.subr.bf16.mxu0 (!%p240_p2), %v5808_v5  ;;  %v5817_v11 = vld [vmem:[%s8284_s1 + $0x520] ss:$8 sps:$4 sm:$0xff] (!%p240_p2)   ;;  %v5818_v12 = vld [vmem:[%s8284_s1 + $0x34] ss:$8 sps:$4 sm:$0xff] (!%p240_p2)   ;;  %v5822_v14 = vld [vmem:[%s8284_s1 + $0x30] ss:$8 sps:$4 sm:$0xff] (!%p240_p2)  }
   0xa   : > { %v5820_v13 = vld [vmem:[%s8284_s1 + $0x534] ss:$8 sps:$4 sm:$0xff] (!%p240_p2)   ;;  %v5823_v15 = vld [vmem:[%s8284_s1 + $0x530] ss:$8 sps:$4 sm:$0xff] (!%p240_p2)   ;;  %v5824_v16 = vld [vmem:[%s8284_s1 + $0x44] ss:$8 sps:$4 sm:$0xff] (!%p240_p2)  }
   0xb   : > { %3311 = vmatpush1.bf16.msra.mxu1 (!%p240_p2), %v5810_v6  ;;  %v5826_v17 = vld [vmem:[%s8284_s1 + $0x544] ss:$8 sps:$4 sm:$0xff] (!%p240_p2)   ;;  %v5828_v18 = vld [vmem:[%s8284_s1 + $0x40] ss:$8 sps:$4 sm:$0xff] (!%p240_p2)   ;;  %v5830_v20 = vld [vmem:[%s8284_s1 + $0x54] ss:$8 sps:$4 sm:$0xff] (!%p240_p2)  }
   0xc   : > { %3676 = vmatpush1.bf16.msra.mxu0 (!%p240_p2), %v5811_v7  ;;  %3312 = vmatprep.subr.bf16.mxu1 (!%p240_p2), %v5812_v8  ;;  %v5829_v19 = vld [vmem:[%s8284_s1 + $0x540] ss:$8 sps:$4 sm:$0xff] (!%p240_p2)   ;;  %v5832_v21 = vld [vmem:[%s8284_s1 + $0x554] ss:$8 sps:$4 sm:$0xff] (!%p240_p2)   ;;  %v5834_v22 = vld [vmem:[%s8284_s1 + $0x50] ss:$8 sps:$4 sm:$0xff] (!%p240_p2)  }
   0xd   : > { %3677 = vmatprep.subr.bf16.mxu0 %v5814_v9  ;;  %v5835_v23 = vld [vmem:[%s8284_s1 + $0x550] ss:$8 sps:$4 sm:$0xff]   ;;  %v5836_v24 = vld [vmem:[%s8284_s1 + $0x64] ss:$8 sps:$4 sm:$0xff]   ;;  %v5840_v26 = vld [vmem:[%s8284_s1 + $0x60] ss:$8 sps:$4 sm:$0xff]  }
   0xe   : > { %v5838_v25 = vld [vmem:[%s8284_s1 + $0x564] ss:$8 sps:$4 sm:$0xff]   ;;  %v5841_v27 = vld [vmem:[%s8284_s1 + $0x560] ss:$8 sps:$4 sm:$0xff]   ;;  %v5842_v28 = vld [vmem:[%s8284_s1 + $0x74] ss:$8 sps:$4 sm:$0xff]  }
   0xf   : > { %3313 = vmatpush1.bf16.msra.mxu1 %v5816_v10  ;;  %v5844_v29 = vld [vmem:[%s8284_s1 + $0x574] ss:$8 sps:$4 sm:$0xff]   ;;  %v5846_v30 = vld [vmem:[%s8284_s1 + $0x70] ss:$8 sps:$4 sm:$0xff]   ;;  %v5848_v32 = vld [vmem:[%s8284_s1 + $0x84] ss:$8 sps:$4 sm:$0xff]  }
  0x10   : > { %3678 = vmatpush1.bf16.msra.mxu0 %v5817_v11  ;;  %3314 = vmatprep.subr.bf16.mxu1 %v5818_v12  ;;  %v5847_v31 = vld [vmem:[%s8284_s1 + $0x570] ss:$8 sps:$4 sm:$0xff]   ;;  %p274_p3 = scmp.lt.s32.totalorder %s4994_s21, 15  ;;  %v5850_v33 = vld [vmem:[%s8284_s1 + $0x584] ss:$8 sps:$4 sm:$0xff]  }
  0x11   : > { %3679 = vmatprep.subr.bf16.mxu0 %v5820_v13  ;;  %v5852_v34 = vld [vmem:[%s8284_s1 + $0x80] ss:$8 sps:$4 sm:$0xff]   ;;  %v5854_v36 = vld [vmem:[%s8284_s1 + $0x94] ss:$8 sps:$4 sm:$0xff]   ;;  %v5858_v38 = vld [vmem:[%s8284_s1 + $0x90] ss:$8 sps:$4 sm:$0xff]  }
  0x12   : > { %v5853_v35 = vld [vmem:[%s8284_s1 + $0x580] ss:$8 sps:$4 sm:$0xff]   ;;  %s8292_s21 = smov (!%p274_p3, %s4994_s21), 15  ;;  %v5856_v37 = vld [vmem:[%s8284_s1 + $0x594] ss:$8 sps:$4 sm:$0xff]  }
  0x13   : > { %3315 = vmatpush1.bf16.msra.mxu1 %v5822_v14  ;;  %v5859_v39 = vld [vmem:[%s8284_s1 + $0x590] ss:$8 sps:$4 sm:$0xff]   ;;  %v5860_v40 = vld [vmem:[%s8284_s1 + $0xa4] ss:$8 sps:$4 sm:$0xff]   ;;  %s5790_s23 = smul.u32 100, %s8292_s21  ;;  %s5573_s13 = sshll.u32 %s8292_s21, 3 }
  0x14   : > { %3680 = vmatpush1.bf16.msra.mxu0 %v5823_v15  ;;  %3316 = vmatprep.subr.bf16.mxu1 %v5824_v16  ;;  %v5862_v41 = vld [vmem:[%s8284_s1 + $0x5a4] ss:$8 sps:$4 sm:$0xff]   ;;  %v5864_v42 = vld [vmem:[%s8284_s1 + $0xa0] ss:$8 sps:$4 sm:$0xff]   ;;  %v5866_v44 = vld [vmem:[%s8284_s1 + $0xb4] ss:$8 sps:$4 sm:$0xff]   ;;  %s8270_s16 = scalar_lea.vmem %s8290_s7, %s5573_s13 }
  0x15   : > { %3681 = vmatprep.subr.bf16.mxu0 %v5826_v17  ;;  %v5865_v43 = vld [vmem:[%s8284_s1 + $0x5a0] ss:$8 sps:$4 sm:$0xff]   ;;  %s6844_s12 = scalar_lea.vmem %s8283_s0, %s5790_s23  ;;  %v5868_v45 = vld [vmem:[%s8284_s1 + $0x5b4] ss:$8 sps:$4 sm:$0xff]   ;;  %v5870_v46 = vld [vmem:[%s8284_s1 + $0xb0] ss:$8 sps:$4 sm:$0xff]  }
  0x16   : > { %v5871_v47 = vld [vmem:[%s8284_s1 + $0x5b0] ss:$8 sps:$4 sm:$0xff]   ;;  %v5898_v48 = vld [vmem:[%s6844_s12 + $0x4] ss:$100 sps:$4 sm:$0xff]   ;;  %v5878_v54 = vld [vmem:[%s8284_s1 + $0xd4] ss:$8 sps:$4 sm:$0xff]  }
  0x17   : > { %3317 = vmatpush1.bf16.msra.mxu1 %v5828_v18  ;;  %v5872_v49 = vld [vmem:[%s8284_s1 + $0xc4] ss:$8 sps:$4 sm:$0xff]   ;;  %3340 = vmatprep.mubr.bf16.mxu1 %v5898_v48  ;;  %v5876_v52 = vld [vmem:[%s8284_s1 + $0xc0] ss:$8 sps:$4 sm:$0xff]   ;;  %v5880_v55 = vld [vmem:[%s8284_s1 + $0x5d4] ss:$8 sps:$4 sm:$0xff]  }
  0x18   : > { %3682 = vmatpush1.bf16.msra.mxu0 %v5829_v19  ;;  %3318 = vmatprep.subr.bf16.mxu1 %v5830_v20  ;;  %v5874_v50 = vld [vmem:[%s8284_s1 + $0x5c4] ss:$8 sps:$4 sm:$0xff]   ;;  %v5877_v53 = vld [vmem:[%s8284_s1 + $0x5c0] ss:$8 sps:$4 sm:$0xff]   ;;  %v5882_v56 = vld [vmem:[%s8284_s1 + $0xd0] ss:$8 sps:$4 sm:$0xff]  }
  0x19   : > { %3683 = vmatprep.subr.bf16.mxu0 %v5832_v21  ;;  %v5904_v51 = vld [vmem:[%s6844_s12 + $0x2c] ss:$100 sps:$4 sm:$0xff]   ;;  %v5888_v60 = vld [vmem:[%s8284_s1 + $0xe0] ss:$8 sps:$4 sm:$0xff]   ;;  %v5890_v62 = vld [vmem:[%s8284_s1 + $0xf4] ss:$8 sps:$4 sm:$0xff]  }
  0x1a   : > { %3705 = vmatprep.mubr.bf16.mxu0 %v5904_v51  ;;  %v5883_v57 = vld [vmem:[%s8284_s1 + $0x5d0] ss:$8 sps:$4 sm:$0xff]   ;;  %v5884_v58 = vld [vmem:[%s8284_s1 + $0xe4] ss:$8 sps:$4 sm:$0xff]   ;;  %v5889_v61 = vld [vmem:[%s8284_s1 + $0x5e0] ss:$8 sps:$4 sm:$0xff]  }
  0x1b   : > { %3319 = vmatpush1.bf16.msra.mxu1 %v5834_v22  ;;  %v5886_v59 = vld [vmem:[%s8284_s1 + $0x5e4] ss:$8 sps:$4 sm:$0xff]   ;;  %v5892_v63 = vld [vmem:[%s8284_s1 + $0x5f4] ss:$8 sps:$4 sm:$0xff]   ;;  %v5894_v0 = vld [vmem:[%s8284_s1 + $0xf0] ss:$8 sps:$4 sm:$0xff]  }
  0x1c   : > { %3684 = vmatpush1.bf16.msra.mxu0 %v5835_v23  ;;  %3320 = vmatprep.subr.bf16.mxu1 %v5836_v24  ;;  %v5895_v1 = vld [vmem:[%s8284_s1 + $0x5f0] ss:$8 sps:$4 sm:$0xff]   ;;  %v5901_v2 = vld [vmem:[%s8284_s1 + $0x104] ss:$8 sps:$4 sm:$0xff]   ;;  %v5899_v5 = vld [vmem:[%s8284_s1 + $0x100] ss:$8 sps:$4 sm:$0xff]  }
  0x1d   : > { %3685 = vmatprep.subr.bf16.mxu0 %v5838_v25  ;;  %v5907_v3 = vld [vmem:[%s8284_s1 + $0x604] ss:$8 sps:$4 sm:$0xff]   ;;  %v5905_v7 = vld [vmem:[%s8284_s1 + $0x600] ss:$8 sps:$4 sm:$0xff]   ;;  %v5910_v8 = vld [vmem:[%s8284_s1 + $0x114] ss:$8 sps:$4 sm:$0xff]  }
  0x1e   : > { %v5896_v4 = vld [vmem:[%s6844_s12] ss:$100 sps:$4 sm:$0xff]   ;;  %v5902_v6 = vld [vmem:[%s6844_s12 + $0x28] ss:$100 sps:$4 sm:$0xff]   ;;  %v5913_v9 = vld [vmem:[%s8284_s1 + $0x614] ss:$8 sps:$4 sm:$0xff]  }
  0x1f   : > { %3321 = vmatpush1.bf16.msra.mxu1 %v5840_v26  ;;  %v5908_v10 = vld [vmem:[%s8284_s1 + $0x110] ss:$8 sps:$4 sm:$0xff]   ;;  %v5916_v12 = vld [vmem:[%s8284_s1 + $0x124] ss:$8 sps:$4 sm:$0xff]   ;;  %v5914_v14 = vld [vmem:[%s8284_s1 + $0x120] ss:$8 sps:$4 sm:$0xff]  }
  0x20   : > { %3686 = vmatpush1.bf16.msra.mxu0 %v5841_v27  ;;  %3322 = vmatprep.subr.bf16.mxu1 %v5842_v28  ;;  %v5911_v11 = vld [vmem:[%s8284_s1 + $0x610] ss:$8 sps:$4 sm:$0xff]   ;;  %v5919_v13 = vld [vmem:[%s8284_s1 + $0x624] ss:$8 sps:$4 sm:$0xff]   ;;  %v5917_v15 = vld [vmem:[%s8284_s1 + $0x620] ss:$8 sps:$4 sm:$0xff]  }
  0x21   : > { %3687 = vmatprep.subr.bf16.mxu0 %v5844_v29  ;;  %v5922_v16 = vld [vmem:[%s8284_s1 + $0x134] ss:$8 sps:$4 sm:$0xff]   ;;  %v5962_v17 = vld [vmem:[%s6844_s12 + $0xcc] ss:$100 sps:$4 sm:$0xff]   ;;  %v5926_v26 = vld [vmem:[%s8284_s1 + $0x140] ss:$8 sps:$4 sm:$0xff]  }
  0x22   : > { %v5925_v18 = vld [vmem:[%s8284_s1 + $0x634] ss:$8 sps:$4 sm:$0xff]   ;;  %v5920_v19 = vld [vmem:[%s8284_s1 + $0x130] ss:$8 sps:$4 sm:$0xff]   ;;  %v5928_v22 = vld [vmem:[%s8284_s1 + $0x144] ss:$8 sps:$4 sm:$0xff]  }
  0x23   : > { %3323 = vmatpush1.bf16.msra.mxu1 %v5846_v30  ;;  %v5923_v20 = vld [vmem:[%s8284_s1 + $0x630] ss:$8 sps:$4 sm:$0xff]   ;;  %v5931_v23 = vld [vmem:[%s8284_s1 + $0x644] ss:$8 sps:$4 sm:$0xff]   ;;  %v5929_v27 = vld [vmem:[%s8284_s1 + $0x640] ss:$8 sps:$4 sm:$0xff]  }
  0x24   : > { %3688 = vmatpush1.bf16.msra.mxu0 %v5847_v31  ;;  %3324 = vmatprep.subr.bf16.mxu1 %v5848_v32  ;;  %v5967_v21 = vld [vmem:[%s6844_s12 + $0xf4] ss:$100 sps:$4 sm:$0xff]   ;;  %v5972_v24 = vld [vmem:[%s6844_s12 + $0xc8] ss:$100 sps:$4 sm:$0xff]  }
  0x25   : > { %3689 = vmatprep.subr.bf16.mxu0 %v5850_v33  ;;  %v5973_v25 = vld [vmem:[%s6844_s12 + $0xf0] ss:$100 sps:$4 sm:$0xff]   ;;  %v5985_v33 = vld [vmem:[%s6844_s12 + $0x1bc] ss:$100 sps:$4 sm:$0xff]  }
  0x26   : > { %v5934_v28 = vld [vmem:[%s8284_s1 + $0x154] ss:$8 sps:$4 sm:$0xff]   ;;  %v5932_v31 = vld [vmem:[%s8284_s1 + $0x150] ss:$8 sps:$4 sm:$0xff]   ;;  %v5953_v51 = vld [vmem:[%s8284_s1 + $0x680] ss:$8 sps:$4 sm:$0xff]  }
  0x27   : > { %3325 = vmatpush1.bf16.msra.mxu1 %v5852_v34  ;;  %v5980_v29 = vld [vmem:[%s6844_s12 + $0x194] ss:$100 sps:$4 sm:$0xff]   ;;  %v5940_v34 = vld [vmem:[%s8284_s1 + $0x164] ss:$8 sps:$4 sm:$0xff]  }
  0x28   : > { %3690 = vmatpush1.bf16.msra.mxu0 %v5853_v35  ;;  %3326 = vmatprep.subr.bf16.mxu1 %v5854_v36  ;;  %v5937_v30 = vld [vmem:[%s8284_s1 + $0x654] ss:$8 sps:$4 sm:$0xff]   ;;  %v5935_v32 = vld [vmem:[%s8284_s1 + $0x650] ss:$8 sps:$4 sm:$0xff]   ;;  %v5943_v35 = vld [vmem:[%s8284_s1 + $0x664] ss:$8 sps:$4 sm:$0xff]  }
  0x29   : > { %3691 = vmatprep.subr.bf16.mxu0 %v5856_v37  ;;  %v5990_v36 = vld [vmem:[%s6844_s12 + $0x190] ss:$100 sps:$4 sm:$0xff]   ;;  %v5991_v37 = vld [vmem:[%s6844_s12 + $0x1b8] ss:$100 sps:$4 sm:$0xff]  }
  0x2a   : > { %v6008_v48 = vld [vmem:[%s6844_s12 + $0x258] ss:$100 sps:$4 sm:$0xff]  }
  0x2b   : > { %3327 = vmatpush1.bf16.msra.mxu1 %v5858_v38  ;;  %v5938_v38 = vld [vmem:[%s8284_s1 + $0x160] ss:$8 sps:$4 sm:$0xff]  }
  0x2c   : > { %3692 = vmatpush1.bf16.msra.mxu0 %v5859_v39  ;;  %3328 = vmatprep.subr.bf16.mxu1 %v5860_v40  ;;  %v5941_v39 = vld [vmem:[%s8284_s1 + $0x660] ss:$8 sps:$4 sm:$0xff]   ;;  %v5946_v40 = vld [vmem:[%s8284_s1 + $0x174] ss:$8 sps:$4 sm:$0xff]  }
  0x2d   : > { %3693 = vmatprep.subr.bf16.mxu0 %v5862_v41  ;;  %v5998_v41 = vld [vmem:[%s6844_s12 + $0x25c] ss:$100 sps:$4 sm:$0xff]  }
  0x2f   : > { %3329 = vmatpush1.bf16.msra.mxu1 %v5864_v42  ;;  %v5949_v42 = vld [vmem:[%s8284_s1 + $0x674] ss:$8 sps:$4 sm:$0xff]  }
  0x30   : > { %3694 = vmatpush1.bf16.msra.mxu0 %v5865_v43  ;;  %3330 = vmatprep.subr.bf16.mxu1 %v5866_v44  ;;  %v5944_v43 = vld [vmem:[%s8284_s1 + $0x170] ss:$8 sps:$4 sm:$0xff]  }
  0x31   : > { %3695 = vmatprep.subr.bf16.mxu0 %v5868_v45  ;;  %v5947_v44 = vld [vmem:[%s8284_s1 + $0x670] ss:$8 sps:$4 sm:$0xff]   ;;  %v6003_v45 = vld [vmem:[%s6844_s12 + $0x284] ss:$100 sps:$4 sm:$0xff]  }
  0x33   : > { %3331 = vmatpush1.bf16.msra.mxu1 %v5870_v46  ;;  %v5952_v46 = vld [vmem:[%s8284_s1 + $0x184] ss:$8 sps:$4 sm:$0xff]  }
  0x34   : > { %3696 = vmatpush1.bf16.msra.mxu0 %v5871_v47  ;;  %3332 = vmatprep.subr.bf16.mxu1 %v5872_v49  ;;  %v5955_v47 = vld [vmem:[%s8284_s1 + $0x684] ss:$8 sps:$4 sm:$0xff]  }
  0x35   : > { %3697 = vmatprep.subr.bf16.mxu0 %v5874_v50  ;;  %v6009_v49 = vld [vmem:[%s6844_s12 + $0x280] ss:$100 sps:$4 sm:$0xff]  }
  0x36   : > { %v5950_v50 = vld [vmem:[%s8284_s1 + $0x180] ss:$8 sps:$4 sm:$0xff]  }
  0x37   : > { %3333 = vmatpush1.bf16.msra.mxu1 %v5876_v52  ;;  %v5958_v52 = vld [vmem:[%s8284_s1 + $0x194] ss:$8 sps:$4 sm:$0xff]  }
  0x38   : > { %3698 = vmatpush1.bf16.msra.mxu0 %v5877_v53  ;;  %3334 = vmatprep.subr.bf16.mxu1 %v5878_v54  ;;  %v5961_v53 = vld [vmem:[%s8284_s1 + $0x694] ss:$8 sps:$4 sm:$0xff]   ;;  %v6018_v54 = vld [vmem:[%s6844_s12 + $0xc] ss:$100 sps:$4 sm:$0xff]  }
  0x39   : > { %3699 = vmatprep.subr.bf16.mxu0 %v5880_v55  ;;  %v5956_v55 = vld [vmem:[%s8284_s1 + $0x190] ss:$8 sps:$4 sm:$0xff]  }
  0x3b   : > { %3335 = vmatpush1.bf16.msra.mxu1 %v5882_v56  ;;  %v5959_v56 = vld [vmem:[%s8284_s1 + $0x690] ss:$8 sps:$4 sm:$0xff]  }
  0x3c   : > { %3700 = vmatpush1.bf16.msra.mxu0 %v5883_v57  ;;  %3336 = vmatprep.subr.bf16.mxu1 %v5884_v58  ;;  %v6024_v57 = vld [vmem:[%s6844_s12 + $0x34] ss:$100 sps:$4 sm:$0xff]   ;;  %v5966_v58 = vld [vmem:[%s8284_s1 + $0x1a4] ss:$8 sps:$4 sm:$0xff]  }
  0x3d   : > { %3701 = vmatprep.subr.bf16.mxu0 %v5886_v59  ;;  %v5971_v59 = vld [vmem:[%s8284_s1 + $0x6a4] ss:$8 sps:$4 sm:$0xff]  }
  0x3f   : > { %3337 = vmatpush1.bf16.msra.mxu1 %v5888_v60  ;;  %v5964_v60 = vld [vmem:[%s8284_s1 + $0x1a0] ss:$8 sps:$4 sm:$0xff]  }
  0x40   : > { %3702 = vmatpush1.bf16.msra.mxu0 %v5889_v61  ;;  %3338 = vmatprep.subr.bf16.mxu1 %v5890_v62  ;;  %v5969_v61 = vld [vmem:[%s8284_s1 + $0x6a0] ss:$8 sps:$4 sm:$0xff]   ;;  %v5976_v62 = vld [vmem:[%s8284_s1 + $0x1b4] ss:$8 sps:$4 sm:$0xff]  }
  0x41   : > { %3703 = vmatprep.subr.bf16.mxu0 %v5892_v63  ;;  %v5979_v63 = vld [vmem:[%s8284_s1 + $0x6b4] ss:$8 sps:$4 sm:$0xff]  }
  0x43   : > { %3339 = vmatpush1.bf16.msra.mxu1 %v5894_v0  ;;  %v5974_v0 = vld [vmem:[%s8284_s1 + $0x1b0] ss:$8 sps:$4 sm:$0xff]  }
  0x44   : > { %3704 = vmatpush1.bf16.msra.mxu0 %v5895_v1  ;;  %3381 = vmatprep.subr.bf16.mxu1 %v5901_v2  ;;  %v5977_v1 = vld [vmem:[%s8284_s1 + $0x6b0] ss:$8 sps:$4 sm:$0xff]   ;;  %v5984_v2 = vld [vmem:[%s8284_s1 + $0x1c4] ss:$8 sps:$4 sm:$0xff]  }
  0x45   : > { %3746 = vmatprep.subr.bf16.mxu0 %v5907_v3  ;;  %v5989_v3 = vld [vmem:[%s8284_s1 + $0x6c4] ss:$8 sps:$4 sm:$0xff]  }
  0x46   : > { %3341 = vmatmul.mubr.bf16.vlgmr.msra.gmra.mrb[0].mxu1 %v5896_v4  ;;  %v5982_v4 = vld [vmem:[%s8284_s1 + $0x1c0] ss:$8 sps:$4 sm:$0xff]  }
  0x47   : > { %3706 = vmatmul.mubr.bf16.vlgmr.msra.gmra.mrb[0].mxu0 %v5902_v6  ;;  %3382 = vmatpush1.bf16.msra.mxu1 %v5899_v5  ;;  %v5987_v5 = vld [vmem:[%s8284_s1 + $0x6c0] ss:$8 sps:$4 sm:$0xff]   ;;  %v5994_v6 = vld [vmem:[%s8284_s1 + $0x1d4] ss:$8 sps:$4 sm:$0xff]  }
  0x48   : > { %3747 = vmatpush1.bf16.msra.mxu0 %v5905_v7  ;;  %3383 = vmatprep.subr.bf16.mxu1 %v5910_v8  ;;  %v5997_v7 = vld [vmem:[%s8284_s1 + $0x6d4] ss:$8 sps:$4 sm:$0xff]   ;;  %v5992_v8 = vld [vmem:[%s8284_s1 + $0x1d0] ss:$8 sps:$4 sm:$0xff]  }
  0x49   : > { %3748 = vmatprep.subr.bf16.mxu0 %v5913_v9  ;;  %3350 = vmatprep.mubr.bf16.mxu1 %v5962_v17  ;;  %v5995_v9 = vld [vmem:[%s8284_s1 + $0x6d0] ss:$8 sps:$4 sm:$0xff]  }
  0x4a   : > { %3715 = vmatprep.mubr.bf16.mxu0 %v5967_v21  ;;  %v6013_v17 = vld [vmem:[%s8284_s1 + $0x6f0] ss:$8 sps:$4 sm:$0xff]   ;;  %v6019_v21 = vld [vmem:[%s8284_s1 + $0x200] ss:$8 sps:$4 sm:$0xff]  }
  0x4b   : > { %3384 = vmatpush1.bf16.msra.mxu1 %v5908_v10  ;;  %v6002_v10 = vld [vmem:[%s8284_s1 + $0x1e4] ss:$8 sps:$4 sm:$0xff]  }
  0x4c   : > { %3749 = vmatpush1.bf16.msra.mxu0 %v5911_v11  ;;  %3385 = vmatprep.subr.bf16.mxu1 %v5916_v12  ;;  %v6007_v11 = vld [vmem:[%s8284_s1 + $0x6e4] ss:$8 sps:$4 sm:$0xff]   ;;  %v6000_v12 = vld [vmem:[%s8284_s1 + $0x1e0] ss:$8 sps:$4 sm:$0xff]  }
  0x4d   : > { %3750 = vmatprep.subr.bf16.mxu0 %v5919_v13  ;;  %v6005_v13 = vld [vmem:[%s8284_s1 + $0x6e0] ss:$8 sps:$4 sm:$0xff]  }
  0x4e   : > { %3351 = vmatmul.mubr.bf16.gmra.mrb[4].mxu1 %v5972_v24  ;;  %v6030_v24 = vld [vmem:[%s8284_s1 + $0x214] ss:$8 sps:$4 sm:$0xff]  }
  0x4f   : > { %3386 = vmatpush1.bf16.msra.mxu1 %v5914_v14  ;;  %3716 = vmatmul.mubr.bf16.gmra.mrb[4].mxu0 %v5973_v25  ;;  %v6012_v14 = vld [vmem:[%s8284_s1 + $0x1f4] ss:$8 sps:$4 sm:$0xff]  }
  0x50   : > { %3751 = vmatpush1.bf16.msra.mxu0 %v5917_v15  ;;  %3387 = vmatprep.subr.bf16.mxu1 %v5922_v16  ;;  %v6015_v15 = vld [vmem:[%s8284_s1 + $0x6f4] ss:$8 sps:$4 sm:$0xff]   ;;  %v6010_v16 = vld [vmem:[%s8284_s1 + $0x1f0] ss:$8 sps:$4 sm:$0xff]  }
  0x51   : > { %3752 = vmatprep.subr.bf16.mxu0 %v5925_v18  ;;  %3360 = vmatprep.mubr.bf16.mxu1 %v5980_v29  ;;  %v6021_v18 = vld [vmem:[%s8284_s1 + $0x204] ss:$8 sps:$4 sm:$0xff]   ;;  %v6033_v25 = vld [vmem:[%s8284_s1 + $0x714] ss:$8 sps:$4 sm:$0xff]   ;;  %v6031_v29 = vld [vmem:[%s8284_s1 + $0x710] ss:$8 sps:$4 sm:$0xff]  }
  0x52   : > { %3725 = vmatprep.mubr.bf16.mxu0 %v5985_v33  ;;  %v6092_v33 = vld [vmem:[%s6844_s12 + $0xd0] ss:$100 sps:$4 sm:$0xff]  }
  0x53   : > { %3388 = vmatpush1.bf16.msra.mxu1 %v5920_v19  ;;  %v6027_v19 = vld [vmem:[%s8284_s1 + $0x704] ss:$8 sps:$4 sm:$0xff]  }
  0x54   : > { %3753 = vmatpush1.bf16.msra.mxu0 %v5923_v20  ;;  %3389 = vmatprep.subr.bf16.mxu1 %v5928_v22  ;;  %v6016_v20 = vld [vmem:[%s6844_s12 + $0x8] ss:$100 sps:$4 sm:$0xff]   ;;  %v6022_v22 = vld [vmem:[%s6844_s12 + $0x30] ss:$100 sps:$4 sm:$0xff]  }
  0x55   : > { %3754 = vmatprep.subr.bf16.mxu0 %v5931_v23  ;;  %v6025_v23 = vld [vmem:[%s8284_s1 + $0x700] ss:$8 sps:$4 sm:$0xff]  }
  0x56   : > { %3361 = vmatmul.mubr.bf16.gmra.mrb[8].mxu1 %v5990_v36  ;;  %v6042_v36 = vld [vmem:[%s8284_s1 + $0x234] ss:$8 sps:$4 sm:$0xff]  }
  0x57   : > { %3390 = vmatpush1.bf16.msra.mxu1 %v5926_v26  ;;  %3726 = vmatmul.mubr.bf16.gmra.mrb[8].mxu0 %v5991_v37  ;;  %v6082_v26 = vld [vmem:[%s6844_s12 + $0xd4] ss:$100 sps:$4 sm:$0xff]  }
  0x58   : > { %3755 = vmatpush1.bf16.msra.mxu0 %v5929_v27  ;;  %3391 = vmatprep.subr.bf16.mxu1 %v5934_v28  ;;  %v6087_v27 = vld [vmem:[%s6844_s12 + $0xfc] ss:$100 sps:$4 sm:$0xff]   ;;  %v6028_v28 = vld [vmem:[%s8284_s1 + $0x210] ss:$8 sps:$4 sm:$0xff]  }
  0x59   : > { %3756 = vmatprep.subr.bf16.mxu0 %v5937_v30  ;;  %3370 = vmatprep.mubr.bf16.mxu1 %v5998_v41  ;;  %v6036_v30 = vld [vmem:[%s8284_s1 + $0x224] ss:$8 sps:$4 sm:$0xff]   ;;  %v6045_v37 = vld [vmem:[%s8284_s1 + $0x734] ss:$8 sps:$4 sm:$0xff]   ;;  %v6043_v41 = vld [vmem:[%s8284_s1 + $0x730] ss:$8 sps:$4 sm:$0xff]  }
  0x5a   : > { %3735 = vmatprep.mubr.bf16.mxu0 %v6003_v45  ;;  %v6110_v45 = vld [vmem:[%s6844_s12 + $0x198] ss:$100 sps:$4 sm:$0xff]  }
  0x5b   : > { %3392 = vmatpush1.bf16.msra.mxu1 %v5932_v31  ;;  %v6039_v31 = vld [vmem:[%s8284_s1 + $0x724] ss:$8 sps:$4 sm:$0xff]  }
  0x5c   : > { %3757 = vmatpush1.bf16.msra.mxu0 %v5935_v32  ;;  %3393 = vmatprep.subr.bf16.mxu1 %v5940_v34  ;;  %v6034_v32 = vld [vmem:[%s8284_s1 + $0x220] ss:$8 sps:$4 sm:$0xff]   ;;  %v6093_v34 = vld [vmem:[%s6844_s12 + $0xf8] ss:$100 sps:$4 sm:$0xff]  }
  0x5d   : > { %3758 = vmatprep.subr.bf16.mxu0 %v5943_v35  ;;  %v6037_v35 = vld [vmem:[%s8284_s1 + $0x720] ss:$8 sps:$4 sm:$0xff]  }
  0x5e   : > { %3371 = vmatmul.mubr.bf16.gmra.mrb[12].mxu1 %v6008_v48  ;;  %v6054_v48 = vld [vmem:[%s8284_s1 + $0x254] ss:$8 sps:$4 sm:$0xff]  }
  0x5f   : > { %3394 = vmatpush1.bf16.msra.mxu1 %v5938_v38  ;;  %3736 = vmatmul.mubr.bf16.gmra.mrb[12].mxu0 %v6009_v49  ;;  %v6100_v38 = vld [vmem:[%s6844_s12 + $0x19c] ss:$100 sps:$4 sm:$0xff]  }
  0x60   : > { %3759 = vmatpush1.bf16.msra.mxu0 %v5941_v39  ;;  %3395 = vmatprep.subr.bf16.mxu1 %v5946_v40  ;;  %v6105_v39 = vld [vmem:[%s6844_s12 + $0x1c4] ss:$100 sps:$4 sm:$0xff]   ;;  %v6040_v40 = vld [vmem:[%s8284_s1 + $0x230] ss:$8 sps:$4 sm:$0xff]   ;;  %v6057_v49 = vld [vmem:[%s8284_s1 + $0x754] ss:$8 sps:$4 sm:$0xff]  }
  0x61   : > { %3760 = vmatprep.subr.bf16.mxu0 %v5949_v42  ;;  %3413 = vmatprep.mubr.bf16.mxu1 %v6018_v54  ;;  %v6048_v42 = vld [vmem:[%s8284_s1 + $0x244] ss:$8 sps:$4 sm:$0xff]  }
  0x62   : > { %3778 = vmatprep.mubr.bf16.mxu0 %v6024_v57  ;;  %v6060_v54 = vld [vmem:[%s8284_s1 + $0x264] ss:$8 sps:$4 sm:$0xff]   ;;  %v6061_v57 = vld [vmem:[%s8284_s1 + $0x760] ss:$8 sps:$4 sm:$0xff]  }
  0x63   : > { %3396 = vmatpush1.bf16.msra.mxu1 %v5944_v43  ;;  %v6051_v43 = vld [vmem:[%s8284_s1 + $0x744] ss:$8 sps:$4 sm:$0xff]  }
  0x64   : > { %3761 = vmatpush1.bf16.msra.mxu0 %v5947_v44  ;;  %3397 = vmatprep.subr.bf16.mxu1 %v5952_v46  ;;  %v6046_v44 = vld [vmem:[%s8284_s1 + $0x240] ss:$8 sps:$4 sm:$0xff]  }
  0x65   : > { %3762 = vmatprep.subr.bf16.mxu0 %v5955_v47  ;;  %v6111_v46 = vld [vmem:[%s6844_s12 + $0x1c0] ss:$100 sps:$4 sm:$0xff]  }
  0x66   : > { %v6049_v47 = vld [vmem:[%s8284_s1 + $0x740] ss:$8 sps:$4 sm:$0xff]  }
  0x67   : > { %3398 = vmatpush1.bf16.msra.mxu1 %v5950_v50  ;;  %v6118_v50 = vld [vmem:[%s6844_s12 + $0x264] ss:$100 sps:$4 sm:$0xff]  }
  0x68   : > { %3763 = vmatpush1.bf16.msra.mxu0 %v5953_v51  ;;  %3399 = vmatprep.subr.bf16.mxu1 %v5958_v52  ;;  %v6123_v51 = vld [vmem:[%s6844_s12 + $0x28c] ss:$100 sps:$4 sm:$0xff]  }
  0x69   : > { %3764 = vmatprep.subr.bf16.mxu0 %v5961_v53  ;;  %v6052_v52 = vld [vmem:[%s8284_s1 + $0x250] ss:$8 sps:$4 sm:$0xff]  }
  0x6a   : > { %v6055_v53 = vld [vmem:[%s8284_s1 + $0x750] ss:$8 sps:$4 sm:$0xff]  }
  0x6b   : > { %3400 = vmatpush1.bf16.msra.mxu1 %v5956_v55  ;;  %v6063_v55 = vld [vmem:[%s8284_s1 + $0x764] ss:$8 sps:$4 sm:$0xff]  }
  0x6c   : > { %3765 = vmatpush1.bf16.msra.mxu0 %v5959_v56  ;;  %3401 = vmatprep.subr.bf16.mxu1 %v5966_v58  ;;  %v6058_v56 = vld [vmem:[%s8284_s1 + $0x260] ss:$8 sps:$4 sm:$0xff]  }
  0x6d   : > { %3766 = vmatprep.subr.bf16.mxu0 %v5971_v59  ;;  %v6128_v58 = vld [vmem:[%s6844_s12 + $0x260] ss:$100 sps:$4 sm:$0xff]   ;;  %v6129_v59 = vld [vmem:[%s6844_s12 + $0x288] ss:$100 sps:$4 sm:$0xff]  }
  0x6f   : > { %3402 = vmatpush1.bf16.msra.mxu1 %v5964_v60  ;;  %v6066_v60 = vld [vmem:[%s8284_s1 + $0x274] ss:$8 sps:$4 sm:$0xff]  }
  0x70   : > { %3767 = vmatpush1.bf16.msra.mxu0 %v5969_v61  ;;  %3403 = vmatprep.subr.bf16.mxu1 %v5976_v62  ;;  %v6069_v61 = vld [vmem:[%s8284_s1 + $0x774] ss:$8 sps:$4 sm:$0xff]  }
  0x71   : > { %3768 = vmatprep.subr.bf16.mxu0 %v5979_v63  ;;  %v6138_v62 = vld [vmem:[%s6844_s12 + $0x14] ss:$100 sps:$4 sm:$0xff]   ;;  %v6144_v63 = vld [vmem:[%s6844_s12 + $0x3c] ss:$100 sps:$4 sm:$0xff]  }
  0x73   : > { %3404 = vmatpush1.bf16.msra.mxu1 %v5974_v0  ;;  %v6064_v0 = vld [vmem:[%s8284_s1 + $0x270] ss:$8 sps:$4 sm:$0xff]  }
  0x74   : > { %3769 = vmatpush1.bf16.msra.mxu0 %v5977_v1  ;;  %3405 = vmatprep.subr.bf16.mxu1 %v5984_v2  ;;  %v6067_v1 = vld [vmem:[%s8284_s1 + $0x770] ss:$8 sps:$4 sm:$0xff]   ;;  %v6072_v2 = vld [vmem:[%s8284_s1 + $0x284] ss:$8 sps:$4 sm:$0xff]  }
  0x75   : > { %3770 = vmatprep.subr.bf16.mxu0 %v5989_v3  ;;  %v6075_v3 = vld [vmem:[%s8284_s1 + $0x784] ss:$8 sps:$4 sm:$0xff]  }
  0x77   : > { %3406 = vmatpush1.bf16.msra.mxu1 %v5982_v4  ;;  %v6070_v4 = vld [vmem:[%s8284_s1 + $0x280] ss:$8 sps:$4 sm:$0xff]  }
  0x78   : > { %3771 = vmatpush1.bf16.msra.mxu0 %v5987_v5  ;;  %3407 = vmatprep.subr.bf16.mxu1 %v5994_v6  ;;  %v6073_v5 = vld [vmem:[%s8284_s1 + $0x780] ss:$8 sps:$4 sm:$0xff]   ;;  %v6078_v6 = vld [vmem:[%s8284_s1 + $0x294] ss:$8 sps:$4 sm:$0xff]  }
  0x79   : > { %3772 = vmatprep.subr.bf16.mxu0 %v5997_v7  ;;  %v6081_v7 = vld [vmem:[%s8284_s1 + $0x794] ss:$8 sps:$4 sm:$0xff]  }
  0x7b   : > { %3408 = vmatpush1.bf16.msra.mxu1 %v5992_v8  ;;  %v6076_v8 = vld [vmem:[%s8284_s1 + $0x290] ss:$8 sps:$4 sm:$0xff]  }
  0x7c   : > { %3773 = vmatpush1.bf16.msra.mxu0 %v5995_v9  ;;  %3409 = vmatprep.subr.bf16.mxu1 %v6002_v10  ;;  %v6079_v9 = vld [vmem:[%s8284_s1 + $0x790] ss:$8 sps:$4 sm:$0xff]   ;;  %v6086_v10 = vld [vmem:[%s8284_s1 + $0x2a4] ss:$8 sps:$4 sm:$0xff]  }
  0x7d   : > { %3774 = vmatprep.subr.bf16.mxu0 %v6007_v11  ;;  %v6091_v11 = vld [vmem:[%s8284_s1 + $0x7a4] ss:$8 sps:$4 sm:$0xff]  }
  0x7f   : > { %3410 = vmatpush1.bf16.msra.mxu1 %v6000_v12  ;;  %v6084_v12 = vld [vmem:[%s8284_s1 + $0x2a0] ss:$8 sps:$4 sm:$0xff]  }
  0x80   : > { %3775 = vmatpush1.bf16.msra.mxu0 %v6005_v13  ;;  %3411 = vmatprep.subr.bf16.mxu1 %v6012_v14  ;;  %v6089_v13 = vld [vmem:[%s8284_s1 + $0x7a0] ss:$8 sps:$4 sm:$0xff]   ;;  %v6096_v14 = vld [vmem:[%s8284_s1 + $0x2b4] ss:$8 sps:$4 sm:$0xff]  }
  0x81   : > { %3776 = vmatprep.subr.bf16.mxu0 %v6015_v15  ;;  %v6099_v15 = vld [vmem:[%s8284_s1 + $0x7b4] ss:$8 sps:$4 sm:$0xff]  }
  0x83   : > { %3412 = vmatpush1.bf16.msra.mxu1 %v6010_v16  ;;  %v6094_v16 = vld [vmem:[%s8284_s1 + $0x2b0] ss:$8 sps:$4 sm:$0xff]  }
  0x84   : > { %3777 = vmatpush1.bf16.msra.mxu0 %v6013_v17  ;;  %3454 = vmatprep.subr.bf16.mxu1 %v6021_v18  ;;  %v6097_v17 = vld [vmem:[%s8284_s1 + $0x7b0] ss:$8 sps:$4 sm:$0xff]   ;;  %v6104_v18 = vld [vmem:[%s8284_s1 + $0x2c4] ss:$8 sps:$4 sm:$0xff]  }
  0x85   : > { %3819 = vmatprep.subr.bf16.mxu0 %v6027_v19  ;;  %v6109_v19 = vld [vmem:[%s8284_s1 + $0x7c4] ss:$8 sps:$4 sm:$0xff]  }
  0x86   : > { %3414 = vmatmul.mubr.bf16.vlgmr.msra.gmra.mrb[0].mxu1 %v6016_v20  ;;  %v6102_v20 = vld [vmem:[%s8284_s1 + $0x2c0] ss:$8 sps:$4 sm:$0xff]  }
  0x87   : > { %3779 = vmatmul.mubr.bf16.vlgmr.msra.gmra.mrb[0].mxu0 %v6022_v22  ;;  %3455 = vmatpush1.bf16.msra.mxu1 %v6019_v21  ;;  %v6107_v21 = vld [vmem:[%s8284_s1 + $0x7c0] ss:$8 sps:$4 sm:$0xff]   ;;  %v6114_v22 = vld [vmem:[%s8284_s1 + $0x2d4] ss:$8 sps:$4 sm:$0xff]  }
  0x88   : > { %3820 = vmatpush1.bf16.msra.mxu0 %v6025_v23  ;;  %3456 = vmatprep.subr.bf16.mxu1 %v6030_v24  ;;  %v6117_v23 = vld [vmem:[%s8284_s1 + $0x7d4] ss:$8 sps:$4 sm:$0xff]   ;;  %v6112_v24 = vld [vmem:[%s8284_s1 + $0x2d0] ss:$8 sps:$4 sm:$0xff]  }
  0x89   : > { %3821 = vmatprep.subr.bf16.mxu0 %v6033_v25  ;;  %3423 = vmatprep.mubr.bf16.mxu1 %v6082_v26  ;;  %v6115_v25 = vld [vmem:[%s8284_s1 + $0x7d0] ss:$8 sps:$4 sm:$0xff]   ;;  %v6122_v26 = vld [vmem:[%s8284_s1 + $0x2e4] ss:$8 sps:$4 sm:$0xff]  }
  0x8a   : > { %3788 = vmatprep.mubr.bf16.mxu0 %v6087_v27  ;;  %v6127_v27 = vld [vmem:[%s8284_s1 + $0x7e4] ss:$8 sps:$4 sm:$0xff]  }
  0x8b   : > { %3457 = vmatpush1.bf16.msra.mxu1 %v6028_v28  ;;  %v6120_v28 = vld [vmem:[%s8284_s1 + $0x2e0] ss:$8 sps:$4 sm:$0xff]  }
  0x8c   : > { %3822 = vmatpush1.bf16.msra.mxu0 %v6031_v29  ;;  %3458 = vmatprep.subr.bf16.mxu1 %v6036_v30  ;;  %v6125_v29 = vld [vmem:[%s8284_s1 + $0x7e0] ss:$8 sps:$4 sm:$0xff]   ;;  %v6132_v30 = vld [vmem:[%s8284_s1 + $0x2f4] ss:$8 sps:$4 sm:$0xff]  }
  0x8d   : > { %3823 = vmatprep.subr.bf16.mxu0 %v6039_v31  ;;  %v6135_v31 = vld [vmem:[%s8284_s1 + $0x7f4] ss:$8 sps:$4 sm:$0xff]  }
  0x8e   : > { %3424 = vmatmul.mubr.bf16.gmra.mrb[4].mxu1 %v6092_v33  ;;  %v6133_v33 = vld [vmem:[%s8284_s1 + $0x7f0] ss:$8 sps:$4 sm:$0xff]  }
  0x8f   : > { %3789 = vmatmul.mubr.bf16.gmra.mrb[4].mxu0 %v6093_v34  ;;  %3459 = vmatpush1.bf16.msra.mxu1 %v6034_v32  ;;  %v6130_v32 = vld [vmem:[%s8284_s1 + $0x2f0] ss:$8 sps:$4 sm:$0xff]   ;;  %v6141_v34 = vld [vmem:[%s8284_s1 + $0x304] ss:$8 sps:$4 sm:$0xff]  }
  0x90   : > { %3824 = vmatpush1.bf16.msra.mxu0 %v6037_v35  ;;  %3460 = vmatprep.subr.bf16.mxu1 %v6042_v36  ;;  %v6147_v35 = vld [vmem:[%s8284_s1 + $0x804] ss:$8 sps:$4 sm:$0xff]   ;;  %v6136_v36 = vld [vmem:[%s6844_s12 + $0x10] ss:$100 sps:$4 sm:$0xff]  }
  0x91   : > { %3825 = vmatprep.subr.bf16.mxu0 %v6045_v37  ;;  %3433 = vmatprep.mubr.bf16.mxu1 %v6100_v38  ;;  %v6139_v37 = vld [vmem:[%s8284_s1 + $0x300] ss:$8 sps:$4 sm:$0xff]   ;;  %v6142_v38 = vld [vmem:[%s6844_s12 + $0x38] ss:$100 sps:$4 sm:$0xff]  }
  0x92   : > { %3798 = vmatprep.mubr.bf16.mxu0 %v6105_v39  ;;  %v6145_v39 = vld [vmem:[%s8284_s1 + $0x800] ss:$8 sps:$4 sm:$0xff]  }
  0x93   : > { %3461 = vmatpush1.bf16.msra.mxu1 %v6040_v40  ;;  %v6150_v40 = vld [vmem:[%s8284_s1 + $0x314] ss:$8 sps:$4 sm:$0xff]  }
  0x94   : > { %3826 = vmatpush1.bf16.msra.mxu0 %v6043_v41  ;;  %3462 = vmatprep.subr.bf16.mxu1 %v6048_v42  ;;  %v6153_v41 = vld [vmem:[%s8284_s1 + $0x814] ss:$8 sps:$4 sm:$0xff]  }
  0x95   : > { %3827 = vmatprep.subr.bf16.mxu0 %v6051_v43  ;;  %v6202_v42 = vld [vmem:[%s6844_s12 + $0xdc] ss:$100 sps:$4 sm:$0xff]   ;;  %v6207_v43 = vld [vmem:[%s6844_s12 + $0x104] ss:$100 sps:$4 sm:$0xff]  }
  0x96   : > { %3434 = vmatmul.mubr.bf16.gmra.mrb[8].mxu1 %v6110_v45  ;;  %v6151_v45 = vld [vmem:[%s8284_s1 + $0x810] ss:$8 sps:$4 sm:$0xff]  }
  0x97   : > { %3799 = vmatmul.mubr.bf16.gmra.mrb[8].mxu0 %v6111_v46  ;;  %3463 = vmatpush1.bf16.msra.mxu1 %v6046_v44  ;;  %v6148_v44 = vld [vmem:[%s8284_s1 + $0x310] ss:$8 sps:$4 sm:$0xff]   ;;  %v6156_v46 = vld [vmem:[%s8284_s1 + $0x324] ss:$8 sps:$4 sm:$0xff]  }
  0x98   : > { %3828 = vmatpush1.bf16.msra.mxu0 %v6049_v47  ;;  %3464 = vmatprep.subr.bf16.mxu1 %v6054_v48  ;;  %v6159_v47 = vld [vmem:[%s8284_s1 + $0x824] ss:$8 sps:$4 sm:$0xff]   ;;  %v6154_v48 = vld [vmem:[%s8284_s1 + $0x320] ss:$8 sps:$4 sm:$0xff]  }
  0x99   : > { %3829 = vmatprep.subr.bf16.mxu0 %v6057_v49  ;;  %3443 = vmatprep.mubr.bf16.mxu1 %v6118_v50  ;;  %v6157_v49 = vld [vmem:[%s8284_s1 + $0x820] ss:$8 sps:$4 sm:$0xff]   ;;  %v6212_v50 = vld [vmem:[%s6844_s12 + $0xd8] ss:$100 sps:$4 sm:$0xff]  }
  0x9a   : > { %3808 = vmatprep.mubr.bf16.mxu0 %v6123_v51  ;;  %v6213_v51 = vld [vmem:[%s6844_s12 + $0x100] ss:$100 sps:$4 sm:$0xff]  }
  0x9b   : > { %3465 = vmatpush1.bf16.msra.mxu1 %v6052_v52  ;;  %v6162_v52 = vld [vmem:[%s8284_s1 + $0x334] ss:$8 sps:$4 sm:$0xff]  }
  0x9c   : > { %3830 = vmatpush1.bf16.msra.mxu0 %v6055_v53  ;;  %3466 = vmatprep.subr.bf16.mxu1 %v6060_v54  ;;  %v6165_v53 = vld [vmem:[%s8284_s1 + $0x834] ss:$8 sps:$4 sm:$0xff]   ;;  %v6220_v54 = vld [vmem:[%s6844_s12 + $0x1a4] ss:$100 sps:$4 sm:$0xff]  }
  0x9d   : > { %3831 = vmatprep.subr.bf16.mxu0 %v6063_v55  ;;  %v6225_v55 = vld [vmem:[%s6844_s12 + $0x1cc] ss:$100 sps:$4 sm:$0xff]  }
  0x9e   : > { %3444 = vmatmul.mubr.bf16.gmra.mrb[12].mxu1 %v6128_v58  ;;  %v6168_v58 = vld [vmem:[%s8284_s1 + $0x344] ss:$8 sps:$4 sm:$0xff]  }
  0x9f   : > { %3809 = vmatmul.mubr.bf16.gmra.mrb[12].mxu0 %v6129_v59  ;;  %3467 = vmatpush1.bf16.msra.mxu1 %v6058_v56  ;;  %v6160_v56 = vld [vmem:[%s8284_s1 + $0x330] ss:$8 sps:$4 sm:$0xff]   ;;  %v6171_v59 = vld [vmem:[%s8284_s1 + $0x844] ss:$8 sps:$4 sm:$0xff]  }
  0xa0   : > { %3832 = vmatpush1.bf16.msra.mxu0 %v6061_v57  ;;  %3468 = vmatprep.subr.bf16.mxu1 %v6066_v60  ;;  %v6163_v57 = vld [vmem:[%s8284_s1 + $0x830] ss:$8 sps:$4 sm:$0xff]   ;;  %v6166_v60 = vld [vmem:[%s8284_s1 + $0x340] ss:$8 sps:$4 sm:$0xff]  }
  0xa1   : > { %3833 = vmatprep.subr.bf16.mxu0 %v6069_v61  ;;  %3486 = vmatprep.mubr.bf16.mxu1 %v6138_v62  ;;  %v6169_v61 = vld [vmem:[%s8284_s1 + $0x840] ss:$8 sps:$4 sm:$0xff]  }
  0xa2   : > { %3851 = vmatprep.mubr.bf16.mxu0 %v6144_v63  ;;  %v6230_v62 = vld [vmem:[%s6844_s12 + $0x1a0] ss:$100 sps:$4 sm:$0xff]   ;;  %v6231_v63 = vld [vmem:[%s6844_s12 + $0x1c8] ss:$100 sps:$4 sm:$0xff]  }
  0xa3   : > { %3469 = vmatpush1.bf16.msra.mxu1 %v6064_v0  ;;  %v6174_v0 = vld [vmem:[%s8284_s1 + $0x354] ss:$8 sps:$4 sm:$0xff]  }
  0xa4   : > { %3834 = vmatpush1.bf16.msra.mxu0 %v6067_v1  ;;  %3470 = vmatprep.subr.bf16.mxu1 %v6072_v2  ;;  %v6177_v1 = vld [vmem:[%s8284_s1 + $0x854] ss:$8 sps:$4 sm:$0xff]   ;;  %v6238_v2 = vld [vmem:[%s6844_s12 + $0x26c] ss:$100 sps:$4 sm:$0xff]  }
  0xa5   : > { %3835 = vmatprep.subr.bf16.mxu0 %v6075_v3  ;;  %v6243_v3 = vld [vmem:[%s6844_s12 + $0x294] ss:$100 sps:$4 sm:$0xff]  }
  0xa7   : > { %3471 = vmatpush1.bf16.msra.mxu1 %v6070_v4  ;;  %v6172_v4 = vld [vmem:[%s8284_s1 + $0x350] ss:$8 sps:$4 sm:$0xff]  }
  0xa8   : > { %3836 = vmatpush1.bf16.msra.mxu0 %v6073_v5  ;;  %3472 = vmatprep.subr.bf16.mxu1 %v6078_v6  ;;  %v6175_v5 = vld [vmem:[%s8284_s1 + $0x850] ss:$8 sps:$4 sm:$0xff]   ;;  %v6180_v6 = vld [vmem:[%s8284_s1 + $0x364] ss:$8 sps:$4 sm:$0xff]  }
  0xa9   : > { %3837 = vmatprep.subr.bf16.mxu0 %v6081_v7  ;;  %v6183_v7 = vld [vmem:[%s8284_s1 + $0x864] ss:$8 sps:$4 sm:$0xff]  }
  0xab   : > { %3473 = vmatpush1.bf16.msra.mxu1 %v6076_v8  ;;  %v6178_v8 = vld [vmem:[%s8284_s1 + $0x360] ss:$8 sps:$4 sm:$0xff]  }
  0xac   : > { %3838 = vmatpush1.bf16.msra.mxu0 %v6079_v9  ;;  %3474 = vmatprep.subr.bf16.mxu1 %v6086_v10  ;;  %v6181_v9 = vld [vmem:[%s8284_s1 + $0x860] ss:$8 sps:$4 sm:$0xff]  }
  0xad   : > { %3839 = vmatprep.subr.bf16.mxu0 %v6091_v11  ;;  %v6248_v10 = vld [vmem:[%s6844_s12 + $0x268] ss:$100 sps:$4 sm:$0xff]   ;;  %v6249_v11 = vld [vmem:[%s6844_s12 + $0x290] ss:$100 sps:$4 sm:$0xff]  }
  0xaf   : > { %3475 = vmatpush1.bf16.msra.mxu1 %v6084_v12  ;;  %v6186_v12 = vld [vmem:[%s8284_s1 + $0x374] ss:$8 sps:$4 sm:$0xff]  }
  0xb0   : > { %3840 = vmatpush1.bf16.msra.mxu0 %v6089_v13  ;;  %3476 = vmatprep.subr.bf16.mxu1 %v6096_v14  ;;  %v6189_v13 = vld [vmem:[%s8284_s1 + $0x874] ss:$8 sps:$4 sm:$0xff]  }
  0xb1   : > { %3841 = vmatprep.subr.bf16.mxu0 %v6099_v15  ;;  %v6258_v14 = vld [vmem:[%s6844_s12 + $0x1c] ss:$100 sps:$4 sm:$0xff]   ;;  %v6264_v15 = vld [vmem:[%s6844_s12 + $0x44] ss:$100 sps:$4 sm:$0xff]  }
  0xb3   : > { %3477 = vmatpush1.bf16.msra.mxu1 %v6094_v16  ;;  %v6184_v16 = vld [vmem:[%s8284_s1 + $0x370] ss:$8 sps:$4 sm:$0xff]  }
  0xb4   : > { %3842 = vmatpush1.bf16.msra.mxu0 %v6097_v17  ;;  %3478 = vmatprep.subr.bf16.mxu1 %v6104_v18  ;;  %v6187_v17 = vld [vmem:[%s8284_s1 + $0x870] ss:$8 sps:$4 sm:$0xff]   ;;  %v6192_v18 = vld [vmem:[%s8284_s1 + $0x384] ss:$8 sps:$4 sm:$0xff]  }
  0xb5   : > { %3843 = vmatprep.subr.bf16.mxu0 %v6109_v19  ;;  %v6195_v19 = vld [vmem:[%s8284_s1 + $0x884] ss:$8 sps:$4 sm:$0xff]  }
  0xb7   : > { %3479 = vmatpush1.bf16.msra.mxu1 %v6102_v20  ;;  %v6190_v20 = vld [vmem:[%s8284_s1 + $0x380] ss:$8 sps:$4 sm:$0xff]  }
  0xb8   : > { %3844 = vmatpush1.bf16.msra.mxu0 %v6107_v21  ;;  %3480 = vmatprep.subr.bf16.mxu1 %v6114_v22  ;;  %v6193_v21 = vld [vmem:[%s8284_s1 + $0x880] ss:$8 sps:$4 sm:$0xff]   ;;  %v6198_v22 = vld [vmem:[%s8284_s1 + $0x394] ss:$8 sps:$4 sm:$0xff]  }
  0xb9   : > { %3845 = vmatprep.subr.bf16.mxu0 %v6117_v23  ;;  %v6201_v23 = vld [vmem:[%s8284_s1 + $0x894] ss:$8 sps:$4 sm:$0xff]  }
  0xbb   : > { %3481 = vmatpush1.bf16.msra.mxu1 %v6112_v24  ;;  %v6196_v24 = vld [vmem:[%s8284_s1 + $0x390] ss:$8 sps:$4 sm:$0xff]  }
  0xbc   : > { %3846 = vmatpush1.bf16.msra.mxu0 %v6115_v25  ;;  %3482 = vmatprep.subr.bf16.mxu1 %v6122_v26  ;;  %v6199_v25 = vld [vmem:[%s8284_s1 + $0x890] ss:$8 sps:$4 sm:$0xff]   ;;  %v6206_v26 = vld [vmem:[%s8284_s1 + $0x3a4] ss:$8 sps:$4 sm:$0xff]  }
  0xbd   : > { %3847 = vmatprep.subr.bf16.mxu0 %v6127_v27  ;;  %v6211_v27 = vld [vmem:[%s8284_s1 + $0x8a4] ss:$8 sps:$4 sm:$0xff]  }
  0xbf   : > { %3483 = vmatpush1.bf16.msra.mxu1 %v6120_v28  ;;  %v6204_v28 = vld [vmem:[%s8284_s1 + $0x3a0] ss:$8 sps:$4 sm:$0xff]  }
  0xc0   : > { %3848 = vmatpush1.bf16.msra.mxu0 %v6125_v29  ;;  %3484 = vmatprep.subr.bf16.mxu1 %v6132_v30  ;;  %v6209_v29 = vld [vmem:[%s8284_s1 + $0x8a0] ss:$8 sps:$4 sm:$0xff]   ;;  %v6216_v30 = vld [vmem:[%s8284_s1 + $0x3b4] ss:$8 sps:$4 sm:$0xff]  }
  0xc1   : > { %3849 = vmatprep.subr.bf16.mxu0 %v6135_v31  ;;  %v6219_v31 = vld [vmem:[%s8284_s1 + $0x8b4] ss:$8 sps:$4 sm:$0xff]  }
  0xc3   : > { %3485 = vmatpush1.bf16.msra.mxu1 %v6130_v32  ;;  %v6214_v32 = vld [vmem:[%s8284_s1 + $0x3b0] ss:$8 sps:$4 sm:$0xff]  }
  0xc4   : > { %3850 = vmatpush1.bf16.msra.mxu0 %v6133_v33  ;;  %3527 = vmatprep.subr.bf16.mxu1 %v6141_v34  ;;  %v6217_v33 = vld [vmem:[%s8284_s1 + $0x8b0] ss:$8 sps:$4 sm:$0xff]   ;;  %v6224_v34 = vld [vmem:[%s8284_s1 + $0x3c4] ss:$8 sps:$4 sm:$0xff]  }
  0xc5   : > { %3892 = vmatprep.subr.bf16.mxu0 %v6147_v35  ;;  %v6229_v35 = vld [vmem:[%s8284_s1 + $0x8c4] ss:$8 sps:$4 sm:$0xff]  }
  0xc6   : > { %3487 = vmatmul.mubr.bf16.vlgmr.msra.gmra.mrb[0].mxu1 %v6136_v36  ;;  %v6222_v36 = vld [vmem:[%s8284_s1 + $0x3c0] ss:$8 sps:$4 sm:$0xff]  }
  0xc7   : > { %3852 = vmatmul.mubr.bf16.vlgmr.msra.gmra.mrb[0].mxu0 %v6142_v38  ;;  %3528 = vmatpush1.bf16.msra.mxu1 %v6139_v37  ;;  %v6227_v37 = vld [vmem:[%s8284_s1 + $0x8c0] ss:$8 sps:$4 sm:$0xff]   ;;  %v6234_v38 = vld [vmem:[%s8284_s1 + $0x3d4] ss:$8 sps:$4 sm:$0xff]  }
  0xc8   : > { %3893 = vmatpush1.bf16.msra.mxu0 %v6145_v39  ;;  %3529 = vmatprep.subr.bf16.mxu1 %v6150_v40  ;;  %v6237_v39 = vld [vmem:[%s8284_s1 + $0x8d4] ss:$8 sps:$4 sm:$0xff]   ;;  %v6232_v40 = vld [vmem:[%s8284_s1 + $0x3d0] ss:$8 sps:$4 sm:$0xff]  }
  0xc9   : > { %3894 = vmatprep.subr.bf16.mxu0 %v6153_v41  ;;  %3496 = vmatprep.mubr.bf16.mxu1 %v6202_v42  ;;  %v6235_v41 = vld [vmem:[%s8284_s1 + $0x8d0] ss:$8 sps:$4 sm:$0xff]   ;;  %v6242_v42 = vld [vmem:[%s8284_s1 + $0x3e4] ss:$8 sps:$4 sm:$0xff]  }
  0xca   : > { %3861 = vmatprep.mubr.bf16.mxu0 %v6207_v43  ;;  %v6247_v43 = vld [vmem:[%s8284_s1 + $0x8e4] ss:$8 sps:$4 sm:$0xff]  }
  0xcb   : > { %3530 = vmatpush1.bf16.msra.mxu1 %v6148_v44  ;;  %v6240_v44 = vld [vmem:[%s8284_s1 + $0x3e0] ss:$8 sps:$4 sm:$0xff]  }
  0xcc   : > { %3895 = vmatpush1.bf16.msra.mxu0 %v6151_v45  ;;  %3531 = vmatprep.subr.bf16.mxu1 %v6156_v46  ;;  %v6245_v45 = vld [vmem:[%s8284_s1 + $0x8e0] ss:$8 sps:$4 sm:$0xff]   ;;  %v6252_v46 = vld [vmem:[%s8284_s1 + $0x3f4] ss:$8 sps:$4 sm:$0xff]  }
  0xcd   : > { %3896 = vmatprep.subr.bf16.mxu0 %v6159_v47  ;;  %v6255_v47 = vld [vmem:[%s8284_s1 + $0x8f4] ss:$8 sps:$4 sm:$0xff]  }
  0xce   : > { %3497 = vmatmul.mubr.bf16.gmra.mrb[4].mxu1 %v6212_v50  ;;  %v6261_v50 = vld [vmem:[%s8284_s1 + $0x404] ss:$8 sps:$4 sm:$0xff]  }
  0xcf   : > { %3862 = vmatmul.mubr.bf16.gmra.mrb[4].mxu0 %v6213_v51  ;;  %3532 = vmatpush1.bf16.msra.mxu1 %v6154_v48  ;;  %v6250_v48 = vld [vmem:[%s8284_s1 + $0x3f0] ss:$8 sps:$4 sm:$0xff]   ;;  %v6267_v51 = vld [vmem:[%s8284_s1 + $0x904] ss:$8 sps:$4 sm:$0xff]  }
  0xd0   : > { %3897 = vmatpush1.bf16.msra.mxu0 %v6157_v49  ;;  %3533 = vmatprep.subr.bf16.mxu1 %v6162_v52  ;;  %v6253_v49 = vld [vmem:[%s8284_s1 + $0x8f0] ss:$8 sps:$4 sm:$0xff]  }
  0xd1   : > { %3898 = vmatprep.subr.bf16.mxu0 %v6165_v53  ;;  %3506 = vmatprep.mubr.bf16.mxu1 %v6220_v54  ;;  %v6256_v52 = vld [vmem:[%s6844_s12 + $0x18] ss:$100 sps:$4 sm:$0xff]   ;;  %v6259_v53 = vld [vmem:[%s8284_s1 + $0x400] ss:$8 sps:$4 sm:$0xff]  }
  0xd2   : > { %3871 = vmatprep.mubr.bf16.mxu0 %v6225_v55  ;;  %v6262_v54 = vld [vmem:[%s6844_s12 + $0x40] ss:$100 sps:$4 sm:$0xff]  }
  0xd3   : > { %3534 = vmatpush1.bf16.msra.mxu1 %v6160_v56  ;;  %v6265_v55 = vld [vmem:[%s8284_s1 + $0x900] ss:$8 sps:$4 sm:$0xff]   ;;  %v6270_v56 = vld [vmem:[%s8284_s1 + $0x414] ss:$8 sps:$4 sm:$0xff]  }
  0xd4   : > { %3899 = vmatpush1.bf16.msra.mxu0 %v6163_v57  ;;  %3535 = vmatprep.subr.bf16.mxu1 %v6168_v58  ;;  %v6273_v57 = vld [vmem:[%s8284_s1 + $0x914] ss:$8 sps:$4 sm:$0xff]   ;;  %v6322_v58 = vld [vmem:[%s6844_s12 + $0xe4] ss:$100 sps:$4 sm:$0xff]  }
  0xd5   : > { %3900 = vmatprep.subr.bf16.mxu0 %v6171_v59  ;;  %v6328_v59 = vld [vmem:[%s6844_s12 + $0x10c] ss:$100 sps:$4 sm:$0xff]  }
  0xd6   : > { %3507 = vmatmul.mubr.bf16.gmra.mrb[8].mxu1 %v6230_v62  ;;  %v6276_v62 = vld [vmem:[%s8284_s1 + $0x424] ss:$8 sps:$4 sm:$0xff]  }
  0xd7   : > { %3872 = vmatmul.mubr.bf16.gmra.mrb[8].mxu0 %v6231_v63  ;;  %3536 = vmatpush1.bf16.msra.mxu1 %v6166_v60  ;;  %v6268_v60 = vld [vmem:[%s8284_s1 + $0x410] ss:$8 sps:$4 sm:$0xff]   ;;  %v6279_v63 = vld [vmem:[%s8284_s1 + $0x924] ss:$8 sps:$4 sm:$0xff]  }
  0xd8   : > { %3901 = vmatpush1.bf16.msra.mxu0 %v6169_v61  ;;  %3537 = vmatprep.subr.bf16.mxu1 %v6174_v0  ;;  %v6271_v61 = vld [vmem:[%s8284_s1 + $0x910] ss:$8 sps:$4 sm:$0xff]   ;;  %v6274_v0 = vld [vmem:[%s8284_s1 + $0x420] ss:$8 sps:$4 sm:$0xff]  }
  0xd9   : > { %3902 = vmatprep.subr.bf16.mxu0 %v6177_v1  ;;  %3516 = vmatprep.mubr.bf16.mxu1 %v6238_v2  ;;  %v6277_v1 = vld [vmem:[%s8284_s1 + $0x920] ss:$8 sps:$4 sm:$0xff]  }
  0xda   : > { %3881 = vmatprep.mubr.bf16.mxu0 %v6243_v3  ;;  %v6324_v2 = vld [vmem:[%s6844_s12 + $0xe0] ss:$100 sps:$4 sm:$0xff]   ;;  %v6333_v3 = vld [vmem:[%s6844_s12 + $0x108] ss:$100 sps:$4 sm:$0xff]  }
  0xdb   : > { %3538 = vmatpush1.bf16.msra.mxu1 %v6172_v4  ;;  %v6282_v4 = vld [vmem:[%s8284_s1 + $0x434] ss:$8 sps:$4 sm:$0xff]  }
  0xdc   : > { %3903 = vmatpush1.bf16.msra.mxu0 %v6175_v5  ;;  %3539 = vmatprep.subr.bf16.mxu1 %v6180_v6  ;;  %v6285_v5 = vld [vmem:[%s8284_s1 + $0x934] ss:$8 sps:$4 sm:$0xff]   ;;  %v6340_v6 = vld [vmem:[%s6844_s12 + $0x1ac] ss:$100 sps:$4 sm:$0xff]  }
  0xdd   : > { %3904 = vmatprep.subr.bf16.mxu0 %v6183_v7  ;;  %v6346_v7 = vld [vmem:[%s6844_s12 + $0x1d4] ss:$100 sps:$4 sm:$0xff]  }
  0xde   : > { %3517 = vmatmul.mubr.bf16.gmra.mrb[12].mxu1 %v6248_v10  ;;  %v6288_v10 = vld [vmem:[%s8284_s1 + $0x444] ss:$8 sps:$4 sm:$0xff]  }
  0xdf   : > { %3882 = vmatmul.mubr.bf16.gmra.mrb[12].mxu0 %v6249_v11  ;;  %3540 = vmatpush1.bf16.msra.mxu1 %v6178_v8  ;;  %v6280_v8 = vld [vmem:[%s8284_s1 + $0x430] ss:$8 sps:$4 sm:$0xff]   ;;  %v6291_v11 = vld [vmem:[%s8284_s1 + $0x944] ss:$8 sps:$4 sm:$0xff]  }
  0xe0   : > { %3905 = vmatpush1.bf16.msra.mxu0 %v6181_v9  ;;  %3541 = vmatprep.subr.bf16.mxu1 %v6186_v12  ;;  %v6283_v9 = vld [vmem:[%s8284_s1 + $0x930] ss:$8 sps:$4 sm:$0xff]   ;;  %v6286_v12 = vld [vmem:[%s8284_s1 + $0x440] ss:$8 sps:$4 sm:$0xff]  }
  0xe1   : > { %3906 = vmatprep.subr.bf16.mxu0 %v6189_v13  ;;  %3559 = vmatprep.mubr.bf16.mxu1 %v6258_v14  ;;  %v6289_v13 = vld [vmem:[%s8284_s1 + $0x940] ss:$8 sps:$4 sm:$0xff]  }
  0xe2   : > { %3924 = vmatprep.mubr.bf16.mxu0 %v6264_v15  ;;  %v6342_v14 = vld [vmem:[%s6844_s12 + $0x1a8] ss:$100 sps:$4 sm:$0xff]   ;;  %v6351_v15 = vld [vmem:[%s6844_s12 + $0x1d0] ss:$100 sps:$4 sm:$0xff]  }
  0xe3   : > { %3542 = vmatpush1.bf16.msra.mxu1 %v6184_v16  ;;  %v6294_v16 = vld [vmem:[%s8284_s1 + $0x454] ss:$8 sps:$4 sm:$0xff]  }
  0xe4   : > { %3907 = vmatpush1.bf16.msra.mxu0 %v6187_v17  ;;  %3543 = vmatprep.subr.bf16.mxu1 %v6192_v18  ;;  %v6297_v17 = vld [vmem:[%s8284_s1 + $0x954] ss:$8 sps:$4 sm:$0xff]  }
  0xe5   : > { %3908 = vmatprep.subr.bf16.mxu0 %v6195_v19  ;;  %v6358_v18 = vld [vmem:[%s6844_s12 + $0x274] ss:$100 sps:$4 sm:$0xff]   ;;  %v6364_v19 = vld [vmem:[%s6844_s12 + $0x29c] ss:$100 sps:$4 sm:$0xff]  }
  0xe7   : > { %3544 = vmatpush1.bf16.msra.mxu1 %v6190_v20  ;;  %v6292_v20 = vld [vmem:[%s8284_s1 + $0x450] ss:$8 sps:$4 sm:$0xff]  }
  0xe8   : > { %3909 = vmatpush1.bf16.msra.mxu0 %v6193_v21  ;;  %3545 = vmatprep.subr.bf16.mxu1 %v6198_v22  ;;  %v6295_v21 = vld [vmem:[%s8284_s1 + $0x950] ss:$8 sps:$4 sm:$0xff]   ;;  %v6300_v22 = vld [vmem:[%s8284_s1 + $0x464] ss:$8 sps:$4 sm:$0xff]  }
  0xe9   : > { %3910 = vmatprep.subr.bf16.mxu0 %v6201_v23  ;;  %v6303_v23 = vld [vmem:[%s8284_s1 + $0x964] ss:$8 sps:$4 sm:$0xff]  }
  0xeb   : > { %3546 = vmatpush1.bf16.msra.mxu1 %v6196_v24  ;;  %v6298_v24 = vld [vmem:[%s8284_s1 + $0x460] ss:$8 sps:$4 sm:$0xff]  }
  0xec   : > { %3911 = vmatpush1.bf16.msra.mxu0 %v6199_v25  ;;  %3547 = vmatprep.subr.bf16.mxu1 %v6206_v26  ;;  %v6301_v25 = vld [vmem:[%s8284_s1 + $0x960] ss:$8 sps:$4 sm:$0xff]   ;;  %v6360_v26 = vld [vmem:[%s6844_s12 + $0x270] ss:$100 sps:$4 sm:$0xff]  }
  0xed   : > { %3912 = vmatprep.subr.bf16.mxu0 %v6211_v27  ;;  %v6369_v27 = vld [vmem:[%s6844_s12 + $0x298] ss:$100 sps:$4 sm:$0xff]  }
  0xef   : > { %3548 = vmatpush1.bf16.msra.mxu1 %v6204_v28  ;;  %v6306_v28 = vld [vmem:[%s8284_s1 + $0x474] ss:$8 sps:$4 sm:$0xff]  }
  0xf0   : > { %3913 = vmatpush1.bf16.msra.mxu0 %v6209_v29  ;;  %3549 = vmatprep.subr.bf16.mxu1 %v6216_v30  ;;  %v6309_v29 = vld [vmem:[%s8284_s1 + $0x974] ss:$8 sps:$4 sm:$0xff]   ;;  %v6378_v30 = vld [vmem:[%s6844_s12 + $0x24] ss:$100 sps:$4 sm:$0xff]  }
  0xf1   : > { %3914 = vmatprep.subr.bf16.mxu0 %v6219_v31  ;;  %v6381_v31 = vld [vmem:[%s6844_s12 + $0x4c] ss:$100 sps:$4 sm:$0xff]  }
  0xf3   : > { %3550 = vmatpush1.bf16.msra.mxu1 %v6214_v32  ;;  %v6304_v32 = vld [vmem:[%s8284_s1 + $0x470] ss:$8 sps:$4 sm:$0xff]  }
  0xf4   : > { %3915 = vmatpush1.bf16.msra.mxu0 %v6217_v33  ;;  %3551 = vmatprep.subr.bf16.mxu1 %v6224_v34  ;;  %v6307_v33 = vld [vmem:[%s8284_s1 + $0x970] ss:$8 sps:$4 sm:$0xff]   ;;  %v6312_v34 = vld [vmem:[%s8284_s1 + $0x484] ss:$8 sps:$4 sm:$0xff]  }
  0xf5   : > { %3916 = vmatprep.subr.bf16.mxu0 %v6229_v35  ;;  %v6315_v35 = vld [vmem:[%s8284_s1 + $0x984] ss:$8 sps:$4 sm:$0xff]  }
  0xf7   : > { %3552 = vmatpush1.bf16.msra.mxu1 %v6222_v36  ;;  %v6310_v36 = vld [vmem:[%s8284_s1 + $0x480] ss:$8 sps:$4 sm:$0xff]  }
  0xf8   : > { %3917 = vmatpush1.bf16.msra.mxu0 %v6227_v37  ;;  %3553 = vmatprep.subr.bf16.mxu1 %v6234_v38  ;;  %v6313_v37 = vld [vmem:[%s8284_s1 + $0x980] ss:$8 sps:$4 sm:$0xff]   ;;  %v6318_v38 = vld [vmem:[%s8284_s1 + $0x494] ss:$8 sps:$4 sm:$0xff]  }
  0xf9   : > { %3918 = vmatprep.subr.bf16.mxu0 %v6237_v39  ;;  %v6321_v39 = vld [vmem:[%s8284_s1 + $0x994] ss:$8 sps:$4 sm:$0xff]  }
  0xfb   : > { %3554 = vmatpush1.bf16.msra.mxu1 %v6232_v40  ;;  %v6316_v40 = vld [vmem:[%s8284_s1 + $0x490] ss:$8 sps:$4 sm:$0xff]  }
  0xfc   : > { %3919 = vmatpush1.bf16.msra.mxu0 %v6235_v41  ;;  %3555 = vmatprep.subr.bf16.mxu1 %v6242_v42  ;;  %v6319_v41 = vld [vmem:[%s8284_s1 + $0x990] ss:$8 sps:$4 sm:$0xff]   ;;  %v6327_v42 = vld [vmem:[%s8284_s1 + $0x4a4] ss:$8 sps:$4 sm:$0xff]  }
  0xfd   : > { %3920 = vmatprep.subr.bf16.mxu0 %v6247_v43  ;;  %v6332_v43 = vld [vmem:[%s8284_s1 + $0x9a4] ss:$8 sps:$4 sm:$0xff]  }
  0xff   : > { %3556 = vmatpush1.bf16.msra.mxu1 %v6240_v44  ;;  %v6325_v44 = vld [vmem:[%s8284_s1 + $0x4a0] ss:$8 sps:$4 sm:$0xff]  }
 0x100   : > { %3921 = vmatpush1.bf16.msra.mxu0 %v6245_v45  ;;  %3557 = vmatprep.subr.bf16.mxu1 %v6252_v46  ;;  %v6330_v45 = vld [vmem:[%s8284_s1 + $0x9a0] ss:$8 sps:$4 sm:$0xff]   ;;  %v6336_v46 = vld [vmem:[%s8284_s1 + $0x4b4] ss:$8 sps:$4 sm:$0xff]  }
 0x101   : > { %3922 = vmatprep.subr.bf16.mxu0 %v6255_v47  ;;  %v6339_v47 = vld [vmem:[%s8284_s1 + $0x9b4] ss:$8 sps:$4 sm:$0xff]  }
 0x103   : > { %3558 = vmatpush1.bf16.msra.mxu1 %v6250_v48  ;;  %v6334_v48 = vld [vmem:[%s8284_s1 + $0x4b0] ss:$8 sps:$4 sm:$0xff]  }
 0x104   : > { %3923 = vmatpush1.bf16.msra.mxu0 %v6253_v49  ;;  %3600 = vmatprep.subr.bf16.mxu1 %v6261_v50  ;;  %v6337_v49 = vld [vmem:[%s8284_s1 + $0x9b0] ss:$8 sps:$4 sm:$0xff]   ;;  %v6345_v50 = vld [vmem:[%s8284_s1 + $0x4c4] ss:$8 sps:$4 sm:$0xff]  }
 0x105   : > { %3965 = vmatprep.subr.bf16.mxu0 %v6267_v51  ;;  %v6350_v51 = vld [vmem:[%s8284_s1 + $0x9c4] ss:$8 sps:$4 sm:$0xff]  }
 0x106   : > { %3560 = vmatmul.mubr.bf16.vlgmr.msra.gmra.mrb[0].mxu1 %v6256_v52  ;;  %v6343_v52 = vld [vmem:[%s8284_s1 + $0x4c0] ss:$8 sps:$4 sm:$0xff]  }
 0x107   : > { %3925 = vmatmul.mubr.bf16.vlgmr.msra.gmra.mrb[0].mxu0 %v6262_v54  ;;  %3601 = vmatpush1.bf16.msra.mxu1 %v6259_v53  ;;  %v6348_v53 = vld [vmem:[%s8284_s1 + $0x9c0] ss:$8 sps:$4 sm:$0xff]   ;;  %v6354_v54 = vld [vmem:[%s8284_s1 + $0x4d4] ss:$8 sps:$4 sm:$0xff]  }
 0x108   : > { %3966 = vmatpush1.bf16.msra.mxu0 %v6265_v55  ;;  %3602 = vmatprep.subr.bf16.mxu1 %v6270_v56  ;;  %v6357_v55 = vld [vmem:[%s8284_s1 + $0x9d4] ss:$8 sps:$4 sm:$0xff]   ;;  %v6352_v56 = vld [vmem:[%s8284_s1 + $0x4d0] ss:$8 sps:$4 sm:$0xff]  }
 0x109   : > { %3967 = vmatprep.subr.bf16.mxu0 %v6273_v57  ;;  %3569 = vmatprep.mubr.bf16.mxu1 %v6322_v58  ;;  %v6355_v57 = vld [vmem:[%s8284_s1 + $0x9d0] ss:$8 sps:$4 sm:$0xff]   ;;  %v6363_v58 = vld [vmem:[%s8284_s1 + $0x4e4] ss:$8 sps:$4 sm:$0xff]  }
 0x10a   : > { %3934 = vmatprep.mubr.bf16.mxu0 %v6328_v59  ;;  %v6368_v59 = vld [vmem:[%s8284_s1 + $0x9e4] ss:$8 sps:$4 sm:$0xff]  }
 0x10b   : > { %3603 = vmatpush1.bf16.msra.mxu1 %v6268_v60  ;;  %v6361_v60 = vld [vmem:[%s8284_s1 + $0x4e0] ss:$8 sps:$4 sm:$0xff]  }
 0x10c   : > { %3968 = vmatpush1.bf16.msra.mxu0 %v6271_v61  ;;  %3604 = vmatprep.subr.bf16.mxu1 %v6276_v62  ;;  %v6366_v61 = vld [vmem:[%s8284_s1 + $0x9e0] ss:$8 sps:$4 sm:$0xff]   ;;  %v6372_v62 = vld [vmem:[%s8284_s1 + $0x4f4] ss:$8 sps:$4 sm:$0xff]  }
 0x10d   : > { %3969 = vmatprep.subr.bf16.mxu0 %v6279_v63  ;;  %v6375_v63 = vld [vmem:[%s8284_s1 + $0x9f4] ss:$8 sps:$4 sm:$0xff]  }
 0x10e   : > { %3570 = vmatmul.mubr.bf16.gmra.mrb[4].mxu1 %v6324_v2  ;;  %v6384_v2 = vld [vmem:[%s8284_s1 + $0xa04] ss:$8 sps:$4 sm:$0xff]  }
 0x10f   : > { %3935 = vmatmul.mubr.bf16.gmra.mrb[4].mxu0 %v6333_v3  ;;  %3605 = vmatpush1.bf16.msra.mxu1 %v6274_v0  ;;  %v6370_v0 = vld [vmem:[%s8284_s1 + $0x4f0] ss:$8 sps:$4 sm:$0xff]   ;;  %v6376_v3 = vld [vmem:[%s6844_s12 + $0x20] ss:$100 sps:$4 sm:$0xff]  }
 0x110   : > { %3970 = vmatpush1.bf16.msra.mxu0 %v6277_v1  ;;  %3606 = vmatprep.subr.bf16.mxu1 %v6282_v4  ;;  %v6373_v1 = vld [vmem:[%s8284_s1 + $0x9f0] ss:$8 sps:$4 sm:$0xff]   ;;  %v6379_v4 = vld [vmem:[%s6844_s12 + $0x48] ss:$100 sps:$4 sm:$0xff]  }
 0x111   : > { %3971 = vmatprep.subr.bf16.mxu0 %v6285_v5  ;;  %3579 = vmatprep.mubr.bf16.mxu1 %v6340_v6  ;;  %v6382_v5 = vld [vmem:[%s8284_s1 + $0xa00] ss:$8 sps:$4 sm:$0xff]   ;;  %v6387_v6 = vld [vmem:[%s8284_s1 + $0xa14] ss:$8 sps:$4 sm:$0xff]  }
 0x112   : > { %3944 = vmatprep.mubr.bf16.mxu0 %v6346_v7  ;;  %v6388_v7 = vld [vmem:[%s6844_s12 + $0xec] ss:$100 sps:$4 sm:$0xff]  }
 0x113   : > { %3607 = vmatpush1.bf16.msra.mxu1 %v6280_v8  ;;  %v6421_v8 = vld [vmem:[%s6844_s12 + $0x114] ss:$100 sps:$4 sm:$0xff]  }
 0x114   : > { %3972 = vmatpush1.bf16.msra.mxu0 %v6283_v9  ;;  %3608 = vmatprep.subr.bf16.mxu1 %v6288_v10  ;;  %v6385_v9 = vld [vmem:[%s8284_s1 + $0xa10] ss:$8 sps:$4 sm:$0xff]   ;;  %v6393_v10 = vld [vmem:[%s8284_s1 + $0xa24] ss:$8 sps:$4 sm:$0xff]  }
 0x115   : > { %3973 = vmatprep.subr.bf16.mxu0 %v6291_v11  ;;  %v6390_v11 = vld [vmem:[%s6844_s12 + $0xe8] ss:$100 sps:$4 sm:$0xff]  }
 0x116   : > { %3580 = vmatmul.mubr.bf16.gmra.mrb[8].mxu1 %v6342_v14  ;;  %v6396_v14 = vld [vmem:[%s8284_s1 + $0xa34] ss:$8 sps:$4 sm:$0xff]  }
 0x117   : > { %3945 = vmatmul.mubr.bf16.gmra.mrb[8].mxu0 %v6351_v15  ;;  %3609 = vmatpush1.bf16.msra.mxu1 %v6286_v12  ;;  %v6426_v12 = vld [vmem:[%s6844_s12 + $0x110] ss:$100 sps:$4 sm:$0xff]  }
 0x118   : > { %3974 = vmatpush1.bf16.msra.mxu0 %v6289_v13  ;;  %3610 = vmatprep.subr.bf16.mxu1 %v6294_v16  ;;  %v6391_v13 = vld [vmem:[%s8284_s1 + $0xa20] ss:$8 sps:$4 sm:$0xff]   ;;  %v6397_v15 = vld [vmem:[%s6844_s12 + $0x1b4] ss:$100 sps:$4 sm:$0xff]  }
 0x119   : > { %3975 = vmatprep.subr.bf16.mxu0 %v6297_v17  ;;  %3589 = vmatprep.mubr.bf16.mxu1 %v6358_v18  ;;  %v6430_v16 = vld [vmem:[%s6844_s12 + $0x1dc] ss:$100 sps:$4 sm:$0xff]   ;;  %v6394_v17 = vld [vmem:[%s8284_s1 + $0xa30] ss:$8 sps:$4 sm:$0xff]   ;;  %v6402_v18 = vld [vmem:[%s8284_s1 + $0xa44] ss:$8 sps:$4 sm:$0xff]  }
 0x11a   : > { %3954 = vmatprep.mubr.bf16.mxu0 %v6364_v19  ;;  %v6399_v19 = vld [vmem:[%s6844_s12 + $0x1b0] ss:$100 sps:$4 sm:$0xff]  }
 0x11b   : > { %3611 = vmatpush1.bf16.msra.mxu1 %v6292_v20  ;;  %v6435_v20 = vld [vmem:[%s6844_s12 + $0x1d8] ss:$100 sps:$4 sm:$0xff]  }
 0x11c   : > { %3976 = vmatpush1.bf16.msra.mxu0 %v6295_v21  ;;  %3612 = vmatprep.subr.bf16.mxu1 %v6300_v22  ;;  %v6400_v21 = vld [vmem:[%s8284_s1 + $0xa40] ss:$8 sps:$4 sm:$0xff]   ;;  %v6405_v22 = vld [vmem:[%s8284_s1 + $0xa54] ss:$8 sps:$4 sm:$0xff]  }
 0x11d   : > { %3977 = vmatprep.subr.bf16.mxu0 %v6303_v23  ;;  %v6406_v23 = vld [vmem:[%s6844_s12 + $0x27c] ss:$100 sps:$4 sm:$0xff]  }
 0x11e   : > { %3590 = vmatmul.mubr.bf16.gmra.mrb[12].mxu1 %v6360_v26  ;;  %v6411_v26 = vld [vmem:[%s8284_s1 + $0xa64] ss:$8 sps:$4 sm:$0xff]  }
 0x11f   : > { %3955 = vmatmul.mubr.bf16.gmra.mrb[12].mxu0 %v6369_v27  ;;  %3613 = vmatpush1.bf16.msra.mxu1 %v6298_v24  ;;  %v6439_v24 = vld [vmem:[%s6844_s12 + $0x2a4] ss:$100 sps:$4 sm:$0xff]   ;;  %v6408_v27 = vld [vmem:[%s6844_s12 + $0x278] ss:$100 sps:$4 sm:$0xff]  }
 0x120   : > { %3978 = vmatpush1.bf16.msra.mxu0 %v6301_v25  ;;  %3614 = vmatprep.subr.bf16.mxu1 %v6306_v28  ;;  %v6403_v25 = vld [vmem:[%s8284_s1 + $0xa50] ss:$8 sps:$4 sm:$0xff]   ;;  %v6444_v28 = vld [vmem:[%s6844_s12 + $0x2a0] ss:$100 sps:$4 sm:$0xff]  }
 0x121   : > { %3979 = vmatprep.subr.bf16.mxu0 %v6309_v29  ;;  %3632 = vmatprep.mubr.bf16.mxu1 %v6378_v30  ;;  %v6409_v29 = vld [vmem:[%s8284_s1 + $0xa60] ss:$8 sps:$4 sm:$0xff]   ;;  %v6450_v30 = vld [vmem:[%s6844_s12 + $0x54] ss:$100 sps:$4 sm:$0xff]  }
 0x122   : > { %3997 = vmatprep.mubr.bf16.mxu0 %v6381_v31  ;;  %v6414_v31 = vld [vmem:[%s8284_s1 + $0xa74] ss:$8 sps:$4 sm:$0xff]  }
 0x123   : > { %3615 = vmatpush1.bf16.msra.mxu1 %v6304_v32  ;;  %v6412_v32 = vld [vmem:[%s8284_s1 + $0xa70] ss:$8 sps:$4 sm:$0xff]  }
 0x124   : > { %3980 = vmatpush1.bf16.msra.mxu0 %v6307_v33  ;;  %3616 = vmatprep.subr.bf16.mxu1 %v6312_v34  ;;  %v6417_v33 = vld [vmem:[%s8284_s1 + $0xa84] ss:$8 sps:$4 sm:$0xff]   ;;  %v6415_v34 = vld [vmem:[%s8284_s1 + $0xa80] ss:$8 sps:$4 sm:$0xff]  }
 0x125   : > { %3981 = vmatprep.subr.bf16.mxu0 %v6315_v35  ;;  %v6420_v35 = vld [vmem:[%s8284_s1 + $0xa94] ss:$8 sps:$4 sm:$0xff]  }
 0x127   : > { %3617 = vmatpush1.bf16.msra.mxu1 %v6310_v36  ;;  %v6418_v36 = vld [vmem:[%s8284_s1 + $0xa90] ss:$8 sps:$4 sm:$0xff]  }
 0x128   : > { %3982 = vmatpush1.bf16.msra.mxu0 %v6313_v37  ;;  %3618 = vmatprep.subr.bf16.mxu1 %v6318_v38  ;;  %v6425_v37 = vld [vmem:[%s8284_s1 + $0xaa4] ss:$8 sps:$4 sm:$0xff]   ;;  %v6423_v38 = vld [vmem:[%s8284_s1 + $0xaa0] ss:$8 sps:$4 sm:$0xff]  }
 0x129   : > { %3983 = vmatprep.subr.bf16.mxu0 %v6321_v39  ;;  %v6429_v39 = vld [vmem:[%s8284_s1 + $0xab4] ss:$8 sps:$4 sm:$0xff]  }
 0x12b   : > { %3619 = vmatpush1.bf16.msra.mxu1 %v6316_v40  ;;  %v6427_v40 = vld [vmem:[%s8284_s1 + $0xab0] ss:$8 sps:$4 sm:$0xff]  }
 0x12c   : > { %3984 = vmatpush1.bf16.msra.mxu0 %v6319_v41  ;;  %3620 = vmatprep.subr.bf16.mxu1 %v6327_v42  ;;  %v6434_v41 = vld [vmem:[%s8284_s1 + $0xac4] ss:$8 sps:$4 sm:$0xff]   ;;  %v6432_v42 = vld [vmem:[%s8284_s1 + $0xac0] ss:$8 sps:$4 sm:$0xff]  }
 0x12d   : > { %3985 = vmatprep.subr.bf16.mxu0 %v6332_v43  ;;  %v6438_v43 = vld [vmem:[%s8284_s1 + $0xad4] ss:$8 sps:$4 sm:$0xff]  }
 0x12f   : > { %3621 = vmatpush1.bf16.msra.mxu1 %v6325_v44  ;;  %v6436_v44 = vld [vmem:[%s8284_s1 + $0xad0] ss:$8 sps:$4 sm:$0xff]  }
 0x130   : > { %3986 = vmatpush1.bf16.msra.mxu0 %v6330_v45  ;;  %3622 = vmatprep.subr.bf16.mxu1 %v6336_v46  ;;  %v6443_v45 = vld [vmem:[%s8284_s1 + $0xae4] ss:$8 sps:$4 sm:$0xff]   ;;  %v6441_v46 = vld [vmem:[%s8284_s1 + $0xae0] ss:$8 sps:$4 sm:$0xff]  }
 0x131   : > { %3987 = vmatprep.subr.bf16.mxu0 %v6339_v47  ;;  %v6447_v47 = vld [vmem:[%s8284_s1 + $0xaf4] ss:$8 sps:$4 sm:$0xff]  }
 0x133   : > { %3623 = vmatpush1.bf16.msra.mxu1 %v6334_v48  ;;  %v6445_v48 = vld [vmem:[%s8284_s1 + $0xaf0] ss:$8 sps:$4 sm:$0xff]  }
 0x134   : > { %3988 = vmatpush1.bf16.msra.mxu0 %v6337_v49  ;;  %3624 = vmatprep.subr.bf16.mxu1 %v6345_v50  ;;  %v6453_v49 = vld [vmem:[%s8284_s1 + $0xb04] ss:$8 sps:$4 sm:$0xff]   ;;  %v6448_v50 = vld [vmem:[%s6844_s12 + $0x50] ss:$100 sps:$4 sm:$0xff]  }
 0x135   : > { %3989 = vmatprep.subr.bf16.mxu0 %v6350_v51  ;;  %v6451_v51 = vld [vmem:[%s8284_s1 + $0xb00] ss:$8 sps:$4 sm:$0xff]  }
 0x137   : > { %3625 = vmatpush1.bf16.msra.mxu1 %v6343_v52  ;;  %v6481_v52 = vld [vmem:[%s6844_s12 + $0x11c] ss:$100 sps:$4 sm:$0xff]  }
 0x138   : > { %3990 = vmatpush1.bf16.msra.mxu0 %v6348_v53  ;;  %3626 = vmatprep.subr.bf16.mxu1 %v6354_v54  ;;  %v6456_v53 = vld [vmem:[%s8284_s1 + $0xb14] ss:$8 sps:$4 sm:$0xff]   ;;  %v6454_v54 = vld [vmem:[%s8284_s1 + $0xb10] ss:$8 sps:$4 sm:$0xff]  }
 0x139   : > { %3991 = vmatprep.subr.bf16.mxu0 %v6357_v55  ;;  %v6459_v55 = vld [vmem:[%s8284_s1 + $0xb24] ss:$8 sps:$4 sm:$0xff]  }
 0x13b   : > { %3627 = vmatpush1.bf16.msra.mxu1 %v6352_v56  ;;  %v6483_v56 = vld [vmem:[%s6844_s12 + $0x118] ss:$100 sps:$4 sm:$0xff]  }
 0x13c   : > { %3992 = vmatpush1.bf16.msra.mxu0 %v6355_v57  ;;  %3628 = vmatprep.subr.bf16.mxu1 %v6363_v58  ;;  %v6457_v57 = vld [vmem:[%s8284_s1 + $0xb20] ss:$8 sps:$4 sm:$0xff]  }
 0x13d   : > { %3993 = vmatprep.subr.bf16.mxu0 %v6368_v59  ;;  %v6490_v58 = vld [vmem:[%s6844_s12 + $0x1e4] ss:$100 sps:$4 sm:$0xff]   ;;  %v6462_v59 = vld [vmem:[%s8284_s1 + $0xb34] ss:$8 sps:$4 sm:$0xff]  }
 0x13f   : > { %3629 = vmatpush1.bf16.msra.mxu1 %v6361_v60  ;;  %v6460_v60 = vld [vmem:[%s8284_s1 + $0xb30] ss:$8 sps:$4 sm:$0xff]  }
 0x140   : > { %3994 = vmatpush1.bf16.msra.mxu0 %v6366_v61  ;;  %3630 = vmatprep.subr.bf16.mxu1 %v6372_v62  ;;  %v6465_v61 = vld [vmem:[%s8284_s1 + $0xb44] ss:$8 sps:$4 sm:$0xff]  }
 0x141   : > { %3995 = vmatprep.subr.bf16.mxu0 %v6375_v63  ;;  %v6492_v62 = vld [vmem:[%s6844_s12 + $0x1e0] ss:$100 sps:$4 sm:$0xff]  }
 0x142   : > { %v6463_v63 = vld [vmem:[%s8284_s1 + $0xb40] ss:$8 sps:$4 sm:$0xff]  }
 0x143   : > { %3631 = vmatpush1.bf16.msra.mxu1 %v6370_v0  ;;  %v6499_v0 = vld [vmem:[%s6844_s12 + $0x2ac] ss:$100 sps:$4 sm:$0xff]  }
 0x144   : > { %3996 = vmatpush1.bf16.msra.mxu0 %v6373_v1  ;;  %v6468_v1 = vld [vmem:[%s8284_s1 + $0xb54] ss:$8 sps:$4 sm:$0xff]  }
 0x145   : > { %4038 = vmatprep.subr.bf16.mxu0 %v6384_v2  ;;  %v6466_v2 = vld [vmem:[%s8284_s1 + $0xb50] ss:$8 sps:$4 sm:$0xff]  }
 0x146   : > { %3633 = vmatmul.mubr.bf16.vlgmr.msra.gmra.mrb[0].mxu1 %v6376_v3  ;;  %v6471_v3 = vld [vmem:[%s8284_s1 + $0xb64] ss:$8 sps:$4 sm:$0xff]  }
 0x147   : > { %3998 = vmatmul.mubr.bf16.vlgmr.msra.gmra.mrb[0].mxu0 %v6379_v4  ;;  %3642 = vmatprep.mubr.bf16.mxu1 %v6388_v7  ;;  %v6501_v4 = vld [vmem:[%s6844_s12 + $0x2a8] ss:$100 sps:$4 sm:$0xff]   ;;  %v6474_v7 = vld [vmem:[%s8284_s1 + $0xb74] ss:$8 sps:$4 sm:$0xff]  }
 0x148   : > { %4039 = vmatpush1.bf16.msra.mxu0 %v6382_v5  ;;  %4007 = vmatprep.mubr.bf16.mxu0 %v6421_v8  ;;  %v6469_v5 = vld [vmem:[%s8284_s1 + $0xb60] ss:$8 sps:$4 sm:$0xff]   ;;  %v6472_v8 = vld [vmem:[%s8284_s1 + $0xb70] ss:$8 sps:$4 sm:$0xff]  }
 0x149   : > { %4040 = vmatprep.subr.bf16.mxu0 %v6387_v6  ;;  %v6510_v6 = vld [vmem:[%s6844_s12 + $0x5c] ss:$100 sps:$4 sm:$0xff]  }
 0x14c   : > { %4041 = vmatpush1.bf16.msra.mxu0 %v6385_v9  ;;  %v6477_v9 = vld [vmem:[%s8284_s1 + $0xb84] ss:$8 sps:$4 sm:$0xff]  }
 0x14d   : > { %4042 = vmatprep.subr.bf16.mxu0 %v6393_v10  ;;  %v6475_v10 = vld [vmem:[%s8284_s1 + $0xb80] ss:$8 sps:$4 sm:$0xff]  }
 0x14e   : > { %3643 = vmatmul.mubr.bf16.gmra.mrb[4].mxu1 %v6390_v11  ;;  %v6480_v11 = vld [vmem:[%s8284_s1 + $0xb94] ss:$8 sps:$4 sm:$0xff]  }
 0x14f   : > { %4008 = vmatmul.mubr.bf16.gmra.mrb[4].mxu0 %v6426_v12  ;;  %3652 = vmatprep.mubr.bf16.mxu1 %v6397_v15  ;;  %v6478_v12 = vld [vmem:[%s8284_s1 + $0xb90] ss:$8 sps:$4 sm:$0xff]   ;;  %v6489_v15 = vld [vmem:[%s8284_s1 + $0xbb4] ss:$8 sps:$4 sm:$0xff]  }
 0x150   : > { %4043 = vmatpush1.bf16.msra.mxu0 %v6391_v13  ;;  %4017 = vmatprep.mubr.bf16.mxu0 %v6430_v16  ;;  %v6486_v13 = vld [vmem:[%s8284_s1 + $0xba4] ss:$8 sps:$4 sm:$0xff]   ;;  %v6487_v16 = vld [vmem:[%s8284_s1 + $0xbb0] ss:$8 sps:$4 sm:$0xff]  }
 0x151   : > { %4044 = vmatprep.subr.bf16.mxu0 %v6396_v14  ;;  %v6484_v14 = vld [vmem:[%s8284_s1 + $0xba0] ss:$8 sps:$4 sm:$0xff]  }
 0x154   : > { %4045 = vmatpush1.bf16.msra.mxu0 %v6394_v17  ;;  %v6495_v17 = vld [vmem:[%s8284_s1 + $0xbc4] ss:$8 sps:$4 sm:$0xff]  }
 0x155   : > { %4046 = vmatprep.subr.bf16.mxu0 %v6402_v18  ;;  %v6493_v18 = vld [vmem:[%s8284_s1 + $0xbc0] ss:$8 sps:$4 sm:$0xff]  }
 0x156   : > { %3653 = vmatmul.mubr.bf16.gmra.mrb[8].mxu1 %v6399_v19  ;;  %v6498_v19 = vld [vmem:[%s8284_s1 + $0xbd4] ss:$8 sps:$4 sm:$0xff]  }
 0x157   : > { %4018 = vmatmul.mubr.bf16.gmra.mrb[8].mxu0 %v6435_v20  ;;  %3662 = vmatprep.mubr.bf16.mxu1 %v6406_v23  ;;  %v6548_v20 = vld [vmem:[%s8286_s3] ss:$8 sps:$4 sm:$0xff]   ;;  %v6496_v23 = vld [vmem:[%s8284_s1 + $0xbd0] ss:$8 sps:$4 sm:$0xff]  }
 0x158   : > { %4047 = vmatpush1.bf16.msra.mxu0 %v6400_v21  ;;  %4027 = vmatprep.mubr.bf16.mxu0 %v6439_v24  ;;  %v6550_v21 = vld [vmem:[%s8286_s3 + $0x4] ss:$8 sps:$4 sm:$0xff]  }
 0x159   : > { %4048 = vmatprep.subr.bf16.mxu0 %v6405_v22  ;;  %v6553_v22 = vld [vmem:[%s8286_s3 + $0x14] ss:$8 sps:$4 sm:$0xff]   ;;  %4485 = vmatprep.subr.bf16.mxu1 %v6550_v21  ;;  %v6504_v24 = vld [vmem:[%s8284_s1 + $0xbe4] ss:$8 sps:$4 sm:$0xff]  }
 0x15a   : > { %4486 = vmatpush1.bf16.msra.mxu1 %v6548_v20 }
 0x15b   : > { %4487 = vmatprep.subr.bf16.mxu1 %v6553_v22 }
 0x15c   : > { %4049 = vmatpush1.bf16.msra.mxu0 %v6403_v25  ;;  %v6551_v25 = vld [vmem:[%s8286_s3 + $0x10] ss:$8 sps:$4 sm:$0xff]  }
 0x15d   : > { %4050 = vmatprep.subr.bf16.mxu0 %v6411_v26  ;;  %v6556_v26 = vld [vmem:[%s8286_s3 + $0x24] ss:$8 sps:$4 sm:$0xff]  }
 0x15e   : > { %3663 = vmatmul.mubr.bf16.gmra.mrb[12].mxu1 %v6408_v27  ;;  %v6502_v27 = vld [vmem:[%s8284_s1 + $0xbe0] ss:$8 sps:$4 sm:$0xff]  }
 0x15f   : > { %4028 = vmatmul.mubr.bf16.gmra.mrb[12].mxu0 %v6444_v28  ;;  %v6507_v28 = vld [vmem:[%s8284_s1 + $0xbf4] ss:$8 sps:$4 sm:$0xff]   ;;  %4488 = vmatpush1.bf16.msra.mxu1 %v6551_v25 }
 0x160   : > { %4051 = vmatpush1.bf16.msra.mxu0 %v6409_v29  ;;  %4070 = vmatprep.mubr.bf16.mxu0 %v6450_v30  ;;  %v6554_v29 = vld [vmem:[%s8286_s3 + $0x20] ss:$8 sps:$4 sm:$0xff]   ;;  %v6559_v30 = vld [vmem:[%s8286_s3 + $0x34] ss:$8 sps:$4 sm:$0xff]  }
 0x161   : > { %4052 = vmatprep.subr.bf16.mxu0 %v6414_v31  ;;  %4489 = vmatprep.subr.bf16.mxu1 %v6556_v26  ;;  %v6505_v31 = vld [vmem:[%s8284_s1 + $0xbf0] ss:$8 sps:$4 sm:$0xff]  }
 0x163   : > { %4490 = vmatpush1.bf16.msra.mxu1 %v6554_v29 }
 0x164   : > { %4053 = vmatpush1.bf16.msra.mxu0 %v6412_v32  ;;  %v6513_v32 = vld [vmem:[%s8284_s1 + $0xc04] ss:$8 sps:$4 sm:$0xff]   ;;  %4491 = vmatprep.subr.bf16.mxu1 %v6559_v30 }
 0x165   : > { %4054 = vmatprep.subr.bf16.mxu0 %v6417_v33  ;;  %v6557_v33 = vld [vmem:[%s8286_s3 + $0x30] ss:$8 sps:$4 sm:$0xff]  }
 0x167   : > { %4492 = vmatpush1.bf16.msra.mxu1 %v6557_v33  ;;  %v6592_v33 = vld [vmem:[%s8286_s3 + $0xe4] ss:$8 sps:$4 sm:$0xff]  }
 0x168   : > { %4055 = vmatpush1.bf16.msra.mxu0 %v6415_v34  ;;  %v6562_v34 = vld [vmem:[%s8286_s3 + $0x44] ss:$8 sps:$4 sm:$0xff]  }
 0x169   : > { %4056 = vmatprep.subr.bf16.mxu0 %v6420_v35  ;;  %v6508_v35 = vld [vmem:[%s6844_s12 + $0x58] ss:$100 sps:$4 sm:$0xff]   ;;  %4493 = vmatprep.subr.bf16.mxu1 %v6562_v34  ;;  %v6590_v34 = vld [vmem:[%s8286_s3 + $0xe0] ss:$8 sps:$4 sm:$0xff]  }
 0x16c   : > { %4057 = vmatpush1.bf16.msra.mxu0 %v6418_v36  ;;  %v6511_v36 = vld [vmem:[%s8284_s1 + $0xc00] ss:$8 sps:$4 sm:$0xff]  }
 0x16d   : > { %4058 = vmatprep.subr.bf16.mxu0 %v6425_v37  ;;  %v6517_v37 = vld [vmem:[%s6844_s12 + $0x124] ss:$100 sps:$4 sm:$0xff]  }
 0x170   : > { %4059 = vmatpush1.bf16.msra.mxu0 %v6423_v38  ;;  %v6516_v38 = vld [vmem:[%s8284_s1 + $0xc14] ss:$8 sps:$4 sm:$0xff]  }
 0x171   : > { %4060 = vmatprep.subr.bf16.mxu0 %v6429_v39  ;;  %v6560_v39 = vld [vmem:[%s8286_s3 + $0x40] ss:$8 sps:$4 sm:$0xff]  }
 0x172   : > { %4494 = vmatpush1.bf16.msra.mxu1 %v6560_v39 }
 0x174   : > { %4061 = vmatpush1.bf16.msra.mxu0 %v6427_v40  ;;  %v6565_v40 = vld [vmem:[%s8286_s3 + $0x54] ss:$8 sps:$4 sm:$0xff]  }
 0x175   : > { %4062 = vmatprep.subr.bf16.mxu0 %v6434_v41  ;;  %v6514_v41 = vld [vmem:[%s8284_s1 + $0xc10] ss:$8 sps:$4 sm:$0xff]   ;;  %4495 = vmatprep.subr.bf16.mxu1 %v6565_v40 }
 0x178   : > { %4063 = vmatpush1.bf16.msra.mxu0 %v6432_v42  ;;  %v6522_v42 = vld [vmem:[%s8284_s1 + $0xc24] ss:$8 sps:$4 sm:$0xff]  }
 0x179   : > { %4064 = vmatprep.subr.bf16.mxu0 %v6438_v43  ;;  %v6563_v43 = vld [vmem:[%s8286_s3 + $0x50] ss:$8 sps:$4 sm:$0xff]  }
 0x17a   : > { %4496 = vmatpush1.bf16.msra.mxu1 %v6563_v43 }
 0x17c   : > { %4065 = vmatpush1.bf16.msra.mxu0 %v6436_v44  ;;  %v6568_v44 = vld [vmem:[%s8286_s3 + $0x64] ss:$8 sps:$4 sm:$0xff]  }
 0x17d   : > { %4066 = vmatprep.subr.bf16.mxu0 %v6443_v45  ;;  %v6519_v45 = vld [vmem:[%s6844_s12 + $0x120] ss:$100 sps:$4 sm:$0xff]   ;;  %4497 = vmatprep.subr.bf16.mxu1 %v6568_v44 }
 0x180   : > { %4067 = vmatpush1.bf16.msra.mxu0 %v6441_v46  ;;  %v6520_v46 = vld [vmem:[%s8284_s1 + $0xc20] ss:$8 sps:$4 sm:$0xff]  }
 0x181   : > { %4068 = vmatprep.subr.bf16.mxu0 %v6447_v47  ;;  %v6526_v47 = vld [vmem:[%s6844_s12 + $0x1ec] ss:$100 sps:$4 sm:$0xff]  }
 0x184   : > { %4069 = vmatpush1.bf16.msra.mxu0 %v6445_v48  ;;  %v6525_v48 = vld [vmem:[%s8284_s1 + $0xc34] ss:$8 sps:$4 sm:$0xff]  }
 0x185   : > { %4111 = vmatprep.subr.bf16.mxu0 %v6453_v49  ;;  %v6566_v49 = vld [vmem:[%s8286_s3 + $0x60] ss:$8 sps:$4 sm:$0xff]  }
 0x186   : > { %4498 = vmatpush1.bf16.msra.mxu1 %v6566_v49 }
 0x187   : > { %4071 = vmatmul.mubr.bf16.vlgmr.msra.gmra.mrb[0].mxu0 %v6448_v50  ;;  %v6571_v50 = vld [vmem:[%s8286_s3 + $0x74] ss:$8 sps:$4 sm:$0xff]  }
 0x188   : > { %4112 = vmatpush1.bf16.msra.mxu0 %v6451_v51  ;;  %4080 = vmatprep.mubr.bf16.mxu0 %v6481_v52  ;;  %v6523_v51 = vld [vmem:[%s8284_s1 + $0xc30] ss:$8 sps:$4 sm:$0xff]   ;;  %v6531_v52 = vld [vmem:[%s8284_s1 + $0xc44] ss:$8 sps:$4 sm:$0xff]  }
 0x189   : > { %4113 = vmatprep.subr.bf16.mxu0 %v6456_v53  ;;  %v6569_v53 = vld [vmem:[%s8286_s3 + $0x70] ss:$8 sps:$4 sm:$0xff]   ;;  %4499 = vmatprep.subr.bf16.mxu1 %v6571_v50 }
 0x18a   : > { %4500 = vmatpush1.bf16.msra.mxu1 %v6569_v53 }
 0x18c   : > { %4114 = vmatpush1.bf16.msra.mxu0 %v6454_v54  ;;  %v6574_v54 = vld [vmem:[%s8286_s3 + $0x84] ss:$8 sps:$4 sm:$0xff]  }
 0x18d   : > { %4115 = vmatprep.subr.bf16.mxu0 %v6459_v55  ;;  %v6528_v55 = vld [vmem:[%s6844_s12 + $0x1e8] ss:$100 sps:$4 sm:$0xff]   ;;  %4501 = vmatprep.subr.bf16.mxu1 %v6574_v54 }
 0x18f   : > { %4081 = vmatmul.mubr.bf16.gmra.mrb[4].mxu0 %v6483_v56  ;;  %v6529_v56 = vld [vmem:[%s8284_s1 + $0xc40] ss:$8 sps:$4 sm:$0xff]  }
 0x190   : > { %4116 = vmatpush1.bf16.msra.mxu0 %v6457_v57  ;;  %4090 = vmatprep.mubr.bf16.mxu0 %v6490_v58  ;;  %v6535_v57 = vld [vmem:[%s6844_s12 + $0x2b4] ss:$100 sps:$4 sm:$0xff]  }
 0x191   : > { %4117 = vmatprep.subr.bf16.mxu0 %v6462_v59  ;;  %v6534_v58 = vld [vmem:[%s8284_s1 + $0xc54] ss:$8 sps:$4 sm:$0xff]   ;;  %v6572_v59 = vld [vmem:[%s8286_s3 + $0x80] ss:$8 sps:$4 sm:$0xff]  }
 0x192   : > { %4502 = vmatpush1.bf16.msra.mxu1 %v6572_v59 }
 0x194   : > { %4118 = vmatpush1.bf16.msra.mxu0 %v6460_v60  ;;  %v6577_v60 = vld [vmem:[%s8286_s3 + $0x94] ss:$8 sps:$4 sm:$0xff]  }
 0x195   : > { %4119 = vmatprep.subr.bf16.mxu0 %v6465_v61  ;;  %v6532_v61 = vld [vmem:[%s8284_s1 + $0xc50] ss:$8 sps:$4 sm:$0xff]   ;;  %4503 = vmatprep.subr.bf16.mxu1 %v6577_v60 }
 0x197   : > { %4091 = vmatmul.mubr.bf16.gmra.mrb[8].mxu0 %v6492_v62  ;;  %v6540_v62 = vld [vmem:[%s8284_s1 + $0xc64] ss:$8 sps:$4 sm:$0xff]  }
 0x198   : > { %4120 = vmatpush1.bf16.msra.mxu0 %v6463_v63  ;;  %4100 = vmatprep.mubr.bf16.mxu0 %v6499_v0  ;;  %v6575_v63 = vld [vmem:[%s8286_s3 + $0x90] ss:$8 sps:$4 sm:$0xff]   ;;  %v6580_v0 = vld [vmem:[%s8286_s3 + $0xa4] ss:$8 sps:$4 sm:$0xff]  }
 0x199   : > { %4121 = vmatprep.subr.bf16.mxu0 %v6468_v1  ;;  %v6537_v1 = vld [vmem:[%s6844_s12 + $0x2b0] ss:$100 sps:$4 sm:$0xff]   ;;  %4504 = vmatpush1.bf16.msra.mxu1 %v6575_v63 }
 0x19a   : > { %4505 = vmatprep.subr.bf16.mxu1 %v6580_v0 }
 0x19c   : > { %4122 = vmatpush1.bf16.msra.mxu0 %v6466_v2  ;;  %v6538_v2 = vld [vmem:[%s8284_s1 + $0xc60] ss:$8 sps:$4 sm:$0xff]  }
 0x19d   : > { %4123 = vmatprep.subr.bf16.mxu0 %v6471_v3  ;;  %v6543_v3 = vld [vmem:[%s8284_s1 + $0xc74] ss:$8 sps:$4 sm:$0xff]  }
 0x19f   : > { %4101 = vmatmul.mubr.bf16.gmra.mrb[12].mxu0 %v6501_v4  ;;  %v6578_v4 = vld [vmem:[%s8286_s3 + $0xa0] ss:$8 sps:$4 sm:$0xff]  }
 0x1a0   : > { %4124 = vmatpush1.bf16.msra.mxu0 %v6469_v5  ;;  %4143 = vmatprep.mubr.bf16.mxu0 %v6510_v6  ;;  %v6583_v5 = vld [vmem:[%s8286_s3 + $0xb4] ss:$8 sps:$4 sm:$0xff]   ;;  %v6541_v6 = vld [vmem:[%s8284_s1 + $0xc70] ss:$8 sps:$4 sm:$0xff]  }
 0x1a1   : > { %4125 = vmatprep.subr.bf16.mxu0 %v6474_v7  ;;  %v6652_v7 = vmov 0   ;;  %4506 = vmatpush1.bf16.msra.mxu1 %v6578_v4 }
 0x1a2   : > { %4507 = vmatprep.subr.bf16.mxu1 %v6583_v5 }
 0x1a4   : > { %4126 = vmatpush1.bf16.msra.mxu0 %v6472_v8  ;;  %v6581_v8 = vld [vmem:[%s8286_s3 + $0xb0] ss:$8 sps:$4 sm:$0xff]  }
 0x1a5   : > { %4127 = vmatprep.subr.bf16.mxu0 %v6477_v9  ;;  %v6586_v9 = vld [vmem:[%s8286_s3 + $0xc4] ss:$8 sps:$4 sm:$0xff]   ;;  %4508 = vmatpush1.bf16.msra.mxu1 %v6581_v8 }
 0x1a6   : > { %4509 = vmatprep.subr.bf16.mxu1 %v6586_v9 }
 0x1a8   : > { %4128 = vmatpush1.bf16.msra.mxu0 %v6475_v10  ;;  %v6544_v10 = vld [vmem:[%s6844_s12 + $0x60] ss:$100 sps:$4 sm:$0xff]  }
 0x1a9   : > { %4129 = vmatprep.subr.bf16.mxu0 %v6480_v11  ;;  %v6584_v11 = vld [vmem:[%s8286_s3 + $0xc0] ss:$8 sps:$4 sm:$0xff]  }
 0x1aa   : > { %4510 = vmatpush1.bf16.msra.mxu1 %v6584_v11 }
 0x1ac   : > { %4130 = vmatpush1.bf16.msra.mxu0 %v6478_v12  ;;  %v6589_v12 = vld [vmem:[%s8286_s3 + $0xd4] ss:$8 sps:$4 sm:$0xff]  }
 0x1ad   : > { %4131 = vmatprep.subr.bf16.mxu0 %v6486_v13  ;;  %v6587_v13 = vld [vmem:[%s8286_s3 + $0xd0] ss:$8 sps:$4 sm:$0xff]   ;;  %4511 = vmatprep.subr.bf16.mxu1 %v6589_v12 }
 0x1ae   : > { %4512 = vmatpush1.bf16.msra.mxu1 %v6587_v13  ;;  %v6599_v13 = vld [vmem:[%s8288_s5 + $0x10] ss:$8 sps:$4 sm:$0xff]  }
 0x1af   : > { %4513 = vmatprep.subr.bf16.mxu1 %v6592_v33 }
 0x1b0   : > { %4132 = vmatpush1.bf16.msra.mxu0 %v6484_v14  ;;  %v6545_v14 = vld [vmem:[%s6844_s12 + $0x128] ss:$100 sps:$4 sm:$0xff]  }
 0x1b1   : > { %4133 = vmatprep.subr.bf16.mxu0 %v6489_v15  ;;  %v6546_v15 = vld [vmem:[%s6844_s12 + $0x1f0] ss:$100 sps:$4 sm:$0xff]  }
 0x1b2   : > { %4514 = vmatpush1.bf16.msra.mxu1 %v6590_v34 }
 0x1b4   : > { %4134 = vmatpush1.bf16.msra.mxu0 %v6487_v16  ;;  %v6547_v16 = vld [vmem:[%s6844_s12 + $0x2b8] ss:$100 sps:$4 sm:$0xff]  }
 0x1b5   : > { %4135 = vmatprep.subr.bf16.mxu0 %v6495_v17 }
 0x1b8   : > { %4136 = vmatpush1.bf16.msra.mxu0 %v6493_v18 }
 0x1b9   : > { %4137 = vmatprep.subr.bf16.mxu0 %v6498_v19 }
 0x1bc   : > { %4138 = vmatpush1.bf16.msra.mxu0 %v6496_v23 }
 0x1bd   : > { %4139 = vmatprep.subr.bf16.mxu0 %v6504_v24 }
 0x1c0   : > { %4140 = vmatpush1.bf16.msra.mxu0 %v6502_v27 }
 0x1c1   : > { %4141 = vmatprep.subr.bf16.mxu0 %v6507_v28 }
 0x1c4   : > { %4142 = vmatpush1.bf16.msra.mxu0 %v6505_v31 }
 0x1c5   : > { %4184 = vmatprep.subr.bf16.mxu0 %v6513_v32 }
 0x1c7   : > { %4144 = vmatmul.mubr.bf16.vlgmr.msra.gmra.mrb[0].mxu0 %v6508_v35  ;;  %v6595_v35 = vld [vmem:[%s8286_s3 + $0xf4] ss:$8 sps:$4 sm:$0xff]  }
 0x1c8   : > { %4185 = vmatpush1.bf16.msra.mxu0 %v6511_v36  ;;  %4153 = vmatprep.mubr.bf16.mxu0 %v6517_v37  ;;  %v6593_v36 = vld [vmem:[%s8286_s3 + $0xf0] ss:$8 sps:$4 sm:$0xff]   ;;  %v6598_v37 = vld [vmem:[%s8288_s5 + $0x4] ss:$8 sps:$4 sm:$0xff]  }
 0x1c9   : > { %4186 = vmatprep.subr.bf16.mxu0 %v6516_v38  ;;  %4515 = vmatprep.subr.bf16.mxu1 %v6595_v35  ;;  %v794_v38 = vlaneseq }
 0x1ca   : > { %4516 = vmatpush1.bf16.msra.mxu1 %v6593_v36 }
 0x1cb   : > { %4786 = vmatprep.subr.bf16.mxu1 %v6598_v37  ;;  %v795_v39 = vshrl.u32 %v794_v38, 7 }
 0x1cc   : > { %4187 = vmatpush1.bf16.msra.mxu0 %v6514_v41  ;;  %v792_v41 = vld [vmem:[%s8285_s2] sm:$0x3] }
 0x1cd   : > { %4188 = vmatprep.subr.bf16.mxu0 %v6522_v42  ;;  %v8126_v40 = vsub.s32 0, %v795_v39  ;;  %v8131_v42 = vsub.s32 1, %v795_v39 }
 0x1cf   : > { %4154 = vmatmul.mubr.bf16.gmra.mrb[4].mxu0 %v6519_v45  ;;  %v8134_v43 = vrot.slane %v792_v41, %v8126_v40  ;;  %v8137_v44 = vrot.slane %v792_v41, %v8131_v42 }
 0x1d0   : > { %4189 = vmatpush1.bf16.msra.mxu0 %v6520_v46  ;;  %4163 = vmatprep.mubr.bf16.mxu0 %v6526_v47 }
 0x1d1   : > { %4190 = vmatprep.subr.bf16.mxu0 %v6525_v48 }
 0x1d4   : > { %4191 = vmatpush1.bf16.msra.mxu0 %v6523_v51 }
 0x1d5   : > { %4192 = vmatprep.subr.bf16.mxu0 %v6531_v52 }
 0x1d7   : > { %4164 = vmatmul.mubr.bf16.gmra.mrb[8].mxu0 %v6528_v55 }
 0x1d8   : > { %4193 = vmatpush1.bf16.msra.mxu0 %v6529_v56  ;;  %4173 = vmatprep.mubr.bf16.mxu0 %v6535_v57 }
 0x1d9   : > { %4194 = vmatprep.subr.bf16.mxu0 %v6534_v58 }
 0x1dc   : > { %4195 = vmatpush1.bf16.msra.mxu0 %v6532_v61 }
 0x1dd   : > { %4196 = vmatprep.subr.bf16.mxu0 %v6540_v62 }
 0x1df   : > { %4174 = vmatmul.mubr.bf16.gmra.mrb[12].mxu0 %v6537_v1 }
 0x1e0   : > { %4197 = vmatpush1.bf16.msra.mxu0 %v6538_v2  ;;  %4216 = vmatprep.mubr.bf16.mxu0 %v6652_v7  ;;  %v6596_v2 = vld [vmem:[%s8288_s5] ss:$8 sps:$4 sm:$0xff]  }
 0x1e1   : > { %4198 = vmatprep.subr.bf16.mxu0 %v6543_v3 }
 0x1e4   : > { %4199 = vmatpush1.bf16.msra.mxu0 %v6541_v6  ;;  %v6601_v6 = vld [vmem:[%s8288_s5 + $0x14] ss:$8 sps:$4 sm:$0xff]  }
 0x1e7   : > { %4217 = vmatmul.mubr.bf16.vlgmr.msra.gmra.mrb[0].mxu0 %v6544_v10 }
 0x1e8   : > { %4226 = vmatprep.mubr.bf16.mxu0 %v6652_v7 }
 0x1ef   : > { %4227 = vmatmul.mubr.bf16.gmra.mrb[4].mxu0 %v6545_v14 }
 0x1f0   : > { %4236 = vmatprep.mubr.bf16.mxu0 %v6652_v7 }
 0x1f7   : > { %4237 = vmatmul.mubr.bf16.gmra.mrb[8].mxu0 %v6546_v15 }
 0x1f8   : > { %4246 = vmatprep.mubr.bf16.mxu0 %v6652_v7 }
 0x1ff   : > { %4247 = vmatmul.mubr.bf16.gmra.mrb[12].mxu0 %v6547_v16  ;;  %v6604_v16 = vld [vmem:[%s8288_s5 + $0x24] ss:$8 sps:$4 sm:$0xff]  }
 0x219   : > { %v3634_v17 = vpop.f32.mrb[0].mxu1 }
 0x21a   : > { %v3636_v18 = vpop.f32.mrb[1].mxu1  ;;  %v5582_v45 = vadd.f32 %v3634_v17, %v8134_v43 }
 0x21b   : > { %v3638_v19 = vpop.f32.mrb[2].mxu1  ;;  %v5584_v46 = vadd.f32 %v3636_v18, %v8137_v44 }
 0x21c   : > { %v3640_v20 = vpop.f32.mrb[3].mxu1  ;;  %v5586_v48 = vadd.f32 %v3638_v19, %v8134_v43 }
 0x21d   : > { %v5588_v51 = vadd.f32 %v3640_v20, %v8137_v44 }
 0x221   : > { %v3644_v21 = vpop.f32.mrb[4].mxu1 }
 0x222   : > { %v3646_v22 = vpop.f32.mrb[5].mxu1  ;;  %v5590_v61 = vadd.f32 %v3644_v21, %v8134_v43 }
 0x223   : > { %v3648_v23 = vpop.f32.mrb[6].mxu1  ;;  %v5592_v63 = vadd.f32 %v3646_v22, %v8137_v44 }
 0x224   : > { %v3650_v24 = vpop.f32.mrb[7].mxu1  ;;  %v5594_v3 = vadd.f32 %v3648_v23, %v8134_v43 }
 0x225   : > { %v5596_v7 = vadd.f32 %v3650_v24, %v8137_v44  ;;  %v6602_v24 = vld [vmem:[%s8288_s5 + $0x20] ss:$8 sps:$4 sm:$0xff]  }
 0x229   : > { %v8095_v25 = vpop.f32.mrb[8].mxu1 }
 0x22a   : > { %v8097_v26 = vpop.f32.mrb[9].mxu1  ;;  %v5598_v19 = vadd.f32 %v8095_v25, %v8134_v43  ;;  %v6607_v25 = vld [vmem:[%s8288_s5 + $0x34] ss:$8 sps:$4 sm:$0xff]  }
 0x22b   : > { %v8099_v27 = vpop.f32.mrb[10].mxu1  ;;  %v5600_v21 = vadd.f32 %v8097_v26, %v8137_v44 }
 0x22c   : > { %v8101_v28 = vpop.f32.mrb[11].mxu1  ;;  %v5602_v33 = vadd.f32 %v8099_v27, %v8134_v43  ;;  %v6605_v27 = vld [vmem:[%s8288_s5 + $0x30] ss:$8 sps:$4 sm:$0xff]  }
 0x22d   : > { %v5604_v26 = vadd.f32 %v8101_v28, %v8137_v44 }
 0x231   : > { %v8103_v29 = vpop.f32.mrb[12].mxu1 }
 0x232   : > { %v8105_v30 = vpop.f32.mrb[13].mxu1 }
 0x233   : > { %v8107_v31 = vpop.f32.mrb[14].mxu1 }
 0x234   : > { %v8109_v32 = vpop.f32.mrb[15].mxu1 }
 0x2ba   : > { %v4218_v47 = vpop.f32.mrb[0].mxu0 }
 0x2bb   : > { %v5583_v49 = vadd.f32 %v5582_v45, %v4218_v47  ;;  %v4220_v50 = vpop.f32.mrb[1].mxu0  ;;  %v6610_v47 = vld [vmem:[%s8288_s5 + $0x44] ss:$8 sps:$4 sm:$0xff]  }
 0x2bc   : > { %v5585_v52 = vadd.f32 %v5584_v46, %v4220_v50  ;;  %v4222_v53 = vpop.f32.mrb[2].mxu0 }
 0x2bd   : > { %v5587_v54 = vadd.f32 %v5586_v48, %v4222_v53  ;;  %v4224_v55 = vpop.f32.mrb[3].mxu0  ;;  %v4257_v57 = vmax.f32 %v5583_v49, 0.0  ;;  %v5606_v49 = vadd.f32 %v8103_v29, %v8134_v43  ;;  %v6613_v29 = vld [vmem:[%s8288_s5 + $0x54] ss:$8 sps:$4 sm:$0xff]  }
 0x2be   : > { %v5589_v56 = vadd.f32 %v5588_v51, %v4224_v55  ;;  %v4258_v59 = vmax.f32 %v5585_v52, 0.0  ;;  %v5608_v51 = vadd.f32 %v8105_v30, %v8137_v44  ;;  %v5610_v55 = vadd.f32 %v8107_v31, %v8134_v43  ;;  %v6611_v31 = vld [vmem:[%s8288_s5 + $0x50] ss:$8 sps:$4 sm:$0xff]  }
 0x2bf   : > { %v4259_v58 = vmax.f32 %v5587_v54, 0.0  ;;  %v6608_v54 = vld [vmem:[%s8288_s5 + $0x40] ss:$8 sps:$4 sm:$0xff]   ;;  %v5612_v30 = vadd.f32 %v8109_v32, %v8137_v44 }
 0x2c0   : > { %v4260_v60 = vmax.f32 %v5589_v56, 0.0 }
 0x2c1   : > { %v4273_v62 = vpack.c.bf16 %v4259_v58, %v4257_v57 }
 0x2c2   : > { %v4274_v0 = vpack.c.bf16 %v4260_v60, %v4258_v59  ;;  %v4228_v1 = vpop.f32.mrb[4].mxu0 }
 0x2c3   : > { %v5591_v4 = vadd.f32 %v5590_v61, %v4228_v1  ;;  %v4230_v5 = vpop.f32.mrb[5].mxu0 }
 0x2c4   : > { %v5593_v8 = vadd.f32 %v5592_v63, %v4230_v5  ;;  %v4232_v9 = vpop.f32.mrb[6].mxu0  ;;  %4517 = vmatprep.mubr.bf16.mxu1 %v4274_v0  ;;  %v6616_v0 = vld [vmem:[%s8288_s5 + $0x64] ss:$8 sps:$4 sm:$0xff]   ;;  %v6617_v5 = vld [vmem:[%s8288_s5 + $0x70] ss:$8 sps:$4 sm:$0xff]  }
 0x2c5   : > { %v5595_v10 = vadd.f32 %v5594_v3, %v4232_v9  ;;  %v4234_v11 = vpop.f32.mrb[7].mxu0  ;;  %4518 = vmatmul.mubr.bf16.vlgmr.msra.gmra.mrb[16].mxu1 %v4273_v62  ;;  %v4261_v14 = vmax.f32 %v5591_v4, 0.0  ;;  %v6614_v3 = vld [vmem:[%s8288_s5 + $0x60] ss:$8 sps:$4 sm:$0xff]   ;;  %v6619_v4 = vld [vmem:[%s8288_s5 + $0x74] ss:$8 sps:$4 sm:$0xff]  }
 0x2c6   : > { %v5597_v12 = vadd.f32 %v5596_v7, %v4234_v11  ;;  %4787 = vmatpush1.bf16.msra.mxu1 %v6596_v2  ;;  %v4262_v17 = vmax.f32 %v5593_v8, 0.0  ;;  %v6620_v7 = vld [vmem:[%s8288_s5 + $0x80] ss:$8 sps:$4 sm:$0xff]   ;;  %v6625_v8 = vld [vmem:[%s8288_s5 + $0x94] ss:$8 sps:$4 sm:$0xff]  }
 0x2c7   : > { %v4263_v15 = vmax.f32 %v5595_v10, 0.0  ;;  %4788 = vmatprep.subr.bf16.mxu1 %v6601_v6  ;;  %v6622_v6 = vld [vmem:[%s8288_s5 + $0x84] ss:$8 sps:$4 sm:$0xff]   ;;  %v6623_v9 = vld [vmem:[%s8288_s5 + $0x90] ss:$8 sps:$4 sm:$0xff]  }
 0x2c8   : > { %v4264_v18 = vmax.f32 %v5597_v12, 0.0  ;;  %v6628_v10 = vld [vmem:[%s8288_s5 + $0xa4] ss:$8 sps:$4 sm:$0xff]   ;;  %v6626_v11 = vld [vmem:[%s8288_s5 + $0xa0] ss:$8 sps:$4 sm:$0xff]  }
 0x2c9   : > { %v4275_v20 = vpack.c.bf16 %v4263_v15, %v4261_v14  ;;  %v6631_v12 = vld [vmem:[%s8288_s5 + $0xb4] ss:$8 sps:$4 sm:$0xff]   ;;  %v6634_v14 = vld [vmem:[%s8288_s5 + $0xc4] ss:$8 sps:$4 sm:$0xff]   ;;  %v6632_v15 = vld [vmem:[%s8288_s5 + $0xc0] ss:$8 sps:$4 sm:$0xff]  }
 0x2ca   : > { %v4276_v22 = vpack.c.bf16 %v4264_v18, %v4262_v17  ;;  %v4238_v23 = vpop.f32.mrb[8].mxu0  ;;  %4789 = vmatpush1.bf16.msra.mxu1 %v6599_v13  ;;  %v6629_v13 = vld [vmem:[%s8288_s5 + $0xb0] ss:$8 sps:$4 sm:$0xff]   ;;  %v6640_v18 = vld [vmem:[%s8288_s5 + $0xe4] ss:$8 sps:$4 sm:$0xff]  }
 0x2cb   : > { %v5599_v34 = vadd.f32 %v5598_v19, %v4238_v23  ;;  %v4240_v35 = vpop.f32.mrb[9].mxu0  ;;  %4790 = vmatprep.subr.bf16.mxu1 %v6604_v16  ;;  %v6637_v16 = vld [vmem:[%s8288_s5 + $0xd4] ss:$8 sps:$4 sm:$0xff]   ;;  %v6635_v17 = vld [vmem:[%s8288_s5 + $0xd0] ss:$8 sps:$4 sm:$0xff]  }
 0x2cc   : > { %v5601_v36 = vadd.f32 %v5600_v21, %v4240_v35  ;;  %v4242_v37 = vpop.f32.mrb[10].mxu0  ;;  %4527 = vmatprep.mubr.bf16.mxu1 %v4276_v22  ;;  %v6638_v19 = vld [vmem:[%s8288_s5 + $0xe0] ss:$8 sps:$4 sm:$0xff]   ;;  %v6641_v21 = vld [vmem:[%s8288_s5 + $0xf0] ss:$8 sps:$4 sm:$0xff]  }
 0x2cd   : > { %v5603_v38 = vadd.f32 %v5602_v33, %v4242_v37  ;;  %v4244_v39 = vpop.f32.mrb[11].mxu0  ;;  %4528 = vmatmul.mubr.bf16.gmra.mrb[20].mxu1 %v4275_v20  ;;  %v4265_v45 = vmax.f32 %v5599_v34, 0.0  ;;  %v6643_v20 = vld [vmem:[%s8288_s5 + $0xf4] ss:$8 sps:$4 sm:$0xff]   ;;  %v4313_v22 = vld [vmem:[%s8287_s4] sm:$0x3] }
 0x2ce   : > { %v5605_v41 = vadd.f32 %v5604_v26, %v4244_v39  ;;  %4791 = vmatpush1.bf16.msra.mxu1 %v6602_v24  ;;  %v4266_v28 = vmax.f32 %v5601_v36, 0.0  ;;  %v4318_v23 = vrot.slane %v4313_v22, %v8126_v40  ;;  %v4322_v24 = vrot.slane %v4313_v22, %v8131_v42 }
 0x2cf   : > { %v4267_v46 = vmax.f32 %v5603_v38, 0.0  ;;  %4792 = vmatprep.subr.bf16.mxu1 %v6607_v25 }
 0x2d0   : > { %v4268_v48 = vmax.f32 %v5605_v41, 0.0 }
 0x2d1   : > { %v4277_v50 = vpack.c.bf16 %v4267_v46, %v4265_v45 }
 0x2d2   : > { %v4278_v52 = vpack.c.bf16 %v4268_v48, %v4266_v28  ;;  %v4248_v53 = vpop.f32.mrb[12].mxu0  ;;  %4793 = vmatpush1.bf16.msra.mxu1 %v6605_v27 }
 0x2d3   : > { %v5607_v56 = vadd.f32 %v5606_v49, %v4248_v53  ;;  %v4250_v57 = vpop.f32.mrb[13].mxu0  ;;  %4794 = vmatprep.subr.bf16.mxu1 %v6610_v47 }
 0x2d4   : > { %v5609_v58 = vadd.f32 %v5608_v51, %v4250_v57  ;;  %v4252_v59 = vpop.f32.mrb[14].mxu0  ;;  %4537 = vmatprep.mubr.bf16.mxu1 %v4278_v52 }
 0x2d5   : > { %v5611_v60 = vadd.f32 %v5610_v55, %v4252_v59  ;;  %v4254_v61 = vpop.f32.mrb[15].mxu0  ;;  %4538 = vmatmul.mubr.bf16.gmra.mrb[24].mxu1 %v4277_v50  ;;  %v4269_v43 = vmax.f32 %v5607_v56, 0.0 }
 0x2d6   : > { %v5613_v62 = vadd.f32 %v5612_v30, %v4254_v61  ;;  %4795 = vmatpush1.bf16.msra.mxu1 %v6608_v54  ;;  %v4270_v32 = vmax.f32 %v5609_v58, 0.0 }
 0x2d7   : > { %v4271_v63 = vmax.f32 %v5611_v60, 0.0  ;;  %4796 = vmatprep.subr.bf16.mxu1 %v6613_v29 }
 0x2d8   : > { %v4272_v44 = vmax.f32 %v5613_v62, 0.0 }
 0x2d9   : > { %v4279_v1 = vpack.c.bf16 %v4271_v63, %v4269_v43 }
 0x2da   : > { %v4280_v2 = vpack.c.bf16 %v4272_v44, %v4270_v32  ;;  %4797 = vmatpush1.bf16.msra.mxu1 %v6611_v31 }
 0x2db   : > { %4798 = vmatprep.subr.bf16.mxu1 %v6616_v0 }
 0x2dc   : > { %4547 = vmatprep.mubr.bf16.mxu1 %v4280_v2 }
 0x2dd   : > { %4548 = vmatmul.mubr.bf16.gmra.mrb[28].mxu1 %v4279_v1 }
 0x2de   : > { %4799 = vmatpush1.bf16.msra.mxu1 %v6614_v3 }
 0x2df   : > { %4800 = vmatprep.subr.bf16.mxu1 %v6619_v4 }
 0x2e2   : > { %4801 = vmatpush1.bf16.msra.mxu1 %v6617_v5 }
 0x2e3   : > { %4802 = vmatprep.subr.bf16.mxu1 %v6622_v6 }
 0x2e6   : > { %4803 = vmatpush1.bf16.msra.mxu1 %v6620_v7 }
 0x2e7   : > { %4804 = vmatprep.subr.bf16.mxu1 %v6625_v8 }
 0x2ea   : > { %4805 = vmatpush1.bf16.msra.mxu1 %v6623_v9 }
 0x2eb   : > { %4806 = vmatprep.subr.bf16.mxu1 %v6628_v10 }
 0x2ee   : > { %4807 = vmatpush1.bf16.msra.mxu1 %v6626_v11 }
 0x2ef   : > { %4808 = vmatprep.subr.bf16.mxu1 %v6631_v12 }
 0x2f2   : > { %4809 = vmatpush1.bf16.msra.mxu1 %v6629_v13 }
 0x2f3   : > { %4810 = vmatprep.subr.bf16.mxu1 %v6634_v14 }
 0x2f6   : > { %4811 = vmatpush1.bf16.msra.mxu1 %v6632_v15 }
 0x2f7   : > { %4812 = vmatprep.subr.bf16.mxu1 %v6637_v16 }
 0x2fa   : > { %4813 = vmatpush1.bf16.msra.mxu1 %v6635_v17 }
 0x2fb   : > { %4814 = vmatprep.subr.bf16.mxu1 %v6640_v18 }
 0x2fe   : > { %4815 = vmatpush1.bf16.msra.mxu1 %v6638_v19  ;;  %v4614_v19 = vld [vmem:[%s8289_s6] sm:$0x3] }
 0x2ff   : > { %4816 = vmatprep.subr.bf16.mxu1 %v6643_v20  ;;  %v4619_v20 = vrot.slane %v4614_v19, %v8126_v40 }
 0x302   : > { %4817 = vmatpush1.bf16.msra.mxu1 %v6641_v21  ;;  %v4623_v21 = vrot.slane %v4614_v19, %v8131_v42 }
 0x398   : > { %v4519_v33 = vpop.f32.mrb[16].mxu1 }
 0x399   : > { %v4520_v34 = vadd.f32 %v4519_v33, %v4318_v23  ;;  %v4521_v35 = vpop.f32.mrb[17].mxu1 }
 0x39a   : > { %v4522_v25 = vadd.f32 %v4521_v35, %v4322_v24  ;;  %v4523_v26 = vpop.f32.mrb[18].mxu1 }
 0x39b   : > { %v4524_v36 = vadd.f32 %v4523_v26, %v4318_v23  ;;  %v4525_v37 = vpop.f32.mrb[19].mxu1  ;;  %v4558_v39 = vmax.f32 %v4520_v34, 0.0 }
 0x39c   : > { %v4526_v38 = vadd.f32 %v4525_v37, %v4322_v24  ;;  %v4559_v27 = vmax.f32 %v4522_v25, 0.0 }
 0x39d   : > { %v4560_v41 = vmax.f32 %v4524_v36, 0.0 }
 0x39e   : > { %v4561_v45 = vmax.f32 %v4526_v38, 0.0 }
 0x39f   : > { %v4574_v46 = vpack.c.bf16 %v4560_v41, %v4558_v39 }
 0x3a0   : > { %v4575_v47 = vpack.c.bf16 %v4561_v45, %v4559_v27  ;;  %v4529_v28 = vpop.f32.mrb[20].mxu1 }
 0x3a1   : > { %v4530_v48 = vadd.f32 %v4529_v28, %v4318_v23  ;;  %v4531_v49 = vpop.f32.mrb[21].mxu1 }
 0x3a2   : > { %v4532_v50 = vadd.f32 %v4531_v49, %v4322_v24  ;;  %v4533_v51 = vpop.f32.mrb[22].mxu1  ;;  %4818 = vmatprep.mubr.bf16.mxu1 %v4575_v47 }
 0x3a3   : > { %v4534_v52 = vadd.f32 %v4533_v51, %v4318_v23  ;;  %v4535_v53 = vpop.f32.mrb[23].mxu1  ;;  %4819 = vmatmul.mubr.bf16.vlgmr.msra.gmra.mrb[32].mxu1 %v4574_v46  ;;  %v4562_v55 = vmax.f32 %v4530_v48, 0.0 }
 0x3a4   : > { %v4536_v54 = vadd.f32 %v4535_v53, %v4322_v24  ;;  %v4563_v57 = vmax.f32 %v4532_v50, 0.0 }
 0x3a5   : > { %v4564_v56 = vmax.f32 %v4534_v52, 0.0 }
 0x3a6   : > { %v4565_v29 = vmax.f32 %v4536_v54, 0.0 }
 0x3a7   : > { %v4576_v30 = vpack.c.bf16 %v4564_v56, %v4562_v55 }
 0x3a8   : > { %v4577_v58 = vpack.c.bf16 %v4565_v29, %v4563_v57  ;;  %v4539_v59 = vpop.f32.mrb[24].mxu1 }
 0x3a9   : > { %v4540_v60 = vadd.f32 %v4539_v59, %v4318_v23  ;;  %v4541_v61 = vpop.f32.mrb[25].mxu1 }
 0x3aa   : > { %v4542_v62 = vadd.f32 %v4541_v61, %v4322_v24  ;;  %v4543_v31 = vpop.f32.mrb[26].mxu1  ;;  %4828 = vmatprep.mubr.bf16.mxu1 %v4577_v58 }
 0x3ab   : > { %v4544_v43 = vadd.f32 %v4543_v31, %v4318_v23  ;;  %v4545_v63 = vpop.f32.mrb[27].mxu1  ;;  %4829 = vmatmul.mubr.bf16.gmra.mrb[36].mxu1 %v4576_v30  ;;  %v4566_v32 = vmax.f32 %v4540_v60, 0.0 }
 0x3ac   : > { %v4546_v0 = vadd.f32 %v4545_v63, %v4322_v24  ;;  %v4567_v1 = vmax.f32 %v4542_v62, 0.0 }
 0x3ad   : > { %v4568_v44 = vmax.f32 %v4544_v43, 0.0 }
 0x3ae   : > { %v4569_v2 = vmax.f32 %v4546_v0, 0.0 }
 0x3af   : > { %v4578_v3 = vpack.c.bf16 %v4568_v44, %v4566_v32 }
 0x3b0   : > { %v4579_v4 = vpack.c.bf16 %v4569_v2, %v4567_v1  ;;  %v4549_v5 = vpop.f32.mrb[28].mxu1 }
 0x3b1   : > { %v4550_v6 = vadd.f32 %v4549_v5, %v4318_v23  ;;  %v4551_v7 = vpop.f32.mrb[29].mxu1 }
 0x3b2   : > { %v4552_v8 = vadd.f32 %v4551_v7, %v4322_v24  ;;  %v4553_v9 = vpop.f32.mrb[30].mxu1  ;;  %4838 = vmatprep.mubr.bf16.mxu1 %v4579_v4 }
 0x3b3   : > { %v4554_v10 = vadd.f32 %v4553_v9, %v4318_v23  ;;  %v4555_v11 = vpop.f32.mrb[31].mxu1  ;;  %4839 = vmatmul.mubr.bf16.gmra.mrb[40].mxu1 %v4578_v3  ;;  %v4570_v13 = vmax.f32 %v4550_v6, 0.0 }
 0x3b4   : > { %v4556_v12 = vadd.f32 %v4555_v11, %v4322_v24  ;;  %v4571_v15 = vmax.f32 %v4552_v8, 0.0 }
 0x3b5   : > { %v4572_v14 = vmax.f32 %v4554_v10, 0.0 }
 0x3b6   : > { %v4573_v16 = vmax.f32 %v4556_v12, 0.0 }
 0x3b7   : > { %v4580_v17 = vpack.c.bf16 %v4572_v14, %v4570_v13 }
 0x3b8   : > { %v4581_v18 = vpack.c.bf16 %v4573_v16, %v4571_v15 }
 0x3ba   : > { %4848 = vmatprep.mubr.bf16.mxu1 %v4581_v18 }
 0x3bb   : > { %4849 = vmatmul.mubr.bf16.gmra.mrb[44].mxu1 %v4580_v17 }
 0x476   : > { %v4820_v22 = vpop.f32.mrb[32].mxu1 }
 0x477   : > { %v4821_v23 = vadd.f32 %v4820_v22, %v4619_v20  ;;  %v4822_v33 = vpop.f32.mrb[33].mxu1 }
 0x478   : > { %v4823_v24 = vadd.f32 %v4822_v33, %v4623_v21  ;;  %v4824_v34 = vpop.f32.mrb[34].mxu1 }
 0x479   : > { %v4859_v35 = vmax.f32 %v4821_v23, 0.0  ;;  %v4825_v25 = vadd.f32 %v4824_v34, %v4619_v20  ;;  %v4826_v26 = vpop.f32.mrb[35].mxu1 }
 0x47a   : > { %v4860_v36 = vmax.f32 %v4823_v24, 0.0  ;;  %v4827_v37 = vadd.f32 %v4826_v26, %v4623_v21 }
 0x47b   : > { %v4861_v40 = vmax.f32 %v4825_v25, 0.0 }
 0x47c   : > { %v5574_v42 = vpack.c.bf16 %v4860_v36, %v4859_v35  ;;  %v4862_v38 = vmax.f32 %v4827_v37, 0.0 }
 0x47e   : > { %4923 = vst [vmem:[%s8270_s16] sm:$0xff] %v5574_v42  ;;  %v5575_v39 = vpack.c.bf16 %v4862_v38, %v4861_v40  ;;  %v4830_v41 = vpop.f32.mrb[36].mxu1 }
 0x47f   : > { %v4831_v27 = vadd.f32 %v4830_v41, %v4619_v20  ;;  %v4832_v45 = vpop.f32.mrb[37].mxu1 }
 0x480   : > { %4924 = vst [vmem:[%s8270_s16 + $0x8] sm:$0xff] %v5575_v39  ;;  %v4833_v46 = vadd.f32 %v4832_v45, %v4623_v21  ;;  %v4834_v47 = vpop.f32.mrb[38].mxu1 }
 0x481   : > { %v4863_v28 = vmax.f32 %v4831_v27, 0.0  ;;  %v4835_v48 = vadd.f32 %v4834_v47, %v4619_v20  ;;  %v4836_v49 = vpop.f32.mrb[39].mxu1 }
 0x482   : > { %v4864_v50 = vmax.f32 %v4833_v46, 0.0  ;;  %v4837_v51 = vadd.f32 %v4836_v49, %v4623_v21 }
 0x483   : > { %v4865_v52 = vmax.f32 %v4835_v48, 0.0 }
 0x484   : > { %v5576_v53 = vpack.c.bf16 %v4864_v50, %v4863_v28  ;;  %v4866_v54 = vmax.f32 %v4837_v51, 0.0 }
 0x486   : > { %4925 = vst [vmem:[%s8270_s16 + $0x10] sm:$0xff] %v5576_v53  ;;  %v5577_v55 = vpack.c.bf16 %v4866_v54, %v4865_v52  ;;  %v4840_v56 = vpop.f32.mrb[40].mxu1 }
 0x487   : > { %v4841_v57 = vadd.f32 %v4840_v56, %v4619_v20  ;;  %v4842_v29 = vpop.f32.mrb[41].mxu1 }
 0x488   : > { %4926 = vst [vmem:[%s8270_s16 + $0x18] sm:$0xff] %v5577_v55  ;;  %v4843_v30 = vadd.f32 %v4842_v29, %v4623_v21  ;;  %v4844_v58 = vpop.f32.mrb[42].mxu1 }
 0x489   : > { %v4867_v59 = vmax.f32 %v4841_v57, 0.0  ;;  %v4845_v60 = vadd.f32 %v4844_v58, %v4619_v20  ;;  %v4846_v61 = vpop.f32.mrb[43].mxu1 }
 0x48a   : > { %v4868_v62 = vmax.f32 %v4843_v30, 0.0  ;;  %v4847_v31 = vadd.f32 %v4846_v61, %v4623_v21 }
 0x48b   : > { %v4869_v43 = vmax.f32 %v4845_v60, 0.0 }
 0x48c   : > { %v5578_v63 = vpack.c.bf16 %v4868_v62, %v4867_v59  ;;  %v4870_v0 = vmax.f32 %v4847_v31, 0.0 }
 0x48e   : > { %4927 = vst [vmem:[%s8270_s16 + $0x20] sm:$0xff] %v5578_v63  ;;  %v5579_v32 = vpack.c.bf16 %v4870_v0, %v4869_v43  ;;  %v4850_v44 = vpop.f32.mrb[44].mxu1 }
 0x48f   : > { %v4851_v1 = vadd.f32 %v4850_v44, %v4619_v20  ;;  %v4852_v2 = vpop.f32.mrb[45].mxu1 }
 0x490   : > { %4928 = vst [vmem:[%s8270_s16 + $0x28] sm:$0xff] %v5579_v32  ;;  %v4853_v3 = vadd.f32 %v4852_v2, %v4623_v21  ;;  %v4854_v4 = vpop.f32.mrb[46].mxu1 }
 0x491   : > { %v4871_v5 = vmax.f32 %v4851_v1, 0.0  ;;  %v4855_v6 = vadd.f32 %v4854_v4, %v4619_v20  ;;  %v4856_v7 = vpop.f32.mrb[47].mxu1 }
 0x492   : > { %v4872_v8 = vmax.f32 %v4853_v3, 0.0  ;;  %v4857_v9 = vadd.f32 %v4856_v7, %v4623_v21 }
 0x493   : > { %v4873_v10 = vmax.f32 %v4855_v6, 0.0 }
 0x494   : > { %v5580_v11 = vpack.c.bf16 %v4872_v8, %v4871_v5  ;;  %v4874_v12 = vmax.f32 %v4857_v9, 0.0 }
 0x496   : > { %4929 = vst [vmem:[%s8270_s16 + $0x30] sm:$0xff] %v5580_v11  ;;  %v5581_v13 = vpack.c.bf16 %v4874_v12, %v4873_v10 }
 0x498   : > { %4930 = vst [vmem:[%s8270_s16 + $0x38] sm:$0xff] %v5581_v13 }
 0x499 PF: > { %s17_s24 = sadd.s32 1, %s6650_s24  }
 0x49a   : > { %p14_p4 = scmp.ge.s32.totalorder %s17_s24, 4  }
 0x49c   :  { %16 = sbr.rel (!%p14_p4) target bundleno = 1 (0x1), region = 78 }

// kernel: _lambda_.7
= control target key start
LH: loop header
LB: loop body
LE: loop exit
PB: predicated region body
PF: predicated region fallthrough
CT: control target
= control target key end

     0   :  { %v505_v29 = vlaneseq  ;;  %v3783_v34 = vmov 1966171168   ;;  %vm3785_vm0 = vmmov 0   ;;  %s4645_s0 = inlined_call_operand.vmem [shape: bf16[2,3456], index: 0, kind: input, shape index: {}]   ;;  %s4646_s1 = inlined_call_operand.vmem [shape: bf16[3456,128], index: 1, kind: input, shape index: {}]   ;;  %s4647_s2 = inlined_call_operand.vmem [shape: f32[1,128], index: 2, kind: input, shape index: {}]   ;;  %s4648_s3 = inlined_call_operand.vmem [shape: bf16[128,128], index: 3, kind: input, shape index: {}]   ;;  %s4649_s4 = inlined_call_operand.vmem [shape: f32[1,128], index: 4, kind: input, shape index: {}]   ;;  %s4650_s5 = inlined_call_operand.vmem [shape: bf16[128,128], index: 5, kind: input, shape index: {}]   ;;  %s4651_s6 = inlined_call_operand.vmem [shape: f32[1,128], index: 6, kind: input, shape index: {}]   ;;  %s4652_s7 = inlined_call_operand.vmem [shape: bf16[2,128], index: 7, kind: output, shape index: {}]  }
   0x1   :  { %v3531_v0 = vld [vmem:[%s4646_s1 + $0x40] sm:$0xff]   ;;  %v3535_v4 = vld [vmem:[%s4646_s1 + $0x48] sm:$0xff]   ;;  %v3539_v8 = vld [vmem:[%s4646_s1 + $0x50] sm:$0xff]   ;;  %v503_v35 = vunpack.c.l.s4 %v3783_v34 }
   0x2   :  { %v3532_v1 = vld [vmem:[%s4646_s1] sm:$0xff]   ;;  %3155 = vmatprep.subr.bf16.mxu0 %v3531_v0  ;;  %v3536_v5 = vld [vmem:[%s4646_s1 + $0x8] sm:$0xff]   ;;  %v3540_v9 = vld [vmem:[%s4646_s1 + $0x10] sm:$0xff]   ;;  %v506_v36 = vshrl.u32 %v505_v29, 7 }
   0x3   :  { %v3533_v2 = vld [vmem:[%s4646_s1 + $0xc0] sm:$0xff]   ;;  %3156 = vmatpush3.bf16.msra.mxu0 %v3532_v1  ;;  %v3537_v6 = vld [vmem:[%s4646_s1 + $0xc8] sm:$0xff]   ;;  %v3541_v10 = vld [vmem:[%s4646_s1 + $0xd0] sm:$0xff]   ;;  %v504_v39 = vunpack.c.0.s8 %v503_v35 }
   0x4   :  { %v3534_v3 = vld [vmem:[%s4646_s1 + $0x80] sm:$0xff]   ;;  %3177 = vmatprep.subr.bf16.mxu1 %v3533_v2  ;;  %3157 = vmatprep.subr.bf16.mxu0 %v3535_v4  ;;  %v3538_v7 = vld [vmem:[%s4646_s1 + $0x88] sm:$0xff]   ;;  %v3542_v11 = vld [vmem:[%s4646_s1 + $0x90] sm:$0xff]  }
   0x5   :  { %3178 = vmatpush3.bf16.msra.mxu1 %v3534_v3  ;;  %v3543_v12 = vld [vmem:[%s4646_s1 + $0x58] sm:$0xff]   ;;  %v3547_v16 = vld [vmem:[%s4646_s1 + $0x60] sm:$0xff]   ;;  %v3551_v20 = vld [vmem:[%s4646_s1 + $0x68] sm:$0xff]   ;;  %v3937_v42 = vsub.s32 %v504_v39, %v506_v36 }
   0x6   :  { %3179 = vmatprep.subr.bf16.mxu1 %v3537_v6  ;;  %v3544_v13 = vld [vmem:[%s4646_s1 + $0x18] sm:$0xff]   ;;  %v3548_v17 = vld [vmem:[%s4646_s1 + $0x20] sm:$0xff]   ;;  %v3552_v21 = vld [vmem:[%s4646_s1 + $0x28] sm:$0xff]  }
   0x7   :  { %3158 = vmatpush3.bf16.msra.mxu0 %v3536_v5  ;;  %v3545_v14 = vld [vmem:[%s4646_s1 + $0xd8] sm:$0xff]   ;;  %v3549_v18 = vld [vmem:[%s4646_s1 + $0xe0] sm:$0xff]   ;;  %v3553_v22 = vld [vmem:[%s4646_s1 + $0xe8] sm:$0xff]  }
   0x8   :  { %3159 = vmatprep.subr.bf16.mxu0 %v3539_v8  ;;  %v3546_v15 = vld [vmem:[%s4646_s1 + $0x98] sm:$0xff]   ;;  %v3550_v19 = vld [vmem:[%s4646_s1 + $0xa0] sm:$0xff]   ;;  %v3554_v23 = vld [vmem:[%s4646_s1 + $0xa8] sm:$0xff]  }
   0x9   :  { %3180 = vmatpush3.bf16.msra.mxu1 %v3538_v7  ;;  %v3555_v24 = vld [vmem:[%s4646_s1 + $0x70] sm:$0xff]   ;;  %v3559_v28 = vld [vmem:[%s4646_s1 + $0x78] sm:$0xff]   ;;  %v3569_v41 = vld [vmem:[%s4646_s1 + $0x140] sm:$0xff]  }
   0xa   :  { %3181 = vmatprep.subr.bf16.mxu1 %v3541_v10  ;;  %v3556_v25 = vld [vmem:[%s4646_s1 + $0x30] sm:$0xff]   ;;  %v3560_v30 = vld [vmem:[%s4646_s1 + $0x38] sm:$0xff]   ;;  %v3571_v43 = vld [vmem:[%s4646_s1 + $0x1c0] sm:$0xff]  }
   0xb   :  { %3160 = vmatpush3.bf16.msra.mxu0 %v3540_v9  ;;  %v3557_v26 = vld [vmem:[%s4646_s1 + $0xf0] sm:$0xff]   ;;  %v3561_v31 = vld [vmem:[%s4646_s1 + $0xf8] sm:$0xff]   ;;  %v3570_v51 = vld [vmem:[%s4646_s1 + $0x100] sm:$0xff]  }
   0xc   :  { %3161 = vmatprep.subr.bf16.mxu0 %v3543_v12  ;;  %v3558_v27 = vld [vmem:[%s4646_s1 + $0xb0] sm:$0xff]   ;;  %v3562_v32 = vld [vmem:[%s4645_s0] ss:$27 sps:$4 sm:$0xff]   ;;  %v3573_v56 = vld [vmem:[%s4646_s1 + $0x148] sm:$0xff]  }
   0xd   :  { %3182 = vmatpush3.bf16.msra.mxu1 %v3542_v11  ;;  %v3564_v33 = vld [vmem:[%s4645_s0 + $0x4] ss:$27 sps:$4 sm:$0xff]   ;;  %v3565_v37 = vld [vmem:[%s4645_s0 + $0x36] ss:$27 sps:$4 sm:$0xff]   ;;  %v508_v44 = vrot.slane %v3562_v32, %v3937_v42  ;;  %v3574_v59 = vld [vmem:[%s4646_s1 + $0x108] sm:$0xff]  }
   0xe   :  { %3183 = vmatprep.subr.bf16.mxu1 %v3545_v14  ;;  %v3567_v38 = vld [vmem:[%s4645_s0 + $0x3a] ss:$27 sps:$4 sm:$0xff]   ;;  %v522_v45 = vrot.slane %v3565_v37, %v3937_v42  ;;  %v3945_v46 = vrot.slane %v3564_v33, %v3937_v42  ;;  %v3572_v54 = vld [vmem:[%s4646_s1 + $0x180] sm:$0xff]   ;;  %v3575_v60 = vld [vmem:[%s4646_s1 + $0x1c8] sm:$0xff]  }
   0xf   :  { %3162 = vmatpush3.bf16.msra.mxu0 %v3544_v13  ;;  %v3568_v40 = vld [vmem:[%s4646_s1 + $0xb8] sm:$0xff]   ;;  %v3948_v47 = vrot.slane %v3567_v38, %v3937_v42  ;;  %v3576_v62 = vld [vmem:[%s4646_s1 + $0x188] sm:$0xff]   ;;  %v3577_v63 = vld [vmem:[%s4646_s1 + $0x150] sm:$0xff]  }
  0x10   :  { %3163 = vmatprep.subr.bf16.mxu0 %v3547_v16  ;;  %v531_v48 = vcombine.high %v508_v44, %v522_v45  ;;  %v530_v49 = vcombine.low %v508_v44, %v522_v45  ;;  %v3578_v0 = vld [vmem:[%s4646_s1 + $0x110] sm:$0xff]   ;;  %v3581_v3 = vld [vmem:[%s4646_s1 + $0x158] sm:$0xff]   ;;  %v3585_v7 = vld [vmem:[%s4646_s1 + $0x160] sm:$0xff]  }
  0x11   :  { %3184 = vmatpush3.bf16.msra.mxu1 %v3546_v15  ;;  %v533_v50 = vcombine.high %v3945_v46, %v3948_v47  ;;  %v3579_v1 = vld [vmem:[%s4646_s1 + $0x1d0] sm:$0xff]   ;;  %v3582_v4 = vld [vmem:[%s4646_s1 + $0x118] sm:$0xff]   ;;  %v3586_v8 = vld [vmem:[%s4646_s1 + $0x120] sm:$0xff]  }
  0x12   :  { %3185 = vmatprep.subr.bf16.mxu1 %v3549_v18  ;;  %v554_v52 = vrot.slane %v531_v48, %v3937_v42  ;;  %v540_v53 = vrot.slane %v530_v49, %v3937_v42  ;;  %v3580_v2 = vld [vmem:[%s4646_s1 + $0x190] sm:$0xff]   ;;  %v3583_v5 = vld [vmem:[%s4646_s1 + $0x1d8] sm:$0xff]   ;;  %v3587_v9 = vld [vmem:[%s4646_s1 + $0x1e0] sm:$0xff]  }
  0x13   :  { %3164 = vmatpush3.bf16.msra.mxu0 %v3548_v17  ;;  %v561_v55 = vrot.slane %v533_v50, %v3937_v42  ;;  %v3584_v6 = vld [vmem:[%s4646_s1 + $0x198] sm:$0xff]   ;;  %v3588_v10 = vld [vmem:[%s4646_s1 + $0x1a0] sm:$0xff]   ;;  %v3589_v11 = vld [vmem:[%s4646_s1 + $0x168] sm:$0xff]  }
  0x14   :  { %3165 = vmatprep.subr.bf16.mxu0 %v3551_v20  ;;  %2090 = vmatprep.mubr.bf16.mxu0 %v554_v52  ;;  %v564_v57 = vcombine.high %v554_v52, %v554_v52  ;;  %v562_v58 = vcombine.high %v540_v53, %v540_v53  ;;  %v3590_v12 = vld [vmem:[%s4646_s1 + $0x128] sm:$0xff]   ;;  %v3593_v15 = vld [vmem:[%s4646_s1 + $0x170] sm:$0xff]   ;;  %v532_v20 = vcombine.low %v3945_v46, %v3948_v47  ;;  %v3613_v38 = vld [vmem:[%s4646_s1 + $0x258] sm:$0xff]  }
  0x15   :  { %3186 = vmatpush3.bf16.msra.mxu1 %v3550_v19  ;;  %v565_v61 = vcombine.high %v561_v55, %v561_v55  ;;  %v3591_v13 = vld [vmem:[%s4646_s1 + $0x1e8] sm:$0xff]   ;;  %v3594_v16 = vld [vmem:[%s4646_s1 + $0x130] sm:$0xff]   ;;  %v3597_v19 = vld [vmem:[%s4646_s1 + $0x178] sm:$0xff]  }
  0x16   :  { %3187 = vmatprep.subr.bf16.mxu1 %v3553_v22  ;;  %2130 = vmatprep.mubr.bf16.mxu1 %v564_v57  ;;  %v3592_v14 = vld [vmem:[%s4646_s1 + $0x1a8] sm:$0xff]   ;;  %v3595_v17 = vld [vmem:[%s4646_s1 + $0x1f0] sm:$0xff]   ;;  %v3599_v22 = vld [vmem:[%s4646_s1 + $0x1f8] sm:$0xff]  }
  0x17   :  { %3166 = vmatpush3.bf16.msra.mxu0 %v3552_v21  ;;  %v3596_v18 = vld [vmem:[%s4646_s1 + $0x1b0] sm:$0xff]   ;;  %v3598_v21 = vld [vmem:[%s4646_s1 + $0x138] sm:$0xff]   ;;  %v3607_v32 = vld [vmem:[%s4646_s1 + $0x2c8] sm:$0xff]  }
  0x18   :  { %3167 = vmatprep.subr.bf16.mxu0 %v3555_v24  ;;  %v547_v24 = vrot.slane %v532_v20, %v3937_v42  ;;  %v3608_v33 = vld [vmem:[%s4646_s1 + $0x288] sm:$0xff]   ;;  %v3609_v34 = vld [vmem:[%s4646_s1 + $0x250] sm:$0xff]   ;;  %v3614_v39 = vld [vmem:[%s4646_s1 + $0x218] sm:$0xff]  }
  0x19   :  { %3188 = vmatpush3.bf16.msra.mxu1 %v3554_v23  ;;  %v3600_v23 = vld [vmem:[%s4646_s1 + $0x1b8] sm:$0xff]   ;;  %v3610_v35 = vld [vmem:[%s4646_s1 + $0x210] sm:$0xff]   ;;  %v3618_v44 = vld [vmem:[%s4646_s1 + $0x220] sm:$0xff]  }
  0x1a   :  { %3189 = vmatprep.subr.bf16.mxu1 %v3557_v26  ;;  %v3602_v26 = vld [vmem:[%s4646_s1 + $0x200] sm:$0xff]   ;;  %v563_v29 = vcombine.high %v547_v24, %v547_v24  ;;  %v3611_v36 = vld [vmem:[%s4646_s1 + $0x2d0] sm:$0xff]   ;;  %v3621_v47 = vld [vmem:[%s4646_s1 + $0x268] sm:$0xff]  }
  0x1b   :  { %3168 = vmatpush3.bf16.msra.mxu0 %v3556_v25  ;;  %v3601_v25 = vld [vmem:[%s4646_s1 + $0x240] sm:$0xff]   ;;  %v3612_v37 = vld [vmem:[%s4646_s1 + $0x290] sm:$0xff]   ;;  %v3622_v48 = vld [vmem:[%s4646_s1 + $0x228] sm:$0xff]  }
  0x1c   :  { %3169 = vmatprep.subr.bf16.mxu0 %v3559_v28  ;;  %v3604_v28 = vld [vmem:[%s4646_s1 + $0x280] sm:$0xff]   ;;  %v3623_v49 = vld [vmem:[%s4646_s1 + $0x2e8] sm:$0xff]   ;;  %v3626_v52 = vld [vmem:[%s4646_s1 + $0x230] sm:$0xff]  }
  0x1d   :  { %3190 = vmatpush3.bf16.msra.mxu1 %v3558_v27  ;;  %v3603_v27 = vld [vmem:[%s4646_s1 + $0x2c0] sm:$0xff]   ;;  %v3624_v50 = vld [vmem:[%s4646_s1 + $0x2a8] sm:$0xff]   ;;  %v3652_v20 = vld [vmem:[%s4646_s1 + $0x398] sm:$0xff]  }
  0x1e   :  { %3191 = vmatprep.subr.bf16.mxu1 %v3561_v31  ;;  %v3606_v31 = vld [vmem:[%s4646_s1 + $0x208] sm:$0xff]   ;;  %v3619_v45 = vld [vmem:[%s4646_s1 + $0x2e0] sm:$0xff]  }
  0x1f   :  { %3170 = vmatpush3.bf16.msra.mxu0 %v3560_v30  ;;  %v3605_v30 = vld [vmem:[%s4646_s1 + $0x248] sm:$0xff]   ;;  %v3620_v46 = vld [vmem:[%s4646_s1 + $0x2a0] sm:$0xff]  }
  0x20   :  { %3199 = vmatprep.subr.bf16.mxu0 %v3569_v41  ;;  %v3616_v41 = vld [vmem:[%s4646_s1 + $0x298] sm:$0xff]  }
  0x21   :  { %3192 = vmatpush3.bf16.msra.mxu1 %v3568_v40  ;;  %v3615_v40 = vld [vmem:[%s4646_s1 + $0x2d8] sm:$0xff]  }
  0x22   :  { %3221 = vmatprep.subr.bf16.mxu1 %v3571_v43  ;;  %2091 = vmatmul.mubr.bf16.vlgmr.msra.gmra.mrb[0].mxu0 %v540_v53  ;;  %v3617_v43 = vld [vmem:[%s4646_s1 + $0x260] sm:$0xff]   ;;  %v3627_v53 = vld [vmem:[%s4646_s1 + $0x2f0] sm:$0xff]  }
  0x23   :  { %3200 = vmatpush3.bf16.msra.mxu0 %v3570_v51  ;;  %2170 = vmatprep.mubr.bf16.mxu0 %v561_v55  ;;  %v3625_v51 = vld [vmem:[%s4646_s1 + $0x270] sm:$0xff]   ;;  %v3634_v57 = vld [vmem:[%s4645_s0 + $0x3e] ss:$27 sps:$4 sm:$0xff]  }
  0x24   :  { %2131 = vmatmul.mubr.bf16.vlgmr.msra.gmra.mrb[0].mxu1 %v562_v58  ;;  %3201 = vmatprep.subr.bf16.mxu0 %v3573_v56  ;;  %v3628_v55 = vld [vmem:[%s4646_s1 + $0x2b0] sm:$0xff]   ;;  %v3632_v56 = vld [vmem:[%s4645_s0 + $0x8] ss:$27 sps:$4 sm:$0xff]   ;;  %v3630_v58 = vld [vmem:[%s4646_s1 + $0x238] sm:$0xff]  }
  0x25   :  { %3222 = vmatpush3.bf16.msra.mxu1 %v3572_v54  ;;  %2210 = vmatprep.mubr.bf16.mxu1 %v565_v61  ;;  %v3629_v54 = vld [vmem:[%s4646_s1 + $0x278] sm:$0xff]   ;;  %v590_v61 = vrot.slane %v3634_v57, %v3937_v42  ;;  %v3680_v57 = vld [vmem:[%s4646_s1 + $0x410] sm:$0xff]  }
  0x26   :  { %3223 = vmatprep.subr.bf16.mxu1 %v3575_v60  ;;  %v576_v60 = vrot.slane %v3632_v56, %v3937_v42  ;;  %v3679_v56 = vld [vmem:[%s4646_s1 + $0x450] sm:$0xff]  }
  0x27   :  { %3202 = vmatpush3.bf16.msra.mxu0 %v3574_v59  ;;  %v3631_v59 = vld [vmem:[%s4646_s1 + $0x2f8] sm:$0xff]  }
  0x28   :  { %3203 = vmatprep.subr.bf16.mxu0 %v3577_v63  ;;  %v599_v63 = vcombine.high %v576_v60, %v590_v61 }
  0x29   :  { %3224 = vmatpush3.bf16.msra.mxu1 %v3576_v62  ;;  %v3636_v62 = vld [vmem:[%s4646_s1 + $0x2b8] sm:$0xff]  }
  0x2a   :  { %3225 = vmatprep.subr.bf16.mxu1 %v3579_v1  ;;  %v3637_v1 = vld [vmem:[%s4646_s1 + $0x340] sm:$0xff]  }
  0x2b   :  { %3204 = vmatpush3.bf16.msra.mxu0 %v3578_v0  ;;  %v598_v0 = vcombine.low %v576_v60, %v590_v61  ;;  %v3683_v60 = vld [vmem:[%s4646_s1 + $0x458] sm:$0xff]  }
  0x2c   :  { %3205 = vmatprep.subr.bf16.mxu0 %v3581_v3  ;;  %v622_v3 = vrot.slane %v599_v63, %v3937_v42  ;;  %v3684_v61 = vld [vmem:[%s4646_s1 + $0x418] sm:$0xff]  }
  0x2d   :  { %3226 = vmatpush3.bf16.msra.mxu1 %v3580_v2  ;;  %v3638_v2 = vld [vmem:[%s4646_s1 + $0x300] sm:$0xff]   ;;  %v3686_v63 = vld [vmem:[%s4646_s1 + $0x498] sm:$0xff]  }
  0x2e   :  { %3227 = vmatprep.subr.bf16.mxu1 %v3583_v5  ;;  %v3639_v5 = vld [vmem:[%s4646_s1 + $0x3c0] sm:$0xff]  }
  0x2f   :  { %3206 = vmatpush3.bf16.msra.mxu0 %v3582_v4  ;;  %v608_v4 = vrot.slane %v598_v0, %v3937_v42  ;;  %v3687_v0 = vld [vmem:[%s4646_s1 + $0x460] sm:$0xff]  }
  0x30   :  { %3207 = vmatprep.subr.bf16.mxu0 %v3585_v7  ;;  %v632_v7 = vcombine.high %v622_v3, %v622_v3 }
  0x31   :  { %3228 = vmatpush3.bf16.msra.mxu1 %v3584_v6  ;;  %v3640_v6 = vld [vmem:[%s4646_s1 + $0x380] sm:$0xff]  }
  0x32   :  { %3229 = vmatprep.subr.bf16.mxu1 %v3587_v9  ;;  %v3641_v9 = vld [vmem:[%s4646_s1 + $0x348] sm:$0xff]  }
  0x33   :  { %3208 = vmatpush3.bf16.msra.mxu0 %v3586_v8  ;;  %v630_v8 = vcombine.high %v608_v4, %v608_v4 }
  0x34   :  { %3209 = vmatprep.subr.bf16.mxu0 %v3589_v11  ;;  %v3643_v11 = vld [vmem:[%s4646_s1 + $0x3c8] sm:$0xff]  }
  0x35   :  { %3230 = vmatpush3.bf16.msra.mxu1 %v3588_v10  ;;  %v3642_v10 = vld [vmem:[%s4646_s1 + $0x308] sm:$0xff]  }
  0x36   :  { %3231 = vmatprep.subr.bf16.mxu1 %v3591_v13  ;;  %v3645_v13 = vld [vmem:[%s4646_s1 + $0x350] sm:$0xff]  }
  0x37   :  { %3210 = vmatpush3.bf16.msra.mxu0 %v3590_v12  ;;  %v3644_v12 = vld [vmem:[%s4646_s1 + $0x388] sm:$0xff]  }
  0x38   :  { %3211 = vmatprep.subr.bf16.mxu0 %v3593_v15  ;;  %v3647_v15 = vld [vmem:[%s4646_s1 + $0x3d0] sm:$0xff]  }
  0x39   :  { %3232 = vmatpush3.bf16.msra.mxu1 %v3592_v14  ;;  %v3646_v14 = vld [vmem:[%s4646_s1 + $0x310] sm:$0xff]  }
  0x3a   :  { %3233 = vmatprep.subr.bf16.mxu1 %v3595_v17  ;;  %v3649_v17 = vld [vmem:[%s4646_s1 + $0x358] sm:$0xff]  }
  0x3b   :  { %3212 = vmatpush3.bf16.msra.mxu0 %v3594_v16  ;;  %v3648_v16 = vld [vmem:[%s4646_s1 + $0x390] sm:$0xff]  }
  0x3c   :  { %3213 = vmatprep.subr.bf16.mxu0 %v3597_v19  ;;  %v3651_v19 = vld [vmem:[%s4646_s1 + $0x3d8] sm:$0xff]  }
  0x3d   :  { %3234 = vmatpush3.bf16.msra.mxu1 %v3596_v18  ;;  %v3650_v18 = vld [vmem:[%s4646_s1 + $0x318] sm:$0xff]  }
  0x3e   :  { %3235 = vmatprep.subr.bf16.mxu1 %v3599_v22  ;;  %v3654_v22 = vld [vmem:[%s4646_s1 + $0x320] sm:$0xff]  }
  0x3f   :  { %3214 = vmatpush3.bf16.msra.mxu0 %v3598_v21  ;;  %v3653_v21 = vld [vmem:[%s4646_s1 + $0x360] sm:$0xff]  }
  0x40   :  { %3243 = vmatprep.subr.bf16.mxu0 %v3601_v25  ;;  %v3657_v25 = vld [vmem:[%s4646_s1 + $0x368] sm:$0xff]  }
  0x41   :  { %3236 = vmatpush3.bf16.msra.mxu1 %v3600_v23  ;;  %v3655_v23 = vld [vmem:[%s4646_s1 + $0x3e0] sm:$0xff]  }
  0x42   :  { %2171 = vmatmul.mubr.bf16.vlgmr.msra.gmra.mrb[4].mxu0 %v547_v24  ;;  %3265 = vmatprep.subr.bf16.mxu1 %v3603_v27  ;;  %v3656_v24 = vld [vmem:[%s4646_s1 + $0x3a0] sm:$0xff]   ;;  %v3659_v27 = vld [vmem:[%s4646_s1 + $0x3e8] sm:$0xff]  }
  0x43   :  { %3244 = vmatpush3.bf16.msra.mxu0 %v3602_v26  ;;  %2250 = vmatprep.mubr.bf16.mxu0 %v622_v3  ;;  %v3658_v26 = vld [vmem:[%s4646_s1 + $0x328] sm:$0xff]   ;;  %v3690_v3 = vld [vmem:[%s4646_s1 + $0x4a0] sm:$0xff]  }
  0x44   :  { %2211 = vmatmul.mubr.bf16.vlgmr.msra.gmra.mrb[4].mxu1 %v563_v29  ;;  %3245 = vmatprep.subr.bf16.mxu0 %v3605_v30  ;;  %v3661_v29 = vld [vmem:[%s4646_s1 + $0x370] sm:$0xff]  }
  0x45   :  { %3266 = vmatpush3.bf16.msra.mxu1 %v3604_v28  ;;  %2290 = vmatprep.mubr.bf16.mxu1 %v632_v7  ;;  %v3660_v28 = vld [vmem:[%s4646_s1 + $0x3a8] sm:$0xff]   ;;  %v3662_v30 = vld [vmem:[%s4646_s1 + $0x330] sm:$0xff]  }
  0x46   :  { %3267 = vmatprep.subr.bf16.mxu1 %v3607_v32  ;;  %v3664_v32 = vld [vmem:[%s4646_s1 + $0x3b0] sm:$0xff]   ;;  %v3694_v7 = vld [vmem:[%s4646_s1 + $0x4a8] sm:$0xff]  }
  0x47   :  { %3246 = vmatpush3.bf16.msra.mxu0 %v3606_v31  ;;  %v3663_v31 = vld [vmem:[%s4646_s1 + $0x3f0] sm:$0xff]  }
  0x48   :  { %3247 = vmatprep.subr.bf16.mxu0 %v3609_v34  ;;  %v3668_v34 = vld [vmem:[%s4645_s0 + $0xc] ss:$27 sps:$4 sm:$0xff]  }
  0x49   :  { %3268 = vmatpush3.bf16.msra.mxu1 %v3608_v33  ;;  %v3665_v33 = vld [vmem:[%s4646_s1 + $0x378] sm:$0xff]  }
  0x4a   :  { %3269 = vmatprep.subr.bf16.mxu1 %v3611_v36  ;;  %v3669_v36 = vld [vmem:[%s4645_s0 + $0x42] ss:$27 sps:$4 sm:$0xff]  }
  0x4b   :  { %3248 = vmatpush3.bf16.msra.mxu0 %v3610_v35  ;;  %v3666_v35 = vld [vmem:[%s4646_s1 + $0x338] sm:$0xff]  }
  0x4c   :  { %3249 = vmatprep.subr.bf16.mxu0 %v3613_v38  ;;  %v583_v38 = vrot.slane %v3668_v34, %v3937_v42  ;;  %v3714_v34 = vld [vmem:[%s4646_s1 + $0x588] sm:$0xff]  }
  0x4d   :  { %3270 = vmatpush3.bf16.msra.mxu1 %v3612_v37  ;;  %v3667_v37 = vld [vmem:[%s4646_s1 + $0x3f8] sm:$0xff]  }
  0x4e   :  { %3271 = vmatprep.subr.bf16.mxu1 %v3615_v40  ;;  %v3670_v40 = vld [vmem:[%s4646_s1 + $0x3b8] sm:$0xff]  }
  0x4f   :  { %3250 = vmatpush3.bf16.msra.mxu0 %v3614_v39  ;;  %v597_v39 = vrot.slane %v3669_v36, %v3937_v42  ;;  %v3716_v36 = vld [vmem:[%s4646_s1 + $0x510] sm:$0xff]  }
  0x50   :  { %3251 = vmatprep.subr.bf16.mxu0 %v3617_v43 }
  0x51   :  { %3272 = vmatpush3.bf16.msra.mxu1 %v3616_v41  ;;  %v3671_v41 = vld [vmem:[%s4646_s1 + $0x440] sm:$0xff]   ;;  %v601_v43 = vcombine.high %v583_v38, %v597_v39 }
  0x52   :  { %3273 = vmatprep.subr.bf16.mxu1 %v3619_v45  ;;  %v3672_v45 = vld [vmem:[%s4646_s1 + $0x400] sm:$0xff]  }
  0x53   :  { %3252 = vmatpush3.bf16.msra.mxu0 %v3618_v44  ;;  %v600_v44 = vcombine.low %v583_v38, %v597_v39  ;;  %v3718_v38 = vld [vmem:[%s4646_s1 + $0x590] sm:$0xff]   ;;  %v3721_v39 = vld [vmem:[%s4646_s1 + $0x5d8] sm:$0xff]  }
  0x54   :  { %3253 = vmatprep.subr.bf16.mxu0 %v3621_v47  ;;  %v629_v47 = vrot.slane %v601_v43, %v3937_v42  ;;  %v3722_v43 = vld [vmem:[%s4646_s1 + $0x598] sm:$0xff]  }
  0x55   :  { %3274 = vmatpush3.bf16.msra.mxu1 %v3620_v46  ;;  %v3673_v46 = vld [vmem:[%s4646_s1 + $0x4c0] sm:$0xff]  }
  0x56   :  { %3275 = vmatprep.subr.bf16.mxu1 %v3623_v49  ;;  %v3674_v49 = vld [vmem:[%s4646_s1 + $0x480] sm:$0xff]  }
  0x57   :  { %3254 = vmatpush3.bf16.msra.mxu0 %v3622_v48  ;;  %v615_v48 = vrot.slane %v600_v44, %v3937_v42  ;;  %v3725_v44 = vld [vmem:[%s4646_s1 + $0x5e0] sm:$0xff]  }
  0x58   :  { %3255 = vmatprep.subr.bf16.mxu0 %v3625_v51  ;;  %v633_v51 = vcombine.high %v629_v47, %v629_v47 }
  0x59   :  { %3276 = vmatpush3.bf16.msra.mxu1 %v3624_v50  ;;  %v3675_v50 = vld [vmem:[%s4646_s1 + $0x448] sm:$0xff]  }
  0x5a   :  { %3277 = vmatprep.subr.bf16.mxu1 %v3627_v53  ;;  %v3676_v53 = vld [vmem:[%s4646_s1 + $0x408] sm:$0xff]  }
  0x5b   :  { %3256 = vmatpush3.bf16.msra.mxu0 %v3626_v52  ;;  %v631_v52 = vcombine.high %v615_v48, %v615_v48 }
  0x5c   :  { %3257 = vmatprep.subr.bf16.mxu0 %v3629_v54  ;;  %v3677_v54 = vld [vmem:[%s4646_s1 + $0x4c8] sm:$0xff]  }
  0x5d   :  { %3278 = vmatpush3.bf16.msra.mxu1 %v3628_v55  ;;  %v3678_v55 = vld [vmem:[%s4646_s1 + $0x488] sm:$0xff]  }
  0x5e   :  { %3279 = vmatprep.subr.bf16.mxu1 %v3631_v59  ;;  %v3682_v59 = vld [vmem:[%s4646_s1 + $0x490] sm:$0xff]  }
  0x5f   :  { %3258 = vmatpush3.bf16.msra.mxu0 %v3630_v58  ;;  %v3681_v58 = vld [vmem:[%s4646_s1 + $0x4d0] sm:$0xff]  }
  0x60   :  { %3287 = vmatprep.subr.bf16.mxu0 %v3637_v1  ;;  %v3688_v1 = vld [vmem:[%s4646_s1 + $0x420] sm:$0xff]  }
  0x61   :  { %3280 = vmatpush3.bf16.msra.mxu1 %v3636_v62  ;;  %v3685_v62 = vld [vmem:[%s4646_s1 + $0x4d8] sm:$0xff]  }
  0x62   :  { %2251 = vmatmul.mubr.bf16.vlgmr.msra.gmra.mrb[8].mxu0 %v608_v4  ;;  %3309 = vmatprep.subr.bf16.mxu1 %v3639_v5  ;;  %v3691_v4 = vld [vmem:[%s4646_s1 + $0x468] sm:$0xff]  }
  0x63   :  { %3288 = vmatpush3.bf16.msra.mxu0 %v3638_v2  ;;  %2330 = vmatprep.mubr.bf16.mxu0 %v629_v47  ;;  %v3689_v2 = vld [vmem:[%s4646_s1 + $0x4e0] sm:$0xff]   ;;  %v3692_v5 = vld [vmem:[%s4646_s1 + $0x428] sm:$0xff]  }
  0x64   :  { %2291 = vmatmul.mubr.bf16.vlgmr.msra.gmra.mrb[8].mxu1 %v630_v8  ;;  %3289 = vmatprep.subr.bf16.mxu0 %v3641_v9  ;;  %v3695_v8 = vld [vmem:[%s4646_s1 + $0x470] sm:$0xff]   ;;  %v3726_v47 = vld [vmem:[%s4646_s1 + $0x5a0] sm:$0xff]  }
  0x65   :  { %3310 = vmatpush3.bf16.msra.mxu1 %v3640_v6  ;;  %2370 = vmatprep.mubr.bf16.mxu1 %v633_v51  ;;  %v3693_v6 = vld [vmem:[%s4646_s1 + $0x4e8] sm:$0xff]   ;;  %v3696_v9 = vld [vmem:[%s4646_s1 + $0x430] sm:$0xff]  }
  0x66   :  { %3311 = vmatprep.subr.bf16.mxu1 %v3643_v11  ;;  %v3698_v11 = vld [vmem:[%s4646_s1 + $0x4b0] sm:$0xff]   ;;  %v3730_v51 = vld [vmem:[%s4646_s1 + $0x5a8] sm:$0xff]  }
  0x67   :  { %3290 = vmatpush3.bf16.msra.mxu0 %v3642_v10  ;;  %v3697_v10 = vld [vmem:[%s4646_s1 + $0x4f0] sm:$0xff]  }
  0x68   :  { %3291 = vmatprep.subr.bf16.mxu0 %v3645_v13  ;;  %v3700_v13 = vld [vmem:[%s4646_s1 + $0x438] sm:$0xff]  }
  0x69   :  { %3312 = vmatpush3.bf16.msra.mxu1 %v3644_v12  ;;  %v3699_v12 = vld [vmem:[%s4646_s1 + $0x478] sm:$0xff]  }
  0x6a   :  { %3313 = vmatprep.subr.bf16.mxu1 %v3647_v15  ;;  %v3702_v15 = vld [vmem:[%s4645_s0 + $0x10] ss:$27 sps:$4 sm:$0xff]  }
  0x6b   :  { %3292 = vmatpush3.bf16.msra.mxu0 %v3646_v14  ;;  %v3701_v14 = vld [vmem:[%s4646_s1 + $0x4f8] sm:$0xff]  }
  0x6c   :  { %3293 = vmatprep.subr.bf16.mxu0 %v3649_v17  ;;  %v644_v17 = vrot.slane %v3702_v15, %v3937_v42  ;;  %v3749_v15 = vld [vmem:[%s4646_s1 + $0x690] sm:$0xff]  }
  0x6d   :  { %3314 = vmatpush3.bf16.msra.mxu1 %v3648_v16  ;;  %v3704_v16 = vld [vmem:[%s4645_s0 + $0x46] ss:$27 sps:$4 sm:$0xff]  }
  0x6e   :  { %3315 = vmatprep.subr.bf16.mxu1 %v3651_v19  ;;  %v658_v19 = vrot.slane %v3704_v16, %v3937_v42  ;;  %v3751_v16 = vld [vmem:[%s4646_s1 + $0x618] sm:$0xff]  }
  0x6f   :  { %3294 = vmatpush3.bf16.msra.mxu0 %v3650_v18  ;;  %v3706_v18 = vld [vmem:[%s4646_s1 + $0x4b8] sm:$0xff]  }
  0x70   :  { %3295 = vmatprep.subr.bf16.mxu0 %v3653_v21  ;;  %v667_v21 = vcombine.high %v644_v17, %v658_v19 }
  0x71   :  { %3316 = vmatpush3.bf16.msra.mxu1 %v3652_v20  ;;  %v3707_v20 = vld [vmem:[%s4646_s1 + $0x540] sm:$0xff]  }
  0x72   :  { %3317 = vmatprep.subr.bf16.mxu1 %v3655_v23  ;;  %v3709_v23 = vld [vmem:[%s4646_s1 + $0x5c0] sm:$0xff]  }
  0x73   :  { %3296 = vmatpush3.bf16.msra.mxu0 %v3654_v22  ;;  %v666_v22 = vcombine.low %v644_v17, %v658_v19  ;;  %v3753_v17 = vld [vmem:[%s4646_s1 + $0x660] sm:$0xff]  }
  0x74   :  { %3297 = vmatprep.subr.bf16.mxu0 %v3657_v25  ;;  %v3754_v19 = vld [vmem:[%s4646_s1 + $0x620] sm:$0xff]  }
  0x75   :  { %3318 = vmatpush3.bf16.msra.mxu1 %v3656_v24  ;;  %v690_v24 = vrot.slane %v667_v21, %v3937_v42  ;;  %v676_v25 = vrot.slane %v666_v22, %v3937_v42  ;;  %v3756_v21 = vld [vmem:[%s4646_s1 + $0x668] sm:$0xff]  }
  0x76   :  { %3319 = vmatprep.subr.bf16.mxu1 %v3659_v27  ;;  %v3711_v27 = vld [vmem:[%s4646_s1 + $0x548] sm:$0xff]  }
  0x77   :  { %3298 = vmatpush3.bf16.msra.mxu0 %v3658_v26  ;;  %v3708_v26 = vld [vmem:[%s4646_s1 + $0x500] sm:$0xff]   ;;  %v3757_v22 = vld [vmem:[%s4646_s1 + $0x628] sm:$0xff]  }
  0x78   :  { %3299 = vmatprep.subr.bf16.mxu0 %v3661_v29  ;;  %v698_v29 = vcombine.high %v676_v25, %v676_v25 }
  0x79   :  { %3320 = vmatpush3.bf16.msra.mxu1 %v3660_v28  ;;  %v700_v28 = vcombine.high %v690_v24, %v690_v24 }
  0x7a   :  { %3321 = vmatprep.subr.bf16.mxu1 %v3663_v31  ;;  %v3713_v31 = vld [vmem:[%s4646_s1 + $0x5c8] sm:$0xff]  }
  0x7b   :  { %3300 = vmatpush3.bf16.msra.mxu0 %v3662_v30  ;;  %v3710_v30 = vld [vmem:[%s4646_s1 + $0x580] sm:$0xff]  }
  0x7c   :  { %3301 = vmatprep.subr.bf16.mxu0 %v3665_v33  ;;  %v3715_v33 = vld [vmem:[%s4646_s1 + $0x550] sm:$0xff]  }
  0x7d   :  { %3322 = vmatpush3.bf16.msra.mxu1 %v3664_v32  ;;  %v3712_v32 = vld [vmem:[%s4646_s1 + $0x508] sm:$0xff]  }
  0x7e   :  { %3323 = vmatprep.subr.bf16.mxu1 %v3667_v37  ;;  %v3719_v37 = vld [vmem:[%s4646_s1 + $0x558] sm:$0xff]  }
  0x7f   :  { %3302 = vmatpush3.bf16.msra.mxu0 %v3666_v35  ;;  %v3717_v35 = vld [vmem:[%s4646_s1 + $0x5d0] sm:$0xff]  }
  0x80   :  { %3331 = vmatprep.subr.bf16.mxu0 %v3671_v41  ;;  %v3723_v41 = vld [vmem:[%s4646_s1 + $0x560] sm:$0xff]  }
  0x81   :  { %3324 = vmatpush3.bf16.msra.mxu1 %v3670_v40  ;;  %v3720_v40 = vld [vmem:[%s4646_s1 + $0x518] sm:$0xff]  }
  0x82   :  { %2331 = vmatmul.mubr.bf16.vlgmr.msra.gmra.mrb[12].mxu0 %v615_v48  ;;  %3353 = vmatprep.subr.bf16.mxu1 %v3673_v46  ;;  %v3727_v46 = vld [vmem:[%s4646_s1 + $0x568] sm:$0xff]  }
  0x83   :  { %3332 = vmatpush3.bf16.msra.mxu0 %v3672_v45  ;;  %2410 = vmatprep.mubr.bf16.mxu0 %v690_v24  ;;  %v3724_v45 = vld [vmem:[%s4646_s1 + $0x520] sm:$0xff]   ;;  %v3729_v48 = vld [vmem:[%s4646_s1 + $0x5e8] sm:$0xff]   ;;  %v3764_v24 = vld [vmem:[%s4645_s0 + $0x18] ss:$27 sps:$4 sm:$0x77]  }
  0x84   :  { %2371 = vmatmul.mubr.bf16.vlgmr.msra.gmra.mrb[12].mxu1 %v631_v52  ;;  %3333 = vmatprep.subr.bf16.mxu0 %v3675_v50  ;;  %v3731_v50 = vld [vmem:[%s4646_s1 + $0x570] sm:$0xff]  }
  0x85   :  { %3354 = vmatpush3.bf16.msra.mxu1 %v3674_v49  ;;  %2450 = vmatprep.mubr.bf16.mxu1 %v700_v28  ;;  %v3728_v49 = vld [vmem:[%s4646_s1 + $0x528] sm:$0xff]   ;;  %v3733_v52 = vld [vmem:[%s4646_s1 + $0x5f0] sm:$0xff]   ;;  %v710_v28 = vrot.slane %v3764_v24, %v3937_v42 }
  0x86   :  { %3355 = vmatprep.subr.bf16.mxu1 %v3677_v54  ;;  %v3735_v54 = vld [vmem:[%s4646_s1 + $0x578] sm:$0xff]   ;;  %v3777_v24 = vld [vmem:[%s4650_s5 + $0x10] sm:$0xff]  }
  0x87   :  { %3334 = vmatpush3.bf16.msra.mxu0 %v3676_v53  ;;  %v3732_v53 = vld [vmem:[%s4646_s1 + $0x530] sm:$0xff]  }
  0x88   :  { %3335 = vmatprep.subr.bf16.mxu0 %v3679_v56  ;;  %v3738_v56 = vld [vmem:[%s4645_s0 + $0x14] ss:$27 sps:$4 sm:$0xff]  }
  0x89   :  { %3356 = vmatpush3.bf16.msra.mxu1 %v3678_v55  ;;  %v3734_v55 = vld [vmem:[%s4646_s1 + $0x5b0] sm:$0xff]  }
  0x8a   :  { %3357 = vmatprep.subr.bf16.mxu1 %v3681_v58  ;;  %v3737_v58 = vld [vmem:[%s4646_s1 + $0x5f8] sm:$0xff]  }
  0x8b   :  { %3336 = vmatpush3.bf16.msra.mxu0 %v3680_v57  ;;  %v3739_v57 = vld [vmem:[%s4645_s0 + $0x4a] ss:$27 sps:$4 sm:$0xff]  }
  0x8c   :  { %3337 = vmatprep.subr.bf16.mxu0 %v3683_v60  ;;  %v651_v60 = vrot.slane %v3738_v56, %v3937_v42 }
  0x8d   :  { %3358 = vmatpush3.bf16.msra.mxu1 %v3682_v59  ;;  %v3736_v59 = vld [vmem:[%s4646_s1 + $0x538] sm:$0xff]  }
  0x8e   :  { %3359 = vmatprep.subr.bf16.mxu1 %v3685_v62  ;;  %v3741_v62 = vld [vmem:[%s4646_s1 + $0x640] sm:$0xff]  }
  0x8f   :  { %3338 = vmatpush3.bf16.msra.mxu0 %v3684_v61  ;;  %v665_v61 = vrot.slane %v3739_v57, %v3937_v42 }
  0x90   :  { %3339 = vmatprep.subr.bf16.mxu0 %v3687_v0  ;;  %v3740_v0 = vld [vmem:[%s4646_s1 + $0x5b8] sm:$0xff]  }
  0x91   :  { %3360 = vmatpush3.bf16.msra.mxu1 %v3686_v63  ;;  %v669_v63 = vcombine.high %v651_v60, %v665_v61 }
  0x92   :  { %3361 = vmatprep.subr.bf16.mxu1 %v3689_v2 }
  0x93   :  { %3340 = vmatpush3.bf16.msra.mxu0 %v3688_v1  ;;  %v668_v1 = vcombine.low %v651_v60, %v665_v61  ;;  %v697_v2 = vrot.slane %v669_v63, %v3937_v42 }
  0x94   :  { %3341 = vmatprep.subr.bf16.mxu0 %v3691_v4  ;;  %v3742_v4 = vld [vmem:[%s4646_s1 + $0x600] sm:$0xff]  }
  0x95   :  { %3362 = vmatpush3.bf16.msra.mxu1 %v3690_v3  ;;  %v683_v3 = vrot.slane %v668_v1, %v3937_v42  ;;  %v3767_v1 = vld [vmem:[%s4648_s3] sm:$0xff]  }
  0x96   :  { %3363 = vmatprep.subr.bf16.mxu1 %v3693_v6  ;;  %v701_v6 = vcombine.high %v697_v2, %v697_v2 }
  0x97   :  { %3342 = vmatpush3.bf16.msra.mxu0 %v3692_v5  ;;  %v3744_v5 = vld [vmem:[%s4646_s1 + $0x648] sm:$0xff]  }
  0x98   :  { %3343 = vmatprep.subr.bf16.mxu0 %v3695_v8  ;;  %v3743_v8 = vld [vmem:[%s4646_s1 + $0x680] sm:$0xff]  }
  0x99   :  { %3364 = vmatpush3.bf16.msra.mxu1 %v3694_v7  ;;  %v699_v7 = vcombine.high %v683_v3, %v683_v3 }
  0x9a   :  { %3365 = vmatprep.subr.bf16.mxu1 %v3697_v10  ;;  %v3745_v10 = vld [vmem:[%s4646_s1 + $0x608] sm:$0xff]  }
  0x9b   :  { %3344 = vmatpush3.bf16.msra.mxu0 %v3696_v9  ;;  %v3784_v9 = vmov 0.0  }
  0x9c   :  { %3345 = vmatprep.subr.bf16.mxu0 %v3699_v12  ;;  %v3746_v12 = vld [vmem:[%s4646_s1 + $0x688] sm:$0xff]  }
  0x9d   :  { %3366 = vmatpush3.bf16.msra.mxu1 %v3698_v11  ;;  %v3747_v11 = vld [vmem:[%s4646_s1 + $0x650] sm:$0xff]  }
  0x9e   :  { %3367 = vmatprep.subr.bf16.mxu1 %v3701_v14  ;;  %v3750_v14 = vld [vmem:[%s4646_s1 + $0x658] sm:$0xff]  }
  0x9f   :  { %3346 = vmatpush3.bf16.msra.mxu0 %v3700_v13  ;;  %v3748_v13 = vld [vmem:[%s4646_s1 + $0x610] sm:$0xff]  }
  0xa0   :  { %3375 = vmatprep.subr.bf16.mxu0 %v3707_v20  ;;  %v3755_v20 = vld [vmem:[%s4646_s1 + $0x6a0] sm:$0xff]  }
  0xa1   :  { %3368 = vmatpush3.bf16.msra.mxu1 %v3706_v18  ;;  %v3752_v18 = vld [vmem:[%s4646_s1 + $0x698] sm:$0xff]  }
  0xa2   :  { %3397 = vmatprep.subr.bf16.mxu1 %v3709_v23  ;;  %2411 = vmatmul.mubr.bf16.vlgmr.msra.gmra.mrb[16].mxu0 %v676_v25  ;;  %v3758_v23 = vld [vmem:[%s4646_s1 + $0x6a8] sm:$0xff]   ;;  %v3759_v25 = vld [vmem:[%s4646_s1 + $0x670] sm:$0xff]  }
  0xa3   :  { %3376 = vmatpush3.bf16.msra.mxu0 %v3708_v26  ;;  %2490 = vmatprep.mubr.bf16.mxu0 %v697_v2  ;;  %v3765_v26 = vld [vmem:[%s4645_s0 + $0x4e] ss:$27 sps:$4 sm:$0x77]  }
  0xa4   :  { %2451 = vmatmul.mubr.bf16.vlgmr.msra.gmra.mrb[16].mxu1 %v698_v29  ;;  %3377 = vmatprep.subr.bf16.mxu0 %v3711_v27  ;;  %v3760_v27 = vld [vmem:[%s4646_s1 + $0x630] sm:$0xff]   ;;  %v3762_v29 = vld [vmem:[%s4646_s1 + $0x678] sm:$0xff]   ;;  %v3768_v2 = vld [vmem:[%s4648_s3 + $0x8] sm:$0xff]  }
  0xa5   :  { %3398 = vmatpush3.bf16.msra.mxu1 %v3710_v30  ;;  %2530 = vmatprep.mubr.bf16.mxu1 %v701_v6  ;;  %v717_v30 = vrot.slane %v3765_v26, %v3937_v42  ;;  %v3779_v26 = vld [vmem:[%s4650_s5 + $0x20] sm:$0xff]  }
  0xa6   :  { %3399 = vmatprep.subr.bf16.mxu1 %v3713_v31  ;;  %v3761_v31 = vld [vmem:[%s4646_s1 + $0x6b0] sm:$0xff]  }
  0xa7   :  { %3378 = vmatpush3.bf16.msra.mxu0 %v3712_v32  ;;  %v719_v32 = vcombine.high %v710_v28, %v717_v30 }
  0xa8   :  { %3379 = vmatprep.subr.bf16.mxu0 %v3715_v33  ;;  %v718_v33 = vcombine.low %v710_v28, %v717_v30  ;;  %v3780_v28 = vld [vmem:[%s4650_s5 + $0x28] sm:$0xff]  }
  0xa9   :  { %3400 = vmatpush3.bf16.msra.mxu1 %v3714_v34  ;;  %v3763_v34 = vld [vmem:[%s4646_s1 + $0x638] sm:$0xff]  }
  0xaa   :  { %3401 = vmatprep.subr.bf16.mxu1 %v3717_v35  ;;  %v733_v35 = vrot.slane %v719_v32, %v3937_v42 }
  0xab   :  { %3380 = vmatpush3.bf16.msra.mxu0 %v3716_v36  ;;  %v3766_v36 = vld [vmem:[%s4646_s1 + $0x6b8] sm:$0xff]  }
  0xac   :  { %3381 = vmatprep.subr.bf16.mxu0 %v3719_v37  ;;  %v726_v37 = vrot.slane %v718_v33, %v3937_v42 }
  0xad   :  { %3402 = vmatpush3.bf16.msra.mxu1 %v3718_v38 }
  0xae   :  { %3403 = vmatprep.subr.bf16.mxu1 %v3721_v39  ;;  %v734_v38 = vcombine.high %v726_v37, %v726_v37 }
  0xaf   :  { %3382 = vmatpush3.bf16.msra.mxu0 %v3720_v40  ;;  %v2918_v40 = vld [vmem:[%s4647_s2] ss:$0 sm:$0xff] }
  0xb0   :  { %3383 = vmatprep.subr.bf16.mxu0 %v3723_v41 }
  0xb1   :  { %3404 = vmatpush3.bf16.msra.mxu1 %v3722_v43 }
  0xb2   :  { %3405 = vmatprep.subr.bf16.mxu1 %v3725_v44 }
  0xb3   :  { %3384 = vmatpush3.bf16.msra.mxu0 %v3724_v45 }
  0xb4   :  { %3385 = vmatprep.subr.bf16.mxu0 %v3727_v46 }
  0xb5   :  { %3406 = vmatpush3.bf16.msra.mxu1 %v3726_v47 }
  0xb6   :  { %3407 = vmatprep.subr.bf16.mxu1 %v3729_v48 }
  0xb7   :  { %3386 = vmatpush3.bf16.msra.mxu0 %v3728_v49 }
  0xb8   :  { %3387 = vmatprep.subr.bf16.mxu0 %v3731_v50 }
  0xb9   :  { %3408 = vmatpush3.bf16.msra.mxu1 %v3730_v51 }
  0xba   :  { %3409 = vmatprep.subr.bf16.mxu1 %v3733_v52 }
  0xbb   :  { %3388 = vmatpush3.bf16.msra.mxu0 %v3732_v53 }
  0xbc   :  { %3389 = vmatprep.subr.bf16.mxu0 %v3735_v54 }
  0xbd   :  { %3410 = vmatpush3.bf16.msra.mxu1 %v3734_v55 }
  0xbe   :  { %3411 = vmatprep.subr.bf16.mxu1 %v3737_v58 }
  0xbf   :  { %3390 = vmatpush3.bf16.msra.mxu0 %v3736_v59 }
  0xc0   :  { %3419 = vmatprep.subr.bf16.mxu0 %v3741_v62 }
  0xc1   :  { %3412 = vmatpush3.bf16.msra.mxu1 %v3740_v0 }
  0xc2   :  { %2491 = vmatmul.mubr.bf16.vlgmr.msra.gmra.mrb[20].mxu0 %v683_v3  ;;  %3468 = vmatprep.subr.bf16.mxu1 %v3784_v9  ;;  %v3769_v3 = vld [vmem:[%s4648_s3 + $0x10] sm:$0xff]  }
  0xc3   :  { %3420 = vmatpush3.bf16.msra.mxu0 %v3742_v4  ;;  %2570 = vmatprep.mubr.bf16.mxu0 %v733_v35  ;;  %v3770_v4 = vld [vmem:[%s4648_s3 + $0x18] sm:$0xff]  }
  0xc4   :  { %2531 = vmatmul.mubr.bf16.vlgmr.msra.gmra.mrb[20].mxu1 %v699_v7  ;;  %3421 = vmatprep.subr.bf16.mxu0 %v3744_v5  ;;  %v3771_v5 = vld [vmem:[%s4648_s3 + $0x20] sm:$0xff]  }
  0xc5   :  { %3469 = vmatpush3.bf16.msra.mxu1 %v3743_v8  ;;  %3484 = vmatprep.mubr.msk.bf16.mxu1 %vm3785_vm0, %v3784_v9  ;;  %v3772_v8 = vld [vmem:[%s4648_s3 + $0x28] sm:$0xff]  }
  0xc6   :  { %3470 = vmatprep.subr.bf16.mxu1 %v3784_v9 }
  0xc7   :  { %3422 = vmatpush3.bf16.msra.mxu0 %v3745_v10 }
  0xc8   :  { %3423 = vmatprep.subr.bf16.mxu0 %v3747_v11 }
  0xc9   :  { %3471 = vmatpush3.bf16.msra.mxu1 %v3746_v12 }
  0xca   :  { %3472 = vmatprep.subr.bf16.mxu1 %v3784_v9 }
  0xcb   :  { %3424 = vmatpush3.bf16.msra.mxu0 %v3748_v13 }
  0xcc   :  { %3425 = vmatprep.subr.bf16.mxu0 %v3750_v14 }
  0xcd   :  { %3473 = vmatpush3.bf16.msra.mxu1 %v3749_v15 }
  0xce   :  { %3474 = vmatprep.subr.bf16.mxu1 %v3784_v9 }
  0xcf   :  { %3426 = vmatpush3.bf16.msra.mxu0 %v3751_v16 }
  0xd0   :  { %3427 = vmatprep.subr.bf16.mxu0 %v3753_v17 }
  0xd1   :  { %3475 = vmatpush3.bf16.msra.mxu1 %v3752_v18 }
  0xd2   :  { %3476 = vmatprep.subr.bf16.mxu1 %v3784_v9 }
  0xd3   :  { %3428 = vmatpush3.bf16.msra.mxu0 %v3754_v19  ;;  %v3773_v19 = vld [vmem:[%s4648_s3 + $0x30] sm:$0xff]  }
  0xd4   :  { %3429 = vmatprep.subr.bf16.mxu0 %v3756_v21  ;;  %v3774_v21 = vld [vmem:[%s4648_s3 + $0x38] sm:$0xff]  }
  0xd5   :  { %3477 = vmatpush3.bf16.msra.mxu1 %v3755_v20 }
  0xd6   :  { %3478 = vmatprep.subr.bf16.mxu1 %v3784_v9 }
  0xd7   :  { %3430 = vmatpush3.bf16.msra.mxu0 %v3757_v22  ;;  %v3775_v22 = vld [vmem:[%s4650_s5] sm:$0xff]  }
  0xd8   :  { %3431 = vmatprep.subr.bf16.mxu0 %v3759_v25  ;;  %v3778_v25 = vld [vmem:[%s4650_s5 + $0x18] sm:$0xff]  }
  0xd9   :  { %3479 = vmatpush3.bf16.msra.mxu1 %v3758_v23  ;;  %v3776_v23 = vld [vmem:[%s4650_s5 + $0x8] sm:$0xff]  }
  0xda   :  { %3480 = vmatprep.subr.bf16.mxu1 %v3784_v9 }
  0xdb   :  { %3432 = vmatpush3.bf16.msra.mxu0 %v3760_v27 }
  0xdc   :  { %3433 = vmatprep.subr.bf16.mxu0 %v3762_v29 }
  0xdd   :  { %3481 = vmatpush3.bf16.msra.mxu1 %v3761_v31 }
  0xde   :  { %3482 = vmatprep.subr.bf16.mxu1 %v3784_v9 }
  0xdf   :  { %3434 = vmatpush3.bf16.msra.mxu0 %v3763_v34 }
  0xe0   :  { %3488 = vmatprep.subr.bf16.mxu0 %v3784_v9 }
  0xe1   :  { %3483 = vmatpush3.bf16.msra.mxu1 %v3766_v36 }
  0xe2   :  { %2571 = vmatmul.mubr.bf16.vlgmr.msra.gmra.mrb[24].mxu0 %v726_v37  ;;  %3508 = vmatprep.subr.bf16.mxu1 %v3784_v9 }
  0xe3   :  { %3504 = vmatprep.mubr.msk.bf16.mxu0 %vm3785_vm0, %v3784_v9  ;;  %3489 = vmatpush3.bf16.msra.mxu0 %v3767_v1 }
  0xe4   :  { %3485 = vmatmul.mubr.bf16.vlgmr.msra.gmra.mrb[24].mxu1 %v734_v38  ;;  %3490 = vmatprep.subr.bf16.mxu0 %v3784_v9 }
  0xe5   :  { %3524 = vmatprep.mubr.msk.bf16.mxu1 %vm3785_vm0, %v3784_v9  ;;  %3509 = vmatpush3.bf16.msra.mxu1 %v3775_v22 }
  0xe6   :  { %3510 = vmatprep.subr.bf16.mxu1 %v3784_v9 }
  0xe7   :  { %3491 = vmatpush3.bf16.msra.mxu0 %v3768_v2 }
  0xe8   :  { %3492 = vmatprep.subr.bf16.mxu0 %v3784_v9 }
  0xe9   :  { %3511 = vmatpush3.bf16.msra.mxu1 %v3776_v23 }
  0xea   :  { %3512 = vmatprep.subr.bf16.mxu1 %v3784_v9 }
  0xeb   :  { %3493 = vmatpush3.bf16.msra.mxu0 %v3769_v3 }
  0xec   :  { %3494 = vmatprep.subr.bf16.mxu0 %v3784_v9 }
  0xed   :  { %3513 = vmatpush3.bf16.msra.mxu1 %v3777_v24 }
  0xee   :  { %3514 = vmatprep.subr.bf16.mxu1 %v3784_v9 }
  0xef   :  { %3495 = vmatpush3.bf16.msra.mxu0 %v3770_v4 }
  0xf0   :  { %3496 = vmatprep.subr.bf16.mxu0 %v3784_v9 }
  0xf1   :  { %3515 = vmatpush3.bf16.msra.mxu1 %v3778_v25 }
  0xf2   :  { %3516 = vmatprep.subr.bf16.mxu1 %v3784_v9 }
  0xf3   :  { %3497 = vmatpush3.bf16.msra.mxu0 %v3771_v5 }
  0xf4   :  { %3498 = vmatprep.subr.bf16.mxu0 %v3784_v9 }
  0xf5   :  { %v3171_v39 = vpop.f32.mrb[0].mxu0  ;;  %3517 = vmatpush3.bf16.msra.mxu1 %v3779_v26 }
  0xf6   :  { %v3172_v41 = vpop.f32.mrb[1].mxu0  ;;  %3518 = vmatprep.subr.bf16.mxu1 %v3784_v9 }
  0xf7   :  { %v3173_v43 = vadd.f32 %v3172_v41, %v3171_v39  ;;  %v3174_v44 = vpop.f32.mrb[2].mxu0  ;;  %v3193_v45 = vpop.f32.mrb[0].mxu1  ;;  %3499 = vmatpush3.bf16.msra.mxu0 %v3772_v8 }
  0xf8   :  { %v3175_v46 = vpop.f32.mrb[3].mxu0  ;;  %v3194_v47 = vpop.f32.mrb[1].mxu1  ;;  %3500 = vmatprep.subr.bf16.mxu0 %v3784_v9 }
  0xf9   :  { %v2093_v48 = vadd.f32 %v3173_v43, %v2918_v40  ;;  %v3195_v49 = vadd.f32 %v3194_v47, %v3193_v45  ;;  %v3196_v50 = vpop.f32.mrb[2].mxu1  ;;  %3519 = vmatpush3.bf16.msra.mxu1 %v3780_v28 }
  0xfa   :  { %v3197_v51 = vpop.f32.mrb[3].mxu1  ;;  %3520 = vmatprep.subr.bf16.mxu1 %v3784_v9 }
  0xfb   :  { %v2133_v52 = vadd.f32 %v3195_v49, %v2093_v48  ;;  %3501 = vmatpush3.bf16.msra.mxu0 %v3773_v19 }
  0xfc   :  { %3502 = vmatprep.subr.bf16.mxu0 %v3784_v9 }
  0xff   :  { %3503 = vmatpush3.bf16.msra.mxu0 %v3774_v21 }
 0x115   :  { %v3215_v53 = vpop.f32.mrb[4].mxu0 }
 0x116   :  { %v3216_v54 = vpop.f32.mrb[5].mxu0 }
 0x117   :  { %v3217_v55 = vadd.f32 %v3216_v54, %v3215_v53  ;;  %v3218_v56 = vpop.f32.mrb[6].mxu0  ;;  %v3237_v57 = vpop.f32.mrb[4].mxu1 }
 0x118   :  { %v3219_v58 = vpop.f32.mrb[7].mxu0  ;;  %v3238_v59 = vpop.f32.mrb[5].mxu1 }
 0x119   :  { %v2173_v60 = vadd.f32 %v3217_v55, %v2133_v52  ;;  %v3239_v61 = vadd.f32 %v3238_v59, %v3237_v57  ;;  %v3240_v62 = vpop.f32.mrb[6].mxu1 }
 0x11a   :  { %v3241_v63 = vpop.f32.mrb[7].mxu1 }
 0x11b   :  { %v2213_v0 = vadd.f32 %v3239_v61, %v2173_v60 }
 0x135   :  { %v3259_v6 = vpop.f32.mrb[8].mxu0 }
 0x136   :  { %v3260_v7 = vpop.f32.mrb[9].mxu0 }
 0x137   :  { %v3261_v10 = vadd.f32 %v3260_v7, %v3259_v6  ;;  %v3262_v11 = vpop.f32.mrb[10].mxu0  ;;  %v3281_v12 = vpop.f32.mrb[8].mxu1 }
 0x138   :  { %v3263_v13 = vpop.f32.mrb[11].mxu0  ;;  %v3282_v14 = vpop.f32.mrb[9].mxu1 }
 0x139   :  { %v2253_v15 = vadd.f32 %v3261_v10, %v2213_v0  ;;  %v3283_v16 = vadd.f32 %v3282_v14, %v3281_v12  ;;  %v3284_v17 = vpop.f32.mrb[10].mxu1 }
 0x13a   :  { %v3285_v18 = vpop.f32.mrb[11].mxu1  ;;  %v3135_v17 = vld [vmem:[%s4649_s4] ss:$0 sm:$0xff] }
 0x13b   :  { %v2293_v20 = vadd.f32 %v3283_v16, %v2253_v15  ;;  %v3781_v15 = vld [vmem:[%s4650_s5 + $0x30] sm:$0xff]   ;;  %v3782_v16 = vld [vmem:[%s4650_s5 + $0x38] sm:$0xff]  }
 0x13c   :  { %3521 = vmatpush3.bf16.msra.mxu1 %v3781_v15 }
 0x13d   :  { %3522 = vmatprep.subr.bf16.mxu1 %v3784_v9  ;;  %v3144_v9 = vld [vmem:[%s4651_s6] ss:$0 sm:$0xff] }
 0x140   :  { %3523 = vmatpush3.bf16.msra.mxu1 %v3782_v16 }
 0x155   :  { %v3303_v27 = vpop.f32.mrb[12].mxu0 }
 0x156   :  { %v3304_v29 = vpop.f32.mrb[13].mxu0 }
 0x157   :  { %v3305_v30 = vadd.f32 %v3304_v29, %v3303_v27  ;;  %v3306_v31 = vpop.f32.mrb[14].mxu0  ;;  %v3325_v32 = vpop.f32.mrb[12].mxu1 }
 0x158   :  { %v3307_v33 = vpop.f32.mrb[15].mxu0  ;;  %v3326_v34 = vpop.f32.mrb[13].mxu1 }
 0x159   :  { %v2333_v35 = vadd.f32 %v3305_v30, %v2293_v20  ;;  %v3327_v36 = vadd.f32 %v3326_v34, %v3325_v32  ;;  %v3328_v37 = vpop.f32.mrb[14].mxu1 }
 0x15a   :  { %v3329_v38 = vpop.f32.mrb[15].mxu1 }
 0x15b   :  { %v2373_v39 = vadd.f32 %v3327_v36, %v2333_v35 }
 0x175   :  { %v3347_v40 = vpop.f32.mrb[16].mxu0 }
 0x176   :  { %v3348_v41 = vpop.f32.mrb[17].mxu0 }
 0x177   :  { %v3349_v43 = vadd.f32 %v3348_v41, %v3347_v40  ;;  %v3350_v44 = vpop.f32.mrb[18].mxu0  ;;  %v3369_v45 = vpop.f32.mrb[16].mxu1 }
 0x178   :  { %v3351_v46 = vpop.f32.mrb[19].mxu0  ;;  %v3370_v47 = vpop.f32.mrb[17].mxu1 }
 0x179   :  { %v2413_v48 = vadd.f32 %v3349_v43, %v2373_v39  ;;  %v3371_v49 = vadd.f32 %v3370_v47, %v3369_v45  ;;  %v3372_v50 = vpop.f32.mrb[18].mxu1 }
 0x17a   :  { %v3373_v51 = vpop.f32.mrb[19].mxu1 }
 0x17b   :  { %v2453_v52 = vadd.f32 %v3371_v49, %v2413_v48 }
 0x195   :  { %v3391_v53 = vpop.f32.mrb[20].mxu0 }
 0x196   :  { %v3392_v54 = vpop.f32.mrb[21].mxu0 }
 0x197   :  { %v3393_v55 = vadd.f32 %v3392_v54, %v3391_v53  ;;  %v3394_v56 = vpop.f32.mrb[22].mxu0  ;;  %v3413_v57 = vpop.f32.mrb[20].mxu1 }
 0x198   :  { %v3395_v58 = vpop.f32.mrb[23].mxu0  ;;  %v3414_v59 = vpop.f32.mrb[21].mxu1 }
 0x199   :  { %v2493_v60 = vadd.f32 %v3393_v55, %v2453_v52  ;;  %v3415_v61 = vadd.f32 %v3414_v59, %v3413_v57  ;;  %v3416_v62 = vpop.f32.mrb[22].mxu1 }
 0x19a   :  { %v3417_v63 = vpop.f32.mrb[23].mxu1 }
 0x19b   :  { %v2533_v0 = vadd.f32 %v3415_v61, %v2493_v60 }
 0x1b5   :  { %v3435_v1 = vpop.f32.mrb[24].mxu0 }
 0x1b6   :  { %v3436_v2 = vpop.f32.mrb[25].mxu0 }
 0x1b7   :  { %v3437_v3 = vadd.f32 %v3436_v2, %v3435_v1  ;;  %v3438_v4 = vpop.f32.mrb[26].mxu0  ;;  %v2612_v5 = vpop.f32.mrb[24].mxu1 }
 0x1b8   :  { %v3439_v6 = vpop.f32.mrb[27].mxu0  ;;  %v3486_v7 = vpop.f32.mrb[25].mxu1 }
 0x1b9   :  { %v2573_v8 = vadd.f32 %v3437_v3, %v2533_v0  ;;  %v2615_v10 = vpop.f32.mrb[26].mxu1 }
 0x1ba   :  { %v3487_v11 = vpop.f32.mrb[27].mxu1 }
 0x1bb   :  { %v2613_v12 = vadd.f32 %v2612_v5, %v2573_v8 }
 0x1bd   :  { %v2618_v13 = vmax.f32 %v2613_v12, 0.0 }
 0x1bf   :  { %v2619_v14 = vpack.c.bf16 %v2618_v13, %v2618_v13 }
 0x1c1   :  { %3505 = vmatmul.mubr.bf16.vlgmr.msra.gmra.mrb[28].mxu0 %v2619_v14 }
 0x294   :  { %v2725_v18 = vpop.f32.mrb[28].mxu0 }
 0x295   :  { %v2726_v19 = vadd.f32 %v3135_v17, %v2725_v18  ;;  %v3506_v20 = vpop.f32.mrb[29].mxu0 }
 0x296   :  { %v2728_v21 = vpop.f32.mrb[30].mxu0 }
 0x297   :  { %v2731_v22 = vmax.f32 %v2726_v19, 0.0  ;;  %v3507_v23 = vpop.f32.mrb[31].mxu0 }
 0x299   :  { %v2732_v24 = vpack.c.bf16 %v2731_v22, %v2731_v22 }
 0x29b   :  { %3525 = vmatmul.mubr.bf16.vlgmr.msra.gmra.mrb[28].mxu1 %v2732_v24 }
 0x36e   :  { %v2838_v25 = vpop.f32.mrb[28].mxu1 }
 0x36f   :  { %v2839_v26 = vadd.f32 %v3144_v9, %v2838_v25  ;;  %v3526_v27 = vpop.f32.mrb[29].mxu1 }
 0x370   :  { %v2841_v28 = vpop.f32.mrb[30].mxu1 }
 0x371   :  { %v2844_v29 = vmax.f32 %v2839_v26, 0.0  ;;  %v3527_v30 = vpop.f32.mrb[31].mxu1 }
 0x373   :  { %v2845_v31 = vpack.c.bf16 %v2844_v29, %v2844_v29 }
 0x375   :  { %v2853_v32 = vrot.slane %v2845_v31, %v3937_v42 }
 0x377   :  { %3153 = vst.sshfl [vmem:[#allocation2] sm:$0x1 pattern:$0x73625140] %v2853_v32 }
 0x37e   :  { %v2896_v33 = vld [vmem:[#allocation2] sm:$0x1] }
 0x37f   :  { %2897 = vst [vmem:[%s4652_s7] sm:$0x1] %v2896_v33 }

// kernel: _lambda_.6
= control target key start
LH: loop header
LB: loop body
LE: loop exit
PB: predicated region body
PF: predicated region fallthrough
CT: control target
= control target key end

     0   :  { %s7184_s24 = smov 0   ;;  %s9100_s0 = inlined_call_operand.vmem [shape: bf16[18,2304], index: 0, kind: input, shape index: {}]   ;;  %s9101_s1 = inlined_call_operand.vmem [shape: bf16[2304,384], index: 1, kind: input, shape index: {}]   ;;  %s9102_s2 = inlined_call_operand.vmem [shape: f32[1,384], index: 2, kind: input, shape index: {}]   ;;  %s9103_s3 = inlined_call_operand.vmem [shape: bf16[384,384], index: 3, kind: input, shape index: {}]   ;;  %s9104_s4 = inlined_call_operand.vmem [shape: f32[1,384], index: 4, kind: input, shape index: {}]   ;;  %s9105_s5 = inlined_call_operand.vmem [shape: bf16[384,384], index: 5, kind: input, shape index: {}]   ;;  %s9106_s6 = inlined_call_operand.vmem [shape: f32[1,384], index: 6, kind: input, shape index: {}]   ;;  %s9107_s7 = inlined_call_operand.vmem [shape: bf16[18,384], index: 7, kind: output, shape index: {}]  }
   0x1 LB: > { %s5381_s25 = sadd.s32 4294967295, %s7139_s24   ;;  %p5385_p0 = scmp.ge.s32.totalorder %s7139_s24, 1  ;;  %s7139_s24 = sphi %s7184_s24, %s17_s24  }
   0x2   : > { %p237_p1 = scmp.lt.s32.totalorder %s7139_s24, 4 }
   0x4   : > { %p238_p2 = pnand %p5385_p0, %p237_p1 }
   0x5   : > { %v6347_v0 = vld [vmem:[%s9101_s1 + $0x4] ss:$12 sps:$4 sm:$0xff] (!%p238_p2)   ;;  %v6349_v1 = vld [vmem:[%s9101_s1] ss:$12 sps:$4 sm:$0xff] (!%p238_p2)   ;;  %v6350_v2 = vld [vmem:[%s9101_s1 + $0x1c] ss:$12 sps:$4 sm:$0xff] (!%p238_p2)  }
   0x6   : > { %241 = sbr.rel (%p238_p2) target bundleno = 1372 (0x55c), region = 48  ;;  %3249 = vmatprep.subr.bf16.mxu0 (!%p238_p2), %v6347_v0  ;;  %v6352_v3 = vld [vmem:[%s9101_s1 + $0x18] ss:$12 sps:$4 sm:$0xff] (!%p238_p2)   ;;  %v6353_v4 = vld [vmem:[%s9101_s1 + $0x34] ss:$12 sps:$4 sm:$0xff] (!%p238_p2)   ;;  %p269_p3 = scmp.lt.s32.totalorder (!%p238_p2), %s5381_s25, 2 }
   0x7   : > { %3250 = vmatpush1.bf16.msra.mxu0 (!%p238_p2), %v6349_v1  ;;  %v6355_v5 = vld [vmem:[%s9101_s1 + $0x30] ss:$12 sps:$4 sm:$0xff] (!%p238_p2)   ;;  %v6356_v6 = vld [vmem:[%s9101_s1 + $0x4c] ss:$12 sps:$4 sm:$0xff] (!%p238_p2)   ;;  %v6358_v7 = vld [vmem:[%s9101_s1 + $0x48] ss:$12 sps:$4 sm:$0xff] (!%p238_p2)  }
   0x8   : > { %3251 = vmatprep.subr.bf16.mxu0 (!%p238_p2), %v6350_v2  ;;  %v6359_v8 = vld [vmem:[%s9101_s1 + $0x64] ss:$12 sps:$4 sm:$0xff] (!%p238_p2)   ;;  %v6361_v9 = vld [vmem:[%s9101_s1 + $0x60] ss:$12 sps:$4 sm:$0xff] (!%p238_p2)   ;;  %v6362_v10 = vld [vmem:[%s9101_s1 + $0x7c] ss:$12 sps:$4 sm:$0xff] (!%p238_p2)  }
   0x9   : > { %v6364_v11 = vld [vmem:[%s9101_s1 + $0x78] ss:$12 sps:$4 sm:$0xff] (!%p238_p2)   ;;  %v6365_v12 = vld [vmem:[%s9101_s1 + $0x94] ss:$12 sps:$4 sm:$0xff] (!%p238_p2)   ;;  %v6367_v15 = vld [vmem:[%s9101_s1 + $0x90] ss:$12 sps:$4 sm:$0xff] (!%p238_p2)  }
   0xa   : > { %v6368_v16 = vld [vmem:[%s9101_s1 + $0xac] ss:$12 sps:$4 sm:$0xff] (!%p238_p2)   ;;  %v6370_v17 = vld [vmem:[%s9101_s1 + $0xa8] ss:$12 sps:$4 sm:$0xff] (!%p238_p2)   ;;  %v6371_v19 = vld [vmem:[%s9101_s1 + $0xc4] ss:$12 sps:$4 sm:$0xff] (!%p238_p2)  }
   0xb   : > { %3252 = vmatpush1.bf16.msra.mxu0 (!%p238_p2), %v6352_v3  ;;  %v6409_v18 = vld [vmem:[%s9101_s1 + $0xc8] ss:$12 sps:$4 sm:$0xff] (!%p238_p2)   ;;  %v6373_v20 = vld [vmem:[%s9101_s1 + $0xc0] ss:$12 sps:$4 sm:$0xff] (!%p238_p2)   ;;  %v6419_v25 = vld [vmem:[%s9101_s1 + $0xf8] ss:$12 sps:$4 sm:$0xff] (!%p238_p2)  }
   0xc   : > { %3253 = vmatprep.subr.bf16.mxu0 (!%p238_p2), %v6353_v4  ;;  %5988 = vmatprep.subr.bf16.mxu1 (!%p238_p2), %v6409_v18  ;;  %v6413_v21 = vld [vmem:[%s9101_s1 + $0x8] ss:$12 sps:$4 sm:$0xff] (!%p238_p2)   ;;  %v6414_v22 = vld [vmem:[%s9101_s1 + $0xe0] ss:$12 sps:$4 sm:$0xff] (!%p238_p2)   ;;  %v6376_v26 = vld [vmem:[%s9101_s1 + $0xd8] ss:$12 sps:$4 sm:$0xff] (!%p238_p2)  }
   0xd   : > { %s9109_s25 = smov (!%p269_p3, %s5381_s25), 2  ;;  %v6374_v23 = vld [vmem:[%s9101_s1 + $0xdc] ss:$12 sps:$4 sm:$0xff]   ;;  %5989 = vmatpush3.bf16.msra.mxu1 %v6413_v21  ;;  %v6418_v24 = vld [vmem:[%s9101_s1 + $0x20] ss:$12 sps:$4 sm:$0xff]   ;;  %vm7142_vm0 = vmmov 0  }
   0xe   : > { %s6334_s21 = smul.u32 72, %s9109_s25  ;;  %5990 = vmatprep.subr.bf16.mxu1 %v6414_v22  ;;  %v6377_v27 = vld [vmem:[%s9101_s1 + $0xf4] ss:$12 sps:$4 sm:$0xff]   ;;  %v6423_v28 = vld [vmem:[%s9101_s1 + $0x38] ss:$12 sps:$4 sm:$0xff]  }
   0xf   : > { %3254 = vmatpush1.bf16.msra.mxu0 %v6355_v5  ;;  %v6424_v29 = vld [vmem:[%s9101_s1 + $0x110] ss:$12 sps:$4 sm:$0xff]   ;;  %v6380_v31 = vld [vmem:[%s9101_s1 + $0x10c] ss:$12 sps:$4 sm:$0xff]   ;;  %v6429_v33 = vld [vmem:[%s9101_s1 + $0x128] ss:$12 sps:$4 sm:$0xff]  }
  0x10   : > { %3255 = vmatprep.subr.bf16.mxu0 %v6356_v6  ;;  %s7231_s30 = scalar_lea.vmem %s9100_s0, %s6334_s21  ;;  %v6379_v30 = vld [vmem:[%s9101_s1 + $0xf0] ss:$12 sps:$4 sm:$0xff]   ;;  %v6382_v34 = vld [vmem:[%s9101_s1 + $0x108] ss:$12 sps:$4 sm:$0xff]   ;;  %v6434_v37 = vld [vmem:[%s9101_s1 + $0x140] ss:$12 sps:$4 sm:$0xff]  }
  0x11   : > { %v7240_v13 = vld [vmem:[%s7231_s30] sm:$0xff]  ;;  %5991 = vmatpush3.bf16.msra.mxu1 %v6418_v24  ;;  %v6428_v32 = vld [vmem:[%s9101_s1 + $0x50] ss:$12 sps:$4 sm:$0xff]   ;;  %v6433_v36 = vld [vmem:[%s9101_s1 + $0x68] ss:$12 sps:$4 sm:$0xff]   ;;  %s6335_s15 = smul.u32 12, %s9109_s25 }
  0x12   : > { %v5389_v14 = vcombine.high %v7240_v13, %v7240_v13  ;;  %5992 = vmatprep.subr.bf16.mxu1 %v6419_v25  ;;  %v6383_v35 = vld [vmem:[%s9101_s1 + $0x124] ss:$12 sps:$4 sm:$0xff]   ;;  %v6385_v38 = vld [vmem:[%s9101_s1 + $0x120] ss:$12 sps:$4 sm:$0xff]   ;;  %v6386_v39 = vld [vmem:[%s9101_s1 + $0x13c] ss:$12 sps:$4 sm:$0xff]   ;;  %v5388_v53 = vcombine.low %v7240_v13, %v7240_v13 }
  0x13   : > { %3256 = vmatpush1.bf16.msra.mxu0 %v6358_v7  ;;  %v6438_v40 = vld [vmem:[%s9101_s1 + $0x80] ss:$12 sps:$4 sm:$0xff]   ;;  %v6439_v41 = vld [vmem:[%s9101_s1 + $0x158] ss:$12 sps:$4 sm:$0xff]   ;;  %v6444_v45 = vld [vmem:[%s9101_s1 + $0x170] ss:$12 sps:$4 sm:$0xff]  }
  0x14   : > { %3257 = vmatprep.subr.bf16.mxu0 %v6359_v8  ;;  %3281 = vmatprep.mubr.bf16.mxu0 %v5389_v14  ;;  %v6388_v42 = vld [vmem:[%s9101_s1 + $0x138] ss:$12 sps:$4 sm:$0xff]   ;;  %v6389_v43 = vld [vmem:[%s9101_s1 + $0x154] ss:$12 sps:$4 sm:$0xff]   ;;  %v6391_v46 = vld [vmem:[%s9101_s1 + $0x150] ss:$12 sps:$4 sm:$0xff]  }
  0x15   : > { %3650 = vmatprep.mubr.bf16.mxu1 %v5389_v14  ;;  %5993 = vmatpush3.bf16.msra.mxu1 %v6423_v28  ;;  %v6443_v44 = vld [vmem:[%s9101_s1 + $0x98] ss:$12 sps:$4 sm:$0xff]   ;;  %v6448_v48 = vld [vmem:[%s9101_s1 + $0xb0] ss:$12 sps:$4 sm:$0xff]   ;;  %v6449_v49 = vld [vmem:[%s9101_s1 + $0x248] ss:$12 sps:$4 sm:$0xff]  }
  0x16   : > { %5994 = vmatprep.subr.bf16.mxu1 %v6424_v29  ;;  %v6392_v47 = vld [vmem:[%s9101_s1 + $0x16c] ss:$12 sps:$4 sm:$0xff]   ;;  %v6394_v50 = vld [vmem:[%s9101_s1 + $0x168] ss:$12 sps:$4 sm:$0xff]   ;;  %v6399_v51 = vld [vmem:[%s9101_s1 + $0x184] ss:$12 sps:$4 sm:$0xff]  }
  0x17   : > { %3258 = vmatpush1.bf16.msra.mxu0 %v6361_v9  ;;  %v6453_v52 = vld [vmem:[%s9101_s1 + $0x188] ss:$12 sps:$4 sm:$0xff]   ;;  %v6454_v54 = vld [vmem:[%s9101_s1 + $0x260] ss:$12 sps:$4 sm:$0xff]   ;;  %v6400_v58 = vld [vmem:[%s9101_s1 + $0x198] ss:$12 sps:$4 sm:$0xff]  }
  0x18   : > { %3259 = vmatprep.subr.bf16.mxu0 %v6362_v10  ;;  %v6397_v55 = vld [vmem:[%s9101_s1 + $0x180] ss:$12 sps:$4 sm:$0xff]   ;;  %v6402_v56 = vld [vmem:[%s9101_s1 + $0x19c] ss:$12 sps:$4 sm:$0xff]   ;;  %v6459_v59 = vld [vmem:[%s9101_s1 + $0x278] ss:$12 sps:$4 sm:$0xff]  }
  0x19   : > { %5995 = vmatpush3.bf16.msra.mxu1 %v6428_v32  ;;  %v6458_v57 = vld [vmem:[%s9101_s1 + $0x1a0] ss:$12 sps:$4 sm:$0xff]   ;;  %v6463_v61 = vld [vmem:[%s9101_s1 + $0x1b8] ss:$12 sps:$4 sm:$0xff]   ;;  %v6464_v63 = vld [vmem:[%s9101_s1 + $0x290] ss:$12 sps:$4 sm:$0xff]  }
  0x1a   : > { %5996 = vmatprep.subr.bf16.mxu1 %v6429_v33  ;;  %v6405_v60 = vld [vmem:[%s9101_s1 + $0x1b4] ss:$12 sps:$4 sm:$0xff]   ;;  %v281_v62 = vld [vmem:[%s7231_s30 + $0x8] sm:$0xff]  ;;  %v6403_v1 = vld [vmem:[%s9101_s1 + $0x1b0] ss:$12 sps:$4 sm:$0xff]  }
  0x1b   : > { %3260 = vmatpush1.bf16.msra.mxu0 %v6364_v11  ;;  %v5391_v0 = vcombine.high %v281_v62, %v281_v62  ;;  %v6408_v2 = vld [vmem:[%s9101_s1 + $0x1cc] ss:$12 sps:$4 sm:$0xff]   ;;  %v6468_v3 = vld [vmem:[%s9101_s1 + $0x1d0] ss:$12 sps:$4 sm:$0xff]   ;;  %v6469_v4 = vld [vmem:[%s9101_s1 + $0x2a8] ss:$12 sps:$4 sm:$0xff]   ;;  %v7457_v24 = vcombine.low %v281_v62, %v281_v62 }
  0x1c   : > { %3261 = vmatprep.subr.bf16.mxu0 %v6365_v12  ;;  %v6406_v5 = vld [vmem:[%s9101_s1 + $0x1c8] ss:$12 sps:$4 sm:$0xff]   ;;  %v6412_v6 = vld [vmem:[%s9101_s1 + $0x1e4] ss:$12 sps:$4 sm:$0xff]   ;;  %v6476_v8 = vld [vmem:[%s9101_s1 + $0x2c0] ss:$12 sps:$4 sm:$0xff]  }
  0x1d   : > { %5997 = vmatpush3.bf16.msra.mxu1 %v6433_v36  ;;  %v6475_v7 = vld [vmem:[%s9101_s1 + $0x1e8] ss:$12 sps:$4 sm:$0xff]   ;;  %v6410_v9 = vld [vmem:[%s9101_s1 + $0x1e0] ss:$12 sps:$4 sm:$0xff]   ;;  %v6481_v12 = vld [vmem:[%s9101_s1 + $0x2d8] ss:$12 sps:$4 sm:$0xff]  }
  0x1e   : > { %5998 = vmatprep.subr.bf16.mxu1 %v6434_v37  ;;  %v6417_v10 = vld [vmem:[%s9101_s1 + $0x1fc] ss:$12 sps:$4 sm:$0xff]   ;;  %v6480_v11 = vld [vmem:[%s9101_s1 + $0x200] ss:$12 sps:$4 sm:$0xff]   ;;  %v6415_v13 = vld [vmem:[%s9101_s1 + $0x1f8] ss:$12 sps:$4 sm:$0xff]  }
  0x1f   : > { %3262 = vmatpush1.bf16.msra.mxu0 %v6367_v15  ;;  %v6422_v14 = vld [vmem:[%s9101_s1 + $0x214] ss:$12 sps:$4 sm:$0xff]   ;;  %v6485_v15 = vld [vmem:[%s9101_s1 + $0x218] ss:$12 sps:$4 sm:$0xff]   ;;  %v6506_v33 = vld [vmem:[%s9101_s1 + $0x410] ss:$12 sps:$4 sm:$0xff]  }
  0x20   : > { %3263 = vmatprep.subr.bf16.mxu0 %v6368_v16  ;;  %v6486_v16 = vld [vmem:[%s9101_s1 + $0x2f0] ss:$12 sps:$4 sm:$0xff]   ;;  %v6427_v18 = vld [vmem:[%s9101_s1 + $0x22c] ss:$12 sps:$4 sm:$0xff]   ;;  %v6425_v21 = vld [vmem:[%s9101_s1 + $0x228] ss:$12 sps:$4 sm:$0xff]  }
  0x21   : > { %5999 = vmatpush3.bf16.msra.mxu1 %v6438_v40  ;;  %v6432_v22 = vld [vmem:[%s9101_s1 + $0x244] ss:$12 sps:$4 sm:$0xff]   ;;  %v6496_v25 = vld [vmem:[%s9101_s1 + $0x3e0] ss:$12 sps:$4 sm:$0xff]   ;;  %v6511_v37 = vld [vmem:[%s9101_s1 + $0x428] ss:$12 sps:$4 sm:$0xff]  }
  0x22   : > { %6000 = vmatprep.subr.bf16.mxu1 %v6439_v41  ;;  %v6500_v28 = vld [vmem:[%s9101_s1 + $0x320] ss:$12 sps:$4 sm:$0xff]   ;;  %v6501_v29 = vld [vmem:[%s9101_s1 + $0x3f8] ss:$12 sps:$4 sm:$0xff]   ;;  %v6510_v36 = vld [vmem:[%s9101_s1 + $0x350] ss:$12 sps:$4 sm:$0xff]  }
  0x23   : > { %3264 = vmatpush1.bf16.msra.mxu0 %v6370_v17  ;;  %v6420_v17 = vld [vmem:[%s9101_s1 + $0x210] ss:$12 sps:$4 sm:$0xff]   ;;  %v6505_v32 = vld [vmem:[%s9101_s1 + $0x338] ss:$12 sps:$4 sm:$0xff]   ;;  %v6515_v41 = vld [vmem:[%s9101_s1 + $0x368] ss:$12 sps:$4 sm:$0xff]  }
  0x24   : > { %3265 = vmatprep.subr.bf16.mxu0 %v6371_v19  ;;  %v6490_v19 = vld [vmem:[%s9101_s1 + $0x230] ss:$12 sps:$4 sm:$0xff]  }
  0x25   : > { %6001 = vmatpush3.bf16.msra.mxu1 %v6443_v44  ;;  %v282_v40 = vld [vmem:[%s7231_s30 + $0x10] sm:$0xff]  ;;  %v6450_v44 = vld [vmem:[%s9101_s1 + $0x2a0] ss:$12 sps:$4 sm:$0xff]   ;;  %v6479_v62 = vld [vmem:[%s9101_s1 + $0x31c] ss:$12 sps:$4 sm:$0xff]  }
  0x26   : > { %6002 = vmatprep.subr.bf16.mxu1 %v6444_v45  ;;  %v6457_v45 = vld [vmem:[%s9101_s1 + $0x2bc] ss:$12 sps:$4 sm:$0xff]  }
  0x27   : > { %3266 = vmatpush1.bf16.msra.mxu0 %v6373_v20  ;;  %v6491_v20 = vld [vmem:[%s9101_s1 + $0x3c8] ss:$12 sps:$4 sm:$0xff]  }
  0x28   : > { %3267 = vmatprep.subr.bf16.mxu0 %v6374_v23  ;;  %v6495_v23 = vld [vmem:[%s9101_s1 + $0x308] ss:$12 sps:$4 sm:$0xff]  }
  0x29   : > { %6003 = vmatpush3.bf16.msra.mxu1 %v6448_v48  ;;  %v6455_v48 = vld [vmem:[%s9101_s1 + $0x2b8] ss:$12 sps:$4 sm:$0xff]  }
  0x2a   : > { %6010 = vmatprep.subr.bf16.mxu1 %v6449_v49  ;;  %v6462_v49 = vld [vmem:[%s9101_s1 + $0x2d4] ss:$12 sps:$4 sm:$0xff]  }
  0x2b   : > { %3268 = vmatpush1.bf16.msra.mxu0 %v6376_v26  ;;  %v6430_v26 = vld [vmem:[%s9101_s1 + $0x240] ss:$12 sps:$4 sm:$0xff]  }
  0x2c   : > { %3269 = vmatprep.subr.bf16.mxu0 %v6377_v27  ;;  %3651 = vmatmul.mubr.bf16.vlgmr.msra.gmra.mrb[0].mxu1 %v5388_v53  ;;  %v6437_v27 = vld [vmem:[%s9101_s1 + $0x25c] ss:$12 sps:$4 sm:$0xff]  }
  0x2d   : > { %6011 = vmatpush3.bf16.msra.mxu1 %v6453_v52  ;;  %3690 = vmatprep.mubr.bf16.mxu1 %v5391_v0  ;;  %v6460_v52 = vld [vmem:[%s9101_s1 + $0x2d0] ss:$12 sps:$4 sm:$0xff]  }
  0x2e   : > { %6012 = vmatprep.subr.bf16.mxu1 %v6454_v54  ;;  %v6530_v54 = vld [vmem:[%s9101_s1 + $0x3b0] ss:$12 sps:$4 sm:$0xff]  }
  0x2f   : > { %3270 = vmatpush1.bf16.msra.mxu0 %v6379_v30  ;;  %v6435_v30 = vld [vmem:[%s9101_s1 + $0x258] ss:$12 sps:$4 sm:$0xff]  }
  0x30   : > { %3271 = vmatprep.subr.bf16.mxu0 %v6380_v31  ;;  %v6442_v31 = vld [vmem:[%s9101_s1 + $0x274] ss:$12 sps:$4 sm:$0xff]  }
  0x31   : > { %6013 = vmatpush3.bf16.msra.mxu1 %v6458_v57  ;;  %v6474_v57 = vld [vmem:[%s9101_s1 + $0x304] ss:$12 sps:$4 sm:$0xff]  }
  0x32   : > { %6014 = vmatprep.subr.bf16.mxu1 %v6459_v59  ;;  %v6537_v59 = vld [vmem:[%s9101_s1 + $0x488] ss:$12 sps:$4 sm:$0xff]  }
  0x33   : > { %3272 = vmatpush1.bf16.msra.mxu0 %v6382_v34  ;;  %v6440_v34 = vld [vmem:[%s9101_s1 + $0x270] ss:$12 sps:$4 sm:$0xff]  }
  0x34   : > { %3273 = vmatprep.subr.bf16.mxu0 %v6383_v35  ;;  %v6447_v35 = vld [vmem:[%s9101_s1 + $0x28c] ss:$12 sps:$4 sm:$0xff]  }
  0x35   : > { %6015 = vmatpush3.bf16.msra.mxu1 %v6463_v61  ;;  %v6472_v61 = vld [vmem:[%s9101_s1 + $0x300] ss:$12 sps:$4 sm:$0xff]  }
  0x36   : > { %6016 = vmatprep.subr.bf16.mxu1 %v6464_v63  ;;  %v6542_v63 = vld [vmem:[%s9101_s1 + $0x4a0] ss:$12 sps:$4 sm:$0xff]  }
  0x37   : > { %3274 = vmatpush1.bf16.msra.mxu0 %v6385_v38  ;;  %v6445_v38 = vld [vmem:[%s9101_s1 + $0x288] ss:$12 sps:$4 sm:$0xff]  }
  0x38   : > { %3275 = vmatprep.subr.bf16.mxu0 %v6386_v39  ;;  %v6452_v39 = vld [vmem:[%s9101_s1 + $0x2a4] ss:$12 sps:$4 sm:$0xff]  }
  0x39   : > { %6017 = vmatpush3.bf16.msra.mxu1 %v6468_v3  ;;  %v6547_v3 = vld [vmem:[%s9101_s1 + $0x4b8] ss:$12 sps:$4 sm:$0xff]  }
  0x3a   : > { %6018 = vmatprep.subr.bf16.mxu1 %v6469_v4  ;;  %v6548_v4 = vld [vmem:[%s9101_s1 + $0x590] ss:$12 sps:$4 sm:$0xff]  }
  0x3b   : > { %3276 = vmatpush1.bf16.msra.mxu0 %v6388_v42  ;;  %v5393_v42 = vcombine.high %v282_v40, %v282_v40 }
  0x3c   : > { %3277 = vmatprep.subr.bf16.mxu0 %v6389_v43  ;;  %v6516_v43 = vld [vmem:[%s9101_s1 + $0x440] ss:$12 sps:$4 sm:$0xff]  }
  0x3d   : > { %6019 = vmatpush3.bf16.msra.mxu1 %v6475_v7 }
  0x3e   : > { %6020 = vmatprep.subr.bf16.mxu1 %v6476_v8  ;;  %v6489_v8 = vld [vmem:[%s9101_s1 + $0x34c] ss:$12 sps:$4 sm:$0xff]  }
  0x3f   : > { %3278 = vmatpush1.bf16.msra.mxu0 %v6391_v46  ;;  %v6520_v46 = vld [vmem:[%s9101_s1 + $0x380] ss:$12 sps:$4 sm:$0xff]  }
  0x40   : > { %3279 = vmatprep.subr.bf16.mxu0 %v6392_v47  ;;  %v6521_v47 = vld [vmem:[%s9101_s1 + $0x458] ss:$12 sps:$4 sm:$0xff]  }
  0x41   : > { %6021 = vmatpush3.bf16.msra.mxu1 %v6480_v11  ;;  %v6487_v11 = vld [vmem:[%s9101_s1 + $0x348] ss:$12 sps:$4 sm:$0xff]  }
  0x42   : > { %6022 = vmatprep.subr.bf16.mxu1 %v6481_v12  ;;  %v6494_v12 = vld [vmem:[%s9101_s1 + $0x364] ss:$12 sps:$4 sm:$0xff]  }
  0x43   : > { %3280 = vmatpush1.bf16.msra.mxu0 %v6394_v50  ;;  %v6525_v50 = vld [vmem:[%s9101_s1 + $0x398] ss:$12 sps:$4 sm:$0xff]  }
  0x44   : > { %3290 = vmatprep.subr.bf16.mxu0 %v6399_v51  ;;  %v6526_v51 = vld [vmem:[%s9101_s1 + $0x470] ss:$12 sps:$4 sm:$0xff]  }
  0x45   : > { %6023 = vmatpush3.bf16.msra.mxu1 %v6485_v15  ;;  %v6492_v15 = vld [vmem:[%s9101_s1 + $0x360] ss:$12 sps:$4 sm:$0xff]  }
  0x46   : > { %3282 = vmatmul.mubr.bf16.vlgmr.msra.gmra.mrb[0].mxu0 %v5388_v53  ;;  %6024 = vmatprep.subr.bf16.mxu1 %v6486_v16  ;;  %v6467_v53 = vld [vmem:[%s9101_s1 + $0x2ec] ss:$12 sps:$4 sm:$0xff]   ;;  %v6499_v16 = vld [vmem:[%s9101_s1 + $0x37c] ss:$12 sps:$4 sm:$0xff]  }
  0x47   : > { %3291 = vmatpush1.bf16.msra.mxu0 %v6397_v55  ;;  %3322 = vmatprep.mubr.bf16.mxu0 %v5391_v0  ;;  %v6533_v55 = vld [vmem:[%s9101_s1 + $0x548] ss:$12 sps:$4 sm:$0xff]   ;;  %v6543_v0 = vld [vmem:[%s9101_s1 + $0x578] ss:$12 sps:$4 sm:$0xff]  }
  0x48   : > { %3292 = vmatprep.subr.bf16.mxu0 %v6402_v56  ;;  %v6465_v56 = vld [vmem:[%s9101_s1 + $0x2e8] ss:$12 sps:$4 sm:$0xff]  }
  0x49   : > { %6025 = vmatpush3.bf16.msra.mxu1 %v6490_v19  ;;  %v6497_v19 = vld [vmem:[%s9101_s1 + $0x378] ss:$12 sps:$4 sm:$0xff]  }
  0x4a   : > { %6032 = vmatprep.subr.bf16.mxu1 %v6491_v20  ;;  %v6504_v20 = vld [vmem:[%s9101_s1 + $0x394] ss:$12 sps:$4 sm:$0xff]  }
  0x4b   : > { %3293 = vmatpush1.bf16.msra.mxu0 %v6400_v58  ;;  %v7554_v58 = vcombine.low %v282_v40, %v282_v40  ;;  %v6589_v40 = vld [vmem:[%s9101_s1 + $0x638] ss:$12 sps:$4 sm:$0xff]  }
  0x4c   : > { %3294 = vmatprep.subr.bf16.mxu0 %v6405_v60  ;;  %3691 = vmatmul.mubr.bf16.vlgmr.msra.gmra.mrb[4].mxu1 %v7457_v24  ;;  %v6538_v60 = vld [vmem:[%s9101_s1 + $0x560] ss:$12 sps:$4 sm:$0xff]  }
  0x4d   : > { %6033 = vmatpush3.bf16.msra.mxu1 %v6495_v23  ;;  %3730 = vmatprep.mubr.bf16.mxu1 %v5393_v42  ;;  %v6502_v23 = vld [vmem:[%s9101_s1 + $0x390] ss:$12 sps:$4 sm:$0xff]  }
  0x4e   : > { %6034 = vmatprep.subr.bf16.mxu1 %v6496_v25  ;;  %v6572_v25 = vld [vmem:[%s9101_s1 + $0x530] ss:$12 sps:$4 sm:$0xff]  }
  0x4f   : > { %3295 = vmatpush1.bf16.msra.mxu0 %v6403_v1  ;;  %v6477_v1 = vld [vmem:[%s9101_s1 + $0x318] ss:$12 sps:$4 sm:$0xff]  }
  0x50   : > { %3296 = vmatprep.subr.bf16.mxu0 %v6408_v2  ;;  %v6484_v2 = vld [vmem:[%s9101_s1 + $0x334] ss:$12 sps:$4 sm:$0xff]  }
  0x51   : > { %6035 = vmatpush3.bf16.msra.mxu1 %v6500_v28 }
  0x52   : > { %6036 = vmatprep.subr.bf16.mxu1 %v6501_v29  ;;  %v6514_v29 = vld [vmem:[%s9101_s1 + $0x3c4] ss:$12 sps:$4 sm:$0xff]  }
  0x53   : > { %3297 = vmatpush1.bf16.msra.mxu0 %v6406_v5  ;;  %v283_v5 = vld [vmem:[%s7231_s30 + $0x18] sm:$0xff] }
  0x54   : > { %3298 = vmatprep.subr.bf16.mxu0 %v6412_v6  ;;  %v6482_v6 = vld [vmem:[%s9101_s1 + $0x330] ss:$12 sps:$4 sm:$0xff]   ;;  %v7592_v7 = vcombine.high %v283_v5, %v283_v5  ;;  %v7655_v28 = vcombine.low %v283_v5, %v283_v5 }
  0x55   : > { %6037 = vmatpush3.bf16.msra.mxu1 %v6505_v32  ;;  %v6512_v32 = vld [vmem:[%s9101_s1 + $0x3c0] ss:$12 sps:$4 sm:$0xff]  }
  0x56   : > { %6038 = vmatprep.subr.bf16.mxu1 %v6506_v33  ;;  %v6519_v33 = vld [vmem:[%s9101_s1 + $0x3dc] ss:$12 sps:$4 sm:$0xff]  }
  0x57   : > { %3299 = vmatpush1.bf16.msra.mxu0 %v6410_v9  ;;  %v6552_v9 = vld [vmem:[%s9101_s1 + $0x4d0] ss:$12 sps:$4 sm:$0xff]  }
  0x58   : > { %3300 = vmatprep.subr.bf16.mxu0 %v6417_v10  ;;  %v6553_v10 = vld [vmem:[%s9101_s1 + $0x5a8] ss:$12 sps:$4 sm:$0xff]  }
  0x59   : > { %6039 = vmatpush3.bf16.msra.mxu1 %v6510_v36  ;;  %v284_v36 = vld [vmem:[%s7231_s30 + $0x20] sm:$0xff] }
  0x5a   : > { %6040 = vmatprep.subr.bf16.mxu1 %v6511_v37  ;;  %v7680_v37 = vcombine.high %v284_v36, %v284_v36 }
  0x5b   : > { %3301 = vmatpush1.bf16.msra.mxu0 %v6415_v13  ;;  %v6557_v13 = vld [vmem:[%s9101_s1 + $0x4e8] ss:$12 sps:$4 sm:$0xff]  }
  0x5c   : > { %3302 = vmatprep.subr.bf16.mxu0 %v6422_v14  ;;  %v6558_v14 = vld [vmem:[%s9101_s1 + $0x5c0] ss:$12 sps:$4 sm:$0xff]  }
  0x5d   : > { %6041 = vmatpush3.bf16.msra.mxu1 %v6515_v41  ;;  %v6590_v41 = vld [vmem:[%s9101_s1 + $0x710] ss:$12 sps:$4 sm:$0xff]  }
  0x5e   : > { %6042 = vmatprep.subr.bf16.mxu1 %v6516_v43  ;;  %v6529_v43 = vld [vmem:[%s9101_s1 + $0x40c] ss:$12 sps:$4 sm:$0xff]  }
  0x5f   : > { %3303 = vmatpush1.bf16.msra.mxu0 %v6420_v17  ;;  %v6562_v17 = vld [vmem:[%s9101_s1 + $0x500] ss:$12 sps:$4 sm:$0xff]  }
  0x60   : > { %3304 = vmatprep.subr.bf16.mxu0 %v6427_v18  ;;  %v6563_v18 = vld [vmem:[%s9101_s1 + $0x5d8] ss:$12 sps:$4 sm:$0xff]  }
  0x61   : > { %6043 = vmatpush3.bf16.msra.mxu1 %v6520_v46  ;;  %v6527_v46 = vld [vmem:[%s9101_s1 + $0x408] ss:$12 sps:$4 sm:$0xff]  }
  0x62   : > { %6044 = vmatprep.subr.bf16.mxu1 %v6521_v47  ;;  %v6536_v47 = vld [vmem:[%s9101_s1 + $0x424] ss:$12 sps:$4 sm:$0xff]  }
  0x63   : > { %3305 = vmatpush1.bf16.msra.mxu0 %v6425_v21  ;;  %v6567_v21 = vld [vmem:[%s9101_s1 + $0x518] ss:$12 sps:$4 sm:$0xff]  }
  0x64   : > { %3306 = vmatprep.subr.bf16.mxu0 %v6432_v22  ;;  %v6568_v22 = vld [vmem:[%s9101_s1 + $0x5f0] ss:$12 sps:$4 sm:$0xff]  }
  0x65   : > { %6045 = vmatpush3.bf16.msra.mxu1 %v6525_v50  ;;  %v6534_v50 = vld [vmem:[%s9101_s1 + $0x420] ss:$12 sps:$4 sm:$0xff]  }
  0x66   : > { %6046 = vmatprep.subr.bf16.mxu1 %v6526_v51  ;;  %v6541_v51 = vld [vmem:[%s9101_s1 + $0x43c] ss:$12 sps:$4 sm:$0xff]  }
  0x67   : > { %3307 = vmatpush1.bf16.msra.mxu0 %v6430_v26  ;;  %v6575_v26 = vld [vmem:[%s9101_s1 + $0x6c8] ss:$12 sps:$4 sm:$0xff]  }
  0x68   : > { %3308 = vmatprep.subr.bf16.mxu0 %v6437_v27  ;;  %v6507_v27 = vld [vmem:[%s9101_s1 + $0x3a8] ss:$12 sps:$4 sm:$0xff]  }
  0x69   : > { %6047 = vmatpush3.bf16.msra.mxu1 %v6530_v54  ;;  %v6539_v54 = vld [vmem:[%s9101_s1 + $0x438] ss:$12 sps:$4 sm:$0xff]  }
  0x6a   : > { %6054 = vmatprep.subr.bf16.mxu1 %v6533_v55  ;;  %v6546_v55 = vld [vmem:[%s9101_s1 + $0x454] ss:$12 sps:$4 sm:$0xff]  }
  0x6b   : > { %3309 = vmatpush1.bf16.msra.mxu0 %v6435_v30  ;;  %v6579_v30 = vld [vmem:[%s9101_s1 + $0x608] ss:$12 sps:$4 sm:$0xff]  }
  0x6c   : > { %3310 = vmatprep.subr.bf16.mxu0 %v6442_v31  ;;  %3731 = vmatmul.mubr.bf16.vlgmr.msra.gmra.mrb[8].mxu1 %v7554_v58  ;;  %v6580_v31 = vld [vmem:[%s9101_s1 + $0x6e0] ss:$12 sps:$4 sm:$0xff]  }
  0x6d   : > { %6055 = vmatpush3.bf16.msra.mxu1 %v6537_v59  ;;  %3770 = vmatprep.mubr.bf16.mxu1 %v7592_v7  ;;  %v6544_v59 = vld [vmem:[%s9101_s1 + $0x450] ss:$12 sps:$4 sm:$0xff]  }
  0x6e   : > { %6056 = vmatprep.subr.bf16.mxu1 %v6538_v60  ;;  %v6551_v60 = vld [vmem:[%s9101_s1 + $0x46c] ss:$12 sps:$4 sm:$0xff]  }
  0x6f   : > { %3311 = vmatpush1.bf16.msra.mxu0 %v6440_v34  ;;  %v6584_v34 = vld [vmem:[%s9101_s1 + $0x620] ss:$12 sps:$4 sm:$0xff]  }
  0x70   : > { %3312 = vmatprep.subr.bf16.mxu0 %v6447_v35  ;;  %v6585_v35 = vld [vmem:[%s9101_s1 + $0x6f8] ss:$12 sps:$4 sm:$0xff]  }
  0x71   : > { %6057 = vmatpush3.bf16.msra.mxu1 %v6542_v63  ;;  %v6549_v63 = vld [vmem:[%s9101_s1 + $0x468] ss:$12 sps:$4 sm:$0xff]  }
  0x72   : > { %6058 = vmatprep.subr.bf16.mxu1 %v6543_v0  ;;  %v6556_v0 = vld [vmem:[%s9101_s1 + $0x484] ss:$12 sps:$4 sm:$0xff]  }
  0x73   : > { %3313 = vmatpush1.bf16.msra.mxu0 %v6445_v38  ;;  %v6517_v38 = vld [vmem:[%s9101_s1 + $0x3d8] ss:$12 sps:$4 sm:$0xff]  }
  0x74   : > { %3314 = vmatprep.subr.bf16.mxu0 %v6452_v39  ;;  %v6524_v39 = vld [vmem:[%s9101_s1 + $0x3f4] ss:$12 sps:$4 sm:$0xff]  }
  0x75   : > { %6059 = vmatpush3.bf16.msra.mxu1 %v6547_v3  ;;  %v7767_v3 = vld [vmem:[%s7231_s30 + $0x28] sm:$0xff] }
  0x76   : > { %6060 = vmatprep.subr.bf16.mxu1 %v6548_v4  ;;  %v6622_v4 = vld [vmem:[%s9101_s1 + $0x860] ss:$12 sps:$4 sm:$0xff]   ;;  %v7774_v5 = vcombine.high %v7767_v3, %v7767_v3 }
  0x77   : > { %3315 = vmatpush1.bf16.msra.mxu0 %v6450_v44  ;;  %v6594_v44 = vld [vmem:[%s9101_s1 + $0x650] ss:$12 sps:$4 sm:$0xff]  }
  0x78   : > { %3316 = vmatprep.subr.bf16.mxu0 %v6457_v45  ;;  %v6595_v45 = vld [vmem:[%s9101_s1 + $0x728] ss:$12 sps:$4 sm:$0xff]  }
  0x79   : > { %6061 = vmatpush3.bf16.msra.mxu1 %v6552_v9  ;;  %v6626_v9 = vld [vmem:[%s9101_s1 + $0x7a0] ss:$12 sps:$4 sm:$0xff]  }
  0x7a   : > { %6062 = vmatprep.subr.bf16.mxu1 %v6553_v10  ;;  %v6627_v10 = vld [vmem:[%s9101_s1 + $0x878] ss:$12 sps:$4 sm:$0xff]  }
  0x7b   : > { %3317 = vmatpush1.bf16.msra.mxu0 %v6455_v48  ;;  %v6599_v48 = vld [vmem:[%s9101_s1 + $0x668] ss:$12 sps:$4 sm:$0xff]  }
  0x7c   : > { %3318 = vmatprep.subr.bf16.mxu0 %v6462_v49  ;;  %v6600_v49 = vld [vmem:[%s9101_s1 + $0x740] ss:$12 sps:$4 sm:$0xff]  }
  0x7d   : > { %6063 = vmatpush3.bf16.msra.mxu1 %v6557_v13  ;;  %v6631_v13 = vld [vmem:[%s9101_s1 + $0x7b8] ss:$12 sps:$4 sm:$0xff]  }
  0x7e   : > { %6064 = vmatprep.subr.bf16.mxu1 %v6558_v14  ;;  %v6564_v14 = vld [vmem:[%s9101_s1 + $0x4b0] ss:$12 sps:$4 sm:$0xff]  }
  0x7f   : > { %3319 = vmatpush1.bf16.msra.mxu0 %v6460_v52  ;;  %v6604_v52 = vld [vmem:[%s9101_s1 + $0x680] ss:$12 sps:$4 sm:$0xff]  }
  0x80   : > { %3320 = vmatprep.subr.bf16.mxu0 %v6467_v53  ;;  %v6605_v53 = vld [vmem:[%s9101_s1 + $0x758] ss:$12 sps:$4 sm:$0xff]  }
  0x81   : > { %6065 = vmatpush3.bf16.msra.mxu1 %v6562_v17  ;;  %v6569_v17 = vld [vmem:[%s9101_s1 + $0x4c8] ss:$12 sps:$4 sm:$0xff]  }
  0x82   : > { %6066 = vmatprep.subr.bf16.mxu1 %v6563_v18  ;;  %v6578_v18 = vld [vmem:[%s9101_s1 + $0x4e4] ss:$12 sps:$4 sm:$0xff]  }
  0x83   : > { %3321 = vmatpush1.bf16.msra.mxu0 %v6465_v56  ;;  %v6609_v56 = vld [vmem:[%s9101_s1 + $0x698] ss:$12 sps:$4 sm:$0xff]  }
  0x84   : > { %3331 = vmatprep.subr.bf16.mxu0 %v6474_v57  ;;  %v6610_v57 = vld [vmem:[%s9101_s1 + $0x770] ss:$12 sps:$4 sm:$0xff]  }
  0x85   : > { %6067 = vmatpush3.bf16.msra.mxu1 %v6567_v21  ;;  %v6576_v21 = vld [vmem:[%s9101_s1 + $0x4e0] ss:$12 sps:$4 sm:$0xff]  }
  0x86   : > { %3323 = vmatmul.mubr.bf16.vlgmr.msra.gmra.mrb[0].mxu0 %v7457_v24  ;;  %v6509_v24 = vld [vmem:[%s9101_s1 + $0x3ac] ss:$12 sps:$4 sm:$0xff]   ;;  %6068 = vmatprep.subr.bf16.mxu1 %v6568_v22  ;;  %v6583_v22 = vld [vmem:[%s9101_s1 + $0x4fc] ss:$12 sps:$4 sm:$0xff]  }
  0x87   : > { %3332 = vmatpush1.bf16.msra.mxu0 %v6472_v61  ;;  %3363 = vmatprep.mubr.bf16.mxu0 %v5393_v42  ;;  %v6522_v42 = vld [vmem:[%s9101_s1 + $0x3f0] ss:$12 sps:$4 sm:$0xff]  }
  0x88   : > { %3333 = vmatprep.subr.bf16.mxu0 %v6479_v62  ;;  %v6614_v61 = vld [vmem:[%s9101_s1 + $0x6b0] ss:$12 sps:$4 sm:$0xff]   ;;  %v6617_v62 = vld [vmem:[%s9101_s1 + $0x848] ss:$12 sps:$4 sm:$0xff]  }
  0x89   : > { %6069 = vmatpush3.bf16.msra.mxu1 %v6572_v25  ;;  %v6581_v25 = vld [vmem:[%s9101_s1 + $0x4f8] ss:$12 sps:$4 sm:$0xff]  }
  0x8a   : > { %6076 = vmatprep.subr.bf16.mxu1 %v6575_v26  ;;  %v6588_v26 = vld [vmem:[%s9101_s1 + $0x514] ss:$12 sps:$4 sm:$0xff]  }
  0x8b   : > { %3334 = vmatpush1.bf16.msra.mxu0 %v6477_v1  ;;  %v7761_v1 = vcombine.low %v284_v36, %v284_v36  ;;  %v6598_v36 = vld [vmem:[%s9101_s1 + $0x544] ss:$12 sps:$4 sm:$0xff]  }
  0x8c   : > { %3335 = vmatprep.subr.bf16.mxu0 %v6484_v2  ;;  %3771 = vmatmul.mubr.bf16.vlgmr.msra.gmra.mrb[12].mxu1 %v7655_v28  ;;  %v6621_v2 = vld [vmem:[%s9101_s1 + $0x788] ss:$12 sps:$4 sm:$0xff]  }
  0x8d   : > { %6077 = vmatpush3.bf16.msra.mxu1 %v6579_v30  ;;  %3810 = vmatprep.mubr.bf16.mxu1 %v7680_v37  ;;  %v6586_v30 = vld [vmem:[%s9101_s1 + $0x510] ss:$12 sps:$4 sm:$0xff]  }
  0x8e   : > { %6078 = vmatprep.subr.bf16.mxu1 %v6580_v31  ;;  %v6593_v31 = vld [vmem:[%s9101_s1 + $0x52c] ss:$12 sps:$4 sm:$0xff]  }
  0x8f   : > { %3336 = vmatpush1.bf16.msra.mxu0 %v6482_v6  ;;  %v6554_v6 = vld [vmem:[%s9101_s1 + $0x480] ss:$12 sps:$4 sm:$0xff]  }
  0x90   : > { %3337 = vmatprep.subr.bf16.mxu0 %v6489_v8  ;;  %v6561_v8 = vld [vmem:[%s9101_s1 + $0x49c] ss:$12 sps:$4 sm:$0xff]  }
  0x91   : > { %6079 = vmatpush3.bf16.msra.mxu1 %v6584_v34  ;;  %v6659_v34 = vld [vmem:[%s9101_s1 + $0x9c8] ss:$12 sps:$4 sm:$0xff]  }
  0x92   : > { %6080 = vmatprep.subr.bf16.mxu1 %v6585_v35  ;;  %v7868_v35 = vld [vmem:[%s7231_s30 + $0x30] sm:$0xff] }
  0x93   : > { %3338 = vmatpush1.bf16.msra.mxu0 %v6487_v11  ;;  %v6559_v11 = vld [vmem:[%s9101_s1 + $0x498] ss:$12 sps:$4 sm:$0xff]  }
  0x94   : > { %3339 = vmatprep.subr.bf16.mxu0 %v6494_v12  ;;  %v6566_v12 = vld [vmem:[%s9101_s1 + $0x4b4] ss:$12 sps:$4 sm:$0xff]  }
  0x95   : > { %6081 = vmatpush3.bf16.msra.mxu1 %v6589_v40  ;;  %v6664_v40 = vld [vmem:[%s9101_s1 + $0x9e0] ss:$12 sps:$4 sm:$0xff]  }
  0x96   : > { %6082 = vmatprep.subr.bf16.mxu1 %v6590_v41  ;;  %v7885_v41 = vcombine.high %v7868_v35, %v7868_v35 }
  0x97   : > { %3340 = vmatpush1.bf16.msra.mxu0 %v6492_v15  ;;  %v6636_v15 = vld [vmem:[%s9101_s1 + $0x7d0] ss:$12 sps:$4 sm:$0xff]  }
  0x98   : > { %3341 = vmatprep.subr.bf16.mxu0 %v6499_v16  ;;  %v6637_v16 = vld [vmem:[%s9101_s1 + $0x8a8] ss:$12 sps:$4 sm:$0xff]  }
  0x99   : > { %6083 = vmatpush3.bf16.msra.mxu1 %v6594_v44  ;;  %v6668_v44 = vld [vmem:[%s9101_s1 + $0x920] ss:$12 sps:$4 sm:$0xff]  }
  0x9a   : > { %6084 = vmatprep.subr.bf16.mxu1 %v6595_v45  ;;  %v6669_v45 = vld [vmem:[%s9101_s1 + $0x9f8] ss:$12 sps:$4 sm:$0xff]  }
  0x9b   : > { %3342 = vmatpush1.bf16.msra.mxu0 %v6497_v19  ;;  %v6641_v19 = vld [vmem:[%s9101_s1 + $0x7e8] ss:$12 sps:$4 sm:$0xff]  }
  0x9c   : > { %3343 = vmatprep.subr.bf16.mxu0 %v6504_v20  ;;  %v6642_v20 = vld [vmem:[%s9101_s1 + $0x8c0] ss:$12 sps:$4 sm:$0xff]  }
  0x9d   : > { %6085 = vmatpush3.bf16.msra.mxu1 %v6599_v48  ;;  %v6673_v48 = vld [vmem:[%s9101_s1 + $0x938] ss:$12 sps:$4 sm:$0xff]  }
  0x9e   : > { %6086 = vmatprep.subr.bf16.mxu1 %v6600_v49  ;;  %v6674_v49 = vld [vmem:[%s9101_s1 + $0xa10] ss:$12 sps:$4 sm:$0xff]  }
  0x9f   : > { %3344 = vmatpush1.bf16.msra.mxu0 %v6502_v23  ;;  %v6646_v23 = vld [vmem:[%s9101_s1 + $0x800] ss:$12 sps:$4 sm:$0xff]  }
  0xa0   : > { %3345 = vmatprep.subr.bf16.mxu0 %v6509_v24  ;;  %v6647_v24 = vld [vmem:[%s9101_s1 + $0x8d8] ss:$12 sps:$4 sm:$0xff]  }
  0xa1   : > { %6087 = vmatpush3.bf16.msra.mxu1 %v6604_v52  ;;  %v6678_v52 = vld [vmem:[%s9101_s1 + $0x950] ss:$12 sps:$4 sm:$0xff]  }
  0xa2   : > { %6088 = vmatprep.subr.bf16.mxu1 %v6605_v53  ;;  %v6679_v53 = vld [vmem:[%s9101_s1 + $0xa28] ss:$12 sps:$4 sm:$0xff]  }
  0xa3   : > { %3346 = vmatpush1.bf16.msra.mxu0 %v6507_v27  ;;  %v6651_v27 = vld [vmem:[%s9101_s1 + $0x818] ss:$12 sps:$4 sm:$0xff]  }
  0xa4   : > { %3347 = vmatprep.subr.bf16.mxu0 %v6514_v29  ;;  %v6652_v29 = vld [vmem:[%s9101_s1 + $0x8f0] ss:$12 sps:$4 sm:$0xff]  }
  0xa5   : > { %6089 = vmatpush3.bf16.msra.mxu1 %v6609_v56  ;;  %v6683_v56 = vld [vmem:[%s9101_s1 + $0x968] ss:$12 sps:$4 sm:$0xff]  }
  0xa6   : > { %6090 = vmatprep.subr.bf16.mxu1 %v6610_v57  ;;  %v6684_v57 = vld [vmem:[%s9101_s1 + $0xa40] ss:$12 sps:$4 sm:$0xff]  }
  0xa7   : > { %3348 = vmatpush1.bf16.msra.mxu0 %v6512_v32  ;;  %v6656_v32 = vld [vmem:[%s9101_s1 + $0x830] ss:$12 sps:$4 sm:$0xff]  }
  0xa8   : > { %3349 = vmatprep.subr.bf16.mxu0 %v6519_v33  ;;  %v6591_v33 = vld [vmem:[%s9101_s1 + $0x528] ss:$12 sps:$4 sm:$0xff]  }
  0xa9   : > { %6091 = vmatpush3.bf16.msra.mxu1 %v6614_v61  ;;  %v6688_v61 = vld [vmem:[%s9101_s1 + $0x980] ss:$12 sps:$4 sm:$0xff]  }
  0xaa   : > { %6098 = vmatprep.subr.bf16.mxu1 %v6617_v62  ;;  %v6689_v62 = vld [vmem:[%s9101_s1 + $0xa58] ss:$12 sps:$4 sm:$0xff]  }
  0xab   : > { %3350 = vmatpush1.bf16.msra.mxu0 %v6517_v38  ;;  %v7875_v38 = vcombine.low %v7767_v3, %v7767_v3  ;;  %v6694_v3 = vld [vmem:[%s9101_s1 + $0xa70] ss:$12 sps:$4 sm:$0xff]  }
  0xac   : > { %3351 = vmatprep.subr.bf16.mxu0 %v6524_v39  ;;  %3811 = vmatmul.mubr.bf16.vlgmr.msra.gmra.mrb[16].mxu1 %v7761_v1  ;;  %v6663_v39 = vld [vmem:[%s9101_s1 + $0x908] ss:$12 sps:$4 sm:$0xff]  }
  0xad   : > { %6099 = vmatpush3.bf16.msra.mxu1 %v6621_v2  ;;  %3850 = vmatprep.mubr.bf16.mxu1 %v7774_v5  ;;  %v6693_v2 = vld [vmem:[%s9101_s1 + $0x998] ss:$12 sps:$4 sm:$0xff]  }
  0xae   : > { %6100 = vmatprep.subr.bf16.mxu1 %v6622_v4  ;;  %v6628_v4 = vld [vmem:[%s9101_s1 + $0x5d0] ss:$12 sps:$4 sm:$0xff]  }
  0xaf   : > { %3352 = vmatpush1.bf16.msra.mxu0 %v6522_v42  ;;  %v6596_v42 = vld [vmem:[%s9101_s1 + $0x540] ss:$12 sps:$4 sm:$0xff]  }
  0xb0   : > { %3353 = vmatprep.subr.bf16.mxu0 %v6529_v43  ;;  %v6603_v43 = vld [vmem:[%s9101_s1 + $0x55c] ss:$12 sps:$4 sm:$0xff]  }
  0xb1   : > { %6101 = vmatpush3.bf16.msra.mxu1 %v6626_v9  ;;  %v6701_v9 = vld [vmem:[%s9101_s1 + $0xb48] ss:$12 sps:$4 sm:$0xff]  }
  0xb2   : > { %6102 = vmatprep.subr.bf16.mxu1 %v6627_v10  ;;  %v7974_v10 = vld [vmem:[%s7231_s30 + $0x38] sm:$0xff] }
  0xb3   : > { %3354 = vmatpush1.bf16.msra.mxu0 %v6527_v46  ;;  %v6601_v46 = vld [vmem:[%s9101_s1 + $0x558] ss:$12 sps:$4 sm:$0xff]  }
  0xb4   : > { %3355 = vmatprep.subr.bf16.mxu0 %v6536_v47  ;;  %v6608_v47 = vld [vmem:[%s9101_s1 + $0x574] ss:$12 sps:$4 sm:$0xff]  }
  0xb5   : > { %6103 = vmatpush3.bf16.msra.mxu1 %v6631_v13  ;;  %v7984_v13 = vcombine.low %v7868_v35, %v7868_v35  ;;  %v6672_v35 = vld [vmem:[%s9101_s1 + $0x694] ss:$12 sps:$4 sm:$0xff]  }
  0xb7   : > { %3356 = vmatpush1.bf16.msra.mxu0 %v6534_v50  ;;  %v6606_v50 = vld [vmem:[%s9101_s1 + $0x570] ss:$12 sps:$4 sm:$0xff]  }
  0xb8   : > { %3357 = vmatprep.subr.bf16.mxu0 %v6541_v51  ;;  %v6613_v51 = vld [vmem:[%s9101_s1 + $0x58c] ss:$12 sps:$4 sm:$0xff]  }
  0xbb   : > { %3358 = vmatpush1.bf16.msra.mxu0 %v6539_v54  ;;  %v6611_v54 = vld [vmem:[%s9101_s1 + $0x588] ss:$12 sps:$4 sm:$0xff]  }
  0xbc   : > { %3359 = vmatprep.subr.bf16.mxu0 %v6546_v55  ;;  %v6620_v55 = vld [vmem:[%s9101_s1 + $0x5a4] ss:$12 sps:$4 sm:$0xff]  }
  0xbf   : > { %3360 = vmatpush1.bf16.msra.mxu0 %v6544_v59  ;;  %v6618_v59 = vld [vmem:[%s9101_s1 + $0x5a0] ss:$12 sps:$4 sm:$0xff]  }
  0xc0   : > { %3361 = vmatprep.subr.bf16.mxu0 %v6551_v60  ;;  %v6625_v60 = vld [vmem:[%s9101_s1 + $0x5bc] ss:$12 sps:$4 sm:$0xff]  }
  0xc3   : > { %3362 = vmatpush1.bf16.msra.mxu0 %v6549_v63  ;;  %v6623_v63 = vld [vmem:[%s9101_s1 + $0x5b8] ss:$12 sps:$4 sm:$0xff]  }
  0xc4   : > { %3372 = vmatprep.subr.bf16.mxu0 %v6556_v0  ;;  %v6630_v0 = vld [vmem:[%s9101_s1 + $0x5d4] ss:$12 sps:$4 sm:$0xff]  }
  0xc6   : > { %3364 = vmatmul.mubr.bf16.vlgmr.msra.gmra.mrb[0].mxu0 %v7554_v58  ;;  %v6632_v58 = vld [vmem:[%s9101_s1 + $0x890] ss:$12 sps:$4 sm:$0xff]  }
  0xc7   : > { %3373 = vmatpush1.bf16.msra.mxu0 %v6554_v6  ;;  %3404 = vmatprep.mubr.bf16.mxu0 %v7592_v7  ;;  %v6571_v7 = vld [vmem:[%s9101_s1 + $0x4cc] ss:$12 sps:$4 sm:$0xff]  }
  0xc8   : > { %3374 = vmatprep.subr.bf16.mxu0 %v6561_v8  ;;  %6104 = vmatprep.subr.bf16.mxu1 %v6632_v58  ;;  %v6635_v6 = vld [vmem:[%s9101_s1 + $0x5ec] ss:$12 sps:$4 sm:$0xff]   ;;  %v6698_v8 = vld [vmem:[%s9101_s1 + $0x9b0] ss:$12 sps:$4 sm:$0xff]   ;;  %v6705_v58 = vld [vmem:[%s9101_s1 + $0xa88] ss:$12 sps:$4 sm:$0xff]  }
  0xc9   : > { %6105 = vmatpush3.bf16.msra.mxu1 %v6636_v15  ;;  %v6638_v15 = vld [vmem:[%s9101_s1 + $0x600] ss:$12 sps:$4 sm:$0xff]  }
  0xca   : > { %6106 = vmatprep.subr.bf16.mxu1 %v6637_v16  ;;  %v6645_v16 = vld [vmem:[%s9101_s1 + $0x61c] ss:$12 sps:$4 sm:$0xff]  }
  0xcb   : > { %3375 = vmatpush1.bf16.msra.mxu0 %v6559_v11  ;;  %v6633_v11 = vld [vmem:[%s9101_s1 + $0x5e8] ss:$12 sps:$4 sm:$0xff]  }
  0xcc   : > { %3376 = vmatprep.subr.bf16.mxu0 %v6566_v12  ;;  %v6640_v12 = vld [vmem:[%s9101_s1 + $0x604] ss:$12 sps:$4 sm:$0xff]  }
  0xcd   : > { %6107 = vmatpush3.bf16.msra.mxu1 %v6641_v19  ;;  %v6643_v19 = vld [vmem:[%s9101_s1 + $0x618] ss:$12 sps:$4 sm:$0xff]  }
  0xce   : > { %6108 = vmatprep.subr.bf16.mxu1 %v6642_v20  ;;  %v6650_v20 = vld [vmem:[%s9101_s1 + $0x634] ss:$12 sps:$4 sm:$0xff]  }
  0xcf   : > { %3377 = vmatpush1.bf16.msra.mxu0 %v6564_v14  ;;  %v6706_v14 = vld [vmem:[%s9101_s1 + $0xb60] ss:$12 sps:$4 sm:$0xff]  }
  0xd0   : > { %3378 = vmatprep.subr.bf16.mxu0 %v6571_v7  ;;  %v7994_v7 = vcombine.high %v7974_v10, %v7974_v10 }
  0xd1   : > { %6109 = vmatpush3.bf16.msra.mxu1 %v6646_v23  ;;  %v6720_v23 = vld [vmem:[%s9101_s1 + $0xad0] ss:$12 sps:$4 sm:$0xff]  }
  0xd2   : > { %6110 = vmatprep.subr.bf16.mxu1 %v6647_v24  ;;  %v6721_v24 = vld [vmem:[%s9101_s1 + $0xba8] ss:$12 sps:$4 sm:$0xff]  }
  0xd3   : > { %3379 = vmatpush1.bf16.msra.mxu0 %v6569_v17  ;;  %v6710_v17 = vld [vmem:[%s9101_s1 + $0xaa0] ss:$12 sps:$4 sm:$0xff]  }
  0xd4   : > { %3380 = vmatprep.subr.bf16.mxu0 %v6578_v18  ;;  %v6711_v18 = vld [vmem:[%s9101_s1 + $0xb78] ss:$12 sps:$4 sm:$0xff]  }
  0xd5   : > { %6111 = vmatpush3.bf16.msra.mxu1 %v6651_v27  ;;  %v6725_v27 = vld [vmem:[%s9101_s1 + $0xae8] ss:$12 sps:$4 sm:$0xff]  }
  0xd6   : > { %6112 = vmatprep.subr.bf16.mxu1 %v6652_v29  ;;  %v6726_v29 = vld [vmem:[%s9101_s1 + $0xbc0] ss:$12 sps:$4 sm:$0xff]  }
  0xd7   : > { %3381 = vmatpush1.bf16.msra.mxu0 %v6576_v21  ;;  %v6715_v21 = vld [vmem:[%s9101_s1 + $0xab8] ss:$12 sps:$4 sm:$0xff]  }
  0xd8   : > { %3382 = vmatprep.subr.bf16.mxu0 %v6583_v22  ;;  %v6648_v22 = vld [vmem:[%s9101_s1 + $0x630] ss:$12 sps:$4 sm:$0xff]  }
  0xd9   : > { %6113 = vmatpush3.bf16.msra.mxu1 %v6656_v32  ;;  %v6730_v32 = vld [vmem:[%s9101_s1 + $0xb00] ss:$12 sps:$4 sm:$0xff]  }
  0xda   : > { %6120 = vmatprep.subr.bf16.mxu1 %v6659_v34  ;;  %v6665_v34 = vld [vmem:[%s9101_s1 + $0x678] ss:$12 sps:$4 sm:$0xff]  }
  0xdb   : > { %3383 = vmatpush1.bf16.msra.mxu0 %v6581_v25  ;;  %v6653_v25 = vld [vmem:[%s9101_s1 + $0x648] ss:$12 sps:$4 sm:$0xff]  }
  0xdc   : > { %3384 = vmatprep.subr.bf16.mxu0 %v6588_v26  ;;  %3851 = vmatmul.mubr.bf16.vlgmr.msra.gmra.mrb[20].mxu1 %v7875_v38  ;;  %v6662_v26 = vld [vmem:[%s9101_s1 + $0x664] ss:$12 sps:$4 sm:$0xff]  }
  0xdd   : > { %6121 = vmatpush3.bf16.msra.mxu1 %v6663_v39  ;;  %3890 = vmatprep.mubr.bf16.mxu1 %v7885_v41  ;;  %v6736_v39 = vld [vmem:[%s9101_s1 + $0xbf0] ss:$12 sps:$4 sm:$0xff]  }
  0xde   : > { %6122 = vmatprep.subr.bf16.mxu1 %v6664_v40  ;;  %v6670_v40 = vld [vmem:[%s9101_s1 + $0x690] ss:$12 sps:$4 sm:$0xff]  }
  0xdf   : > { %3385 = vmatpush1.bf16.msra.mxu0 %v6586_v30  ;;  %v6660_v30 = vld [vmem:[%s9101_s1 + $0x660] ss:$12 sps:$4 sm:$0xff]  }
  0xe0   : > { %3386 = vmatprep.subr.bf16.mxu0 %v6593_v31  ;;  %v6667_v31 = vld [vmem:[%s9101_s1 + $0x67c] ss:$12 sps:$4 sm:$0xff]  }
  0xe1   : > { %6123 = vmatpush3.bf16.msra.mxu1 %v6668_v44  ;;  %v6743_v44 = vld [vmem:[%s9101_s1 + $0xcc8] ss:$12 sps:$4 sm:$0xff]  }
  0xe2   : > { %6124 = vmatprep.subr.bf16.mxu1 %v6669_v45  ;;  %v6675_v45 = vld [vmem:[%s9101_s1 + $0x6a8] ss:$12 sps:$4 sm:$0xff]  }
  0xe3   : > { %3387 = vmatpush1.bf16.msra.mxu0 %v6591_v33  ;;  %v6731_v33 = vld [vmem:[%s9101_s1 + $0xbd8] ss:$12 sps:$4 sm:$0xff]  }
  0xe4   : > { %3388 = vmatprep.subr.bf16.mxu0 %v6598_v36  ;;  %v6735_v36 = vld [vmem:[%s9101_s1 + $0xb18] ss:$12 sps:$4 sm:$0xff]  }
  0xe5   : > { %6125 = vmatpush3.bf16.msra.mxu1 %v6673_v48  ;;  %v8095_v48 = vcombine.low %v7974_v10, %v7974_v10  ;;  %v6772_v10 = vld [vmem:[%s9101_s1 + $0xc80] ss:$12 sps:$4 sm:$0xff]  }
  0xe6   : > { %6126 = vmatprep.subr.bf16.mxu1 %v6674_v49  ;;  %v6747_v49 = vld [vmem:[%s9101_s1 + $0xc08] ss:$12 sps:$4 sm:$0xff]  }
  0xe7   : > { %3389 = vmatpush1.bf16.msra.mxu0 %v6596_v42  ;;  %v6677_v42 = vld [vmem:[%s9101_s1 + $0x6ac] ss:$12 sps:$4 sm:$0xff]  }
  0xe8   : > { %3390 = vmatprep.subr.bf16.mxu0 %v6603_v43  ;;  %v6740_v43 = vld [vmem:[%s9101_s1 + $0xb30] ss:$12 sps:$4 sm:$0xff]  }
  0xe9   : > { %6127 = vmatpush3.bf16.msra.mxu1 %v6678_v52 }
  0xea   : > { %6128 = vmatprep.subr.bf16.mxu1 %v6679_v53  ;;  %v6687_v53 = vld [vmem:[%s9101_s1 + $0x6dc] ss:$12 sps:$4 sm:$0xff]  }
  0xeb   : > { %3391 = vmatpush1.bf16.msra.mxu0 %v6601_v46  ;;  %v8088_v46 = vld [vmem:[%s7231_s30 + $0x40] sm:$0xff]  ;;  %s278_s30 = scalar_lea.vmem %s9107_s7, %s6335_s15 }
  0xec   : > { %3392 = vmatprep.subr.bf16.mxu0 %v6608_v47  ;;  %v6682_v47 = vld [vmem:[%s9101_s1 + $0x6c4] ss:$12 sps:$4 sm:$0xff]   ;;  %v8108_v52 = vcombine.high %v8088_v46, %v8088_v46 }
  0xed   : > { %6129 = vmatpush3.bf16.msra.mxu1 %v6683_v56  ;;  %v6685_v56 = vld [vmem:[%s9101_s1 + $0x6d8] ss:$12 sps:$4 sm:$0xff]  }
  0xee   : > { %6130 = vmatprep.subr.bf16.mxu1 %v6684_v57  ;;  %v6692_v57 = vld [vmem:[%s9101_s1 + $0x6f4] ss:$12 sps:$4 sm:$0xff]  }
  0xef   : > { %3393 = vmatpush1.bf16.msra.mxu0 %v6606_v50  ;;  %v6680_v50 = vld [vmem:[%s9101_s1 + $0x6c0] ss:$12 sps:$4 sm:$0xff]  }
  0xf0   : > { %3394 = vmatprep.subr.bf16.mxu0 %v6613_v51  ;;  %v6748_v51 = vld [vmem:[%s9101_s1 + $0xce0] ss:$12 sps:$4 sm:$0xff]  }
  0xf1   : > { %6131 = vmatpush3.bf16.msra.mxu1 %v6688_v61  ;;  %v6690_v61 = vld [vmem:[%s9101_s1 + $0x6f0] ss:$12 sps:$4 sm:$0xff]  }
  0xf2   : > { %6132 = vmatprep.subr.bf16.mxu1 %v6689_v62  ;;  %v6697_v62 = vld [vmem:[%s9101_s1 + $0x70c] ss:$12 sps:$4 sm:$0xff]  }
  0xf3   : > { %3395 = vmatpush1.bf16.msra.mxu0 %v6611_v54  ;;  %v6752_v54 = vld [vmem:[%s9101_s1 + $0xc20] ss:$12 sps:$4 sm:$0xff]  }
  0xf4   : > { %3396 = vmatprep.subr.bf16.mxu0 %v6620_v55  ;;  %v6753_v55 = vld [vmem:[%s9101_s1 + $0xcf8] ss:$12 sps:$4 sm:$0xff]  }
  0xf5   : > { %6133 = vmatpush3.bf16.msra.mxu1 %v6693_v2  ;;  %v6695_v2 = vld [vmem:[%s9101_s1 + $0x708] ss:$12 sps:$4 sm:$0xff]  }
  0xf6   : > { %6134 = vmatprep.subr.bf16.mxu1 %v6694_v3  ;;  %v6704_v3 = vld [vmem:[%s9101_s1 + $0x724] ss:$12 sps:$4 sm:$0xff]  }
  0xf7   : > { %3397 = vmatpush1.bf16.msra.mxu0 %v6618_v59  ;;  %v6757_v59 = vld [vmem:[%s9101_s1 + $0xc38] ss:$12 sps:$4 sm:$0xff]  }
  0xf8   : > { %3398 = vmatprep.subr.bf16.mxu0 %v6625_v60  ;;  %v6758_v60 = vld [vmem:[%s9101_s1 + $0xd10] ss:$12 sps:$4 sm:$0xff]  }
  0xf9   : > { %6135 = vmatpush3.bf16.msra.mxu1 %v6698_v8  ;;  %v6702_v8 = vld [vmem:[%s9101_s1 + $0x720] ss:$12 sps:$4 sm:$0xff]  }
  0xfa   : > { %6142 = vmatprep.subr.bf16.mxu1 %v6701_v9  ;;  %v6709_v9 = vld [vmem:[%s9101_s1 + $0x73c] ss:$12 sps:$4 sm:$0xff]  }
  0xfb   : > { %3399 = vmatpush1.bf16.msra.mxu0 %v6623_v63  ;;  %v6762_v63 = vld [vmem:[%s9101_s1 + $0xc50] ss:$12 sps:$4 sm:$0xff]  }
  0xfc   : > { %3400 = vmatprep.subr.bf16.mxu0 %v6630_v0  ;;  %3891 = vmatmul.mubr.bf16.vlgmr.msra.gmra.mrb[24].mxu1 %v7984_v13  ;;  %v6763_v0 = vld [vmem:[%s9101_s1 + $0xd28] ss:$12 sps:$4 sm:$0xff]  }
  0xfd   : > { %6143 = vmatpush3.bf16.msra.mxu1 %v6705_v58  ;;  %3930 = vmatprep.mubr.bf16.mxu1 %v7994_v7  ;;  %v6714_v58 = vld [vmem:[%s9101_s1 + $0x754] ss:$12 sps:$4 sm:$0xff]  }
  0xfe   : > { %6144 = vmatprep.subr.bf16.mxu1 %v6706_v14  ;;  %v6777_v14 = vld [vmem:[%s9101_s1 + $0xc98] ss:$12 sps:$4 sm:$0xff]  }
  0xff   : > { %3401 = vmatpush1.bf16.msra.mxu0 %v6628_v4  ;;  %v6767_v4 = vld [vmem:[%s9101_s1 + $0xc68] ss:$12 sps:$4 sm:$0xff]  }
 0x100   : > { %3402 = vmatprep.subr.bf16.mxu0 %v6635_v6  ;;  %v6768_v6 = vld [vmem:[%s9101_s1 + $0xd40] ss:$12 sps:$4 sm:$0xff]  }
 0x101   : > { %6145 = vmatpush3.bf16.msra.mxu1 %v6710_v17  ;;  %v6719_v17 = vld [vmem:[%s9101_s1 + $0x76c] ss:$12 sps:$4 sm:$0xff]  }
 0x102   : > { %6146 = vmatprep.subr.bf16.mxu1 %v6711_v18  ;;  %v6782_v18 = vld [vmem:[%s9101_s1 + $0xcb0] ss:$12 sps:$4 sm:$0xff]  }
 0x103   : > { %3403 = vmatpush1.bf16.msra.mxu0 %v6633_v11  ;;  %v6773_v11 = vld [vmem:[%s9101_s1 + $0xd58] ss:$12 sps:$4 sm:$0xff]  }
 0x104   : > { %3413 = vmatprep.subr.bf16.mxu0 %v6640_v12  ;;  %v6707_v12 = vld [vmem:[%s9101_s1 + $0x738] ss:$12 sps:$4 sm:$0xff]  }
 0x105   : > { %6147 = vmatpush3.bf16.msra.mxu1 %v6715_v21  ;;  %v8198_v21 = vcombine.low %v8088_v46, %v8088_v46  ;;  %v6785_v46 = vld [vmem:[%s9101_s1 + $0x8a0] ss:$12 sps:$4 sm:$0xff]  }
 0x106   : > { %3405 = vmatmul.mubr.bf16.vlgmr.msra.gmra.mrb[0].mxu0 %v7655_v28  ;;  %v6716_v28 = vld [vmem:[%s9101_s1 + $0xb90] ss:$12 sps:$4 sm:$0xff]  }
 0x107   : > { %3414 = vmatpush1.bf16.msra.mxu0 %v6638_v15  ;;  %3445 = vmatprep.mubr.bf16.mxu0 %v7680_v37  ;;  %v6655_v37 = vld [vmem:[%s9101_s1 + $0x64c] ss:$12 sps:$4 sm:$0xff]   ;;  %v6778_v15 = vld [vmem:[%s9101_s1 + $0xd70] ss:$12 sps:$4 sm:$0xff]  }
 0x108   : > { %3415 = vmatprep.subr.bf16.mxu0 %v6645_v16  ;;  %6148 = vmatprep.subr.bf16.mxu1 %v6716_v28  ;;  %v6712_v16 = vld [vmem:[%s9101_s1 + $0x750] ss:$12 sps:$4 sm:$0xff]   ;;  %v6722_v28 = vld [vmem:[%s9101_s1 + $0x780] ss:$12 sps:$4 sm:$0xff]  }
 0x109   : > { %6149 = vmatpush3.bf16.msra.mxu1 %v6720_v23  ;;  %v6734_v23 = vld [vmem:[%s9101_s1 + $0x7b4] ss:$12 sps:$4 sm:$0xff]  }
 0x10a   : > { %6150 = vmatprep.subr.bf16.mxu1 %v6721_v24  ;;  %v6732_v24 = vld [vmem:[%s9101_s1 + $0x7b0] ss:$12 sps:$4 sm:$0xff]  }
 0x10b   : > { %3416 = vmatpush1.bf16.msra.mxu0 %v6643_v19  ;;  %v6717_v19 = vld [vmem:[%s9101_s1 + $0x768] ss:$12 sps:$4 sm:$0xff]  }
 0x10c   : > { %3417 = vmatprep.subr.bf16.mxu0 %v6650_v20  ;;  %v6724_v20 = vld [vmem:[%s9101_s1 + $0x784] ss:$12 sps:$4 sm:$0xff]  }
 0x10d   : > { %6151 = vmatpush3.bf16.msra.mxu1 %v6725_v27  ;;  %v6751_v27 = vld [vmem:[%s9101_s1 + $0x7fc] ss:$12 sps:$4 sm:$0xff]  }
 0x10e   : > { %6152 = vmatprep.subr.bf16.mxu1 %v6726_v29  ;;  %v6749_v29 = vld [vmem:[%s9101_s1 + $0x7f8] ss:$12 sps:$4 sm:$0xff]  }
 0x10f   : > { %3418 = vmatpush1.bf16.msra.mxu0 %v6648_v22  ;;  %v6729_v22 = vld [vmem:[%s9101_s1 + $0x79c] ss:$12 sps:$4 sm:$0xff]  }
 0x110   : > { %3419 = vmatprep.subr.bf16.mxu0 %v6655_v37  ;;  %v6727_v37 = vld [vmem:[%s9101_s1 + $0x798] ss:$12 sps:$4 sm:$0xff]  }
 0x111   : > { %6153 = vmatpush3.bf16.msra.mxu1 %v6730_v32  ;;  %v6761_v32 = vld [vmem:[%s9101_s1 + $0x82c] ss:$12 sps:$4 sm:$0xff]  }
 0x112   : > { %6154 = vmatprep.subr.bf16.mxu1 %v6731_v33  ;;  %v6759_v33 = vld [vmem:[%s9101_s1 + $0x828] ss:$12 sps:$4 sm:$0xff]  }
 0x113   : > { %3420 = vmatpush1.bf16.msra.mxu0 %v6653_v25  ;;  %v6737_v25 = vld [vmem:[%s9101_s1 + $0x7c8] ss:$12 sps:$4 sm:$0xff]  }
 0x114   : > { %3421 = vmatprep.subr.bf16.mxu0 %v6662_v26  ;;  %v6744_v26 = vld [vmem:[%s9101_s1 + $0x7e0] ss:$12 sps:$4 sm:$0xff]  }
 0x115   : > { %6155 = vmatpush3.bf16.msra.mxu1 %v6735_v36  ;;  %v6771_v36 = vld [vmem:[%s9101_s1 + $0x85c] ss:$12 sps:$4 sm:$0xff]  }
 0x116   : > { %6156 = vmatprep.subr.bf16.mxu1 %v6736_v39  ;;  %v6769_v39 = vld [vmem:[%s9101_s1 + $0x858] ss:$12 sps:$4 sm:$0xff]  }
 0x117   : > { %3422 = vmatpush1.bf16.msra.mxu0 %v6660_v30  ;;  %v6756_v30 = vld [vmem:[%s9101_s1 + $0x814] ss:$12 sps:$4 sm:$0xff]  }
 0x118   : > { %3423 = vmatprep.subr.bf16.mxu0 %v6667_v31  ;;  %v6754_v31 = vld [vmem:[%s9101_s1 + $0x810] ss:$12 sps:$4 sm:$0xff]  }
 0x119   : > { %6157 = vmatpush3.bf16.msra.mxu1 %v6740_v43  ;;  %v6781_v43 = vld [vmem:[%s9101_s1 + $0x88c] ss:$12 sps:$4 sm:$0xff]  }
 0x11a   : > { %6164 = vmatprep.subr.bf16.mxu1 %v6743_v44  ;;  %v6779_v44 = vld [vmem:[%s9101_s1 + $0x888] ss:$12 sps:$4 sm:$0xff]  }
 0x11b   : > { %3424 = vmatpush1.bf16.msra.mxu0 %v6665_v34  ;;  %v6766_v34 = vld [vmem:[%s9101_s1 + $0x844] ss:$12 sps:$4 sm:$0xff]  }
 0x11c   : > { %3425 = vmatprep.subr.bf16.mxu0 %v6672_v35  ;;  %3931 = vmatmul.mubr.bf16.vlgmr.msra.gmra.mrb[28].mxu1 %v8095_v48  ;;  %v6764_v35 = vld [vmem:[%s9101_s1 + $0x840] ss:$12 sps:$4 sm:$0xff]  }
 0x11d   : > { %6165 = vmatpush3.bf16.msra.mxu1 %v6747_v49  ;;  %3970 = vmatprep.mubr.bf16.mxu1 %v8108_v52  ;;  %v6788_v49 = vld [vmem:[%s9101_s1 + $0x8b8] ss:$12 sps:$4 sm:$0xff]  }
 0x11e   : > { %6166 = vmatprep.subr.bf16.mxu1 %v6748_v51  ;;  %v6791_v51 = vld [vmem:[%s9101_s1 + $0x8d0] ss:$12 sps:$4 sm:$0xff]  }
 0x11f   : > { %3426 = vmatpush1.bf16.msra.mxu0 %v6670_v40  ;;  %v6776_v40 = vld [vmem:[%s9101_s1 + $0x874] ss:$12 sps:$4 sm:$0xff]  }
 0x120   : > { %3427 = vmatprep.subr.bf16.mxu0 %v6677_v42  ;;  %v6774_v42 = vld [vmem:[%s9101_s1 + $0x870] ss:$12 sps:$4 sm:$0xff]  }
 0x121   : > { %6167 = vmatpush3.bf16.msra.mxu1 %v6752_v54  ;;  %v6794_v54 = vld [vmem:[%s9101_s1 + $0x8e8] ss:$12 sps:$4 sm:$0xff]  }
 0x122   : > { %6168 = vmatprep.subr.bf16.mxu1 %v6753_v55  ;;  %v6799_v55 = vld [vmem:[%s9101_s1 + $0x904] ss:$12 sps:$4 sm:$0xff]  }
 0x123   : > { %3428 = vmatpush1.bf16.msra.mxu0 %v6675_v45  ;;  %v6787_v45 = vld [vmem:[%s9101_s1 + $0x8a4] ss:$12 sps:$4 sm:$0xff]  }
 0x124   : > { %3429 = vmatprep.subr.bf16.mxu0 %v6682_v47  ;;  %v6790_v47 = vld [vmem:[%s9101_s1 + $0x8bc] ss:$12 sps:$4 sm:$0xff]  }
 0x125   : > { %6169 = vmatpush3.bf16.msra.mxu1 %v6757_v59  ;;  %v6800_v59 = vld [vmem:[%s9101_s1 + $0x918] ss:$12 sps:$4 sm:$0xff]  }
 0x126   : > { %6170 = vmatprep.subr.bf16.mxu1 %v6758_v60  ;;  %v6805_v60 = vld [vmem:[%s9101_s1 + $0x934] ss:$12 sps:$4 sm:$0xff]  }
 0x127   : > { %3430 = vmatpush1.bf16.msra.mxu0 %v6680_v50  ;;  %v6793_v50 = vld [vmem:[%s9101_s1 + $0x8d4] ss:$12 sps:$4 sm:$0xff]  }
 0x128   : > { %3431 = vmatprep.subr.bf16.mxu0 %v6687_v53  ;;  %v6796_v53 = vld [vmem:[%s9101_s1 + $0x8ec] ss:$12 sps:$4 sm:$0xff]  }
 0x129   : > { %6171 = vmatpush3.bf16.msra.mxu1 %v6762_v63  ;;  %v6809_v63 = vld [vmem:[%s9101_s1 + $0x960] ss:$12 sps:$4 sm:$0xff]  }
 0x12a   : > { %6172 = vmatprep.subr.bf16.mxu1 %v6763_v0  ;;  %v6814_v0 = vld [vmem:[%s9101_s1 + $0x97c] ss:$12 sps:$4 sm:$0xff]  }
 0x12b   : > { %3432 = vmatpush1.bf16.msra.mxu0 %v6685_v56  ;;  %v6797_v56 = vld [vmem:[%s9101_s1 + $0x900] ss:$12 sps:$4 sm:$0xff]  }
 0x12c   : > { %3433 = vmatprep.subr.bf16.mxu0 %v6692_v57  ;;  %v6802_v57 = vld [vmem:[%s9101_s1 + $0x91c] ss:$12 sps:$4 sm:$0xff]  }
 0x12d   : > { %6173 = vmatpush3.bf16.msra.mxu1 %v6767_v4  ;;  %v6815_v4 = vld [vmem:[%s9101_s1 + $0x990] ss:$12 sps:$4 sm:$0xff]  }
 0x12e   : > { %6174 = vmatprep.subr.bf16.mxu1 %v6768_v6  ;;  %v6820_v6 = vld [vmem:[%s9101_s1 + $0x9ac] ss:$12 sps:$4 sm:$0xff]  }
 0x12f   : > { %3434 = vmatpush1.bf16.msra.mxu0 %v6690_v61  ;;  %v6803_v61 = vld [vmem:[%s9101_s1 + $0x930] ss:$12 sps:$4 sm:$0xff]  }
 0x130   : > { %3435 = vmatprep.subr.bf16.mxu0 %v6697_v62  ;;  %v6806_v62 = vld [vmem:[%s9101_s1 + $0x948] ss:$12 sps:$4 sm:$0xff]  }
 0x131   : > { %6175 = vmatpush3.bf16.msra.mxu1 %v6772_v10  ;;  %v6821_v10 = vld [vmem:[%s9101_s1 + $0x9c0] ss:$12 sps:$4 sm:$0xff]  }
 0x132   : > { %6176 = vmatprep.subr.bf16.mxu1 %v6773_v11  ;;  %v6826_v11 = vld [vmem:[%s9101_s1 + $0x9dc] ss:$12 sps:$4 sm:$0xff]  }
 0x133   : > { %3436 = vmatpush1.bf16.msra.mxu0 %v6695_v2  ;;  %v6812_v2 = vld [vmem:[%s9101_s1 + $0x978] ss:$12 sps:$4 sm:$0xff]  }
 0x134   : > { %3437 = vmatprep.subr.bf16.mxu0 %v6704_v3  ;;  %v6817_v3 = vld [vmem:[%s9101_s1 + $0x994] ss:$12 sps:$4 sm:$0xff]  }
 0x135   : > { %6177 = vmatpush3.bf16.msra.mxu1 %v6777_v14  ;;  %v867_v14 = vlaneseq }
 0x136   : > { %6178 = vmatprep.subr.bf16.mxu1 %v6778_v15  ;;  %v6829_v15 = vld [vmem:[%s9101_s1 + $0x9f4] ss:$12 sps:$4 sm:$0xff]  }
 0x137   : > { %3438 = vmatpush1.bf16.msra.mxu0 %v6702_v8  ;;  %v6818_v8 = vld [vmem:[%s9101_s1 + $0x9a8] ss:$12 sps:$4 sm:$0xff]  }
 0x138   : > { %3439 = vmatprep.subr.bf16.mxu0 %v6709_v9  ;;  %v6823_v9 = vld [vmem:[%s9101_s1 + $0x9c4] ss:$12 sps:$4 sm:$0xff]  }
 0x139   : > { %6179 = vmatpush3.bf16.msra.mxu1 %v6782_v18 }
 0x13b   : > { %3440 = vmatpush1.bf16.msra.mxu0 %v6707_v12  ;;  %v6824_v12 = vld [vmem:[%s9101_s1 + $0x9d8] ss:$12 sps:$4 sm:$0xff]  }
 0x13c   : > { %3441 = vmatprep.subr.bf16.mxu0 %v6714_v58  ;;  %3971 = vmatmul.mubr.bf16.vlgmr.msra.gmra.mrb[32].mxu1 %v8198_v21  ;;  %v6004_v58 = vpop.f32.mrb[0].mxu1 }
 0x13f   : > { %3442 = vmatpush1.bf16.msra.mxu0 %v6712_v16  ;;  %v6005_v16 = vpop.f32.mrb[1].mxu1 }
 0x140   : > { %3443 = vmatprep.subr.bf16.mxu0 %v6719_v17  ;;  %v8361_v17 = vshrl.u32 %v867_v14, 7  ;;  %v6006_v18 = vadd.f32 %v6005_v16, %v6004_v58  ;;  %v6946_v58 = vld [vmem:[%s9103_s3 + $0x1c] ss:$12 sps:$4 sm:$0xff]   ;;  %v6944_v14 = vld [vmem:[%s9103_s3 + $0x18] ss:$12 sps:$4 sm:$0xff]  }
 0x141   : > { %v6856_v16 = vld [vmem:[%s9101_s1 + $0xacc] ss:$12 sps:$4 sm:$0xff]  }
 0x143   : > { %3444 = vmatpush1.bf16.msra.mxu0 %v6717_v19  ;;  %v6007_v19 = vpop.f32.mrb[2].mxu1 }
 0x144   : > { %3454 = vmatprep.subr.bf16.mxu0 %v6724_v20  ;;  %v8366_v20 = vld [vmem:[%s9102_s2] sm:$0x7]  ;;  %v6952_v19 = vld [vmem:[%s9103_s3 + $0x4c] ss:$12 sps:$4 sm:$0xff]  }
 0x146   : > { %3446 = vmatmul.mubr.bf16.vlgmr.msra.gmra.mrb[0].mxu0 %v7761_v1  ;;  %v6739_v1 = vld [vmem:[%s9101_s1 + $0x7cc] ss:$12 sps:$4 sm:$0xff]  }
 0x147   : > { %3455 = vmatpush1.bf16.msra.mxu0 %v6722_v28  ;;  %3486 = vmatprep.mubr.bf16.mxu0 %v7774_v5  ;;  %v6746_v5 = vld [vmem:[%s9101_s1 + $0x7e4] ss:$12 sps:$4 sm:$0xff]   ;;  %v6008_v28 = vpop.f32.mrb[3].mxu1 }
 0x148   : > { %3456 = vmatprep.subr.bf16.mxu0 %v6729_v22  ;;  %v6827_v22 = vld [vmem:[%s9101_s1 + $0x9f0] ss:$12 sps:$4 sm:$0xff]   ;;  %v6854_v28 = vld [vmem:[%s9101_s1 + $0xac8] ss:$12 sps:$4 sm:$0xff]  }
 0x14b   : > { %3457 = vmatpush1.bf16.msra.mxu0 %v6727_v37  ;;  %v8372_v37 = vsub.s32 2, %v8361_v17 }
 0x14c   : > { %3458 = vmatprep.subr.bf16.mxu0 %v6734_v23  ;;  %v6026_v23 = vpop.f32.mrb[4].mxu1 }
 0x14f   : > { %3459 = vmatpush1.bf16.msra.mxu0 %v6732_v24  ;;  %v6832_v24 = vld [vmem:[%s9101_s1 + $0xa0c] ss:$12 sps:$4 sm:$0xff]  }
 0x150   : > { %3460 = vmatprep.subr.bf16.mxu0 %v6739_v1  ;;  %v6027_v1 = vpop.f32.mrb[5].mxu1 }
 0x153   : > { %3461 = vmatpush1.bf16.msra.mxu0 %v6737_v25  ;;  %v878_v25 = vrot.slane %v8366_v20, %v8372_v37 }
 0x154   : > { %3462 = vmatprep.subr.bf16.mxu0 %v6746_v5  ;;  %v6028_v5 = vadd.f32 %v6027_v1, %v6026_v23  ;;  %v6950_v23 = vld [vmem:[%s9103_s3 + $0x48] ss:$12 sps:$4 sm:$0xff]   ;;  %v6857_v1 = vld [vmem:[%s9101_s1 + $0xae0] ss:$12 sps:$4 sm:$0xff]  }
 0x157   : > { %3463 = vmatpush1.bf16.msra.mxu0 %v6744_v26  ;;  %v6029_v26 = vpop.f32.mrb[6].mxu1 }
 0x158   : > { %3464 = vmatprep.subr.bf16.mxu0 %v6751_v27  ;;  %v6030_v27 = vpop.f32.mrb[7].mxu1 }
 0x159   : > { %v6958_v27 = vld [vmem:[%s9103_s3 + $0x7c] ss:$12 sps:$4 sm:$0xff]  }
 0x15b   : > { %3465 = vmatpush1.bf16.msra.mxu0 %v6749_v29  ;;  %v6830_v29 = vld [vmem:[%s9101_s1 + $0xa08] ss:$12 sps:$4 sm:$0xff]  }
 0x15c   : > { %3466 = vmatprep.subr.bf16.mxu0 %v6756_v30  ;;  %v3653_v30 = vadd.f32 %v6006_v18, %v878_v25  ;;  %v6947_v18 = vld [vmem:[%s9103_s3 + $0x30] ss:$12 sps:$4 sm:$0xff]  }
 0x15d   : > { %v6862_v25 = vld [vmem:[%s9101_s1 + $0xafc] ss:$12 sps:$4 sm:$0xff]  }
 0x15f   : > { %3467 = vmatpush1.bf16.msra.mxu0 %v6754_v31  ;;  %v6048_v31 = vpop.f32.mrb[8].mxu1 }
 0x160   : > { %3468 = vmatprep.subr.bf16.mxu0 %v6761_v32  ;;  %v6835_v32 = vld [vmem:[%s9101_s1 + $0xa24] ss:$12 sps:$4 sm:$0xff]  }
 0x163   : > { %3469 = vmatpush1.bf16.msra.mxu0 %v6759_v33  ;;  %v6049_v33 = vpop.f32.mrb[9].mxu1 }
 0x164   : > { %3470 = vmatprep.subr.bf16.mxu0 %v6766_v34  ;;  %v3693_v34 = vadd.f32 %v6028_v5, %v3653_v30  ;;  %v6953_v5 = vld [vmem:[%s9103_s3 + $0x60] ss:$12 sps:$4 sm:$0xff]  }
 0x167   : > { %3471 = vmatpush1.bf16.msra.mxu0 %v6764_v35  ;;  %v6050_v35 = vadd.f32 %v6049_v33, %v6048_v31  ;;  %v6865_v31 = vld [vmem:[%s9101_s1 + $0xb14] ss:$12 sps:$4 sm:$0xff]  }
 0x168   : > { %3472 = vmatprep.subr.bf16.mxu0 %v6771_v36  ;;  %v6051_v36 = vpop.f32.mrb[10].mxu1 }
 0x16b   : > { %3473 = vmatpush1.bf16.msra.mxu0 %v6769_v39  ;;  %v6052_v39 = vpop.f32.mrb[11].mxu1 }
 0x16c   : > { %3474 = vmatprep.subr.bf16.mxu0 %v6776_v40  ;;  %v6833_v40 = vld [vmem:[%s9101_s1 + $0xa20] ss:$12 sps:$4 sm:$0xff]  }
 0x16d   : > { %v6961_v39 = vld [vmem:[%s9103_s3 + $0x94] ss:$12 sps:$4 sm:$0xff]  }
 0x16f   : > { %3475 = vmatpush1.bf16.msra.mxu0 %v6774_v42  ;;  %v3733_v42 = vadd.f32 %v6050_v35, %v3693_v34  ;;  %v6956_v35 = vld [vmem:[%s9103_s3 + $0x78] ss:$12 sps:$4 sm:$0xff]  }
 0x170   : > { %3476 = vmatprep.subr.bf16.mxu0 %v6781_v43  ;;  %v6070_v43 = vpop.f32.mrb[12].mxu1 }
 0x173   : > { %3477 = vmatpush1.bf16.msra.mxu0 %v6779_v44  ;;  %v6838_v44 = vld [vmem:[%s9101_s1 + $0xa3c] ss:$12 sps:$4 sm:$0xff]  }
 0x174   : > { %3478 = vmatprep.subr.bf16.mxu0 %v6787_v45  ;;  %v6071_v45 = vpop.f32.mrb[13].mxu1 }
 0x177   : > { %3479 = vmatpush1.bf16.msra.mxu0 %v6785_v46  ;;  %v6072_v46 = vadd.f32 %v6071_v45, %v6070_v43  ;;  %v6959_v43 = vld [vmem:[%s9103_s3 + $0x90] ss:$12 sps:$4 sm:$0xff]   ;;  %v6866_v45 = vld [vmem:[%s9101_s1 + $0xb28] ss:$12 sps:$4 sm:$0xff]  }
 0x178   : > { %3480 = vmatprep.subr.bf16.mxu0 %v6790_v47  ;;  %v6073_v47 = vpop.f32.mrb[14].mxu1 }
 0x179   : > { %v6962_v47 = vld [vmem:[%s9103_s3 + $0xa8] ss:$12 sps:$4 sm:$0xff]  }
 0x17b   : > { %3481 = vmatpush1.bf16.msra.mxu0 %v6788_v49  ;;  %v6074_v49 = vpop.f32.mrb[15].mxu1 }
 0x17c   : > { %3482 = vmatprep.subr.bf16.mxu0 %v6793_v50  ;;  %v6836_v50 = vld [vmem:[%s9101_s1 + $0xa38] ss:$12 sps:$4 sm:$0xff]  }
 0x17d   : > { %v6967_v49 = vld [vmem:[%s9103_s3 + $0xc4] ss:$12 sps:$4 sm:$0xff]  }
 0x17f   : > { %3483 = vmatpush1.bf16.msra.mxu0 %v6791_v51  ;;  %v3773_v51 = vadd.f32 %v6072_v46, %v3733_v42  ;;  %v6868_v42 = vld [vmem:[%s9101_s1 + $0xb2c] ss:$12 sps:$4 sm:$0xff]   ;;  %v6871_v46 = vld [vmem:[%s9101_s1 + $0xb44] ss:$12 sps:$4 sm:$0xff]  }
 0x180   : > { %3484 = vmatprep.subr.bf16.mxu0 %v6796_v53  ;;  %v6092_v53 = vpop.f32.mrb[16].mxu1 }
 0x183   : > { %3485 = vmatpush1.bf16.msra.mxu0 %v6794_v54  ;;  %v6841_v54 = vld [vmem:[%s9101_s1 + $0xa54] ss:$12 sps:$4 sm:$0xff]  }
 0x184   : > { %3495 = vmatprep.subr.bf16.mxu0 %v6799_v55  ;;  %v6093_v55 = vpop.f32.mrb[17].mxu1 }
 0x186   : > { %3487 = vmatmul.mubr.bf16.vlgmr.msra.gmra.mrb[0].mxu0 %v7875_v38  ;;  %v6808_v38 = vld [vmem:[%s9101_s1 + $0x94c] ss:$12 sps:$4 sm:$0xff]  }
 0x187   : > { %3496 = vmatpush1.bf16.msra.mxu0 %v6797_v56  ;;  %3527 = vmatprep.mubr.bf16.mxu0 %v7885_v41  ;;  %v6811_v41 = vld [vmem:[%s9101_s1 + $0x964] ss:$12 sps:$4 sm:$0xff]   ;;  %v6094_v56 = vadd.f32 %v6093_v55, %v6092_v53  ;;  %v6965_v53 = vld [vmem:[%s9103_s3 + $0xc0] ss:$12 sps:$4 sm:$0xff]  }
 0x188   : > { %3497 = vmatprep.subr.bf16.mxu0 %v6802_v57  ;;  %v6095_v57 = vpop.f32.mrb[18].mxu1  ;;  %v6872_v55 = vld [vmem:[%s9101_s1 + $0xb58] ss:$12 sps:$4 sm:$0xff]  }
 0x189   : > { %v6968_v57 = vld [vmem:[%s9103_s3 + $0xd8] ss:$12 sps:$4 sm:$0xff]  }
 0x18b   : > { %3498 = vmatpush1.bf16.msra.mxu0 %v6800_v59  ;;  %v6096_v59 = vpop.f32.mrb[19].mxu1 }
 0x18c   : > { %3499 = vmatprep.subr.bf16.mxu0 %v6805_v60  ;;  %v6839_v60 = vld [vmem:[%s9101_s1 + $0xa50] ss:$12 sps:$4 sm:$0xff]   ;;  %v6973_v59 = vld [vmem:[%s9103_s3 + $0xf4] ss:$12 sps:$4 sm:$0xff]  }
 0x18f   : > { %3500 = vmatpush1.bf16.msra.mxu0 %v6803_v61  ;;  %v3813_v61 = vadd.f32 %v6094_v56, %v3773_v51  ;;  %v6874_v51 = vld [vmem:[%s9101_s1 + $0xb5c] ss:$12 sps:$4 sm:$0xff]   ;;  %v6877_v56 = vld [vmem:[%s9101_s1 + $0xb74] ss:$12 sps:$4 sm:$0xff]  }
 0x190   : > { %3501 = vmatprep.subr.bf16.mxu0 %v6808_v38 }
 0x193   : > { %3502 = vmatpush1.bf16.msra.mxu0 %v6806_v62  ;;  %v6844_v62 = vld [vmem:[%s9101_s1 + $0xa6c] ss:$12 sps:$4 sm:$0xff]  }
 0x194   : > { %3503 = vmatprep.subr.bf16.mxu0 %v6811_v41 }
 0x197   : > { %3504 = vmatpush1.bf16.msra.mxu0 %v6809_v63 }
 0x198   : > { %3505 = vmatprep.subr.bf16.mxu0 %v6814_v0 }
 0x19b   : > { %3506 = vmatpush1.bf16.msra.mxu0 %v6812_v2 }
 0x19c   : > { %3507 = vmatprep.subr.bf16.mxu0 %v6817_v3  ;;  %v6842_v3 = vld [vmem:[%s9101_s1 + $0xa68] ss:$12 sps:$4 sm:$0xff]  }
 0x19f   : > { %3508 = vmatpush1.bf16.msra.mxu0 %v6815_v4 }
 0x1a0   : > { %3509 = vmatprep.subr.bf16.mxu0 %v6820_v6  ;;  %v6847_v6 = vld [vmem:[%s9101_s1 + $0xa84] ss:$12 sps:$4 sm:$0xff]  }
 0x1a3   : > { %3510 = vmatpush1.bf16.msra.mxu0 %v6818_v8  ;;  %v6845_v8 = vld [vmem:[%s9101_s1 + $0xa80] ss:$12 sps:$4 sm:$0xff]  }
 0x1a4   : > { %3511 = vmatprep.subr.bf16.mxu0 %v6823_v9  ;;  %v6850_v9 = vld [vmem:[%s9101_s1 + $0xa9c] ss:$12 sps:$4 sm:$0xff]  }
 0x1a7   : > { %3512 = vmatpush1.bf16.msra.mxu0 %v6821_v10  ;;  %v6941_v10 = vld [vmem:[%s9103_s3] ss:$12 sps:$4 sm:$0xff]  }
 0x1a8   : > { %3513 = vmatprep.subr.bf16.mxu0 %v6826_v11  ;;  %v6943_v11 = vld [vmem:[%s9103_s3 + $0x4] ss:$12 sps:$4 sm:$0xff]  }
 0x1a9   : > { %4481 = vmatprep.subr.bf16.mxu1 %v6943_v11 }
 0x1aa   : > { %4482 = vmatpush1.bf16.msra.mxu1 %v6941_v10  ;;  %v6884_v10 = vld [vmem:[%s9101_s1 + $0xbb8] ss:$12 sps:$4 sm:$0xff]  }
 0x1ab   : > { %3514 = vmatpush1.bf16.msra.mxu0 %v6824_v12  ;;  %v6848_v12 = vld [vmem:[%s9101_s1 + $0xa98] ss:$12 sps:$4 sm:$0xff]   ;;  %4483 = vmatprep.subr.bf16.mxu1 %v6946_v58 }
 0x1ac   : > { %3515 = vmatprep.subr.bf16.mxu0 %v6829_v15  ;;  %v6851_v15 = vld [vmem:[%s9101_s1 + $0xab0] ss:$12 sps:$4 sm:$0xff]  }
 0x1ae   : > { %4484 = vmatpush1.bf16.msra.mxu1 %v6944_v14 }
 0x1af   : > { %3516 = vmatpush1.bf16.msra.mxu0 %v6827_v22  ;;  %v6114_v38 = vpop.f32.mrb[20].mxu1  ;;  %v6859_v22 = vld [vmem:[%s9101_s1 + $0xae4] ss:$12 sps:$4 sm:$0xff]  }
 0x1b0   : > { %3517 = vmatprep.subr.bf16.mxu0 %v6832_v24  ;;  %v6115_v41 = vpop.f32.mrb[21].mxu1  ;;  %v6955_v24 = vld [vmem:[%s9103_s3 + $0x64] ss:$12 sps:$4 sm:$0xff]  }
 0x1b1   : > { %v6116_v63 = vadd.f32 %v6115_v41, %v6114_v38  ;;  %v6117_v0 = vpop.f32.mrb[22].mxu1  ;;  %v6971_v38 = vld [vmem:[%s9103_s3 + $0xf0] ss:$12 sps:$4 sm:$0xff]   ;;  %v6878_v41 = vld [vmem:[%s9101_s1 + $0xb88] ss:$12 sps:$4 sm:$0xff]  }
 0x1b2   : > { %v6118_v2 = vpop.f32.mrb[23].mxu1  ;;  %v6974_v0 = vld [vmem:[%s9103_s3 + $0x108] ss:$12 sps:$4 sm:$0xff]  }
 0x1b3   : > { %3518 = vmatpush1.bf16.msra.mxu0 %v6830_v29  ;;  %v3853_v4 = vadd.f32 %v6116_v63, %v3813_v61  ;;  %v6860_v29 = vld [vmem:[%s9101_s1 + $0xaf8] ss:$12 sps:$4 sm:$0xff]  }
 0x1b4   : > { %3519 = vmatprep.subr.bf16.mxu0 %v6835_v32  ;;  %v6880_v61 = vld [vmem:[%s9101_s1 + $0xb8c] ss:$12 sps:$4 sm:$0xff]   ;;  %v6883_v63 = vld [vmem:[%s9101_s1 + $0xba4] ss:$12 sps:$4 sm:$0xff]  }
 0x1b5   : > { %v6979_v2 = vld [vmem:[%s9103_s3 + $0x124] ss:$12 sps:$4 sm:$0xff]  }
 0x1b7   : > { %3520 = vmatpush1.bf16.msra.mxu0 %v6833_v40  ;;  %v6863_v40 = vld [vmem:[%s9101_s1 + $0xb10] ss:$12 sps:$4 sm:$0xff]  }
 0x1b8   : > { %3521 = vmatprep.subr.bf16.mxu0 %v6838_v44  ;;  %v6964_v44 = vld [vmem:[%s9103_s3 + $0xac] ss:$12 sps:$4 sm:$0xff]  }
 0x1bb   : > { %3522 = vmatpush1.bf16.msra.mxu0 %v6836_v50  ;;  %v6869_v50 = vld [vmem:[%s9101_s1 + $0xb40] ss:$12 sps:$4 sm:$0xff]  }
 0x1bc   : > { %3523 = vmatprep.subr.bf16.mxu0 %v6841_v54  ;;  %v6970_v54 = vld [vmem:[%s9103_s3 + $0xdc] ss:$12 sps:$4 sm:$0xff]  }
 0x1bf   : > { %3524 = vmatpush1.bf16.msra.mxu0 %v6839_v60  ;;  %v6875_v60 = vld [vmem:[%s9101_s1 + $0xb70] ss:$12 sps:$4 sm:$0xff]  }
 0x1c0   : > { %3525 = vmatprep.subr.bf16.mxu0 %v6844_v62  ;;  %v6976_v62 = vld [vmem:[%s9103_s3 + $0x10c] ss:$12 sps:$4 sm:$0xff]  }
 0x1c3   : > { %3526 = vmatpush1.bf16.msra.mxu0 %v6842_v3  ;;  %v6881_v3 = vld [vmem:[%s9101_s1 + $0xba0] ss:$12 sps:$4 sm:$0xff]  }
 0x1c4   : > { %3536 = vmatprep.subr.bf16.mxu0 %v6847_v6  ;;  %v6977_v6 = vld [vmem:[%s9103_s3 + $0x120] ss:$12 sps:$4 sm:$0xff]  }
 0x1c6   : > { %3528 = vmatmul.mubr.bf16.vlgmr.msra.gmra.mrb[0].mxu0 %v7984_v13  ;;  %v6853_v13 = vld [vmem:[%s9101_s1 + $0xab4] ss:$12 sps:$4 sm:$0xff]  }
 0x1c7   : > { %3537 = vmatpush1.bf16.msra.mxu0 %v6845_v8  ;;  %3568 = vmatprep.mubr.bf16.mxu0 %v7994_v7  ;;  %v6949_v7 = vld [vmem:[%s9103_s3 + $0x34] ss:$12 sps:$4 sm:$0xff]  }
 0x1c8   : > { %3538 = vmatprep.subr.bf16.mxu0 %v6850_v9  ;;  %4485 = vmatprep.subr.bf16.mxu1 %v6949_v7  ;;  %v6982_v9 = vld [vmem:[%s9103_s3 + $0x13c] ss:$12 sps:$4 sm:$0xff]   ;;  %v6980_v7 = vld [vmem:[%s9103_s3 + $0x138] ss:$12 sps:$4 sm:$0xff]  }
 0x1c9   : > { %4486 = vmatpush1.bf16.msra.mxu1 %v6947_v18  ;;  %v6892_v18 = vld [vmem:[%s9101_s1 + $0xbec] ss:$12 sps:$4 sm:$0xff]  }
 0x1ca   : > { %4487 = vmatprep.subr.bf16.mxu1 %v6952_v19  ;;  %v6890_v19 = vld [vmem:[%s9101_s1 + $0xbe8] ss:$12 sps:$4 sm:$0xff]  }
 0x1cb   : > { %3539 = vmatpush1.bf16.msra.mxu0 %v6848_v12  ;;  %v6889_v12 = vld [vmem:[%s9101_s1 + $0xbd4] ss:$12 sps:$4 sm:$0xff]  }
 0x1cc   : > { %3540 = vmatprep.subr.bf16.mxu0 %v6853_v13 }
 0x1cd   : > { %4488 = vmatpush1.bf16.msra.mxu1 %v6950_v23  ;;  %v6898_v23 = vld [vmem:[%s9101_s1 + $0xc1c] ss:$12 sps:$4 sm:$0xff]  }
 0x1ce   : > { %4489 = vmatprep.subr.bf16.mxu1 %v6955_v24  ;;  %v6896_v24 = vld [vmem:[%s9101_s1 + $0xc18] ss:$12 sps:$4 sm:$0xff]  }
 0x1cf   : > { %3541 = vmatpush1.bf16.msra.mxu0 %v6851_v15  ;;  %v6136_v26 = vpop.f32.mrb[24].mxu1 }
 0x1d0   : > { %3542 = vmatprep.subr.bf16.mxu0 %v6856_v16  ;;  %v6137_v30 = vpop.f32.mrb[25].mxu1  ;;  %v6887_v16 = vld [vmem:[%s9101_s1 + $0xbd0] ss:$12 sps:$4 sm:$0xff]  }
 0x1d1   : > { %v6138_v32 = vadd.f32 %v6137_v30, %v6136_v26  ;;  %v6139_v33 = vpop.f32.mrb[26].mxu1  ;;  %4490 = vmatpush1.bf16.msra.mxu1 %v6953_v5  ;;  %v6907_v5 = vld [vmem:[%s9101_s1 + $0xc64] ss:$12 sps:$4 sm:$0xff]   ;;  %v6905_v26 = vld [vmem:[%s9101_s1 + $0xc60] ss:$12 sps:$4 sm:$0xff]  }
 0x1d2   : > { %v6140_v34 = vpop.f32.mrb[27].mxu1  ;;  %4491 = vmatprep.subr.bf16.mxu1 %v6958_v27  ;;  %v6910_v27 = vld [vmem:[%s9101_s1 + $0xc7c] ss:$12 sps:$4 sm:$0xff]   ;;  %v6908_v30 = vld [vmem:[%s9101_s1 + $0xc78] ss:$12 sps:$4 sm:$0xff]  }
 0x1d3   : > { %3543 = vmatpush1.bf16.msra.mxu0 %v6854_v28  ;;  %v8483_v36 = vadd.f32 %v6138_v32, %v3853_v4  ;;  %v6886_v4 = vld [vmem:[%s9101_s1 + $0xbbc] ss:$12 sps:$4 sm:$0xff]   ;;  %v6895_v28 = vld [vmem:[%s9101_s1 + $0xc04] ss:$12 sps:$4 sm:$0xff]   ;;  %v6913_v32 = vld [vmem:[%s9101_s1 + $0xc94] ss:$12 sps:$4 sm:$0xff]  }
 0x1d4   : > { %3544 = vmatprep.subr.bf16.mxu0 %v6859_v22  ;;  %v6893_v22 = vld [vmem:[%s9101_s1 + $0xc00] ss:$12 sps:$4 sm:$0xff]  }
 0x1d5   : > { %4492 = vmatpush1.bf16.msra.mxu1 %v6956_v35 }
 0x1d6   : > { %4493 = vmatprep.subr.bf16.mxu1 %v6961_v39  ;;  %v6911_v39 = vld [vmem:[%s9101_s1 + $0xc90] ss:$12 sps:$4 sm:$0xff]  }
 0x1d7   : > { %3545 = vmatpush1.bf16.msra.mxu0 %v6857_v1  ;;  %v6901_v1 = vld [vmem:[%s9101_s1 + $0xc34] ss:$12 sps:$4 sm:$0xff]  }
 0x1d8   : > { %3546 = vmatprep.subr.bf16.mxu0 %v6862_v25  ;;  %v6899_v25 = vld [vmem:[%s9101_s1 + $0xc30] ss:$12 sps:$4 sm:$0xff]  }
 0x1d9   : > { %4494 = vmatpush1.bf16.msra.mxu1 %v6959_v43  ;;  %v6919_v43 = vld [vmem:[%s9101_s1 + $0xcc4] ss:$12 sps:$4 sm:$0xff]  }
 0x1da   : > { %4495 = vmatprep.subr.bf16.mxu1 %v6964_v44  ;;  %v6917_v44 = vld [vmem:[%s9101_s1 + $0xcc0] ss:$12 sps:$4 sm:$0xff]  }
 0x1db   : > { %3547 = vmatpush1.bf16.msra.mxu0 %v6860_v29 }
 0x1dc   : > { %3548 = vmatprep.subr.bf16.mxu0 %v6865_v31 }
 0x1dd   : > { %4496 = vmatpush1.bf16.msra.mxu1 %v6962_v47  ;;  %v6925_v47 = vld [vmem:[%s9101_s1 + $0xcf4] ss:$12 sps:$4 sm:$0xff]  }
 0x1de   : > { %4497 = vmatprep.subr.bf16.mxu1 %v6967_v49  ;;  %v6923_v49 = vld [vmem:[%s9101_s1 + $0xcf0] ss:$12 sps:$4 sm:$0xff]  }
 0x1df   : > { %3549 = vmatpush1.bf16.msra.mxu0 %v6863_v40  ;;  %v6916_v40 = vld [vmem:[%s9101_s1 + $0xcac] ss:$12 sps:$4 sm:$0xff]  }
 0x1e0   : > { %3550 = vmatprep.subr.bf16.mxu0 %v6868_v42  ;;  %v6914_v42 = vld [vmem:[%s9101_s1 + $0xca8] ss:$12 sps:$4 sm:$0xff]  }
 0x1e1   : > { %4498 = vmatpush1.bf16.msra.mxu1 %v6965_v53  ;;  %v6931_v53 = vld [vmem:[%s9101_s1 + $0xd24] ss:$12 sps:$4 sm:$0xff]  }
 0x1e2   : > { %4499 = vmatprep.subr.bf16.mxu1 %v6970_v54  ;;  %v6929_v54 = vld [vmem:[%s9101_s1 + $0xd20] ss:$12 sps:$4 sm:$0xff]  }
 0x1e3   : > { %3551 = vmatpush1.bf16.msra.mxu0 %v6866_v45  ;;  %v6922_v45 = vld [vmem:[%s9101_s1 + $0xcdc] ss:$12 sps:$4 sm:$0xff]  }
 0x1e4   : > { %3552 = vmatprep.subr.bf16.mxu0 %v6871_v46  ;;  %v6920_v46 = vld [vmem:[%s9101_s1 + $0xcd8] ss:$12 sps:$4 sm:$0xff]  }
 0x1e5   : > { %4500 = vmatpush1.bf16.msra.mxu1 %v6968_v57  ;;  %v6937_v57 = vld [vmem:[%s9101_s1 + $0xd54] ss:$12 sps:$4 sm:$0xff]  }
 0x1e6   : > { %4501 = vmatprep.subr.bf16.mxu1 %v6973_v59  ;;  %v6935_v59 = vld [vmem:[%s9101_s1 + $0xd50] ss:$12 sps:$4 sm:$0xff]  }
 0x1e7   : > { %3553 = vmatpush1.bf16.msra.mxu0 %v6869_v50  ;;  %v6928_v50 = vld [vmem:[%s9101_s1 + $0xd0c] ss:$12 sps:$4 sm:$0xff]  }
 0x1e8   : > { %3554 = vmatprep.subr.bf16.mxu0 %v6874_v51  ;;  %v6926_v51 = vld [vmem:[%s9101_s1 + $0xd08] ss:$12 sps:$4 sm:$0xff]  }
 0x1e9   : > { %4502 = vmatpush1.bf16.msra.mxu1 %v6971_v38  ;;  %v6985_v38 = vld [vmem:[%s9103_s3 + $0x154] ss:$12 sps:$4 sm:$0xff]  }
 0x1ea   : > { %4503 = vmatprep.subr.bf16.mxu1 %v6976_v62  ;;  %v6983_v62 = vld [vmem:[%s9103_s3 + $0x150] ss:$12 sps:$4 sm:$0xff]  }
 0x1eb   : > { %3555 = vmatpush1.bf16.msra.mxu0 %v6872_v55  ;;  %v6934_v55 = vld [vmem:[%s9101_s1 + $0xd3c] ss:$12 sps:$4 sm:$0xff]  }
 0x1ec   : > { %3556 = vmatprep.subr.bf16.mxu0 %v6877_v56  ;;  %v6932_v56 = vld [vmem:[%s9101_s1 + $0xd38] ss:$12 sps:$4 sm:$0xff]  }
 0x1ed   : > { %4504 = vmatpush1.bf16.msra.mxu1 %v6974_v0  ;;  %v7141_v0 = vmov 0.0  }
 0x1ee   : > { %4505 = vmatprep.subr.bf16.mxu1 %v6979_v2  ;;  %v8711_v2 = vsub.s32 0, %v8361_v17 }
 0x1ef   : > { %3557 = vmatpush1.bf16.msra.mxu0 %v6875_v60  ;;  %v6158_v8 = vpop.f32.mrb[28].mxu1  ;;  %v6940_v60 = vld [vmem:[%s9101_s1 + $0xd6c] ss:$12 sps:$4 sm:$0xff]  }
 0x1f0   : > { %3558 = vmatprep.subr.bf16.mxu0 %v6880_v61  ;;  %v6159_v11 = vpop.f32.mrb[29].mxu1  ;;  %v6938_v61 = vld [vmem:[%s9101_s1 + $0xd68] ss:$12 sps:$4 sm:$0xff]  }
 0x1f1   : > { %v6160_v58 = vadd.f32 %v6159_v11, %v6158_v8  ;;  %v6161_v13 = vpop.f32.mrb[30].mxu1  ;;  %4506 = vmatpush1.bf16.msra.mxu1 %v6977_v6 }
 0x1f2   : > { %v6162_v14 = vpop.f32.mrb[31].mxu1  ;;  %4507 = vmatprep.subr.bf16.mxu1 %v6982_v9 }
 0x1f3   : > { %3559 = vmatpush1.bf16.msra.mxu0 %v6878_v41  ;;  %v3933_v15 = vadd.f32 %v6160_v58, %v8483_v36  ;;  %v6988_v41 = vld [vmem:[%s9103_s3 + $0x16c] ss:$12 sps:$4 sm:$0xff]  }
 0x1f4   : > { %3560 = vmatprep.subr.bf16.mxu0 %v6883_v63  ;;  %v6986_v63 = vld [vmem:[%s9103_s3 + $0x168] ss:$12 sps:$4 sm:$0xff]  }
 0x1f5   : > { %4508 = vmatpush1.bf16.msra.mxu1 %v6980_v7 }
 0x1f6   : > { %4509 = vmatprep.subr.bf16.mxu1 %v6985_v38  ;;  %v7037_v38 = vld [vmem:[%s9105_s5] ss:$12 sps:$4 sm:$0xff]  }
 0x1f7   : > { %3561 = vmatpush1.bf16.msra.mxu0 %v6881_v3  ;;  %v8714_v3 = vsub.s32 1, %v8361_v17  ;;  %v6989_v17 = vld [vmem:[%s9103_s3 + $0x180] ss:$12 sps:$4 sm:$0xff]  }
 0x1f8   : > { %3562 = vmatprep.subr.bf16.mxu0 %v6886_v4  ;;  %v870_v4 = vrot.slane %v8366_v20, %v8711_v2 }
 0x1f9   : > { %4510 = vmatpush1.bf16.msra.mxu1 %v6983_v62  ;;  %v874_v6 = vrot.slane %v8366_v20, %v8714_v3  ;;  %v6992_v20 = vld [vmem:[%s9103_s3 + $0x198] ss:$12 sps:$4 sm:$0xff]   ;;  %v7042_v62 = vld [vmem:[%s9105_s5 + $0x1c] ss:$12 sps:$4 sm:$0xff]  }
 0x1fa   : > { %4511 = vmatprep.subr.bf16.mxu1 %v6988_v41  ;;  %v7040_v41 = vld [vmem:[%s9105_s5 + $0x18] ss:$12 sps:$4 sm:$0xff]  }
 0x1fb   : > { %3563 = vmatpush1.bf16.msra.mxu0 %v6884_v10 }
 0x1fc   : > { %3564 = vmatprep.subr.bf16.mxu0 %v6889_v12 }
 0x1fd   : > { %4512 = vmatpush1.bf16.msra.mxu1 %v6986_v63  ;;  %v7045_v63 = vld [vmem:[%s9105_s5 + $0x34] ss:$12 sps:$4 sm:$0xff]  }
 0x1ff   : > { %3565 = vmatpush1.bf16.msra.mxu0 %v6887_v16  ;;  %v6994_v16 = vld [vmem:[%s9103_s3 + $0x19c] ss:$12 sps:$4 sm:$0xff]  }
 0x200   : > { %3566 = vmatprep.subr.bf16.mxu0 %v6892_v18  ;;  %v7143_v18 = vmov 0  }
 0x203   : > { %3567 = vmatpush1.bf16.msra.mxu0 %v6890_v19  ;;  %v6997_v19 = vld [vmem:[%s9103_s3 + $0x1b4] ss:$12 sps:$4 sm:$0xff]  }
 0x204   : > { %3577 = vmatprep.subr.bf16.mxu0 %v6895_v28  ;;  %v6995_v28 = vld [vmem:[%s9103_s3 + $0x1b0] ss:$12 sps:$4 sm:$0xff]  }
 0x206   : > { %3569 = vmatmul.mubr.bf16.vlgmr.msra.gmra.mrb[0].mxu0 %v8095_v48  ;;  %v6904_v48 = vld [vmem:[%s9101_s1 + $0xc4c] ss:$12 sps:$4 sm:$0xff]  }
 0x207   : > { %3578 = vmatpush1.bf16.msra.mxu0 %v6893_v22  ;;  %3609 = vmatprep.mubr.bf16.mxu0 %v8108_v52  ;;  %v6902_v52 = vld [vmem:[%s9101_s1 + $0xc48] ss:$12 sps:$4 sm:$0xff]   ;;  %v7000_v22 = vld [vmem:[%s9103_s3 + $0x1cc] ss:$12 sps:$4 sm:$0xff]  }
 0x208   : > { %3579 = vmatprep.subr.bf16.mxu0 %v6898_v23  ;;  %v6998_v23 = vld [vmem:[%s9103_s3 + $0x1c8] ss:$12 sps:$4 sm:$0xff]  }
 0x20b   : > { %3580 = vmatpush1.bf16.msra.mxu0 %v6896_v24  ;;  %v7003_v24 = vld [vmem:[%s9103_s3 + $0x1e4] ss:$12 sps:$4 sm:$0xff]  }
 0x20c   : > { %3581 = vmatprep.subr.bf16.mxu0 %v6901_v1  ;;  %v7001_v1 = vld [vmem:[%s9103_s3 + $0x1e0] ss:$12 sps:$4 sm:$0xff]  }
 0x20f   : > { %3582 = vmatpush1.bf16.msra.mxu0 %v6899_v25  ;;  %v6180_v29 = vpop.f32.mrb[32].mxu1  ;;  %v7006_v25 = vld [vmem:[%s9103_s3 + $0x1fc] ss:$12 sps:$4 sm:$0xff]  }
 0x210   : > { %3583 = vmatprep.subr.bf16.mxu0 %v6904_v48  ;;  %v6181_v31 = vpop.f32.mrb[33].mxu1  ;;  %v7004_v48 = vld [vmem:[%s9103_s3 + $0x1f8] ss:$12 sps:$4 sm:$0xff]  }
 0x211   : > { %v6182_v33 = vadd.f32 %v6181_v31, %v6180_v29  ;;  %v6183_v34 = vpop.f32.mrb[34].mxu1  ;;  %v7014_v31 = vld [vmem:[%s9103_s3 + $0x8] ss:$12 sps:$4 sm:$0xff]  }
 0x212   : > { %v6184_v35 = vpop.f32.mrb[35].mxu1  ;;  %v7016_v34 = vld [vmem:[%s9103_s3 + $0x20] ss:$12 sps:$4 sm:$0xff]  }
 0x213   : > { %3584 = vmatpush1.bf16.msra.mxu0 %v6902_v52  ;;  %v8632_v36 = vadd.f32 %v6182_v33, %v3933_v15  ;;  %v7009_v52 = vld [vmem:[%s9103_s3 + $0x214] ss:$12 sps:$4 sm:$0xff]   ;;  %v7017_v35 = vld [vmem:[%s9103_s3 + $0xf8] ss:$12 sps:$4 sm:$0xff]  }
 0x214   : > { %3585 = vmatprep.subr.bf16.mxu0 %v6907_v5  ;;  %v7007_v5 = vld [vmem:[%s9103_s3 + $0x210] ss:$12 sps:$4 sm:$0xff]   ;;  %v7015_v33 = vld [vmem:[%s9103_s3 + $0xe0] ss:$12 sps:$4 sm:$0xff]  }
 0x215   : > { %v3980_v29 = vmax.f32 %v8632_v36, 0.0  ;;  %v7018_v36 = vld [vmem:[%s9103_s3 + $0x38] ss:$12 sps:$4 sm:$0xff]  }
 0x217   : > { %3586 = vmatpush1.bf16.msra.mxu0 %v6905_v26  ;;  %v7012_v26 = vld [vmem:[%s9103_s3 + $0x22c] ss:$12 sps:$4 sm:$0xff]  }
 0x218   : > { %3587 = vmatprep.subr.bf16.mxu0 %v6910_v27  ;;  %v7010_v27 = vld [vmem:[%s9103_s3 + $0x228] ss:$12 sps:$4 sm:$0xff]  }
 0x21b   : > { %3588 = vmatpush1.bf16.msra.mxu0 %v6908_v30  ;;  %v7013_v30 = vld [vmem:[%s9103_s3 + $0xc8] ss:$12 sps:$4 sm:$0xff]  }
 0x21c   : > { %3589 = vmatprep.subr.bf16.mxu0 %v6913_v32  ;;  %v3983_v32 = vpack.c.bf16 %v3980_v29, %v3980_v29  ;;  %v7082_v29 = vld [vmem:[%s9105_s5 + $0x168] ss:$12 sps:$4 sm:$0xff]  }
 0x21f   : > { %3590 = vmatpush1.bf16.msra.mxu0 %v6911_v39  ;;  %v7019_v39 = vld [vmem:[%s9103_s3 + $0x110] ss:$12 sps:$4 sm:$0xff]  }
 0x220   : > { %3591 = vmatprep.subr.bf16.mxu0 %v6916_v40  ;;  %v7020_v40 = vld [vmem:[%s9103_s3 + $0x50] ss:$12 sps:$4 sm:$0xff]  }
 0x223   : > { %3592 = vmatpush1.bf16.msra.mxu0 %v6914_v42  ;;  %v7021_v42 = vld [vmem:[%s9103_s3 + $0x128] ss:$12 sps:$4 sm:$0xff]  }
 0x224   : > { %3593 = vmatprep.subr.bf16.mxu0 %v6919_v43  ;;  %v7022_v43 = vld [vmem:[%s9103_s3 + $0x68] ss:$12 sps:$4 sm:$0xff]  }
 0x227   : > { %3594 = vmatpush1.bf16.msra.mxu0 %v6917_v44  ;;  %v7023_v44 = vld [vmem:[%s9103_s3 + $0x140] ss:$12 sps:$4 sm:$0xff]  }
 0x228   : > { %3595 = vmatprep.subr.bf16.mxu0 %v6922_v45  ;;  %v7024_v45 = vld [vmem:[%s9103_s3 + $0x80] ss:$12 sps:$4 sm:$0xff]  }
 0x22b   : > { %3596 = vmatpush1.bf16.msra.mxu0 %v6920_v46  ;;  %v7025_v46 = vld [vmem:[%s9103_s3 + $0x158] ss:$12 sps:$4 sm:$0xff]  }
 0x22c   : > { %3597 = vmatprep.subr.bf16.mxu0 %v6925_v47  ;;  %v7026_v47 = vld [vmem:[%s9103_s3 + $0x98] ss:$12 sps:$4 sm:$0xff]  }
 0x22f   : > { %3598 = vmatpush1.bf16.msra.mxu0 %v6923_v49  ;;  %v7027_v49 = vld [vmem:[%s9103_s3 + $0x170] ss:$12 sps:$4 sm:$0xff]  }
 0x230   : > { %3599 = vmatprep.subr.bf16.mxu0 %v6928_v50  ;;  %v7028_v50 = vld [vmem:[%s9103_s3 + $0xb0] ss:$12 sps:$4 sm:$0xff]  }
 0x233   : > { %3600 = vmatpush1.bf16.msra.mxu0 %v6926_v51  ;;  %v7029_v51 = vld [vmem:[%s9103_s3 + $0x188] ss:$12 sps:$4 sm:$0xff]  }
 0x234   : > { %3601 = vmatprep.subr.bf16.mxu0 %v6931_v53  ;;  %v7030_v53 = vld [vmem:[%s9103_s3 + $0x1a0] ss:$12 sps:$4 sm:$0xff]  }
 0x237   : > { %3602 = vmatpush1.bf16.msra.mxu0 %v6929_v54  ;;  %v7031_v54 = vld [vmem:[%s9103_s3 + $0x1b8] ss:$12 sps:$4 sm:$0xff]  }
 0x238   : > { %3603 = vmatprep.subr.bf16.mxu0 %v6934_v55  ;;  %v7032_v55 = vld [vmem:[%s9103_s3 + $0x1d0] ss:$12 sps:$4 sm:$0xff]  }
 0x23b   : > { %3604 = vmatpush1.bf16.msra.mxu0 %v6932_v56  ;;  %v7033_v56 = vld [vmem:[%s9103_s3 + $0x1e8] ss:$12 sps:$4 sm:$0xff]  }
 0x23c   : > { %3605 = vmatprep.subr.bf16.mxu0 %v6937_v57  ;;  %v7034_v57 = vld [vmem:[%s9103_s3 + $0x200] ss:$12 sps:$4 sm:$0xff]  }
 0x23f   : > { %3606 = vmatpush1.bf16.msra.mxu0 %v6935_v59  ;;  %v7035_v59 = vld [vmem:[%s9103_s3 + $0x218] ss:$12 sps:$4 sm:$0xff]  }
 0x240   : > { %3607 = vmatprep.subr.bf16.mxu0 %v6940_v60  ;;  %v7036_v60 = vld [vmem:[%s9103_s3 + $0x230] ss:$12 sps:$4 sm:$0xff]  }
 0x243   : > { %3608 = vmatpush1.bf16.msra.mxu0 %v6938_v61  ;;  %v7039_v61 = vld [vmem:[%s9105_s5 + $0x4] ss:$12 sps:$4 sm:$0xff]  }
 0x244   : > { %6268 = vmatprep.subr.bf16.mxu0 %v7141_v0 }
 0x246   : > { %3610 = vmatmul.mubr.bf16.vlgmr.msra.gmra.mrb[0].mxu0 %v8198_v21  ;;  %v6991_v21 = vld [vmem:[%s9103_s3 + $0x184] ss:$12 sps:$4 sm:$0xff]  }
 0x247   : > { %4522 = vmatprep.subr.bf16.mxu1 %v6991_v21  ;;  %6284 = vmatprep.mubr.msk.bf16.mxu0 %vm7142_vm0, %v7141_v0  ;;  %v7043_v21 = vld [vmem:[%s9105_s5 + $0x30] ss:$12 sps:$4 sm:$0xff]  }
 0x319   : > { %v3611_v8 = vpop.f32.mrb[0].mxu0 }
 0x31a   : > { %v6288_v9 = vadd.f32 %v3611_v8, %v870_v4  ;;  %v3613_v10 = vpop.f32.mrb[1].mxu0  ;;  %v7048_v4 = vld [vmem:[%s9105_s5 + $0x4c] ss:$12 sps:$4 sm:$0xff]   ;;  %v7051_v8 = vld [vmem:[%s9105_s5 + $0x64] ss:$12 sps:$4 sm:$0xff]  }
 0x31b   : > { %v6289_v11 = vadd.f32 %v3613_v10, %v874_v6  ;;  %v3615_v12 = vpop.f32.mrb[2].mxu0  ;;  %v7046_v6 = vld [vmem:[%s9105_s5 + $0x48] ss:$12 sps:$4 sm:$0xff]  }
 0x31c   : > { %v3978_v58 = vmax.f32 %v6288_v9, 0.0  ;;  %v3616_v13 = vpop.f32.mrb[3].mxu0  ;;  %v7049_v9 = vld [vmem:[%s9105_s5 + $0x60] ss:$12 sps:$4 sm:$0xff]   ;;  %v7054_v10 = vld [vmem:[%s9105_s5 + $0x7c] ss:$12 sps:$4 sm:$0xff]  }
 0x31d   : > { %v3979_v14 = vmax.f32 %v6289_v11, 0.0  ;;  %v7052_v11 = vld [vmem:[%s9105_s5 + $0x78] ss:$12 sps:$4 sm:$0xff]   ;;  %v7057_v12 = vld [vmem:[%s9105_s5 + $0x94] ss:$12 sps:$4 sm:$0xff]  }
 0x31e   : > { %v8723_v15 = vpack.c.bf16 %v3978_v58, %v3978_v58  ;;  %v7055_v58 = vld [vmem:[%s9105_s5 + $0x90] ss:$12 sps:$4 sm:$0xff]   ;;  %v7060_v13 = vld [vmem:[%s9105_s5 + $0xac] ss:$12 sps:$4 sm:$0xff]  }
 0x31f   : > { %v3982_v7 = vpack.c.bf16 %v3979_v14, %v3979_v14  ;;  %v7058_v14 = vld [vmem:[%s9105_s5 + $0xa8] ss:$12 sps:$4 sm:$0xff]  }
 0x321   : > { %4513 = vmatprep.mubr.bf16.mxu1 %v3982_v7 }
 0x322   : > { %4514 = vmatmul.mubr.bf16.vlgmr.msra.gmra.mrb[36].mxu1 %v8723_v15 }
 0x323   : > { %4523 = vmatpush1.bf16.msra.mxu1 %v6989_v17  ;;  %4554 = vmatprep.mubr.bf16.mxu1 %v7143_v18  ;;  %v7061_v17 = vld [vmem:[%s9105_s5 + $0xc0] ss:$12 sps:$4 sm:$0xff]  }
 0x324   : > { %4524 = vmatprep.subr.bf16.mxu1 %v6994_v16  ;;  %v7064_v16 = vld [vmem:[%s9105_s5 + $0xd8] ss:$12 sps:$4 sm:$0xff]  }
 0x327   : > { %4525 = vmatpush1.bf16.msra.mxu1 %v6992_v20  ;;  %v7069_v20 = vld [vmem:[%s9105_s5 + $0xf4] ss:$12 sps:$4 sm:$0xff]  }
 0x328   : > { %4526 = vmatprep.subr.bf16.mxu1 %v6997_v19  ;;  %v7067_v19 = vld [vmem:[%s9105_s5 + $0xf0] ss:$12 sps:$4 sm:$0xff]  }
 0x32b   : > { %4527 = vmatpush1.bf16.msra.mxu1 %v6995_v28  ;;  %v7072_v28 = vld [vmem:[%s9105_s5 + $0x10c] ss:$12 sps:$4 sm:$0xff]  }
 0x32c   : > { %4528 = vmatprep.subr.bf16.mxu1 %v7000_v22  ;;  %v7070_v22 = vld [vmem:[%s9105_s5 + $0x108] ss:$12 sps:$4 sm:$0xff]  }
 0x32f   : > { %4529 = vmatpush1.bf16.msra.mxu1 %v6998_v23  ;;  %v7075_v23 = vld [vmem:[%s9105_s5 + $0x124] ss:$12 sps:$4 sm:$0xff]  }
 0x330   : > { %4530 = vmatprep.subr.bf16.mxu1 %v7003_v24  ;;  %v7073_v24 = vld [vmem:[%s9105_s5 + $0x120] ss:$12 sps:$4 sm:$0xff]  }
 0x333   : > { %4531 = vmatpush1.bf16.msra.mxu1 %v7001_v1  ;;  %v7078_v1 = vld [vmem:[%s9105_s5 + $0x13c] ss:$12 sps:$4 sm:$0xff]  }
 0x334   : > { %4532 = vmatprep.subr.bf16.mxu1 %v7006_v25  ;;  %v7076_v25 = vld [vmem:[%s9105_s5 + $0x138] ss:$12 sps:$4 sm:$0xff]  }
 0x337   : > { %4533 = vmatpush1.bf16.msra.mxu1 %v7004_v48  ;;  %v7081_v48 = vld [vmem:[%s9105_s5 + $0x154] ss:$12 sps:$4 sm:$0xff]  }
 0x338   : > { %4534 = vmatprep.subr.bf16.mxu1 %v7009_v52  ;;  %v7079_v52 = vld [vmem:[%s9105_s5 + $0x150] ss:$12 sps:$4 sm:$0xff]  }
 0x33b   : > { %4535 = vmatpush1.bf16.msra.mxu1 %v7007_v5  ;;  %v7084_v5 = vld [vmem:[%s9105_s5 + $0x16c] ss:$12 sps:$4 sm:$0xff]  }
 0x33c   : > { %4536 = vmatprep.subr.bf16.mxu1 %v7012_v26  ;;  %v7088_v26 = vld [vmem:[%s9105_s5 + $0x188] ss:$12 sps:$4 sm:$0xff]  }
 0x33d   : > { %6269 = vmatpush3.bf16.msra.mxu0 %v7088_v26  ;;  %v7126_v26 = vld [vmem:[%s9105_s5 + $0x68] ss:$12 sps:$4 sm:$0xff]  }
 0x33e   : > { %6270 = vmatprep.subr.bf16.mxu0 %v7141_v0 }
 0x33f   : > { %4537 = vmatpush1.bf16.msra.mxu1 %v7010_v27  ;;  %v7092_v27 = vld [vmem:[%s9105_s5 + $0x1a0] ss:$12 sps:$4 sm:$0xff]  }
 0x340   : > { %6186 = vmatprep.subr.bf16.mxu1 %v7013_v30  ;;  %v7087_v30 = vld [vmem:[%s9105_s5 + $0x184] ss:$12 sps:$4 sm:$0xff]  }
 0x341   : > { %6271 = vmatpush3.bf16.msra.mxu0 %v7092_v27  ;;  %v7127_v27 = vld [vmem:[%s9105_s5 + $0x140] ss:$12 sps:$4 sm:$0xff]  }
 0x342   : > { %4555 = vmatmul.mubr.bf16.vlgmr.msra.gmra.mrb[36].mxu1 %v3983_v32  ;;  %6272 = vmatprep.subr.bf16.mxu0 %v7141_v0 }
 0x343   : > { %6187 = vmatpush3.bf16.msra.mxu1 %v7014_v31  ;;  %4595 = vmatprep.mubr.bf16.mxu1 %v3982_v7  ;;  %v7063_v7 = vld [vmem:[%s9105_s5 + $0xc4] ss:$12 sps:$4 sm:$0xff]  }
 0x344   : > { %6188 = vmatprep.subr.bf16.mxu1 %v7015_v33  ;;  %v7096_v31 = vld [vmem:[%s9105_s5 + $0x1b8] ss:$12 sps:$4 sm:$0xff]   ;;  %v7104_v33 = vld [vmem:[%s9105_s5 + $0x1e8] ss:$12 sps:$4 sm:$0xff]  }
 0x345   : > { %6273 = vmatpush3.bf16.msra.mxu0 %v7096_v31  ;;  %v7130_v31 = vld [vmem:[%s9105_s5 + $0x98] ss:$12 sps:$4 sm:$0xff]  }
 0x346   : > { %6274 = vmatprep.subr.bf16.mxu0 %v7141_v0 }
 0x347   : > { %6189 = vmatpush3.bf16.msra.mxu1 %v7016_v34  ;;  %v7108_v34 = vld [vmem:[%s9105_s5 + $0x200] ss:$12 sps:$4 sm:$0xff]  }
 0x348   : > { %6190 = vmatprep.subr.bf16.mxu1 %v7017_v35  ;;  %v7112_v35 = vld [vmem:[%s9105_s5 + $0x218] ss:$12 sps:$4 sm:$0xff]  }
 0x34b   : > { %6191 = vmatpush3.bf16.msra.mxu1 %v7018_v36  ;;  %v7116_v36 = vld [vmem:[%s9105_s5 + $0x230] ss:$12 sps:$4 sm:$0xff]  }
 0x34c   : > { %6192 = vmatprep.subr.bf16.mxu1 %v7019_v39  ;;  %v4080_v39 = vld [vmem:[%s9104_s4] sm:$0x7] }
 0x34f   : > { %6193 = vmatpush3.bf16.msra.mxu1 %v7020_v40  ;;  %v4085_v40 = vrot.slane %v4080_v39, %v8711_v2 }
 0x350   : > { %6194 = vmatprep.subr.bf16.mxu1 %v7021_v42  ;;  %v4089_v42 = vrot.slane %v4080_v39, %v8714_v3 }
 0x353   : > { %6195 = vmatpush3.bf16.msra.mxu1 %v7022_v43 }
 0x354   : > { %6196 = vmatprep.subr.bf16.mxu1 %v7023_v44 }
 0x357   : > { %6197 = vmatpush3.bf16.msra.mxu1 %v7024_v45 }
 0x358   : > { %6198 = vmatprep.subr.bf16.mxu1 %v7025_v46 }
 0x35b   : > { %6199 = vmatpush3.bf16.msra.mxu1 %v7026_v47 }
 0x35c   : > { %6200 = vmatprep.subr.bf16.mxu1 %v7027_v49 }
 0x35f   : > { %6201 = vmatpush3.bf16.msra.mxu1 %v7028_v50 }
 0x360   : > { %6248 = vmatprep.subr.bf16.mxu1 %v7141_v0 }
 0x362   : > { %4596 = vmatmul.mubr.bf16.vlgmr.msra.gmra.mrb[40].mxu1 %v8723_v15  ;;  %v7066_v15 = vld [vmem:[%s9105_s5 + $0xdc] ss:$12 sps:$4 sm:$0xff]  }
 0x363   : > { %6249 = vmatpush3.bf16.msra.mxu1 %v7029_v51  ;;  %6264 = vmatprep.mubr.msk.bf16.mxu1 %vm7142_vm0, %v7141_v0 }
 0x364   : > { %6250 = vmatprep.subr.bf16.mxu1 %v7141_v0 }
 0x367   : > { %6251 = vmatpush3.bf16.msra.mxu1 %v7030_v53  ;;  %v7085_v53 = vld [vmem:[%s9105_s5 + $0x180] ss:$12 sps:$4 sm:$0xff]  }
 0x368   : > { %6252 = vmatprep.subr.bf16.mxu1 %v7141_v0 }
 0x36b   : > { %6253 = vmatpush3.bf16.msra.mxu1 %v7031_v54 }
 0x36c   : > { %6254 = vmatprep.subr.bf16.mxu1 %v7141_v0 }
 0x36f   : > { %6255 = vmatpush3.bf16.msra.mxu1 %v7032_v55  ;;  %v7091_v55 = vld [vmem:[%s9105_s5 + $0x19c] ss:$12 sps:$4 sm:$0xff]  }
 0x370   : > { %6256 = vmatprep.subr.bf16.mxu1 %v7141_v0 }
 0x373   : > { %6257 = vmatpush3.bf16.msra.mxu1 %v7033_v56  ;;  %v7089_v56 = vld [vmem:[%s9105_s5 + $0x198] ss:$12 sps:$4 sm:$0xff]  }
 0x374   : > { %6258 = vmatprep.subr.bf16.mxu1 %v7141_v0 }
 0x377   : > { %6259 = vmatpush3.bf16.msra.mxu1 %v7034_v57  ;;  %v7095_v57 = vld [vmem:[%s9105_s5 + $0x1b4] ss:$12 sps:$4 sm:$0xff]  }
 0x378   : > { %6260 = vmatprep.subr.bf16.mxu1 %v7141_v0 }
 0x37b   : > { %6261 = vmatpush3.bf16.msra.mxu1 %v7035_v59  ;;  %v7093_v59 = vld [vmem:[%s9105_s5 + $0x1b0] ss:$12 sps:$4 sm:$0xff]  }
 0x37c   : > { %6262 = vmatprep.subr.bf16.mxu1 %v7141_v0 }
 0x37f   : > { %6263 = vmatpush3.bf16.msra.mxu1 %v7036_v60  ;;  %v7099_v60 = vld [vmem:[%s9105_s5 + $0x1cc] ss:$12 sps:$4 sm:$0xff]  }
 0x380   : > { %5146 = vmatprep.subr.bf16.mxu1 %v7039_v61  ;;  %v7103_v61 = vld [vmem:[%s9105_s5 + $0x1e4] ss:$12 sps:$4 sm:$0xff]  }
 0x382   : > { %6265 = vmatmul.mubr.bf16.vlgmr.msra.gmra.mrb[44].mxu1 %v3983_v32  ;;  %v7100_v32 = vld [vmem:[%s9105_s5 + $0x1d0] ss:$12 sps:$4 sm:$0xff]  }
 0x383   : > { %5147 = vmatpush1.bf16.msra.mxu1 %v7037_v38  ;;  %6275 = vmatpush3.bf16.msra.mxu0 %v7100_v32  ;;  %v7101_v38 = vld [vmem:[%s9105_s5 + $0x1e0] ss:$12 sps:$4 sm:$0xff]   ;;  %v7131_v32 = vld [vmem:[%s9105_s5 + $0x170] ss:$12 sps:$4 sm:$0xff]  }
 0x384   : > { %5148 = vmatprep.subr.bf16.mxu1 %v7042_v62  ;;  %6276 = vmatprep.subr.bf16.mxu0 %v7141_v0  ;;  %v7107_v62 = vld [vmem:[%s9105_s5 + $0x1fc] ss:$12 sps:$4 sm:$0xff]  }
 0x387   : > { %5149 = vmatpush1.bf16.msra.mxu1 %v7040_v41  ;;  %6277 = vmatpush3.bf16.msra.mxu0 %v7104_v33  ;;  %v7105_v41 = vld [vmem:[%s9105_s5 + $0x1f8] ss:$12 sps:$4 sm:$0xff]   ;;  %v7132_v33 = vld [vmem:[%s9105_s5 + $0xb0] ss:$12 sps:$4 sm:$0xff]  }
 0x388   : > { %5150 = vmatprep.subr.bf16.mxu1 %v7045_v63  ;;  %6278 = vmatprep.subr.bf16.mxu0 %v7141_v0  ;;  %v7111_v63 = vld [vmem:[%s9105_s5 + $0x214] ss:$12 sps:$4 sm:$0xff]  }
 0x38b   : > { %5151 = vmatpush1.bf16.msra.mxu1 %v7043_v21  ;;  %6279 = vmatpush3.bf16.msra.mxu0 %v7108_v34  ;;  %v7109_v21 = vld [vmem:[%s9105_s5 + $0x210] ss:$12 sps:$4 sm:$0xff]   ;;  %v4745_v34 = vld [vmem:[%s9106_s6] sm:$0x7] }
 0x38c   : > { %5152 = vmatprep.subr.bf16.mxu1 %v7048_v4  ;;  %6280 = vmatprep.subr.bf16.mxu0 %v7141_v0  ;;  %v7115_v4 = vld [vmem:[%s9105_s5 + $0x22c] ss:$12 sps:$4 sm:$0xff]  }
 0x38f   : > { %5153 = vmatpush1.bf16.msra.mxu1 %v7046_v6  ;;  %6281 = vmatpush3.bf16.msra.mxu0 %v7112_v35  ;;  %v4750_v35 = vrot.slane %v4745_v34, %v8711_v2 }
 0x390   : > { %5154 = vmatprep.subr.bf16.mxu1 %v7051_v8  ;;  %6282 = vmatprep.subr.bf16.mxu0 %v7141_v0 }
 0x393   : > { %5155 = vmatpush1.bf16.msra.mxu1 %v7049_v9  ;;  %6283 = vmatpush3.bf16.msra.mxu0 %v7116_v36  ;;  %v4754_v36 = vrot.slane %v4745_v34, %v8714_v3 }
 0x394   : > { %5156 = vmatprep.subr.bf16.mxu1 %v7054_v10 }
 0x397   : > { %5157 = vmatpush1.bf16.msra.mxu1 %v7052_v11  ;;  %v7113_v11 = vld [vmem:[%s9105_s5 + $0x228] ss:$12 sps:$4 sm:$0xff]  }
 0x398   : > { %5158 = vmatprep.subr.bf16.mxu1 %v7057_v12 }
 0x39b   : > { %5159 = vmatpush1.bf16.msra.mxu1 %v7055_v58  ;;  %v7117_v58 = vld [vmem:[%s9105_s5 + $0xc8] ss:$12 sps:$4 sm:$0xff]  }
 0x39c   : > { %5160 = vmatprep.subr.bf16.mxu1 %v7060_v13  ;;  %v4093_v13 = vrot.slane %v4080_v39, %v8372_v37 }
 0x39f   : > { %5161 = vmatpush1.bf16.msra.mxu1 %v7058_v14 }
 0x3a0   : > { %5162 = vmatprep.subr.bf16.mxu1 %v7063_v7 }
 0x3a3   : > { %5163 = vmatpush1.bf16.msra.mxu1 %v7061_v17 }
 0x3a4   : > { %5164 = vmatprep.subr.bf16.mxu1 %v7066_v15 }
 0x3a7   : > { %5165 = vmatpush1.bf16.msra.mxu1 %v7064_v16 }
 0x3a8   : > { %5166 = vmatprep.subr.bf16.mxu1 %v7069_v20 }
 0x3ab   : > { %5167 = vmatpush1.bf16.msra.mxu1 %v7067_v19 }
 0x3ac   : > { %5168 = vmatprep.subr.bf16.mxu1 %v7072_v28  ;;  %v7118_v28 = vld [vmem:[%s9105_s5 + $0x8] ss:$12 sps:$4 sm:$0xff]  }
 0x3af   : > { %5169 = vmatpush1.bf16.msra.mxu1 %v7070_v22 }
 0x3b0   : > { %5170 = vmatprep.subr.bf16.mxu1 %v7075_v23  ;;  %v7119_v23 = vld [vmem:[%s9105_s5 + $0xe0] ss:$12 sps:$4 sm:$0xff]  }
 0x3b3   : > { %5171 = vmatpush1.bf16.msra.mxu1 %v7073_v24  ;;  %v7120_v24 = vld [vmem:[%s9105_s5 + $0x20] ss:$12 sps:$4 sm:$0xff]  }
 0x3b4   : > { %5172 = vmatprep.subr.bf16.mxu1 %v7078_v1  ;;  %v7121_v1 = vld [vmem:[%s9105_s5 + $0xf8] ss:$12 sps:$4 sm:$0xff]  }
 0x3b7   : > { %5173 = vmatpush1.bf16.msra.mxu1 %v7076_v25  ;;  %v7122_v25 = vld [vmem:[%s9105_s5 + $0x38] ss:$12 sps:$4 sm:$0xff]  }
 0x3b8   : > { %5174 = vmatprep.subr.bf16.mxu1 %v7081_v48  ;;  %v7123_v48 = vld [vmem:[%s9105_s5 + $0x110] ss:$12 sps:$4 sm:$0xff]  }
 0x3bb   : > { %5175 = vmatpush1.bf16.msra.mxu1 %v7079_v52  ;;  %v7124_v52 = vld [vmem:[%s9105_s5 + $0x50] ss:$12 sps:$4 sm:$0xff]  }
 0x3bc   : > { %5176 = vmatprep.subr.bf16.mxu1 %v7084_v5  ;;  %v7125_v5 = vld [vmem:[%s9105_s5 + $0x128] ss:$12 sps:$4 sm:$0xff]  }
 0x3bf   : > { %5177 = vmatpush1.bf16.msra.mxu1 %v7082_v29  ;;  %v7128_v29 = vld [vmem:[%s9105_s5 + $0x80] ss:$12 sps:$4 sm:$0xff]  }
 0x3c0   : > { %5187 = vmatprep.subr.bf16.mxu1 %v7087_v30  ;;  %v7129_v30 = vld [vmem:[%s9105_s5 + $0x158] ss:$12 sps:$4 sm:$0xff]  }
 0x415   : > { %v4556_v43 = vpop.f32.mrb[36].mxu1 }
 0x416   : > { %v6290_v44 = vadd.f32 %v4556_v43, %v4085_v40  ;;  %v4558_v45 = vpop.f32.mrb[37].mxu1 }
 0x417   : > { %v6291_v46 = vadd.f32 %v4558_v45, %v4089_v42  ;;  %v4560_v47 = vpop.f32.mrb[38].mxu1 }
 0x418   : > { %v4643_v49 = vmax.f32 %v6290_v44, 0.0  ;;  %v4561_v0 = vpop.f32.mrb[39].mxu1 }
 0x419   : > { %v4644_v50 = vmax.f32 %v6291_v46, 0.0 }
 0x41a   : > { %v8991_v54 = vpack.c.bf16 %v4643_v49, %v4643_v49 }
 0x41b   : > { %v4647_v51 = vpack.c.bf16 %v4644_v50, %v4644_v50 }
 0x41d   : > { %5178 = vmatprep.mubr.bf16.mxu1 %v4647_v51 }
 0x41e   : > { %5179 = vmatmul.mubr.bf16.vlgmr.msra.gmra.mrb[48].mxu1 %v8991_v54 }
 0x41f   : > { %5188 = vmatpush1.bf16.msra.mxu1 %v7085_v53  ;;  %5219 = vmatprep.mubr.bf16.mxu1 %v7143_v18  ;;  %v7097_v18 = vld [vmem:[%s9105_s5 + $0x1c8] ss:$12 sps:$4 sm:$0xff]   ;;  %v4758_v53 = vrot.slane %v4745_v34, %v8372_v37 }
 0x420   : > { %5189 = vmatprep.subr.bf16.mxu1 %v7091_v55 }
 0x423   : > { %5190 = vmatpush1.bf16.msra.mxu1 %v7089_v56 }
 0x424   : > { %5191 = vmatprep.subr.bf16.mxu1 %v7095_v57 }
 0x427   : > { %5192 = vmatpush1.bf16.msra.mxu1 %v7093_v59 }
 0x428   : > { %5193 = vmatprep.subr.bf16.mxu1 %v7099_v60 }
 0x42b   : > { %5194 = vmatpush1.bf16.msra.mxu1 %v7097_v18 }
 0x42c   : > { %5195 = vmatprep.subr.bf16.mxu1 %v7103_v61 }
 0x42f   : > { %5196 = vmatpush1.bf16.msra.mxu1 %v7101_v38 }
 0x430   : > { %5197 = vmatprep.subr.bf16.mxu1 %v7107_v62 }
 0x433   : > { %5198 = vmatpush1.bf16.msra.mxu1 %v7105_v41 }
 0x434   : > { %5199 = vmatprep.subr.bf16.mxu1 %v7111_v63 }
 0x435   : > { %v6202_v6 = vpop.f32.mrb[40].mxu1 }
 0x436   : > { %v6203_v8 = vpop.f32.mrb[41].mxu1 }
 0x437   : > { %v6204_v9 = vadd.f32 %v6203_v8, %v6202_v6  ;;  %v6205_v10 = vpop.f32.mrb[42].mxu1  ;;  %5200 = vmatpush1.bf16.msra.mxu1 %v7109_v21 }
 0x438   : > { %v6206_v12 = vpop.f32.mrb[43].mxu1  ;;  %5201 = vmatprep.subr.bf16.mxu1 %v7115_v4 }
 0x439   : > { %v4598_v14 = vadd.f32 %v6204_v9, %v4093_v13 }
 0x43b   : > { %5202 = vmatpush1.bf16.msra.mxu1 %v7113_v11 }
 0x43c   : > { %6217 = vmatprep.subr.bf16.mxu1 %v7117_v58 }
 0x455   : > { %v4637_v7 = vpop.f32.mrb[44].mxu1 }
 0x456   : > { %v4638_v17 = vadd.f32 %v4637_v7, %v4598_v14  ;;  %v6266_v15 = vpop.f32.mrb[45].mxu1 }
 0x457   : > { %v4640_v16 = vpop.f32.mrb[46].mxu1 }
 0x458   : > { %v4645_v20 = vmax.f32 %v4638_v17, 0.0  ;;  %v6267_v19 = vpop.f32.mrb[47].mxu1 }
 0x45a   : > { %v4648_v22 = vpack.c.bf16 %v4645_v20, %v4645_v20 }
 0x45c   : > { %5220 = vmatmul.mubr.bf16.vlgmr.msra.gmra.mrb[48].mxu1 %v4648_v22  ;;  %6285 = vmatmul.mubr.bf16.vlgmr.msra.gmra.mrb[4].mxu0 %v4648_v22 }
 0x45d   : > { %6218 = vmatpush3.bf16.msra.mxu1 %v7118_v28  ;;  %5260 = vmatprep.mubr.bf16.mxu1 %v4647_v51 }
 0x45e   : > { %6219 = vmatprep.subr.bf16.mxu1 %v7119_v23 }
 0x461   : > { %6220 = vmatpush3.bf16.msra.mxu1 %v7120_v24 }
 0x462   : > { %6221 = vmatprep.subr.bf16.mxu1 %v7121_v1 }
 0x465   : > { %6222 = vmatpush3.bf16.msra.mxu1 %v7122_v25 }
 0x466   : > { %6223 = vmatprep.subr.bf16.mxu1 %v7123_v48 }
 0x469   : > { %6224 = vmatpush3.bf16.msra.mxu1 %v7124_v52 }
 0x46a   : > { %6225 = vmatprep.subr.bf16.mxu1 %v7125_v5 }
 0x46d   : > { %6226 = vmatpush3.bf16.msra.mxu1 %v7126_v26 }
 0x46e   : > { %6227 = vmatprep.subr.bf16.mxu1 %v7127_v27 }
 0x471   : > { %6228 = vmatpush3.bf16.msra.mxu1 %v7128_v29 }
 0x472   : > { %6229 = vmatprep.subr.bf16.mxu1 %v7129_v30 }
 0x475   : > { %6230 = vmatpush3.bf16.msra.mxu1 %v7130_v31 }
 0x476   : > { %6231 = vmatprep.subr.bf16.mxu1 %v7131_v32 }
 0x479   : > { %6232 = vmatpush3.bf16.msra.mxu1 %v7132_v33 }
 0x47c   : > { %5261 = vmatmul.mubr.bf16.vlgmr.msra.gmra.mrb[52].mxu1 %v8991_v54 }
 0x52f   : > { %v5221_v39 = vpop.f32.mrb[48].mxu1  ;;  %v5302_v40 = vpop.f32.mrb[4].mxu0 }
 0x530   : > { %v6292_v42 = vadd.f32 %v5221_v39, %v4750_v35  ;;  %v5223_v43 = vpop.f32.mrb[49].mxu1  ;;  %v6286_v44 = vpop.f32.mrb[5].mxu0 }
 0x531   : > { %v6293_v45 = vadd.f32 %v5223_v43, %v4754_v36  ;;  %v5225_v46 = vpop.f32.mrb[50].mxu1  ;;  %v5305_v47 = vpop.f32.mrb[6].mxu0 }
 0x532   : > { %v5308_v49 = vmax.f32 %v6292_v42, 0.0  ;;  %v5226_v0 = vpop.f32.mrb[51].mxu1  ;;  %v6287_v50 = vpop.f32.mrb[7].mxu0 }
 0x533   : > { %v5309_v51 = vmax.f32 %v6293_v45, 0.0 }
 0x535   : > { %v5986_v2 = vpack.c.bf16 %v5309_v51, %v5308_v49 }
 0x537   : > { %5324 = vst [vmem:[%s278_s30] sm:$0xff] %v5986_v2 }
 0x54f   : > { %v6233_v3 = vpop.f32.mrb[52].mxu1 }
 0x550   : > { %v6234_v54 = vpop.f32.mrb[53].mxu1 }
 0x551   : > { %v6235_v55 = vadd.f32 %v6234_v54, %v6233_v3  ;;  %v6236_v56 = vpop.f32.mrb[54].mxu1 }
 0x552   : > { %v6237_v57 = vpop.f32.mrb[55].mxu1 }
 0x553   : > { %v5263_v59 = vadd.f32 %v6235_v55, %v4758_v53 }
 0x555   : > { %v5303_v60 = vadd.f32 %v5302_v40, %v5263_v59 }
 0x557   : > { %v5310_v18 = vmax.f32 %v5303_v60, 0.0 }
 0x559   : > { %v5987_v61 = vpack.c.bf16 %v5310_v18, %v5310_v18 }
 0x55b   : > { %5325 = vst [vmem:[%s278_s30 + $0x8] sm:$0xf] %v5987_v61 }
 0x55c PF: > { %s17_s24 = sadd.s32 1, %s7139_s24  }
 0x55d   : > { %p14_p4 = scmp.ge.s32.totalorder %s17_s24, 5  }
 0x55f   :  { %16 = sbr.rel (!%p14_p4) target bundleno = 1 (0x1), region = 78 }

</bundles_post_ra>
